<compile_context>
chip_gen: v5e
topology: v5e:2x2
jax: 0.10.0
libtpu: 0.0.40
codegen_flags: <defaults>
</compile_context>

<pallas_src>
import jax
import jax.numpy as jnp
from jax import lax
from jax.experimental import pallas as pl
from jax.experimental.pallas import tpu as pltpu


# ------------------------------ Pallas kernel ------------------------------ #

def fused_cnn_kernel(x_ref, w1_ref, b1_ref, w2_ref, b2_ref,
                     fw1_ref, fb1_ref, fw2_ref, fb2_ref,
                     o_ref, col1_ref, p_ref, col2_ref):
    """Whole CustomCNN forward for a block of `bb` images (grid over batch blocks).

    x_ref   : (bb, H+2, W+2, Cin) zero-padded NHWC input block
    w1_ref  : (9*Cin, C1) conv1 weights, rows ordered (ky, kx, cin)
    w2_ref  : (9*C1,  C2) conv2 weights
    col1_ref: VMEM scratch (bb*H*W,    9*Cin)  conv1 im2col slab
    p_ref   : VMEM scratch (bb, H/2+2, W/2+2, C1) zero-padded conv2 input
    col2_ref: VMEM scratch (bb*H2*W2,  9*C1)   conv2 im2col slab
    o_ref   : (bb, 1, num_classes)
    """
    f32 = jnp.float32
    bb, Hp, Wp, Cin = x_ref.shape
    H, W = Hp - 2, Wp - 2
    H2, W2 = H // 2, W // 2
    H4, W4 = H // 4, W // 4
    C1 = w1_ref.shape[1]
    C2 = w2_ref.shape[1]

    # -------- stage 1: im2col -> conv1 (ONE matmul) -> maxpool -> bias+ReLU --------
    for dy in range(3):
        for dx in range(3):
            t = dy * 3 + dx
            col1_ref[:, t * Cin:(t + 1) * Cin] = (
                x_ref[:, dy:dy + H, dx:dx + W, :].reshape(bb * H * W, Cin))
    y1 = jnp.dot(col1_ref[...], w1_ref[...],
                 preferred_element_type=f32)                        # (bb*H*W, C1)
    m1 = jnp.max(y1.reshape(bb * H * W2, 2, C1), axis=1)            # W-pair max
    m1 = jnp.max(m1.reshape(bb * H2, 2, W2, C1), axis=1)            # H-pair max
    h1 = jnp.maximum(m1 + b1_ref[...], 0.0)                         # hoisted bias+ReLU

    # -------- stage 2: pad (border strips only) -> im2col -> conv2 -> pool --------
    zrow = jnp.zeros((bb, 1, W2 + 2, C1), f32)
    zcol = jnp.zeros((bb, H2 + 2, 1, C1), f32)
    p_ref[:, 0:1, :, :] = zrow
    p_ref[:, H2 + 1:H2 + 2, :, :] = zrow
    p_ref[:, :, 0:1, :] = zcol
    p_ref[:, :, W2 + 1:W2 + 2, :] = zcol
    p_ref[:, 1:H2 + 1, 1:W2 + 1, :] = h1.reshape(bb, H2, W2, C1)

    for dy in range(3):
        for dx in range(3):
            t = dy * 3 + dx
            col2_ref[:, t * C1:(t + 1) * C1] = (
                p_ref[:, dy:dy + H2, dx:dx + W2, :].reshape(bb * H2 * W2, C1))
    y2 = jnp.dot(col2_ref[...], w2_ref[...],
                 preferred_element_type=f32)                        # (bb*H2*W2, C2)
    m2 = jnp.max(y2.reshape(bb * H2 * W4, 2, C2), axis=1)           # W-pair max
    m2 = jnp.max(m2.reshape(bb * H4, 2, W4, C2), axis=1)            # H-pair max
    h2 = jnp.maximum(m2 + b2_ref[...], 0.0)                         # (bb*H4, W4, C2)

    # -------- stage 3: global average pool + MLP head --------
    feat = jnp.sum(h2.reshape(bb, H4 * W4, C2), axis=1) * (1.0 / (H4 * W4))  # (bb, C2)
    hid = jnp.maximum(
        jnp.dot(feat, fw1_ref[...], preferred_element_type=f32) + fb1_ref[...], 0.0)
    # TODO(synk): nn.Dropout(0.5) is identity at inference; training-mode masking
    # (pltpu.prng_seed / prng_random_bits) not implemented.
    out = jnp.dot(hid, fw2_ref[...], preferred_element_type=f32) + fb2_ref[...]
    o_ref[...] = out.reshape(o_ref.shape).astype(o_ref.dtype)


# ------------------------------- JAX wrapper -------------------------------- #

def _num_grid_blocks(batch):
    """2-way 'parallel' grid on v7x (two TensorCores/chip); single fused step on
    single-TensorCore chips (v5e/v6e), folding the whole batch into matmul M."""
    try:
        kind = jax.devices()[0].device_kind.lower()
    except Exception:
        kind = ""
    if "v7" in kind and batch >= 2 and batch % 2 == 0:
        return 2
    return 1


def custom_cnn_forward(x_nchw, params):
    B, Cin, H, W = x_nchw.shape
    assert H % 4 == 0 and W % 4 == 0, "kernel assumes H and W are multiples of 4"

    x = jnp.transpose(x_nchw, (0, 2, 3, 1))                     # NCHW -> NHWC (glue)
    xp = jnp.pad(x, ((0, 0), (1, 1), (1, 1), (0, 0)))           # conv1 zero padding
    Hp, Wp = H + 2, W + 2
    H2, W2 = H // 2, W // 2

    # torch OIHW -> tap-packed (9*Cin, Cout), rows ordered (ky, kx, cin)
    w1 = jnp.transpose(params['conv1_w'], (2, 3, 1, 0)).reshape(9 * Cin, -1)
    C1 = w1.shape[1]
    w2 = jnp.transpose(params['conv2_w'], (2, 3, 1, 0)).reshape(9 * C1, -1)
    C2 = w2.shape[1]
    b1 = params['conv1_b'].reshape(1, C1)
    b2 = params['conv2_b'].reshape(1, C2)
    fw1, fb1 = params['fc1_w'], params['fc1_b'].reshape(1, -1)
    fw2, fb2 = params['fc2_w'], params['fc2_b'].reshape(1, -1)
    F1 = fw1.shape[1]
    nc = fw2.shape[1]

    nblk = _num_grid_blocks(B)
    bb = B // nblk

    flops = B * (2 * H * W * 9 * Cin * C1 + 2 * H2 * W2 * 9 * C1 * C2
                 + 2 * C2 * F1 + 2 * F1 * nc)
    bytes_accessed = 4 * (xp.size + w1.size + b1.size + w2.size + b2.size
                          + fw1.size + fb1.size + fw2.size + fb2.size + B * nc)

    out = pl.pallas_call(
        fused_cnn_kernel,
        out_shape=jax.ShapeDtypeStruct((B, 1, nc), jnp.float32),
        grid=(nblk,),
        in_specs=[
            pl.BlockSpec((bb, Hp, Wp, Cin), lambda i: (i, 0, 0, 0)),
            pl.BlockSpec((9 * Cin, C1), lambda i: (0, 0)),
            pl.BlockSpec((1, C1), lambda i: (0, 0)),
            pl.BlockSpec((9 * C1, C2), lambda i: (0, 0)),
            pl.BlockSpec((1, C2), lambda i: (0, 0)),
            pl.BlockSpec((C2, F1), lambda i: (0, 0)),
            pl.BlockSpec((1, F1), lambda i: (0, 0)),
            pl.BlockSpec((F1, nc), lambda i: (0, 0)),
            pl.BlockSpec((1, nc), lambda i: (0, 0)),
        ],
        out_specs=pl.BlockSpec((bb, 1, nc), lambda i: (i, 0, 0)),
        scratch_shapes=[
            pltpu.VMEM((bb * H * W, 9 * Cin), jnp.float32),      # conv1 im2col slab
            pltpu.VMEM((bb, H2 + 2, W2 + 2, C1), jnp.float32),   # padded conv2 input
            pltpu.VMEM((bb * H2 * W2, 9 * C1), jnp.float32),     # conv2 im2col slab
        ],
        compiler_params=pltpu.CompilerParams(
            dimension_semantics=("parallel",)),
        cost_estimate=pl.CostEstimate(flops=flops, transcendentals=0,
                                      bytes_accessed=bytes_accessed),
    )(xp, w1, b1, w2, b2, fw1, fb1, fw2, fb2)
    return out.reshape(B, nc)


# --------------------------- params / reference ---------------------------- #

def init_params(key, num_classes):
    ks = jax.random.split(key, 8)

    def u(k, shape, fan_in):
        bound = 1.0 / (fan_in ** 0.5)
        return jax.random.uniform(k, shape, jnp.float32, -bound, bound)

    return {
        'conv1_w': u(ks[0], (8, 3, 3, 3), 3 * 9),        # torch OIHW
        'conv1_b': u(ks[1], (8,), 3 * 9),
        'conv2_w': u(ks[2], (16, 8, 3, 3), 8 * 9),
        'conv2_b': u(ks[3], (16,), 8 * 9),
        'fc1_w': u(ks[4], (16, 50), 16),                 # stored (in, out)
        'fc1_b': u(ks[5], (50,), 16),
        'fc2_w': u(ks[6], (50, num_classes), 50),
        'fc2_b': u(ks[7], (num_classes,), 50),
    }


def reference_forward(x_nchw, params):
    """Pure-JAX reference matching the PyTorch module semantics (eval mode)."""
    def block(x, w, b):
        y = lax.conv_general_dilated(
            x, w, window_strides=(1, 1), padding=((1, 1), (1, 1)),
            dimension_numbers=('NCHW', 'OIHW', 'NCHW'))
        y = jnp.maximum(y + b.reshape(1, -1, 1, 1), 0.0)
        y = lax.reduce_window(y, -jnp.inf, lax.max,
                              (1, 1, 2, 2), (1, 1, 2, 2), 'VALID')
        return y

    x = block(x_nchw, params['conv1_w'], params['conv1_b'])
    x = block(x, params['conv2_w'], params['conv2_b'])
    feat = jnp.mean(x, axis=(2, 3))                      # AdaptiveAvgPool2d((1,1)) + Flatten
    h = jnp.maximum(feat @ params['fc1_w'] + params['fc1_b'], 0.0)
    return h @ params['fc2_w'] + params['fc2_b']


# ---------------------------------- main ----------------------------------- #

if __name__ == "__main__":
    key = jax.random.PRNGKey(0)
    pkey, xkey = jax.random.split(key)
    num_classes = 10

    params = init_params(pkey, num_classes)
    x = jax.random.normal(xkey, (2, 3, 16, 16), jnp.float32)

    out = custom_cnn_forward(x, params)
    out = jax.block_until_ready(out)

    ref = reference_forward(x, params)
    assert out.shape == (2, num_classes)
    assert jnp.allclose(out, ref, atol=1e-4, rtol=1e-4), (out, ref)

    print("KERNEL_OK")
</pallas_src>

<mosaic_0001>
module attributes {stable_mosaic.version = 11 : i64} {
  func.func @fused_cnn_kernel(%arg0: i32, %arg1: memref<2x18x18x3xf32, #tpu.memory_space<vmem>>, %arg2: memref<27x8xf32, #tpu.memory_space<vmem>>, %arg3: memref<1x8xf32, #tpu.memory_space<vmem>>, %arg4: memref<72x16xf32, #tpu.memory_space<vmem>>, %arg5: memref<1x16xf32, #tpu.memory_space<vmem>>, %arg6: memref<16x50xf32, #tpu.memory_space<vmem>>, %arg7: memref<1x50xf32, #tpu.memory_space<vmem>>, %arg8: memref<50x10xf32, #tpu.memory_space<vmem>>, %arg9: memref<1x10xf32, #tpu.memory_space<vmem>>, %arg10: memref<2x1x10xf32, #tpu.memory_space<vmem>>, %arg11: memref<512x27xf32, #tpu.memory_space<vmem>>, %arg12: memref<2x10x10x8xf32, #tpu.memory_space<vmem>>, %arg13: memref<128x72xf32, #tpu.memory_space<vmem>>) attributes {dimension_semantics = [#tpu.dimension_semantics<parallel>], iteration_bounds = array<i64: 1>, scalar_prefetch = 0 : i64, scratch_operands = 3 : i64, tpu.core_type = #tpu.core_type<tc>, window_params = [{transform_indices = @transform_0, window_bounds = array<i64: 2, 18, 18, 3>}, {pipeline_mode = #tpu.pipeline_mode<synchronous>, transform_indices = @transform_1, window_bounds = array<i64: 27, 8>}, {pipeline_mode = #tpu.pipeline_mode<synchronous>, transform_indices = @transform_2, window_bounds = array<i64: 1, 8>}, {pipeline_mode = #tpu.pipeline_mode<synchronous>, transform_indices = @transform_3, window_bounds = array<i64: 72, 16>}, {pipeline_mode = #tpu.pipeline_mode<synchronous>, transform_indices = @transform_4, window_bounds = array<i64: 1, 16>}, {pipeline_mode = #tpu.pipeline_mode<synchronous>, transform_indices = @transform_5, window_bounds = array<i64: 16, 50>}, {pipeline_mode = #tpu.pipeline_mode<synchronous>, transform_indices = @transform_6, window_bounds = array<i64: 1, 50>}, {pipeline_mode = #tpu.pipeline_mode<synchronous>, transform_indices = @transform_7, window_bounds = array<i64: 50, 10>}, {pipeline_mode = #tpu.pipeline_mode<synchronous>, transform_indices = @transform_8, window_bounds = array<i64: 1, 10>}, {transform_indices = @transform_9, window_bounds = array<i64: 2, 1, 10>}]} {
    %c0 = arith.constant 0 : index
    %c0_0 = arith.constant 0 : index
    %c0_1 = arith.constant 0 : index
    %c0_2 = arith.constant 0 : index
    %0 = vector.load %arg1[%c0, %c0_0, %c0_1, %c0_2] : memref<2x18x18x3xf32, #tpu.memory_space<vmem>>, vector<2x16x16x3xf32>
    %1 = vector.shape_cast %0 : vector<2x16x16x3xf32> to vector<512x3xf32>
    %c0_3 = arith.constant 0 : index
    %c0_4 = arith.constant 0 : index
    %2 = vector.load %arg11[%c0_3, %c0_4] : memref<512x27xf32, #tpu.memory_space<vmem>>, vector<512x3xf32>
    tpu.vector_store %arg11[%c0_3, %c0_4], %1 {strides = array<i32>} : memref<512x27xf32, #tpu.memory_space<vmem>>, vector<512x3xf32>,
    %c0_5 = arith.constant 0 : index
    %c0_6 = arith.constant 0 : index
    %c1 = arith.constant 1 : index
    %c0_7 = arith.constant 0 : index
    %3 = vector.load %arg1[%c0_5, %c0_6, %c1, %c0_7] : memref<2x18x18x3xf32, #tpu.memory_space<vmem>>, vector<2x16x16x3xf32>
    %4 = vector.shape_cast %3 : vector<2x16x16x3xf32> to vector<512x3xf32>
    %c0_8 = arith.constant 0 : index
    %c3 = arith.constant 3 : index
    %5 = vector.load %arg11[%c0_8, %c3] : memref<512x27xf32, #tpu.memory_space<vmem>>, vector<512x3xf32>
    tpu.vector_store %arg11[%c0_8, %c3], %4 {strides = array<i32>} : memref<512x27xf32, #tpu.memory_space<vmem>>, vector<512x3xf32>,
    %c0_9 = arith.constant 0 : index
    %c0_10 = arith.constant 0 : index
    %c2 = arith.constant 2 : index
    %c0_11 = arith.constant 0 : index
    %6 = vector.load %arg1[%c0_9, %c0_10, %c2, %c0_11] : memref<2x18x18x3xf32, #tpu.memory_space<vmem>>, vector<2x16x16x3xf32>
    %7 = vector.shape_cast %6 : vector<2x16x16x3xf32> to vector<512x3xf32>
    %c0_12 = arith.constant 0 : index
    %c6 = arith.constant 6 : index
    %8 = vector.load %arg11[%c0_12, %c6] : memref<512x27xf32, #tpu.memory_space<vmem>>, vector<512x3xf32>
    tpu.vector_store %arg11[%c0_12, %c6], %7 {strides = array<i32>} : memref<512x27xf32, #tpu.memory_space<vmem>>, vector<512x3xf32>,
    %c0_13 = arith.constant 0 : index
    %c1_14 = arith.constant 1 : index
    %c0_15 = arith.constant 0 : index
    %c0_16 = arith.constant 0 : index
    %9 = vector.load %arg1[%c0_13, %c1_14, %c0_15, %c0_16] : memref<2x18x18x3xf32, #tpu.memory_space<vmem>>, vector<2x16x16x3xf32>
    %10 = vector.shape_cast %9 : vector<2x16x16x3xf32> to vector<512x3xf32>
    %c0_17 = arith.constant 0 : index
    %c9 = arith.constant 9 : index
    %11 = vector.load %arg11[%c0_17, %c9] : memref<512x27xf32, #tpu.memory_space<vmem>>, vector<512x3xf32>
    tpu.vector_store %arg11[%c0_17, %c9], %10 {strides = array<i32>} : memref<512x27xf32, #tpu.memory_space<vmem>>, vector<512x3xf32>,
    %c0_18 = arith.constant 0 : index
    %c1_19 = arith.constant 1 : index
    %c1_20 = arith.constant 1 : index
    %c0_21 = arith.constant 0 : index
    %12 = vector.load %arg1[%c0_18, %c1_19, %c1_20, %c0_21] : memref<2x18x18x3xf32, #tpu.memory_space<vmem>>, vector<2x16x16x3xf32>
    %13 = vector.shape_cast %12 : vector<2x16x16x3xf32> to vector<512x3xf32>
    %c0_22 = arith.constant 0 : index
    %c12 = arith.constant 12 : index
    %14 = vector.load %arg11[%c0_22, %c12] : memref<512x27xf32, #tpu.memory_space<vmem>>, vector<512x3xf32>
    tpu.vector_store %arg11[%c0_22, %c12], %13 {strides = array<i32>} : memref<512x27xf32, #tpu.memory_space<vmem>>, vector<512x3xf32>,
    %c0_23 = arith.constant 0 : index
    %c1_24 = arith.constant 1 : index
    %c2_25 = arith.constant 2 : index
    %c0_26 = arith.constant 0 : index
    %15 = vector.load %arg1[%c0_23, %c1_24, %c2_25, %c0_26] : memref<2x18x18x3xf32, #tpu.memory_space<vmem>>, vector<2x16x16x3xf32>
    %16 = vector.shape_cast %15 : vector<2x16x16x3xf32> to vector<512x3xf32>
    %c0_27 = arith.constant 0 : index
    %c15 = arith.constant 15 : index
    %17 = vector.load %arg11[%c0_27, %c15] : memref<512x27xf32, #tpu.memory_space<vmem>>, vector<512x3xf32>
    tpu.vector_store %arg11[%c0_27, %c15], %16 {strides = array<i32>} : memref<512x27xf32, #tpu.memory_space<vmem>>, vector<512x3xf32>,
    %c0_28 = arith.constant 0 : index
    %c2_29 = arith.constant 2 : index
    %c0_30 = arith.constant 0 : index
    %c0_31 = arith.constant 0 : index
    %18 = vector.load %arg1[%c0_28, %c2_29, %c0_30, %c0_31] : memref<2x18x18x3xf32, #tpu.memory_space<vmem>>, vector<2x16x16x3xf32>
    %19 = vector.shape_cast %18 : vector<2x16x16x3xf32> to vector<512x3xf32>
    %c0_32 = arith.constant 0 : index
    %c18 = arith.constant 18 : index
    %20 = vector.load %arg11[%c0_32, %c18] : memref<512x27xf32, #tpu.memory_space<vmem>>, vector<512x3xf32>
    tpu.vector_store %arg11[%c0_32, %c18], %19 {strides = array<i32>} : memref<512x27xf32, #tpu.memory_space<vmem>>, vector<512x3xf32>,
    %c0_33 = arith.constant 0 : index
    %c2_34 = arith.constant 2 : index
    %c1_35 = arith.constant 1 : index
    %c0_36 = arith.constant 0 : index
    %21 = vector.load %arg1[%c0_33, %c2_34, %c1_35, %c0_36] : memref<2x18x18x3xf32, #tpu.memory_space<vmem>>, vector<2x16x16x3xf32>
    %22 = vector.shape_cast %21 : vector<2x16x16x3xf32> to vector<512x3xf32>
    %c0_37 = arith.constant 0 : index
    %c21 = arith.constant 21 : index
    %23 = vector.load %arg11[%c0_37, %c21] : memref<512x27xf32, #tpu.memory_space<vmem>>, vector<512x3xf32>
    tpu.vector_store %arg11[%c0_37, %c21], %22 {strides = array<i32>} : memref<512x27xf32, #tpu.memory_space<vmem>>, vector<512x3xf32>,
    %c0_38 = arith.constant 0 : index
    %c2_39 = arith.constant 2 : index
    %c2_40 = arith.constant 2 : index
    %c0_41 = arith.constant 0 : index
    %24 = vector.load %arg1[%c0_38, %c2_39, %c2_40, %c0_41] : memref<2x18x18x3xf32, #tpu.memory_space<vmem>>, vector<2x16x16x3xf32>
    %25 = vector.shape_cast %24 : vector<2x16x16x3xf32> to vector<512x3xf32>
    %c0_42 = arith.constant 0 : index
    %c24 = arith.constant 24 : index
    %26 = vector.load %arg11[%c0_42, %c24] : memref<512x27xf32, #tpu.memory_space<vmem>>, vector<512x3xf32>
    tpu.vector_store %arg11[%c0_42, %c24], %25 {strides = array<i32>} : memref<512x27xf32, #tpu.memory_space<vmem>>, vector<512x3xf32>,
    %c0_43 = arith.constant 0 : index
    %c0_44 = arith.constant 0 : index
    %27 = vector.load %arg11[%c0_43, %c0_44] : memref<512x27xf32, #tpu.memory_space<vmem>>, vector<512x27xf32>
    %c0_45 = arith.constant 0 : index
    %c0_46 = arith.constant 0 : index
    %28 = vector.load %arg2[%c0_45, %c0_46] : memref<27x8xf32, #tpu.memory_space<vmem>>, vector<27x8xf32>
    %cst = arith.constant dense<0.000000e+00> : vector<512x8xf32>
    %29 = tpu.matmul %27, %28, %cst {dimension_numbers = #tpu.dot_dimension_numbers<[1], [0], [0], [1], [0, 0, 1, 1], [], []>} : vector<512x27xf32>, vector<27x8xf32>, vector<512x8xf32> -> vector<512x8xf32>
    %30 = vector.shape_cast %29 : vector<512x8xf32> to vector<256x2x8xf32>
    %cst_47 = arith.constant dense<0xFF800000> : vector<256x8xf32>
    %31 = vector.multi_reduction <maximumf>, %30, %cst_47 [1] : vector<256x2x8xf32> to vector<256x8xf32>
    %32 = vector.shape_cast %31 : vector<256x8xf32> to vector<16x2x8x8xf32>
    %cst_48 = arith.constant dense<0xFF800000> : vector<16x8x8xf32>
    %33 = vector.multi_reduction <maximumf>, %32, %cst_48 [1] : vector<16x2x8x8xf32> to vector<16x8x8xf32>
    %c0_49 = arith.constant 0 : index
    %c0_50 = arith.constant 0 : index
    %34 = vector.load %arg3[%c0_49, %c0_50] : memref<1x8xf32, #tpu.memory_space<vmem>>, vector<1x8xf32>
    %35 = vector.shape_cast %34 : vector<1x8xf32> to vector<1x1x8xf32>
    %36 = vector.broadcast %35 : vector<1x1x8xf32> to vector<16x8x8xf32>
    %37 = arith.addf %33, %36 : vector<16x8x8xf32>
    %cst_51 = arith.constant 0.000000e+00 : f32
    %38 = vector.broadcast %cst_51 : f32 to vector<16x8x8xf32>
    %39 = arith.maximumf %37, %38 : vector<16x8x8xf32>
    %cst_52 = arith.constant 0.000000e+00 : f32
    %40 = vector.broadcast %cst_52 : f32 to vector<2x1x10x8xf32>
    %cst_53 = arith.constant 0.000000e+00 : f32
    %41 = vector.broadcast %cst_53 : f32 to vector<2x10x1x8xf32>
    %c0_54 = arith.constant 0 : index
    %c0_55 = arith.constant 0 : index
    %c0_56 = arith.constant 0 : index
    %c0_57 = arith.constant 0 : index
    %42 = vector.load %arg12[%c0_54, %c0_55, %c0_56, %c0_57] : memref<2x10x10x8xf32, #tpu.memory_space<vmem>>, vector<2x1x10x8xf32>
    tpu.vector_store %arg12[%c0_54, %c0_55, %c0_56, %c0_57], %40 {strides = array<i32>} : memref<2x10x10x8xf32, #tpu.memory_space<vmem>>, vector<2x1x10x8xf32>,
    %c0_58 = arith.constant 0 : index
    %c9_59 = arith.constant 9 : index
    %c0_60 = arith.constant 0 : index
    %c0_61 = arith.constant 0 : index
    %43 = vector.load %arg12[%c0_58, %c9_59, %c0_60, %c0_61] : memref<2x10x10x8xf32, #tpu.memory_space<vmem>>, vector<2x1x10x8xf32>
    tpu.vector_store %arg12[%c0_58, %c9_59, %c0_60, %c0_61], %40 {strides = array<i32>} : memref<2x10x10x8xf32, #tpu.memory_space<vmem>>, vector<2x1x10x8xf32>,
    %c0_62 = arith.constant 0 : index
    %c0_63 = arith.constant 0 : index
    %c0_64 = arith.constant 0 : index
    %c0_65 = arith.constant 0 : index
    %44 = vector.load %arg12[%c0_62, %c0_63, %c0_64, %c0_65] : memref<2x10x10x8xf32, #tpu.memory_space<vmem>>, vector<2x10x1x8xf32>
    tpu.vector_store %arg12[%c0_62, %c0_63, %c0_64, %c0_65], %41 {strides = array<i32>} : memref<2x10x10x8xf32, #tpu.memory_space<vmem>>, vector<2x10x1x8xf32>,
    %c0_66 = arith.constant 0 : index
    %c0_67 = arith.constant 0 : index
    %c9_68 = arith.constant 9 : index
    %c0_69 = arith.constant 0 : index
    %45 = vector.load %arg12[%c0_66, %c0_67, %c9_68, %c0_69] : memref<2x10x10x8xf32, #tpu.memory_space<vmem>>, vector<2x10x1x8xf32>
    tpu.vector_store %arg12[%c0_66, %c0_67, %c9_68, %c0_69], %41 {strides = array<i32>} : memref<2x10x10x8xf32, #tpu.memory_space<vmem>>, vector<2x10x1x8xf32>,
    %46 = vector.shape_cast %39 : vector<16x8x8xf32> to vector<2x8x8x8xf32>
    %c0_70 = arith.constant 0 : index
    %c1_71 = arith.constant 1 : index
    %c1_72 = arith.constant 1 : index
    %c0_73 = arith.constant 0 : index
    %47 = vector.load %arg12[%c0_70, %c1_71, %c1_72, %c0_73] : memref<2x10x10x8xf32, #tpu.memory_space<vmem>>, vector<2x8x8x8xf32>
    tpu.vector_store %arg12[%c0_70, %c1_71, %c1_72, %c0_73], %46 {strides = array<i32>} : memref<2x10x10x8xf32, #tpu.memory_space<vmem>>, vector<2x8x8x8xf32>,
    %c0_74 = arith.constant 0 : index
    %c0_75 = arith.constant 0 : index
    %c0_76 = arith.constant 0 : index
    %c0_77 = arith.constant 0 : index
    %48 = vector.load %arg12[%c0_74, %c0_75, %c0_76, %c0_77] : memref<2x10x10x8xf32, #tpu.memory_space<vmem>>, vector<2x8x8x8xf32>
    %49 = vector.shape_cast %48 : vector<2x8x8x8xf32> to vector<128x8xf32>
    %c0_78 = arith.constant 0 : index
    %c0_79 = arith.constant 0 : index
    %50 = vector.load %arg13[%c0_78, %c0_79] : memref<128x72xf32, #tpu.memory_space<vmem>>, vector<128x8xf32>
    tpu.vector_store %arg13[%c0_78, %c0_79], %49 {strides = array<i32>} : memref<128x72xf32, #tpu.memory_space<vmem>>, vector<128x8xf32>,
    %c0_80 = arith.constant 0 : index
    %c0_81 = arith.constant 0 : index
    %c1_82 = arith.constant 1 : index
    %c0_83 = arith.constant 0 : index
    %51 = vector.load %arg12[%c0_80, %c0_81, %c1_82, %c0_83] : memref<2x10x10x8xf32, #tpu.memory_space<vmem>>, vector<2x8x8x8xf32>
    %52 = vector.shape_cast %51 : vector<2x8x8x8xf32> to vector<128x8xf32>
    %c0_84 = arith.constant 0 : index
    %c8 = arith.constant 8 : index
    %53 = vector.load %arg13[%c0_84, %c8] : memref<128x72xf32, #tpu.memory_space<vmem>>, vector<128x8xf32>
    tpu.vector_store %arg13[%c0_84, %c8], %52 {strides = array<i32>} : memref<128x72xf32, #tpu.memory_space<vmem>>, vector<128x8xf32>,
    %c0_85 = arith.constant 0 : index
    %c0_86 = arith.constant 0 : index
    %c2_87 = arith.constant 2 : index
    %c0_88 = arith.constant 0 : index
    %54 = vector.load %arg12[%c0_85, %c0_86, %c2_87, %c0_88] : memref<2x10x10x8xf32, #tpu.memory_space<vmem>>, vector<2x8x8x8xf32>
    %55 = vector.shape_cast %54 : vector<2x8x8x8xf32> to vector<128x8xf32>
    %c0_89 = arith.constant 0 : index
    %c16 = arith.constant 16 : index
    %56 = vector.load %arg13[%c0_89, %c16] : memref<128x72xf32, #tpu.memory_space<vmem>>, vector<128x8xf32>
    tpu.vector_store %arg13[%c0_89, %c16], %55 {strides = array<i32>} : memref<128x72xf32, #tpu.memory_space<vmem>>, vector<128x8xf32>,
    %c0_90 = arith.constant 0 : index
    %c1_91 = arith.constant 1 : index
    %c0_92 = arith.constant 0 : index
    %c0_93 = arith.constant 0 : index
    %57 = vector.load %arg12[%c0_90, %c1_91, %c0_92, %c0_93] : memref<2x10x10x8xf32, #tpu.memory_space<vmem>>, vector<2x8x8x8xf32>
    %58 = vector.shape_cast %57 : vector<2x8x8x8xf32> to vector<128x8xf32>
    %c0_94 = arith.constant 0 : index
    %c24_95 = arith.constant 24 : index
    %59 = vector.load %arg13[%c0_94, %c24_95] : memref<128x72xf32, #tpu.memory_space<vmem>>, vector<128x8xf32>
    tpu.vector_store %arg13[%c0_94, %c24_95], %58 {strides = array<i32>} : memref<128x72xf32, #tpu.memory_space<vmem>>, vector<128x8xf32>,
    %c0_96 = arith.constant 0 : index
    %c1_97 = arith.constant 1 : index
    %c1_98 = arith.constant 1 : index
    %c0_99 = arith.constant 0 : index
    %60 = vector.load %arg12[%c0_96, %c1_97, %c1_98, %c0_99] : memref<2x10x10x8xf32, #tpu.memory_space<vmem>>, vector<2x8x8x8xf32>
    %61 = vector.shape_cast %60 : vector<2x8x8x8xf32> to vector<128x8xf32>
    %c0_100 = arith.constant 0 : index
    %c32 = arith.constant 32 : index
    %62 = vector.load %arg13[%c0_100, %c32] : memref<128x72xf32, #tpu.memory_space<vmem>>, vector<128x8xf32>
    tpu.vector_store %arg13[%c0_100, %c32], %61 {strides = array<i32>} : memref<128x72xf32, #tpu.memory_space<vmem>>, vector<128x8xf32>,
    %c0_101 = arith.constant 0 : index
    %c1_102 = arith.constant 1 : index
    %c2_103 = arith.constant 2 : index
    %c0_104 = arith.constant 0 : index
    %63 = vector.load %arg12[%c0_101, %c1_102, %c2_103, %c0_104] : memref<2x10x10x8xf32, #tpu.memory_space<vmem>>, vector<2x8x8x8xf32>
    %64 = vector.shape_cast %63 : vector<2x8x8x8xf32> to vector<128x8xf32>
    %c0_105 = arith.constant 0 : index
    %c40 = arith.constant 40 : index
    %65 = vector.load %arg13[%c0_105, %c40] : memref<128x72xf32, #tpu.memory_space<vmem>>, vector<128x8xf32>
    tpu.vector_store %arg13[%c0_105, %c40], %64 {strides = array<i32>} : memref<128x72xf32, #tpu.memory_space<vmem>>, vector<128x8xf32>,
    %c0_106 = arith.constant 0 : index
    %c2_107 = arith.constant 2 : index
    %c0_108 = arith.constant 0 : index
    %c0_109 = arith.constant 0 : index
    %66 = vector.load %arg12[%c0_106, %c2_107, %c0_108, %c0_109] : memref<2x10x10x8xf32, #tpu.memory_space<vmem>>, vector<2x8x8x8xf32>
    %67 = vector.shape_cast %66 : vector<2x8x8x8xf32> to vector<128x8xf32>
    %c0_110 = arith.constant 0 : index
    %c48 = arith.constant 48 : index
    %68 = vector.load %arg13[%c0_110, %c48] : memref<128x72xf32, #tpu.memory_space<vmem>>, vector<128x8xf32>
    tpu.vector_store %arg13[%c0_110, %c48], %67 {strides = array<i32>} : memref<128x72xf32, #tpu.memory_space<vmem>>, vector<128x8xf32>,
    %c0_111 = arith.constant 0 : index
    %c2_112 = arith.constant 2 : index
    %c1_113 = arith.constant 1 : index
    %c0_114 = arith.constant 0 : index
    %69 = vector.load %arg12[%c0_111, %c2_112, %c1_113, %c0_114] : memref<2x10x10x8xf32, #tpu.memory_space<vmem>>, vector<2x8x8x8xf32>
    %70 = vector.shape_cast %69 : vector<2x8x8x8xf32> to vector<128x8xf32>
    %c0_115 = arith.constant 0 : index
    %c56 = arith.constant 56 : index
    %71 = vector.load %arg13[%c0_115, %c56] : memref<128x72xf32, #tpu.memory_space<vmem>>, vector<128x8xf32>
    tpu.vector_store %arg13[%c0_115, %c56], %70 {strides = array<i32>} : memref<128x72xf32, #tpu.memory_space<vmem>>, vector<128x8xf32>,
    %c0_116 = arith.constant 0 : index
    %c2_117 = arith.constant 2 : index
    %c2_118 = arith.constant 2 : index
    %c0_119 = arith.constant 0 : index
    %72 = vector.load %arg12[%c0_116, %c2_117, %c2_118, %c0_119] : memref<2x10x10x8xf32, #tpu.memory_space<vmem>>, vector<2x8x8x8xf32>
    %73 = vector.shape_cast %72 : vector<2x8x8x8xf32> to vector<128x8xf32>
    %c0_120 = arith.constant 0 : index
    %c64 = arith.constant 64 : index
    %74 = vector.load %arg13[%c0_120, %c64] : memref<128x72xf32, #tpu.memory_space<vmem>>, vector<128x8xf32>
    tpu.vector_store %arg13[%c0_120, %c64], %73 {strides = array<i32>} : memref<128x72xf32, #tpu.memory_space<vmem>>, vector<128x8xf32>,
    %c0_121 = arith.constant 0 : index
    %c0_122 = arith.constant 0 : index
    %75 = vector.load %arg13[%c0_121, %c0_122] : memref<128x72xf32, #tpu.memory_space<vmem>>, vector<128x72xf32>
    %c0_123 = arith.constant 0 : index
    %c0_124 = arith.constant 0 : index
    %76 = vector.load %arg4[%c0_123, %c0_124] : memref<72x16xf32, #tpu.memory_space<vmem>>, vector<72x16xf32>
    %cst_125 = arith.constant dense<0.000000e+00> : vector<128x16xf32>
    %77 = tpu.matmul %75, %76, %cst_125 {dimension_numbers = #tpu.dot_dimension_numbers<[1], [0], [0], [1], [0, 0, 1, 1], [], []>} : vector<128x72xf32>, vector<72x16xf32>, vector<128x16xf32> -> vector<128x16xf32>
    %78 = vector.shape_cast %77 : vector<128x16xf32> to vector<64x2x16xf32>
    %cst_126 = arith.constant dense<0xFF800000> : vector<64x16xf32>
    %79 = vector.multi_reduction <maximumf>, %78, %cst_126 [1] : vector<64x2x16xf32> to vector<64x16xf32>
    %80 = vector.shape_cast %79 : vector<64x16xf32> to vector<8x2x4x16xf32>
    %cst_127 = arith.constant dense<0xFF800000> : vector<8x4x16xf32>
    %81 = vector.multi_reduction <maximumf>, %80, %cst_127 [1] : vector<8x2x4x16xf32> to vector<8x4x16xf32>
    %c0_128 = arith.constant 0 : index
    %c0_129 = arith.constant 0 : index
    %82 = vector.load %arg5[%c0_128, %c0_129] : memref<1x16xf32, #tpu.memory_space<vmem>>, vector<1x16xf32>
    %83 = vector.shape_cast %82 : vector<1x16xf32> to vector<1x1x16xf32>
    %84 = vector.broadcast %83 : vector<1x1x16xf32> to vector<8x4x16xf32>
    %85 = arith.addf %81, %84 : vector<8x4x16xf32>
    %cst_130 = arith.constant 0.000000e+00 : f32
    %86 = vector.broadcast %cst_130 : f32 to vector<8x4x16xf32>
    %87 = arith.maximumf %85, %86 : vector<8x4x16xf32>
    %88 = vector.shape_cast %87 : vector<8x4x16xf32> to vector<2x16x16xf32>
    %cst_131 = arith.constant dense<0.000000e+00> : vector<2x16xf32>
    %89 = vector.multi_reduction <add>, %88, %cst_131 [1] : vector<2x16x16xf32> to vector<2x16xf32>
    %cst_132 = arith.constant 6.250000e-02 : f32
    %90 = vector.broadcast %cst_132 : f32 to vector<2x16xf32>
    %91 = arith.mulf %89, %90 : vector<2x16xf32>
    %c0_133 = arith.constant 0 : index
    %c0_134 = arith.constant 0 : index
    %92 = vector.load %arg6[%c0_133, %c0_134] : memref<16x50xf32, #tpu.memory_space<vmem>>, vector<16x50xf32>
    %cst_135 = arith.constant dense<0.000000e+00> : vector<2x50xf32>
    %93 = tpu.matmul %91, %92, %cst_135 {dimension_numbers = #tpu.dot_dimension_numbers<[1], [0], [0], [1], [0, 0, 1, 1], [], []>} : vector<2x16xf32>, vector<16x50xf32>, vector<2x50xf32> -> vector<2x50xf32>
    %c0_136 = arith.constant 0 : index
    %c0_137 = arith.constant 0 : index
    %94 = vector.load %arg7[%c0_136, %c0_137] : memref<1x50xf32, #tpu.memory_space<vmem>>, vector<1x50xf32>
    %95 = vector.broadcast %94 : vector<1x50xf32> to vector<2x50xf32>
    %96 = arith.addf %93, %95 : vector<2x50xf32>
    %cst_138 = arith.constant 0.000000e+00 : f32
    %97 = vector.broadcast %cst_138 : f32 to vector<2x50xf32>
    %98 = arith.maximumf %96, %97 : vector<2x50xf32>
    %c0_139 = arith.constant 0 : index
    %c0_140 = arith.constant 0 : index
    %99 = vector.load %arg8[%c0_139, %c0_140] : memref<50x10xf32, #tpu.memory_space<vmem>>, vector<50x10xf32>
    %cst_141 = arith.constant dense<0.000000e+00> : vector<2x10xf32>
    %100 = tpu.matmul %98, %99, %cst_141 {dimension_numbers = #tpu.dot_dimension_numbers<[1], [0], [0], [1], [0, 0, 1, 1], [], []>} : vector<2x50xf32>, vector<50x10xf32>, vector<2x10xf32> -> vector<2x10xf32>
    %c0_142 = arith.constant 0 : index
    %c0_143 = arith.constant 0 : index
    %101 = vector.load %arg9[%c0_142, %c0_143] : memref<1x10xf32, #tpu.memory_space<vmem>>, vector<1x10xf32>
    %102 = vector.broadcast %101 : vector<1x10xf32> to vector<2x10xf32>
    %103 = arith.addf %100, %102 : vector<2x10xf32>
    %104 = vector.shape_cast %103 : vector<2x10xf32> to vector<2x1x10xf32>
    %c0_144 = arith.constant 0 : index
    %c0_145 = arith.constant 0 : index
    %c0_146 = arith.constant 0 : index
    %105 = vector.load %arg10[%c0_144, %c0_145, %c0_146] : memref<2x1x10xf32, #tpu.memory_space<vmem>>, vector<2x1x10xf32>
    tpu.vector_store %arg10[%c0_144, %c0_145, %c0_146], %104 {strides = array<i32>} : memref<2x1x10xf32, #tpu.memory_space<vmem>>, vector<2x1x10xf32>,
    return
  }
  func.func @transform_0(%arg0: i32) -> (i32, i32, i32, i32) {
    %c0_i32 = arith.constant 0 : i32
    %c0_i32_0 = arith.constant 0 : i32
    %c0_i32_1 = arith.constant 0 : i32
    %c0_i32_2 = arith.constant 0 : i32
    return %arg0, %c0_i32, %c0_i32_0, %c0_i32_1 : i32, i32, i32, i32
  }
  func.func @transform_1(%arg0: i32) -> (i32, i32) {
    %c0_i32 = arith.constant 0 : i32
    %c0_i32_0 = arith.constant 0 : i32
    %c0_i32_1 = arith.constant 0 : i32
    return %c0_i32, %c0_i32_0 : i32, i32
  }
  func.func @transform_2(%arg0: i32) -> (i32, i32) {
    %c0_i32 = arith.constant 0 : i32
    %c0_i32_0 = arith.constant 0 : i32
    %c0_i32_1 = arith.constant 0 : i32
    return %c0_i32, %c0_i32_0 : i32, i32
  }
  func.func @transform_3(%arg0: i32) -> (i32, i32) {
    %c0_i32 = arith.constant 0 : i32
    %c0_i32_0 = arith.constant 0 : i32
    %c0_i32_1 = arith.constant 0 : i32
    return %c0_i32, %c0_i32_0 : i32, i32
  }
  func.func @transform_4(%arg0: i32) -> (i32, i32) {
    %c0_i32 = arith.constant 0 : i32
    %c0_i32_0 = arith.constant 0 : i32
    %c0_i32_1 = arith.constant 0 : i32
    return %c0_i32, %c0_i32_0 : i32, i32
  }
  func.func @transform_5(%arg0: i32) -> (i32, i32) {
    %c0_i32 = arith.constant 0 : i32
    %c0_i32_0 = arith.constant 0 : i32
    %c0_i32_1 = arith.constant 0 : i32
    return %c0_i32, %c0_i32_0 : i32, i32
  }
  func.func @transform_6(%arg0: i32) -> (i32, i32) {
    %c0_i32 = arith.constant 0 : i32
    %c0_i32_0 = arith.constant 0 : i32
    %c0_i32_1 = arith.constant 0 : i32
    return %c0_i32, %c0_i32_0 : i32, i32
  }
  func.func @transform_7(%arg0: i32) -> (i32, i32) {
    %c0_i32 = arith.constant 0 : i32
    %c0_i32_0 = arith.constant 0 : i32
    %c0_i32_1 = arith.constant 0 : i32
    return %c0_i32, %c0_i32_0 : i32, i32
  }
  func.func @transform_8(%arg0: i32) -> (i32, i32) {
    %c0_i32 = arith.constant 0 : i32
    %c0_i32_0 = arith.constant 0 : i32
    %c0_i32_1 = arith.constant 0 : i32
    return %c0_i32, %c0_i32_0 : i32, i32
  }
  func.func @transform_9(%arg0: i32) -> (i32, i32, i32) {
    %c0_i32 = arith.constant 0 : i32
    %c0_i32_0 = arith.constant 0 : i32
    %c0_i32_1 = arith.constant 0 : i32
    return %arg0, %c0_i32, %c0_i32_0 : i32, i32, i32
  }
}

</mosaic_0001>

<bundles_post_ra>
// kernel: tpu_custom_call.1
= control target key start
LH: loop header
LB: loop body
LE: loop exit
PB: predicated region body
PF: predicated region fallthrough
CT: control target
= control target key end

     0   :  { %s9463_s15 = smov 3   ;;  %s15082_s0 = inlined_call_operand.vmem [shape: f32[2,18,18,3], index: 0, kind: input, shape index: {}]   ;;  %s15083_s1 = inlined_call_operand.vmem [shape: f32[27,8], index: 1, kind: input, shape index: {}]   ;;  %s15084_s2 = inlined_call_operand.vmem [shape: f32[1,8], index: 2, kind: input, shape index: {}]   ;;  %s15085_s3 = inlined_call_operand.vmem [shape: f32[72,16], index: 3, kind: input, shape index: {}]   ;;  %s15086_s4 = inlined_call_operand.vmem [shape: f32[1,16], index: 4, kind: input, shape index: {}]   ;;  %s15087_s5 = inlined_call_operand.vmem [shape: f32[16,50], index: 5, kind: input, shape index: {}]   ;;  %s15088_s6 = inlined_call_operand.vmem [shape: f32[1,50], index: 6, kind: input, shape index: {}]   ;;  %s15089_s7 = inlined_call_operand.vmem [shape: f32[50,10], index: 7, kind: input, shape index: {}]   ;;  %s15090_s8 = inlined_call_operand.vmem [shape: f32[1,10], index: 8, kind: input, shape index: {}]   ;;  %s15091_s9 = inlined_call_operand.hbm [shape: f32[2,1,10], index: 9, kind: output, shape index: {}]  }
   0x1   :  { %v166_v0 = vld [vmem:[%s15082_s0 + $0x31] sm:$0xff]  ;;  %v164_v1 = vld [vmem:[%s15082_s0 + $0x19] sm:$0xff]  ;;  %v162_v2 = vld [vmem:[%s15082_s0 + $0x1] sm:$0xff] }
   0x2   :  { %298 = vrot.lane.b32.xlu2 %v166_v0, %s9463_s15  ;;  %294 = vrot.lane.b32.xlu1 %v164_v1, %s9463_s15  ;;  %v167_v3 = vld [vmem:[%s15082_s0 + $0x39] sm:$0xff]  ;;  %v165_v4 = vld [vmem:[%s15082_s0 + $0x21] sm:$0xff] }
   0x3   :  { %290 = vrot.lane.b32.xlu0 %v162_v2, %s9463_s15  ;;  %v163_v5 = vld [vmem:[%s15082_s0 + $0x9] sm:$0xff] }
   0x4   :  { %14 = vsyncpa [#allocation6], 0  ;;  %v170_v6 = vld [vmem:[%s15082_s0 + $0x61] sm:$0xff]  ;;  %v169_v7 = vld [vmem:[%s15082_s0 + $0x51] sm:$0xff]  ;;  %vm97_vm0 = vcmask 23552   ;;  %vm482_vm1 = vcmask 48152  }
   0x5   :  { %v168_v8 = vld [vmem:[%s15082_s0 + $0x49] sm:$0xff]  ;;  %v173_v9 = vld [vmem:[%s15082_s0 + $0x81] sm:$0xff]  ;;  %v172_v10 = vld [vmem:[%s15082_s0 + $0x79] sm:$0xff]  ;;  %s9464_s13 = smov 6   ;;  %vm867_vm2 = vcmask 72752   ;;  %s9465_s14 = smov 9  }
   0x6   :  { %v171_v11 = vld [vmem:[%s15082_s0 + $0x69] sm:$0xff]  ;;  %v175_v13 = vld [vmem:[%s15082_s0 + $0x99] sm:$0xff]  ;;  %v174_v14 = vld [vmem:[%s15082_s0 + $0x91] sm:$0xff]  ;;  %vm1253_vm3 = vcmask 97352   ;;  %s9466_s28 = smov 12   ;;  %vm1638_vm4 = vcmask 121952  }
   0x7   :  { %v176_v12 = vld [vmem:[%s15082_s0 + $0xa9] sm:$0xff]  ;;  %v178_v16 = vld [vmem:[%s15082_s0 + $0xc1] sm:$0xff]  ;;  %v177_v17 = vld [vmem:[%s15082_s0 + $0xb1] sm:$0xff]  ;;  %vm2023_vm5 = vcmask 146552   ;;  %s9468_s20 = smov 18   ;;  %s9469_s25 = smov 24  }
   0x8   :  { %v179_v15 = vld [vmem:[%s15082_s0 + $0xc9] sm:$0xff]  ;;  %v182_v18 = vld [vmem:[%s15082_s0 + $0xf1] sm:$0xff]  ;;  %v181_v19 = vld [vmem:[%s15082_s0 + $0xe1] sm:$0xff]  ;;  %vm2409_vm6 = vcmask 171152   ;;  %vm3505_vm7 = vcmask 1042432   ;;  %vm2794_vm8 = vcmask 195752  }
   0x9   :  { %v180_v20 = vld [vmem:[%s15082_s0 + $0xd9] sm:$0xff]  ;;  %v185_v21 = vld [vmem:[%s15082_s0 + $0x111] sm:$0xff]  ;;  %v184_v22 = vld [vmem:[%s15082_s0 + $0x109] sm:$0xff]  ;;  %vm3179_vm9 = vcmask 220352   ;;  %vm3312_vm10 = vcmask 220160   ;;  %vm4166_vm11 = vcmask 58368  }
   0xa   :  { %300 = vrot.lane.b32.xlu2 %v167_v3, %s9463_s15  ;;  %296 = vrot.lane.b32.xlu1 %v165_v4, %s9463_s15  ;;  %v183_v23 = vld [vmem:[%s15082_s0 + $0xf9] sm:$0xff]  ;;  %v9630_v24 = vld [vmem:[%s15082_s0 + $0x30] sm:$0xff]  ;;  %vm5959_vm12 = vcmask 64512   ;;  %vm15097_vm13 = vcmask 1041409   ;;  %vm15096_vm14 = vcmask 1042434   ;;  %vm15095_vm15 = vcmask 1043459  }
   0xb   :  { %292 = vrot.lane.b32.xlu0 %v163_v5, %s9463_s15  ;;  %102 = vst.msk [vmem:[#allocation2 + $0x20] sm:$0xff] %vm97_vm0, %v9630_v24  ;;  %v188_v25 = vld [vmem:[%s15082_s0 + $0x139] sm:$0xff]  ;;  %v187_v26 = vld [vmem:[%s15082_s0 + $0x129] sm:$0xff]  ;;  %v186_v27 = vld [vmem:[%s15082_s0 + $0x121] sm:$0xff]  ;;  %s9472_s21 = smov 8   ;;  %s9473_s22 = smov 32  }
   0xc   :  { %v9649_v28 = vld [vmem:[%s15082_s0 + $0x38] sm:$0xff]  ;;  %v189_v31 = vld [vmem:[%s15082_s0 + $0x141] sm:$0xff]  ;;  %v192_v35 = vld [vmem:[%s15082_s0 + $0x169] sm:$0xff]  ;;  %s9475_s23 = smov 56   ;;  %s9476_s24 = smov 48  }
   0xd   :  { %103 = vst.msk [vmem:[#allocation2 + $0x28] sm:$0xff] %vm97_vm0, %v9649_v28  ;;  %v191_v29 = vld [vmem:[%s15082_s0 + $0x159] sm:$0xff]  ;;  %v190_v30 = vld [vmem:[%s15082_s0 + $0x151] sm:$0xff]  ;;  %v196_v40 = vld [vmem:[%s15082_s0 + $0x1c9] sm:$0xff]  ;;  %s9477_s26 = smov 40   ;;  %s9478_s27 = smov 64  }
   0xe   :  { %v9668_v32 = vld [vmem:[%s15082_s0 + $0x60] sm:$0xff]  ;;  %v194_v33 = vld [vmem:[%s15082_s0 + $0x1b1] sm:$0xff]  ;;  %v9717_v43 = vld [vmem:[%s15082_s0 + $0xa8] sm:$0xff]  ;;  %s8916_s18 = sshll.u32 %s15091_s9, 4  ;;  %s8917_s18 = int_to_ptr.hbm [resolvable:$true] %s8916_s18 }
   0xf   :  { %106 = vst.msk [vmem:[#allocation2 + $0x40] sm:$0xff] %vm97_vm0, %v9668_v32  ;;  %v193_v34 = vld [vmem:[%s15082_s0 + $0x171] sm:$0xff]  ;;  %v9687_v36 = vld [vmem:[%s15082_s0 + $0x80] sm:$0xff]  ;;  %v34_v45 = vld [vmem:[%s15082_s0 + $0x8] sm:$0xff] }
  0x10   :  { %v33_v37 = vld [vmem:[%s15082_s0] sm:$0xff]  ;;  %109 = vst.msk [vmem:[#allocation2 + $0x58] sm:$0xff] %vm97_vm0, %v9687_v36  ;;  %v9697_v38 = vld [vmem:[%s15082_s0 + $0x18] sm:$0xff]  ;;  %v199_v47 = vld [vmem:[%s15082_s0 + $0x1e9] sm:$0xff] }
  0x11   :  { %100 = vst.msk [vmem:[#allocation2 + $0x10] sm:$0xff] %vm97_vm0, %v9697_v38  ;;  %v197_v39 = vld [vmem:[%s15082_s0 + $0x1d1] sm:$0xff]  ;;  %v195_v41 = vld [vmem:[%s15082_s0 + $0x1b9] sm:$0xff]  ;;  %v198_v48 = vld [vmem:[%s15082_s0 + $0x1e1] sm:$0xff] }
  0x12   :  { %306 = vrot.lane.b32.xlu2 %v170_v6, %s9463_s15  ;;  %304 = vrot.lane.b32.xlu1 %v169_v7, %s9463_s15  ;;  %98 = vst.msk [vmem:[#allocation2] sm:$0xff] %vm97_vm0, %v33_v37  ;;  %v9723_v44 = vld [vmem:[%s15082_s0 + $0x20] sm:$0xff]  ;;  %v9748_v50 = vld [vmem:[%s15082_s0 + $0xc8] sm:$0xff] }
  0x13   :  { %302 = vrot.lane.b32.xlu0 %v168_v8, %s9463_s15  ;;  %112 = vst.msk [vmem:[#allocation2 + $0x70] sm:$0xff] %vm97_vm0, %v9717_v43  ;;  %v200_v46 = vld [vmem:[%s15082_s0 + $0x1f9] sm:$0xff]  ;;  %v9754_v51 = vld [vmem:[%s15082_s0 + $0x50] sm:$0xff]  ;;  %v9759_v52 = vld [vmem:[%s15082_s0 + $0x48] sm:$0xff] }
  0x14   :  { %101 = vst.msk [vmem:[#allocation2 + $0x18] sm:$0xff] %vm97_vm0, %v9723_v44  ;;  %v203_v53 = vld [vmem:[%s15082_s0 + $0x219] sm:$0xff]  ;;  %v202_v54 = vld [vmem:[%s15082_s0 + $0x211] sm:$0xff]  ;;  %v201_v55 = vld [vmem:[%s15082_s0 + $0x201] sm:$0xff] }
  0x15   :  { %99 = vst.msk [vmem:[#allocation2 + $0x8] sm:$0xff] %vm97_vm0, %v34_v45  ;;  %v9782_v57 = vld [vmem:[%s15082_s0 + $0xf0] sm:$0xff]  ;;  %v9788_v58 = vld [vmem:[%s15082_s0 + $0x78] sm:$0xff]  ;;  %v9793_v59 = vld [vmem:[%s15082_s0 + $0x68] sm:$0xff] }
  0x16   :  { %115 = vst.msk [vmem:[#allocation2 + $0x88] sm:$0xff] %vm97_vm0, %v9748_v50  ;;  %v206_v60 = vld [vmem:[%s15082_s0 + $0x241] sm:$0xff]  ;;  %v205_v61 = vld [vmem:[%s15082_s0 + $0x231] sm:$0xff]  ;;  %v204_v62 = vld [vmem:[%s15082_s0 + $0x229] sm:$0xff] }
  0x17   :  { %105 = vst.msk [vmem:[#allocation2 + $0x38] sm:$0xff] %vm97_vm0, %v9754_v51  ;;  %v9817_v2 = vld [vmem:[%s15082_s0 + $0x110] sm:$0xff]  ;;  %v9823_v3 = vld [vmem:[%s15082_s0 + $0x98] sm:$0xff]  ;;  %v209_v4 = vld [vmem:[%s15082_s0 + $0x261] sm:$0xff] }
  0x18   :  { %104 = vst.msk [vmem:[#allocation2 + $0x30] sm:$0xff] %vm97_vm0, %v9759_v52  ;;  %v208_v5 = vld [vmem:[%s15082_s0 + $0x259] sm:$0xff]  ;;  %v9835_v6 = vld [vmem:[%s15082_s0 + $0x90] sm:$0xff] }
  0x19   :  { %118 = vst.msk [vmem:[#allocation2 + $0xa0] sm:$0xff] %vm97_vm0, %v9782_v57  ;;  %v207_v7 = vld [vmem:[%s15082_s0 + $0x249] sm:$0xff]  ;;  %v9941_v37 = vld [vmem:[%s15082_s0 + $0xf8] sm:$0xff] }
  0x1a   :  { %312 = vrot.lane.b32.xlu2 %v173_v9, %s9463_s15  ;;  %310 = vrot.lane.b32.xlu1 %v172_v10, %s9463_s15  ;;  %108 = vst.msk [vmem:[#allocation2 + $0x50] sm:$0xff] %vm97_vm0, %v9788_v58  ;;  %v9958_v45 = vld [vmem:[%s15082_s0 + $0x1d0] sm:$0xff] }
  0x1b   :  { %308 = vrot.lane.b32.xlu0 %v171_v11, %s9463_s15  ;;  %107 = vst.msk [vmem:[#allocation2 + $0x48] sm:$0xff] %vm97_vm0, %v9793_v59  ;;  %v9853_v11 = vld [vmem:[%s15082_s0 + $0x138] sm:$0xff] }
  0x1c   :  { %121 = vst.msk [vmem:[#allocation2 + $0xb8] sm:$0xff] %vm97_vm0, %v9817_v2 }
  0x1d   :  { %111 = vst.msk [vmem:[#allocation2 + $0x68] sm:$0xff] %vm97_vm0, %v9823_v3 }
  0x1e   :  { %110 = vst.msk [vmem:[#allocation2 + $0x60] sm:$0xff] %vm97_vm0, %v9835_v6 }
  0x1f   :  { %124 = vst.msk [vmem:[#allocation2 + $0xd0] sm:$0xff] %vm97_vm0, %v9853_v11 }
  0x20   :  { %119 = vst.msk [vmem:[#allocation2 + $0xa8] sm:$0xff] %vm97_vm0, %v9941_v37 }
  0x21   :  { %133 = vst.msk [vmem:[#allocation2 + $0x118] sm:$0xff] %vm97_vm0, %v9958_v45 }
  0x22   :  { %318 = vrot.lane.b32.xlu2 %v176_v12, %s9463_s15  ;;  %316 = vrot.lane.b32.xlu1 %v175_v13, %s9463_s15  ;;  %v9859_v12 = vld [vmem:[%s15082_s0 + $0xc0] sm:$0xff]  ;;  %v212_v13 = vld [vmem:[%s15082_s0 + $0x289] sm:$0xff] }
  0x23   :  { %314 = vrot.lane.b32.xlu0 %v174_v14, %s9463_s15  ;;  %v211_v14 = vld [vmem:[%s15082_s0 + $0x279] sm:$0xff]  ;;  %114 = vst.msk [vmem:[#allocation2 + $0x80] sm:$0xff] %vm97_vm0, %v9859_v12 }
  0x2a   :  { %324 = vrot.lane.b32.xlu2 %v179_v15, %s9463_s15  ;;  %322 = vrot.lane.b32.xlu1 %v178_v16, %s9463_s15  ;;  %v9871_v15 = vld [vmem:[%s15082_s0 + $0xb0] sm:$0xff] }
  0x2b   :  { %320 = vrot.lane.b32.xlu0 %v177_v17, %s9463_s15  ;;  %v210_v16 = vld [vmem:[%s15082_s0 + $0x271] sm:$0xff]  ;;  %113 = vst.msk [vmem:[#allocation2 + $0x78] sm:$0xff] %vm97_vm0, %v9871_v15 }
  0x32   :  { %330 = vrot.lane.b32.xlu2 %v182_v18, %s9463_s15  ;;  %328 = vrot.lane.b32.xlu1 %v181_v19, %s9463_s15 }
  0x33   :  { %326 = vrot.lane.b32.xlu0 %v180_v20, %s9463_s15  ;;  %v9889_v20 = vld [vmem:[%s15082_s0 + $0x158] sm:$0xff] }
  0x34   :  { %127 = vst.msk [vmem:[#allocation2 + $0xe8] sm:$0xff] %vm97_vm0, %v9889_v20 }
  0x3a   :  { %336 = vrot.lane.b32.xlu2 %v185_v21, %s9463_s15  ;;  %334 = vrot.lane.b32.xlu1 %v184_v22, %s9463_s15  ;;  %v9895_v21 = vld [vmem:[%s15082_s0 + $0xe0] sm:$0xff]  ;;  %v215_v22 = vld [vmem:[%s15082_s0 + $0x2a9] sm:$0xff] }
  0x3b   :  { %332 = vrot.lane.b32.xlu0 %v183_v23, %s9463_s15  ;;  %v214_v23 = vld [vmem:[%s15082_s0 + $0x2a1] sm:$0xff]  ;;  %117 = vst.msk [vmem:[#allocation2 + $0x98] sm:$0xff] %vm97_vm0, %v9895_v21 }
  0x42   :  { %342 = vrot.lane.b32.xlu2 %v188_v25, %s9463_s15  ;;  %340 = vrot.lane.b32.xlu1 %v187_v26, %s9463_s15  ;;  %v9907_v25 = vld [vmem:[%s15082_s0 + $0xd8] sm:$0xff] }
  0x43   :  { %338 = vrot.lane.b32.xlu0 %v186_v27, %s9463_s15  ;;  %v213_v26 = vld [vmem:[%s15082_s0 + $0x291] sm:$0xff]  ;;  %116 = vst.msk [vmem:[#allocation2 + $0x90] sm:$0xff] %vm97_vm0, %v9907_v25 }
  0x4a   :  { %348 = vrot.lane.b32.xlu2 %v191_v29, %s9463_s15  ;;  %346 = vrot.lane.b32.xlu1 %v190_v30, %s9463_s15 }
  0x4b   :  { %344 = vrot.lane.b32.xlu0 %v189_v31, %s9463_s15  ;;  %v65_v31 = vld [vmem:[%s15082_s0 + $0x1b0] sm:$0xff] }
  0x4c   :  { %130 = vst.msk [vmem:[#allocation2 + $0x100] sm:$0xff] %vm97_vm0, %v65_v31 }
  0x52   :  { %354 = vrot.lane.b32.xlu2 %v194_v33, %s9463_s15  ;;  %352 = vrot.lane.b32.xlu1 %v193_v34, %s9463_s15  ;;  %v9929_v33 = vld [vmem:[%s15082_s0 + $0x108] sm:$0xff]  ;;  %v218_v34 = vld [vmem:[%s15082_s0 + $0x2d1] sm:$0xff] }
  0x53   :  { %350 = vrot.lane.b32.xlu0 %v192_v35, %s9463_s15  ;;  %v217_v35 = vld [vmem:[%s15082_s0 + $0x2c1] sm:$0xff]  ;;  %120 = vst.msk [vmem:[#allocation2 + $0xb0] sm:$0xff] %vm97_vm0, %v9929_v33 }
  0x5a   :  { %360 = vrot.lane.b32.xlu2 %v197_v39, %s9463_s15  ;;  %358 = vrot.lane.b32.xlu1 %v196_v40, %s9463_s15  ;;  %v216_v39 = vld [vmem:[%s15082_s0 + $0x2b9] sm:$0xff] }
  0x5b   :  { %356 = vrot.lane.b32.xlu0 %v195_v41, %s9463_s15 }
  0x5c   :  { %v299_v42 = vpop.permute.xlu2 %298 }
  0x5d   :  { %487 = vst.msk [vmem:[#allocation2 + $0x20] sm:$0xff] %vm482_vm1, %v299_v42 }
  0x62   :  { %366 = vrot.lane.b32.xlu2 %v200_v46, %s9463_s15  ;;  %364 = vrot.lane.b32.xlu1 %v199_v47, %s9463_s15  ;;  %v9964_v46 = vld [vmem:[%s15082_s0 + $0x128] sm:$0xff]  ;;  %v221_v47 = vld [vmem:[%s15082_s0 + $0x2f1] sm:$0xff] }
  0x63   :  { %362 = vrot.lane.b32.xlu0 %v198_v48, %s9463_s15  ;;  %v220_v48 = vld [vmem:[%s15082_s0 + $0x2e9] sm:$0xff]  ;;  %123 = vst.msk [vmem:[#allocation2 + $0xc8] sm:$0xff] %vm97_vm0, %v9964_v46 }
  0x64   :  { %v301_v49 = vpop.permute.xlu2 %300 }
  0x65   :  { %488 = vst.msk [vmem:[#allocation2 + $0x28] sm:$0xff] %vm482_vm1, %v301_v49  ;;  %v9976_v49 = vld [vmem:[%s15082_s0 + $0x120] sm:$0xff] }
  0x66   :  { %122 = vst.msk [vmem:[#allocation2 + $0xc0] sm:$0xff] %vm97_vm0, %v9976_v49 }
  0x6a   :  { %372 = vrot.lane.b32.xlu2 %v203_v53, %s9463_s15  ;;  %370 = vrot.lane.b32.xlu1 %v202_v54, %s9463_s15  ;;  %v219_v53 = vld [vmem:[%s15082_s0 + $0x2d9] sm:$0xff] }
  0x6b   :  { %368 = vrot.lane.b32.xlu0 %v201_v55, %s9463_s15 }
  0x6c   :  { %v307_v56 = vpop.permute.xlu2 %306 }
  0x6d   :  { %491 = vst.msk [vmem:[#allocation2 + $0x40] sm:$0xff] %vm482_vm1, %v307_v56 }
  0x72   :  { %378 = vrot.lane.b32.xlu2 %v206_v60, %s9463_s15  ;;  %376 = vrot.lane.b32.xlu1 %v205_v61, %s9463_s15  ;;  %v9994_v60 = vld [vmem:[%s15082_s0 + $0x1f8] sm:$0xff]  ;;  %v10000_v61 = vld [vmem:[%s15082_s0 + $0x150] sm:$0xff] }
  0x73   :  { %374 = vrot.lane.b32.xlu0 %v204_v62, %s9463_s15  ;;  %v224_v62 = vld [vmem:[%s15082_s0 + $0x319] sm:$0xff]  ;;  %136 = vst.msk [vmem:[#allocation2 + $0x130] sm:$0xff] %vm97_vm0, %v9994_v60 }
  0x74   :  { %v313_v63 = vpop.permute.xlu2 %312  ;;  %v295_v0 = vpop.permute.xlu1 %294  ;;  %126 = vst.msk [vmem:[#allocation2 + $0xe0] sm:$0xff] %vm97_vm0, %v10000_v61 }
  0x75   :  { %494 = vst.msk [vmem:[#allocation2 + $0x58] sm:$0xff] %vm482_vm1, %v313_v63  ;;  %v291_v1 = vpop.permute.xlu0 %290  ;;  %v223_v63 = vld [vmem:[%s15082_s0 + $0x309] sm:$0xff] }
  0x76   :  { %485 = vst.msk [vmem:[#allocation2 + $0x10] sm:$0xff] %vm482_vm1, %v295_v0  ;;  %v10012_v0 = vld [vmem:[%s15082_s0 + $0x140] sm:$0xff] }
  0x77   :  { %483 = vst.msk [vmem:[#allocation2] sm:$0xff] %vm482_vm1, %v291_v1  ;;  %v222_v1 = vld [vmem:[%s15082_s0 + $0x301] sm:$0xff] }
  0x78   :  { %125 = vst.msk [vmem:[#allocation2 + $0xd8] sm:$0xff] %vm97_vm0, %v10012_v0 }
  0x7a   :  { %384 = vrot.lane.b32.xlu2 %v209_v4, %s9463_s15  ;;  %382 = vrot.lane.b32.xlu1 %v208_v5, %s9463_s15 }
  0x7b   :  { %380 = vrot.lane.b32.xlu0 %v207_v7, %s9463_s15 }
  0x7c   :  { %v319_v8 = vpop.permute.xlu2 %318  ;;  %v297_v9 = vpop.permute.xlu1 %296 }
  0x7d   :  { %497 = vst.msk [vmem:[#allocation2 + $0x70] sm:$0xff] %vm482_vm1, %v319_v8  ;;  %v293_v10 = vpop.permute.xlu0 %292  ;;  %v10030_v8 = vld [vmem:[%s15082_s0 + $0x218] sm:$0xff] }
  0x7e   :  { %486 = vst.msk [vmem:[#allocation2 + $0x18] sm:$0xff] %vm482_vm1, %v297_v9  ;;  %v10036_v9 = vld [vmem:[%s15082_s0 + $0x170] sm:$0xff] }
  0x7f   :  { %484 = vst.msk [vmem:[#allocation2 + $0x8] sm:$0xff] %vm482_vm1, %v293_v10  ;;  %v548_v10 = vld [vmem:[%s15082_s0 + $0xa] sm:$0xff] }
  0x80   :  { %139 = vst.msk [vmem:[#allocation2 + $0x148] sm:$0xff] %vm97_vm0, %v10030_v8 }
  0x81   :  { %129 = vst.msk [vmem:[#allocation2 + $0xf8] sm:$0xff] %vm97_vm0, %v10036_v9 }
  0x82   :  { %390 = vrot.lane.b32.xlu2 %v212_v13, %s9463_s15  ;;  %388 = vrot.lane.b32.xlu1 %v211_v14, %s9463_s15  ;;  %v547_v13 = vld [vmem:[%s15082_s0 + $0x2] sm:$0xff] }
  0x83   :  { %386 = vrot.lane.b32.xlu0 %v210_v16, %s9463_s15  ;;  %v10048_v14 = vld [vmem:[%s15082_s0 + $0x168] sm:$0xff] }
  0x84   :  { %v325_v17 = vpop.permute.xlu2 %324  ;;  %v305_v18 = vpop.permute.xlu1 %304  ;;  %v225_v16 = vld [vmem:[%s15082_s0 + $0x321] sm:$0xff]  ;;  %128 = vst.msk [vmem:[#allocation2 + $0xf0] sm:$0xff] %vm97_vm0, %v10048_v14 }
  0x85   :  { %500 = vst.msk [vmem:[#allocation2 + $0x88] sm:$0xff] %vm482_vm1, %v325_v17  ;;  %v303_v19 = vpop.permute.xlu0 %302 }
  0x86   :  { %490 = vst.msk [vmem:[#allocation2 + $0x38] sm:$0xff] %vm482_vm1, %v305_v18 }
  0x87   :  { %489 = vst.msk [vmem:[#allocation2 + $0x30] sm:$0xff] %vm482_vm1, %v303_v19 }
  0x8a   :  { %396 = vrot.lane.b32.xlu2 %v215_v22, %s9463_s15  ;;  %394 = vrot.lane.b32.xlu1 %v214_v23, %s9463_s15  ;;  %v10066_v22 = vld [vmem:[%s15082_s0 + $0x240] sm:$0xff]  ;;  %v10072_v23 = vld [vmem:[%s15082_s0 + $0x1c8] sm:$0xff] }
  0x8b   :  { %392 = vrot.lane.b32.xlu0 %v213_v26, %s9463_s15  ;;  %v551_v26 = vld [vmem:[%s15082_s0 + $0x32] sm:$0xff]  ;;  %142 = vst.msk [vmem:[#allocation2 + $0x160] sm:$0xff] %vm97_vm0, %v10066_v22 }
  0x8c   :  { %v331_v27 = vpop.permute.xlu2 %330  ;;  %v311_v29 = vpop.permute.xlu1 %310  ;;  %132 = vst.msk [vmem:[#allocation2 + $0x110] sm:$0xff] %vm97_vm0, %v10072_v23 }
  0x8d   :  { %503 = vst.msk [vmem:[#allocation2 + $0xa0] sm:$0xff] %vm482_vm1, %v331_v27  ;;  %v309_v30 = vpop.permute.xlu0 %308  ;;  %v550_v27 = vld [vmem:[%s15082_s0 + $0x22] sm:$0xff] }
  0x8e   :  { %493 = vst.msk [vmem:[#allocation2 + $0x50] sm:$0xff] %vm482_vm1, %v311_v29  ;;  %v66_v29 = vld [vmem:[%s15082_s0 + $0x1b8] sm:$0xff] }
  0x8f   :  { %492 = vst.msk [vmem:[#allocation2 + $0x48] sm:$0xff] %vm482_vm1, %v309_v30  ;;  %v549_v30 = vld [vmem:[%s15082_s0 + $0x1a] sm:$0xff] }
  0x90   :  { %131 = vst.msk [vmem:[#allocation2 + $0x108] sm:$0xff] %vm97_vm0, %v66_v29 }
  0x92   :  { %402 = vrot.lane.b32.xlu2 %v218_v34, %s9463_s15  ;;  %400 = vrot.lane.b32.xlu1 %v217_v35, %s9463_s15 }
  0x93   :  { %398 = vrot.lane.b32.xlu0 %v216_v39, %s9463_s15  ;;  %v10099_v39 = vld [vmem:[%s15082_s0 + $0x260] sm:$0xff] }
  0x94   :  { %v337_v40 = vpop.permute.xlu2 %336  ;;  %v317_v41 = vpop.permute.xlu1 %316  ;;  %145 = vst.msk [vmem:[#allocation2 + $0x178] sm:$0xff] %vm97_vm0, %v10099_v39 }
  0x95   :  { %506 = vst.msk [vmem:[#allocation2 + $0xb8] sm:$0xff] %vm482_vm1, %v337_v40  ;;  %v315_v42 = vpop.permute.xlu0 %314  ;;  %v10105_v40 = vld [vmem:[%s15082_s0 + $0x1e8] sm:$0xff] }
  0x96   :  { %496 = vst.msk [vmem:[#allocation2 + $0x68] sm:$0xff] %vm482_vm1, %v317_v41  ;;  %v554_v41 = vld [vmem:[%s15082_s0 + $0x52] sm:$0xff] }
  0x97   :  { %495 = vst.msk [vmem:[#allocation2 + $0x60] sm:$0xff] %vm482_vm1, %v315_v42  ;;  %v553_v42 = vld [vmem:[%s15082_s0 + $0x4a] sm:$0xff] }
  0x98   :  { %135 = vst.msk [vmem:[#allocation2 + $0x128] sm:$0xff] %vm97_vm0, %v10105_v40 }
  0x9a   :  { %408 = vrot.lane.b32.xlu2 %v221_v47, %s9463_s15  ;;  %406 = vrot.lane.b32.xlu1 %v220_v48, %s9463_s15  ;;  %v10117_v47 = vld [vmem:[%s15082_s0 + $0x1e0] sm:$0xff] }
  0x9b   :  { %404 = vrot.lane.b32.xlu0 %v219_v53, %s9463_s15  ;;  %v552_v48 = vld [vmem:[%s15082_s0 + $0x3a] sm:$0xff]  ;;  %134 = vst.msk [vmem:[#allocation2 + $0x120] sm:$0xff] %vm97_vm0, %v10117_v47 }
  0x9c   :  { %v343_v54 = vpop.permute.xlu2 %342  ;;  %v323_v55 = vpop.permute.xlu1 %322 }
  0x9d   :  { %509 = vst.msk [vmem:[#allocation2 + $0xd0] sm:$0xff] %vm482_vm1, %v343_v54  ;;  %v321_v56 = vpop.permute.xlu0 %320 }
  0x9e   :  { %499 = vst.msk [vmem:[#allocation2 + $0x80] sm:$0xff] %vm482_vm1, %v323_v55 }
  0x9f   :  { %498 = vst.msk [vmem:[#allocation2 + $0x78] sm:$0xff] %vm482_vm1, %v321_v56  ;;  %v10135_v56 = vld [vmem:[%s15082_s0 + $0x288] sm:$0xff] }
  0xa0   :  { %148 = vst.msk [vmem:[#allocation2 + $0x190] sm:$0xff] %vm97_vm0, %v10135_v56 }
  0xa2   :  { %414 = vrot.lane.b32.xlu2 %v224_v62, %s9463_s15  ;;  %412 = vrot.lane.b32.xlu1 %v223_v63, %s9463_s15  ;;  %v10141_v62 = vld [vmem:[%s15082_s0 + $0x210] sm:$0xff]  ;;  %v557_v63 = vld [vmem:[%s15082_s0 + $0x7a] sm:$0xff] }
  0xa3   :  { %410 = vrot.lane.b32.xlu0 %v222_v1, %s9463_s15  ;;  %v556_v1 = vld [vmem:[%s15082_s0 + $0x6a] sm:$0xff]  ;;  %138 = vst.msk [vmem:[#allocation2 + $0x140] sm:$0xff] %vm97_vm0, %v10141_v62 }
  0xa4   :  { %v349_v4 = vpop.permute.xlu2 %348  ;;  %v329_v5 = vpop.permute.xlu1 %328 }
  0xa5   :  { %512 = vst.msk [vmem:[#allocation2 + $0xe8] sm:$0xff] %vm482_vm1, %v349_v4  ;;  %v327_v7 = vpop.permute.xlu0 %326  ;;  %v10153_v4 = vld [vmem:[%s15082_s0 + $0x200] sm:$0xff] }
  0xa6   :  { %502 = vst.msk [vmem:[#allocation2 + $0x98] sm:$0xff] %vm482_vm1, %v329_v5  ;;  %v555_v5 = vld [vmem:[%s15082_s0 + $0x62] sm:$0xff] }
  0xa7   :  { %501 = vst.msk [vmem:[#allocation2 + $0x90] sm:$0xff] %vm482_vm1, %v327_v7 }
  0xa8   :  { %137 = vst.msk [vmem:[#allocation2 + $0x138] sm:$0xff] %vm97_vm0, %v10153_v4 }
  0xaa   :  { %677 = vrot.lane.b32.xlu2 %v548_v10, %s9464_s13  ;;  %675 = vrot.lane.b32.xlu1 %v547_v13, %s9464_s13 }
  0xab   :  { %416 = vrot.lane.b32.xlu0 %v225_v16, %s9463_s15  ;;  %v10171_v16 = vld [vmem:[%s15082_s0 + $0x2a8] sm:$0xff] }
  0xac   :  { %v355_v17 = vpop.permute.xlu2 %354  ;;  %v335_v18 = vpop.permute.xlu1 %334  ;;  %151 = vst.msk [vmem:[#allocation2 + $0x1a8] sm:$0xff] %vm97_vm0, %v10171_v16 }
  0xad   :  { %515 = vst.msk [vmem:[#allocation2 + $0x100] sm:$0xff] %vm482_vm1, %v355_v17  ;;  %v333_v19 = vpop.permute.xlu0 %332  ;;  %v10177_v17 = vld [vmem:[%s15082_s0 + $0x230] sm:$0xff] }
  0xae   :  { %505 = vst.msk [vmem:[#allocation2 + $0xb0] sm:$0xff] %vm482_vm1, %v335_v18  ;;  %v560_v18 = vld [vmem:[%s15082_s0 + $0x9a] sm:$0xff] }
  0xaf   :  { %504 = vst.msk [vmem:[#allocation2 + $0xa8] sm:$0xff] %vm482_vm1, %v333_v19  ;;  %v559_v19 = vld [vmem:[%s15082_s0 + $0x92] sm:$0xff] }
  0xb0   :  { %141 = vst.msk [vmem:[#allocation2 + $0x158] sm:$0xff] %vm97_vm0, %v10177_v17 }
  0xb2   :  { %683 = vrot.lane.b32.xlu2 %v551_v26, %s9464_s13  ;;  %681 = vrot.lane.b32.xlu1 %v550_v27, %s9464_s13  ;;  %v10189_v26 = vld [vmem:[%s15082_s0 + $0x228] sm:$0xff] }
  0xb3   :  { %679 = vrot.lane.b32.xlu0 %v549_v30, %s9464_s13  ;;  %v558_v27 = vld [vmem:[%s15082_s0 + $0x82] sm:$0xff]  ;;  %140 = vst.msk [vmem:[#allocation2 + $0x150] sm:$0xff] %vm97_vm0, %v10189_v26 }
  0xb4   :  { %v361_v31 = vpop.permute.xlu2 %360  ;;  %v341_v34 = vpop.permute.xlu1 %340 }
  0xb5   :  { %518 = vst.msk [vmem:[#allocation2 + $0x118] sm:$0xff] %vm482_vm1, %v361_v31  ;;  %v339_v35 = vpop.permute.xlu0 %338 }
  0xb6   :  { %508 = vst.msk [vmem:[#allocation2 + $0xc8] sm:$0xff] %vm482_vm1, %v341_v34  ;;  %v10207_v34 = vld [vmem:[%s15082_s0 + $0x2d0] sm:$0xff] }
  0xb7   :  { %507 = vst.msk [vmem:[#allocation2 + $0xc0] sm:$0xff] %vm482_vm1, %v339_v35  ;;  %v10213_v35 = vld [vmem:[%s15082_s0 + $0x258] sm:$0xff] }
  0xb8   :  { %154 = vst.msk [vmem:[#allocation2 + $0x1c0] sm:$0xff] %vm97_vm0, %v10207_v34 }
  0xb9   :  { %144 = vst.msk [vmem:[#allocation2 + $0x170] sm:$0xff] %vm97_vm0, %v10213_v35 }
  0xba   :  { %689 = vrot.lane.b32.xlu2 %v554_v41, %s9464_s13  ;;  %687 = vrot.lane.b32.xlu1 %v553_v42, %s9464_s13  ;;  %v563_v41 = vld [vmem:[%s15082_s0 + $0xc2] sm:$0xff]  ;;  %v562_v42 = vld [vmem:[%s15082_s0 + $0xb2] sm:$0xff] }
  0xbb   :  { %685 = vrot.lane.b32.xlu0 %v552_v48, %s9464_s13  ;;  %v10225_v48 = vld [vmem:[%s15082_s0 + $0x248] sm:$0xff] }
  0xbc   :  { %v367_v53 = vpop.permute.xlu2 %366  ;;  %v347_v54 = vpop.permute.xlu1 %346  ;;  %143 = vst.msk [vmem:[#allocation2 + $0x168] sm:$0xff] %vm97_vm0, %v10225_v48 }
  0xbd   :  { %521 = vst.msk [vmem:[#allocation2 + $0x130] sm:$0xff] %vm482_vm1, %v367_v53  ;;  %v345_v55 = vpop.permute.xlu0 %344  ;;  %v561_v53 = vld [vmem:[%s15082_s0 + $0xaa] sm:$0xff] }
  0xbe   :  { %511 = vst.msk [vmem:[#allocation2 + $0xe0] sm:$0xff] %vm482_vm1, %v347_v54 }
  0xbf   :  { %510 = vst.msk [vmem:[#allocation2 + $0xd8] sm:$0xff] %vm482_vm1, %v345_v55 }
  0xc2   :  { %695 = vrot.lane.b32.xlu2 %v557_v63, %s9464_s13  ;;  %693 = vrot.lane.b32.xlu1 %v556_v1, %s9464_s13  ;;  %v10243_v1 = vld [vmem:[%s15082_s0 + $0x2f0] sm:$0xff] }
  0xc3   :  { %691 = vrot.lane.b32.xlu0 %v555_v5, %s9464_s13  ;;  %v10249_v5 = vld [vmem:[%s15082_s0 + $0x278] sm:$0xff]  ;;  %157 = vst.msk [vmem:[#allocation2 + $0x1d8] sm:$0xff] %vm97_vm0, %v10243_v1 }
  0xc4   :  { %v373_v7 = vpop.permute.xlu2 %372  ;;  %v353_v10 = vpop.permute.xlu1 %352  ;;  %147 = vst.msk [vmem:[#allocation2 + $0x188] sm:$0xff] %vm97_vm0, %v10249_v5 }
  0xc5   :  { %524 = vst.msk [vmem:[#allocation2 + $0x148] sm:$0xff] %vm482_vm1, %v373_v7  ;;  %v351_v13 = vpop.permute.xlu0 %350  ;;  %v566_v7 = vld [vmem:[%s15082_s0 + $0xe2] sm:$0xff] }
  0xc6   :  { %514 = vst.msk [vmem:[#allocation2 + $0xf8] sm:$0xff] %vm482_vm1, %v353_v10  ;;  %v565_v10 = vld [vmem:[%s15082_s0 + $0xda] sm:$0xff] }
  0xc7   :  { %513 = vst.msk [vmem:[#allocation2 + $0xf0] sm:$0xff] %vm482_vm1, %v351_v13  ;;  %v10261_v13 = vld [vmem:[%s15082_s0 + $0x270] sm:$0xff] }
  0xc8   :  { %146 = vst.msk [vmem:[#allocation2 + $0x180] sm:$0xff] %vm97_vm0, %v10261_v13 }
  0xca   :  { %701 = vrot.lane.b32.xlu2 %v560_v18, %s9464_s13  ;;  %699 = vrot.lane.b32.xlu1 %v559_v19, %s9464_s13  ;;  %v564_v18 = vld [vmem:[%s15082_s0 + $0xca] sm:$0xff] }
  0xcb   :  { %697 = vrot.lane.b32.xlu0 %v558_v27, %s9464_s13 }
  0xcc   :  { %v379_v29 = vpop.permute.xlu2 %378  ;;  %v359_v30 = vpop.permute.xlu1 %358 }
  0xcd   :  { %527 = vst.msk [vmem:[#allocation2 + $0x160] sm:$0xff] %vm482_vm1, %v379_v29  ;;  %v357_v31 = vpop.permute.xlu0 %356 }
  0xce   :  { %517 = vst.msk [vmem:[#allocation2 + $0x110] sm:$0xff] %vm482_vm1, %v359_v30  ;;  %v10279_v30 = vld [vmem:[%s15082_s0 + $0x318] sm:$0xff] }
  0xcf   :  { %516 = vst.msk [vmem:[#allocation2 + $0x108] sm:$0xff] %vm482_vm1, %v357_v31  ;;  %v10285_v31 = vld [vmem:[%s15082_s0 + $0x2a0] sm:$0xff] }
  0xd0   :  { %15101 = vst [vmem:[#allocation8_spill] sm:$0xff] %v10279_v30 }
  0xd1   :  { %160 = vst.msk [vmem:[#allocation2 + $0x1f0] sm:$0xff] %vm97_vm0, %v10279_v30 }
  0xd2   :  { %707 = vrot.lane.b32.xlu2 %v563_v41, %s9464_s13  ;;  %705 = vrot.lane.b32.xlu1 %v562_v42, %s9464_s13  ;;  %v569_v41 = vld [vmem:[%s15082_s0 + $0x10a] sm:$0xff]  ;;  %v568_v42 = vld [vmem:[%s15082_s0 + $0xfa] sm:$0xff]  ;;  %150 = vst.msk [vmem:[#allocation2 + $0x1a0] sm:$0xff] %vm97_vm0, %v10285_v31 }
  0xd3   :  { %703 = vrot.lane.b32.xlu0 %v561_v53, %s9464_s13  ;;  %v10297_v53 = vld [vmem:[%s15082_s0 + $0x290] sm:$0xff] }
  0xd4   :  { %v385_v54 = vpop.permute.xlu2 %384  ;;  %v365_v55 = vpop.permute.xlu1 %364  ;;  %149 = vst.msk [vmem:[#allocation2 + $0x198] sm:$0xff] %vm97_vm0, %v10297_v53 }
  0xd5   :  { %530 = vst.msk [vmem:[#allocation2 + $0x178] sm:$0xff] %vm482_vm1, %v385_v54  ;;  %v363_v63 = vpop.permute.xlu0 %362  ;;  %v567_v54 = vld [vmem:[%s15082_s0 + $0xf2] sm:$0xff] }
  0xd6   :  { %520 = vst.msk [vmem:[#allocation2 + $0x128] sm:$0xff] %vm482_vm1, %v365_v55 }
  0xd7   :  { %519 = vst.msk [vmem:[#allocation2 + $0x120] sm:$0xff] %vm482_vm1, %v363_v63 }
  0xda   :  { %713 = vrot.lane.b32.xlu2 %v566_v7, %s9464_s13  ;;  %711 = vrot.lane.b32.xlu1 %v565_v10, %s9464_s13  ;;  %v10315_v10 = vld [vmem:[%s15082_s0 + $0x2c0] sm:$0xff] }
  0xdb   :  { %709 = vrot.lane.b32.xlu0 %v564_v18, %s9464_s13  ;;  %v10321_v18 = vld [vmem:[%s15082_s0 + $0x2b8] sm:$0xff]  ;;  %153 = vst.msk [vmem:[#allocation2 + $0x1b8] sm:$0xff] %vm97_vm0, %v10315_v10 }
  0xdc   :  { %v391_v19 = vpop.permute.xlu2 %390  ;;  %v371_v27 = vpop.permute.xlu1 %370  ;;  %152 = vst.msk [vmem:[#allocation2 + $0x1b0] sm:$0xff] %vm97_vm0, %v10321_v18 }
  0xdd   :  { %533 = vst.msk [vmem:[#allocation2 + $0x190] sm:$0xff] %vm482_vm1, %v391_v19  ;;  %v369_v29 = vpop.permute.xlu0 %368  ;;  %v572_v19 = vld [vmem:[%s15082_s0 + $0x12a] sm:$0xff] }
  0xde   :  { %523 = vst.msk [vmem:[#allocation2 + $0x140] sm:$0xff] %vm482_vm1, %v371_v27  ;;  %v571_v27 = vld [vmem:[%s15082_s0 + $0x122] sm:$0xff] }
  0xdf   :  { %522 = vst.msk [vmem:[#allocation2 + $0x138] sm:$0xff] %vm482_vm1, %v369_v29  ;;  %v570_v29 = vld [vmem:[%s15082_s0 + $0x112] sm:$0xff] }
  0xe2   :  { %719 = vrot.lane.b32.xlu2 %v569_v41, %s9464_s13  ;;  %717 = vrot.lane.b32.xlu1 %v568_v42, %s9464_s13 }
  0xe3   :  { %715 = vrot.lane.b32.xlu0 %v567_v54, %s9464_s13 }
  0xe4   :  { %v397_v55 = vpop.permute.xlu2 %396  ;;  %v377_v63 = vpop.permute.xlu1 %376 }
  0xe5   :  { %536 = vst.msk [vmem:[#allocation2 + $0x1a8] sm:$0xff] %vm482_vm1, %v397_v55  ;;  %v375_v7 = vpop.permute.xlu0 %374  ;;  %v10344_v55 = vld [vmem:[%s15082_s0 + $0x2e8] sm:$0xff] }
  0xe6   :  { %526 = vst.msk [vmem:[#allocation2 + $0x158] sm:$0xff] %vm482_vm1, %v377_v63  ;;  %v10350_v63 = vld [vmem:[%s15082_s0 + $0x2d8] sm:$0xff] }
  0xe7   :  { %525 = vst.msk [vmem:[#allocation2 + $0x150] sm:$0xff] %vm482_vm1, %v375_v7  ;;  %v575_v7 = vld [vmem:[%s15082_s0 + $0x152] sm:$0xff] }
  0xe8   :  { %15102 = vst [vmem:[#allocation9_spill] sm:$0xff] %v10350_v63 }
  0xe9   :  { %156 = vst.msk [vmem:[#allocation2 + $0x1d0] sm:$0xff] %vm97_vm0, %v10344_v55 }
  0xea   :  { %725 = vrot.lane.b32.xlu2 %v572_v19, %s9464_s13  ;;  %723 = vrot.lane.b32.xlu1 %v571_v27, %s9464_s13  ;;  %v574_v19 = vld [vmem:[%s15082_s0 + $0x142] sm:$0xff]  ;;  %v573_v27 = vld [vmem:[%s15082_s0 + $0x13a] sm:$0xff]  ;;  %155 = vst.msk [vmem:[#allocation2 + $0x1c8] sm:$0xff] %vm97_vm0, %v10350_v63 }
  0xeb   :  { %721 = vrot.lane.b32.xlu0 %v570_v29, %s9464_s13  ;;  %v10402_v63 = vld [vmem:[%s15082_s0 + $0x320] sm:$0xff] }
  0xec   :  { %v403_v41 = vpop.permute.xlu2 %402  ;;  %v383_v42 = vpop.permute.xlu1 %382  ;;  %15103 = vst [vmem:[#allocation10_spill] sm:$0xff] %v10402_v63 }
  0xed   :  { %539 = vst.msk [vmem:[#allocation2 + $0x1c0] sm:$0xff] %vm482_vm1, %v403_v41  ;;  %v381_v54 = vpop.permute.xlu0 %380 }
  0xee   :  { %529 = vst.msk [vmem:[#allocation2 + $0x170] sm:$0xff] %vm482_vm1, %v383_v42 }
  0xef   :  { %528 = vst.msk [vmem:[#allocation2 + $0x168] sm:$0xff] %vm482_vm1, %v381_v54  ;;  %v10373_v54 = vld [vmem:[%s15082_s0 + $0x308] sm:$0xff] }
  0xf0   :  { %159 = vst.msk [vmem:[#allocation2 + $0x1e8] sm:$0xff] %vm97_vm0, %v10373_v54 }
  0xf1   :  { %161 = vst.msk [vmem:[#allocation2 + $0x1f8] sm:$0xff] %vm97_vm0, %v10402_v63  ;;  %v584_v63 = vld [vmem:[%s15082_s0 + $0x1ea] sm:$0xff] }
  0xf2   :  { %731 = vrot.lane.b32.xlu2 %v575_v7, %s9464_s13  ;;  %729 = vrot.lane.b32.xlu1 %v574_v19, %s9464_s13  ;;  %v10379_v7 = vld [vmem:[%s15082_s0 + $0x300] sm:$0xff]  ;;  %v578_v19 = vld [vmem:[%s15082_s0 + $0x172] sm:$0xff] }
  0xf3   :  { %727 = vrot.lane.b32.xlu0 %v573_v27, %s9464_s13  ;;  %v577_v27 = vld [vmem:[%s15082_s0 + $0x16a] sm:$0xff]  ;;  %158 = vst.msk [vmem:[#allocation2 + $0x1e0] sm:$0xff] %vm97_vm0, %v10379_v7  ;;  %vm6792_vm0 = vcmask 1044484  }
  0xf4   :  { %v409_v29 = vpop.permute.xlu2 %408  ;;  %v389_v41 = vpop.permute.xlu1 %388 }
  0xf5   :  { %542 = vst.msk [vmem:[#allocation2 + $0x1d8] sm:$0xff] %vm482_vm1, %v409_v29  ;;  %v387_v42 = vpop.permute.xlu0 %386  ;;  %v576_v29 = vld [vmem:[%s15082_s0 + $0x15a] sm:$0xff] }
  0xf6   :  { %532 = vst.msk [vmem:[#allocation2 + $0x188] sm:$0xff] %vm482_vm1, %v389_v41 }
  0xf7   :  { %531 = vst.msk [vmem:[#allocation2 + $0x180] sm:$0xff] %vm482_vm1, %v387_v42 }
  0xfa   :  { %737 = vrot.lane.b32.xlu2 %v578_v19, %s9464_s13  ;;  %735 = vrot.lane.b32.xlu1 %v577_v27, %s9464_s13  ;;  %v581_v19 = vld [vmem:[%s15082_s0 + $0x1ca] sm:$0xff]  ;;  %v580_v27 = vld [vmem:[%s15082_s0 + $0x1ba] sm:$0xff] }
  0xfb   :  { %733 = vrot.lane.b32.xlu0 %v576_v29, %s9464_s13  ;;  %v579_v29 = vld [vmem:[%s15082_s0 + $0x1b2] sm:$0xff] }
  0xfc   :  { %v415_v41 = vpop.permute.xlu2 %414  ;;  %v395_v42 = vpop.permute.xlu1 %394 }
  0xfd   :  { %545 = vst.msk [vmem:[#allocation2 + $0x1f0] sm:$0xff] %vm482_vm1, %v415_v41  ;;  %v393_v30 = vpop.permute.xlu0 %392 }
  0xfe   :  { %535 = vst.msk [vmem:[#allocation2 + $0x1a0] sm:$0xff] %vm482_vm1, %v395_v42 }
  0xff   :  { %534 = vst.msk [vmem:[#allocation2 + $0x198] sm:$0xff] %vm482_vm1, %v393_v30 }
 0x102   :  { %743 = vrot.lane.b32.xlu2 %v581_v19, %s9464_s13  ;;  %741 = vrot.lane.b32.xlu1 %v580_v27, %s9464_s13  ;;  %v583_v19 = vld [vmem:[%s15082_s0 + $0x1e2] sm:$0xff]  ;;  %v582_v27 = vld [vmem:[%s15082_s0 + $0x1d2] sm:$0xff] }
 0x103   :  { %739 = vrot.lane.b32.xlu0 %v579_v29, %s9464_s13 }
 0x104   :  { %v678_v30 = vpop.permute.xlu2 %677  ;;  %v401_v41 = vpop.permute.xlu1 %400 }
 0x105   :  { %869 = vst.msk [vmem:[#allocation2 + $0x8] sm:$0xff] %vm867_vm2, %v678_v30  ;;  %v399_v42 = vpop.permute.xlu0 %398 }
 0x106   :  { %538 = vst.msk [vmem:[#allocation2 + $0x1b8] sm:$0xff] %vm482_vm1, %v401_v41 }
 0x107   :  { %537 = vst.msk [vmem:[#allocation2 + $0x1b0] sm:$0xff] %vm482_vm1, %v399_v42  ;;  %v587_v42 = vld [vmem:[%s15082_s0 + $0x212] sm:$0xff] }
 0x10a   :  { %749 = vrot.lane.b32.xlu2 %v584_v63, %s9464_s13  ;;  %747 = vrot.lane.b32.xlu1 %v583_v19, %s9464_s13  ;;  %v586_v63 = vld [vmem:[%s15082_s0 + $0x202] sm:$0xff]  ;;  %v585_v19 = vld [vmem:[%s15082_s0 + $0x1fa] sm:$0xff] }
 0x10b   :  { %745 = vrot.lane.b32.xlu0 %v582_v27, %s9464_s13 }
 0x10c   :  { %v684_v29 = vpop.permute.xlu2 %683  ;;  %v407_v30 = vpop.permute.xlu1 %406 }
 0x10d   :  { %872 = vst.msk [vmem:[#allocation2 + $0x20] sm:$0xff] %vm867_vm2, %v684_v29  ;;  %v405_v41 = vpop.permute.xlu0 %404 }
 0x10e   :  { %541 = vst.msk [vmem:[#allocation2 + $0x1d0] sm:$0xff] %vm482_vm1, %v407_v30 }
 0x10f   :  { %540 = vst.msk [vmem:[#allocation2 + $0x1c8] sm:$0xff] %vm482_vm1, %v405_v41  ;;  %v590_v41 = vld [vmem:[%s15082_s0 + $0x232] sm:$0xff] }
 0x112   :  { %755 = vrot.lane.b32.xlu2 %v587_v42, %s9464_s13  ;;  %753 = vrot.lane.b32.xlu1 %v586_v63, %s9464_s13  ;;  %v589_v42 = vld [vmem:[%s15082_s0 + $0x22a] sm:$0xff]  ;;  %v588_v63 = vld [vmem:[%s15082_s0 + $0x21a] sm:$0xff] }
 0x113   :  { %751 = vrot.lane.b32.xlu0 %v585_v19, %s9464_s13 }
 0x114   :  { %v690_v27 = vpop.permute.xlu2 %689  ;;  %v413_v29 = vpop.permute.xlu1 %412 }
 0x115   :  { %875 = vst.msk [vmem:[#allocation2 + $0x38] sm:$0xff] %vm867_vm2, %v690_v27  ;;  %v411_v30 = vpop.permute.xlu0 %410 }
 0x116   :  { %544 = vst.msk [vmem:[#allocation2 + $0x1e8] sm:$0xff] %vm482_vm1, %v413_v29 }
 0x117   :  { %543 = vst.msk [vmem:[#allocation2 + $0x1e0] sm:$0xff] %vm482_vm1, %v411_v30  ;;  %v593_v30 = vld [vmem:[%s15082_s0 + $0x25a] sm:$0xff] }
 0x11a   :  { %761 = vrot.lane.b32.xlu2 %v590_v41, %s9464_s13  ;;  %759 = vrot.lane.b32.xlu1 %v589_v42, %s9464_s13  ;;  %v592_v41 = vld [vmem:[%s15082_s0 + $0x24a] sm:$0xff]  ;;  %v591_v42 = vld [vmem:[%s15082_s0 + $0x242] sm:$0xff] }
 0x11b   :  { %757 = vrot.lane.b32.xlu0 %v588_v63, %s9464_s13 }
 0x11c   :  { %v696_v19 = vpop.permute.xlu2 %695  ;;  %v676_v27 = vpop.permute.xlu1 %675 }
 0x11d   :  { %878 = vst.msk [vmem:[#allocation2 + $0x50] sm:$0xff] %vm867_vm2, %v696_v19  ;;  %v417_v29 = vpop.permute.xlu0 %416 }
 0x11e   :  { %868 = vst.msk [vmem:[#allocation2] sm:$0xff] %vm867_vm2, %v676_v27 }
 0x11f   :  { %546 = vst.msk [vmem:[#allocation2 + $0x1f8] sm:$0xff] %vm482_vm1, %v417_v29  ;;  %v596_v29 = vld [vmem:[%s15082_s0 + $0x27a] sm:$0xff]  ;;  %vm6795_vm1 = vcmask 1045509  }
 0x122   :  { %767 = vrot.lane.b32.xlu2 %v593_v30, %s9464_s13  ;;  %765 = vrot.lane.b32.xlu1 %v592_v41, %s9464_s13  ;;  %v595_v30 = vld [vmem:[%s15082_s0 + $0x272] sm:$0xff]  ;;  %v594_v41 = vld [vmem:[%s15082_s0 + $0x262] sm:$0xff] }
 0x123   :  { %763 = vrot.lane.b32.xlu0 %v591_v42, %s9464_s13 }
 0x124   :  { %v702_v63 = vpop.permute.xlu2 %701  ;;  %v682_v19 = vpop.permute.xlu1 %681 }
 0x125   :  { %881 = vst.msk [vmem:[#allocation2 + $0x68] sm:$0xff] %vm867_vm2, %v702_v63  ;;  %v680_v27 = vpop.permute.xlu0 %679 }
 0x126   :  { %871 = vst.msk [vmem:[#allocation2 + $0x18] sm:$0xff] %vm867_vm2, %v682_v19 }
 0x127   :  { %870 = vst.msk [vmem:[#allocation2 + $0x10] sm:$0xff] %vm867_vm2, %v680_v27  ;;  %v599_v27 = vld [vmem:[%s15082_s0 + $0x2a2] sm:$0xff] }
 0x12a   :  { %773 = vrot.lane.b32.xlu2 %v596_v29, %s9464_s13  ;;  %771 = vrot.lane.b32.xlu1 %v595_v30, %s9464_s13  ;;  %v598_v29 = vld [vmem:[%s15082_s0 + $0x292] sm:$0xff]  ;;  %v597_v30 = vld [vmem:[%s15082_s0 + $0x28a] sm:$0xff] }
 0x12b   :  { %769 = vrot.lane.b32.xlu0 %v594_v41, %s9464_s13 }
 0x12c   :  { %v708_v42 = vpop.permute.xlu2 %707  ;;  %v688_v63 = vpop.permute.xlu1 %687 }
 0x12d   :  { %884 = vst.msk [vmem:[#allocation2 + $0x80] sm:$0xff] %vm867_vm2, %v708_v42  ;;  %v686_v19 = vpop.permute.xlu0 %685 }
 0x12e   :  { %874 = vst.msk [vmem:[#allocation2 + $0x30] sm:$0xff] %vm867_vm2, %v688_v63 }
 0x12f   :  { %873 = vst.msk [vmem:[#allocation2 + $0x28] sm:$0xff] %vm867_vm2, %v686_v19  ;;  %v602_v19 = vld [vmem:[%s15082_s0 + $0x2c2] sm:$0xff] }
 0x132   :  { %779 = vrot.lane.b32.xlu2 %v599_v27, %s9464_s13  ;;  %777 = vrot.lane.b32.xlu1 %v598_v29, %s9464_s13  ;;  %v601_v27 = vld [vmem:[%s15082_s0 + $0x2ba] sm:$0xff]  ;;  %v600_v29 = vld [vmem:[%s15082_s0 + $0x2aa] sm:$0xff] }
 0x133   :  { %775 = vrot.lane.b32.xlu0 %v597_v30, %s9464_s13 }
 0x134   :  { %v714_v41 = vpop.permute.xlu2 %713  ;;  %v694_v42 = vpop.permute.xlu1 %693 }
 0x135   :  { %887 = vst.msk [vmem:[#allocation2 + $0x98] sm:$0xff] %vm867_vm2, %v714_v41  ;;  %v692_v63 = vpop.permute.xlu0 %691 }
 0x136   :  { %877 = vst.msk [vmem:[#allocation2 + $0x48] sm:$0xff] %vm867_vm2, %v694_v42 }
 0x137   :  { %876 = vst.msk [vmem:[#allocation2 + $0x40] sm:$0xff] %vm867_vm2, %v692_v63  ;;  %v605_v63 = vld [vmem:[%s15082_s0 + $0x2ea] sm:$0xff] }
 0x13a   :  { %785 = vrot.lane.b32.xlu2 %v602_v19, %s9464_s13  ;;  %783 = vrot.lane.b32.xlu1 %v601_v27, %s9464_s13  ;;  %v604_v19 = vld [vmem:[%s15082_s0 + $0x2da] sm:$0xff]  ;;  %v603_v27 = vld [vmem:[%s15082_s0 + $0x2d2] sm:$0xff] }
 0x13b   :  { %781 = vrot.lane.b32.xlu0 %v600_v29, %s9464_s13 }
 0x13c   :  { %v720_v30 = vpop.permute.xlu2 %719  ;;  %v700_v41 = vpop.permute.xlu1 %699 }
 0x13d   :  { %890 = vst.msk [vmem:[#allocation2 + $0xb0] sm:$0xff] %vm867_vm2, %v720_v30  ;;  %v698_v42 = vpop.permute.xlu0 %697 }
 0x13e   :  { %880 = vst.msk [vmem:[#allocation2 + $0x60] sm:$0xff] %vm867_vm2, %v700_v41 }
 0x13f   :  { %879 = vst.msk [vmem:[#allocation2 + $0x58] sm:$0xff] %vm867_vm2, %v698_v42  ;;  %v608_v42 = vld [vmem:[%s15082_s0 + $0x30a] sm:$0xff] }
 0x142   :  { %791 = vrot.lane.b32.xlu2 %v605_v63, %s9464_s13  ;;  %789 = vrot.lane.b32.xlu1 %v604_v19, %s9464_s13  ;;  %v607_v63 = vld [vmem:[%s15082_s0 + $0x302] sm:$0xff]  ;;  %v606_v19 = vld [vmem:[%s15082_s0 + $0x2f2] sm:$0xff] }
 0x143   :  { %787 = vrot.lane.b32.xlu0 %v603_v27, %s9464_s13 }
 0x144   :  { %v726_v29 = vpop.permute.xlu2 %725  ;;  %v706_v30 = vpop.permute.xlu1 %705 }
 0x145   :  { %893 = vst.msk [vmem:[#allocation2 + $0xc8] sm:$0xff] %vm867_vm2, %v726_v29  ;;  %v704_v41 = vpop.permute.xlu0 %703 }
 0x146   :  { %883 = vst.msk [vmem:[#allocation2 + $0x78] sm:$0xff] %vm867_vm2, %v706_v30 }
 0x147   :  { %882 = vst.msk [vmem:[#allocation2 + $0x70] sm:$0xff] %vm867_vm2, %v704_v41  ;;  %v610_v41 = vld [vmem:[%s15082_s0 + $0x322] sm:$0xff] }
 0x14a   :  { %797 = vrot.lane.b32.xlu2 %v608_v42, %s9464_s13  ;;  %795 = vrot.lane.b32.xlu1 %v607_v63, %s9464_s13  ;;  %v609_v42 = vld [vmem:[%s15082_s0 + $0x31a] sm:$0xff] }
 0x14b   :  { %793 = vrot.lane.b32.xlu0 %v606_v19, %s9464_s13 }
 0x14c   :  { %v732_v27 = vpop.permute.xlu2 %731  ;;  %v712_v29 = vpop.permute.xlu1 %711 }
 0x14d   :  { %896 = vst.msk [vmem:[#allocation2 + $0xe0] sm:$0xff] %vm867_vm2, %v732_v27  ;;  %v710_v30 = vpop.permute.xlu0 %709 }
 0x14e   :  { %886 = vst.msk [vmem:[#allocation2 + $0x90] sm:$0xff] %vm867_vm2, %v712_v29 }
 0x14f   :  { %885 = vst.msk [vmem:[#allocation2 + $0x88] sm:$0xff] %vm867_vm2, %v710_v30 }
 0x152   :  { %1061 = vrot.lane.b32.xlu2 %v9697_v38, %s9465_s14  ;;  %801 = vrot.lane.b32.xlu1 %v610_v41, %s9464_s13  ;;  %v8958_v41 = vld [vmem:[%s15082_s0 + $0x180] sm:$0xff] }
 0x153   :  { %799 = vrot.lane.b32.xlu0 %v609_v42, %s9464_s13  ;;  %v8959_v42 = vld [vmem:[%s15082_s0 + $0x188] sm:$0xff]  ;;  %s9467_s13 = smov 15  }
 0x154   :  { %v738_v63 = vpop.permute.xlu2 %737  ;;  %v718_v19 = vpop.permute.xlu1 %717 }
 0x155   :  { %899 = vst.msk [vmem:[#allocation2 + $0xf8] sm:$0xff] %vm867_vm2, %v738_v63  ;;  %v716_v27 = vpop.permute.xlu0 %715 }
 0x156   :  { %889 = vst.msk [vmem:[#allocation2 + $0xa8] sm:$0xff] %vm867_vm2, %v718_v19 }
 0x157   :  { %888 = vst.msk [vmem:[#allocation2 + $0xa0] sm:$0xff] %vm867_vm2, %v716_v27 }
 0x15a   :  { %1067 = vrot.lane.b32.xlu2 %v9649_v28, %s9465_s14  ;;  %1065 = vrot.lane.b32.xlu1 %v9630_v24, %s9465_s14 }
 0x15b   :  { %1063 = vrot.lane.b32.xlu0 %v9723_v44, %s9465_s14 }
 0x15c   :  { %v744_v38 = vpop.permute.xlu2 %743  ;;  %v724_v29 = vpop.permute.xlu1 %723 }
 0x15d   :  { %902 = vst.msk [vmem:[#allocation2 + $0x110] sm:$0xff] %vm867_vm2, %v744_v38  ;;  %v722_v30 = vpop.permute.xlu0 %721  ;;  %v15105_v38 = vld [vmem:[#allocation8_spill] sm:$0xff] }
 0x15e   :  { %892 = vst.msk [vmem:[#allocation2 + $0xc0] sm:$0xff] %vm867_vm2, %v724_v29 }
 0x15f   :  { %891 = vst.msk [vmem:[#allocation2 + $0xb8] sm:$0xff] %vm867_vm2, %v722_v30  ;;  %v8991_v30 = vld [vmem:[%s15082_s0 + $0x338] sm:$0xff] }
 0x162   :  { %1073 = vrot.lane.b32.xlu2 %v9668_v32, %s9465_s14  ;;  %1071 = vrot.lane.b32.xlu1 %v9754_v51, %s9465_s14 }
 0x163   :  { %1069 = vrot.lane.b32.xlu0 %v9759_v52, %s9465_s14 }
 0x164   :  { %v750_v24 = vpop.permute.xlu2 %749  ;;  %v730_v28 = vpop.permute.xlu1 %729 }
 0x165   :  { %905 = vst.msk [vmem:[#allocation2 + $0x128] sm:$0xff] %vm867_vm2, %v750_v24  ;;  %v728_v44 = vpop.permute.xlu0 %727 }
 0x166   :  { %895 = vst.msk [vmem:[#allocation2 + $0xd8] sm:$0xff] %vm867_vm2, %v730_v28 }
 0x167   :  { %894 = vst.msk [vmem:[#allocation2 + $0xd0] sm:$0xff] %vm867_vm2, %v728_v44 }
 0x16a   :  { %1079 = vrot.lane.b32.xlu2 %v9687_v36, %s9465_s14  ;;  %1077 = vrot.lane.b32.xlu1 %v9788_v58, %s9465_s14 }
 0x16b   :  { %1075 = vrot.lane.b32.xlu0 %v9793_v59, %s9465_s14 }
 0x16c   :  { %v756_v32 = vpop.permute.xlu2 %755  ;;  %v736_v51 = vpop.permute.xlu1 %735 }
 0x16d   :  { %908 = vst.msk [vmem:[#allocation2 + $0x140] sm:$0xff] %vm867_vm2, %v756_v32  ;;  %v734_v52 = vpop.permute.xlu0 %733  ;;  %v8994_v32 = vld [vmem:[%s15082_s0 + $0x31] sm:$0xff] }
 0x16e   :  { %898 = vst.msk [vmem:[#allocation2 + $0xf0] sm:$0xff] %vm867_vm2, %v736_v51  ;;  %v8993_v51 = vld [vmem:[%s15082_s0 + $0x21] sm:$0xff] }
 0x16f   :  { %897 = vst.msk [vmem:[#allocation2 + $0xe8] sm:$0xff] %vm867_vm2, %v734_v52  ;;  %v8992_v52 = vld [vmem:[%s15082_s0 + $0x19] sm:$0xff] }
 0x172   :  { %1085 = vrot.lane.b32.xlu2 %v9717_v43, %s9465_s14  ;;  %1083 = vrot.lane.b32.xlu1 %v9823_v3, %s9465_s14 }
 0x173   :  { %1081 = vrot.lane.b32.xlu0 %v9835_v6, %s9465_s14 }
 0x174   :  { %v762_v36 = vpop.permute.xlu2 %761  ;;  %v742_v58 = vpop.permute.xlu1 %741 }
 0x175   :  { %911 = vst.msk [vmem:[#allocation2 + $0x158] sm:$0xff] %vm867_vm2, %v762_v36  ;;  %v740_v59 = vpop.permute.xlu0 %739 }
 0x176   :  { %901 = vst.msk [vmem:[#allocation2 + $0x108] sm:$0xff] %vm867_vm2, %v742_v58 }
 0x177   :  { %900 = vst.msk [vmem:[#allocation2 + $0x100] sm:$0xff] %vm867_vm2, %v740_v59 }
 0x17a   :  { %1091 = vrot.lane.b32.xlu2 %v9748_v50, %s9465_s14  ;;  %1089 = vrot.lane.b32.xlu1 %v9859_v12, %s9465_s14 }
 0x17b   :  { %1087 = vrot.lane.b32.xlu0 %v9871_v15, %s9465_s14 }
 0x17c   :  { %v768_v43 = vpop.permute.xlu2 %767  ;;  %v748_v3 = vpop.permute.xlu1 %747 }
 0x17d   :  { %914 = vst.msk [vmem:[#allocation2 + $0x170] sm:$0xff] %vm867_vm2, %v768_v43  ;;  %v746_v6 = vpop.permute.xlu0 %745  ;;  %v8997_v43 = vld [vmem:[%s15082_s0 + $0x51] sm:$0xff] }
 0x17e   :  { %904 = vst.msk [vmem:[#allocation2 + $0x120] sm:$0xff] %vm867_vm2, %v748_v3  ;;  %v8996_v3 = vld [vmem:[%s15082_s0 + $0x49] sm:$0xff] }
 0x17f   :  { %903 = vst.msk [vmem:[#allocation2 + $0x118] sm:$0xff] %vm867_vm2, %v746_v6  ;;  %v8995_v6 = vld [vmem:[%s15082_s0 + $0x39] sm:$0xff] }
 0x182   :  { %1097 = vrot.lane.b32.xlu2 %v9782_v57, %s9465_s14  ;;  %1095 = vrot.lane.b32.xlu1 %v9895_v21, %s9465_s14 }
 0x183   :  { %1093 = vrot.lane.b32.xlu0 %v9907_v25, %s9465_s14 }
 0x184   :  { %v774_v50 = vpop.permute.xlu2 %773  ;;  %v754_v12 = vpop.permute.xlu1 %753 }
 0x185   :  { %917 = vst.msk [vmem:[#allocation2 + $0x188] sm:$0xff] %vm867_vm2, %v774_v50  ;;  %v752_v15 = vpop.permute.xlu0 %751 }
 0x186   :  { %907 = vst.msk [vmem:[#allocation2 + $0x138] sm:$0xff] %vm867_vm2, %v754_v12 }
 0x187   :  { %906 = vst.msk [vmem:[#allocation2 + $0x130] sm:$0xff] %vm867_vm2, %v752_v15 }
 0x18a   :  { %1103 = vrot.lane.b32.xlu2 %v9817_v2, %s9465_s14  ;;  %1101 = vrot.lane.b32.xlu1 %v9929_v33, %s9465_s14 }
 0x18b   :  { %1099 = vrot.lane.b32.xlu0 %v9941_v37, %s9465_s14 }
 0x18c   :  { %v780_v57 = vpop.permute.xlu2 %779  ;;  %v760_v21 = vpop.permute.xlu1 %759 }
 0x18d   :  { %920 = vst.msk [vmem:[#allocation2 + $0x1a0] sm:$0xff] %vm867_vm2, %v780_v57  ;;  %v758_v25 = vpop.permute.xlu0 %757  ;;  %v9000_v57 = vld [vmem:[%s15082_s0 + $0x79] sm:$0xff] }
 0x18e   :  { %910 = vst.msk [vmem:[#allocation2 + $0x150] sm:$0xff] %vm867_vm2, %v760_v21  ;;  %v8999_v21 = vld [vmem:[%s15082_s0 + $0x69] sm:$0xff] }
 0x18f   :  { %909 = vst.msk [vmem:[#allocation2 + $0x148] sm:$0xff] %vm867_vm2, %v758_v25  ;;  %v8998_v25 = vld [vmem:[%s15082_s0 + $0x61] sm:$0xff] }
 0x192   :  { %1109 = vrot.lane.b32.xlu2 %v9853_v11, %s9465_s14  ;;  %1107 = vrot.lane.b32.xlu1 %v9964_v46, %s9465_s14 }
 0x193   :  { %1105 = vrot.lane.b32.xlu0 %v9976_v49, %s9465_s14 }
 0x194   :  { %v786_v2 = vpop.permute.xlu2 %785  ;;  %v766_v33 = vpop.permute.xlu1 %765 }
 0x195   :  { %923 = vst.msk [vmem:[#allocation2 + $0x1b8] sm:$0xff] %vm867_vm2, %v786_v2  ;;  %v764_v37 = vpop.permute.xlu0 %763 }
 0x196   :  { %913 = vst.msk [vmem:[#allocation2 + $0x168] sm:$0xff] %vm867_vm2, %v766_v33 }
 0x197   :  { %912 = vst.msk [vmem:[#allocation2 + $0x160] sm:$0xff] %vm867_vm2, %v764_v37 }
 0x19a   :  { %1115 = vrot.lane.b32.xlu2 %v9889_v20, %s9465_s14  ;;  %1113 = vrot.lane.b32.xlu1 %v10000_v61, %s9465_s14 }
 0x19b   :  { %1111 = vrot.lane.b32.xlu0 %v10012_v0, %s9465_s14 }
 0x19c   :  { %v792_v11 = vpop.permute.xlu2 %791  ;;  %v772_v46 = vpop.permute.xlu1 %771 }
 0x19d   :  { %926 = vst.msk [vmem:[#allocation2 + $0x1d0] sm:$0xff] %vm867_vm2, %v792_v11  ;;  %v770_v49 = vpop.permute.xlu0 %769  ;;  %v9003_v11 = vld [vmem:[%s15082_s0 + $0x99] sm:$0xff] }
 0x19e   :  { %916 = vst.msk [vmem:[#allocation2 + $0x180] sm:$0xff] %vm867_vm2, %v772_v46  ;;  %v9002_v46 = vld [vmem:[%s15082_s0 + $0x91] sm:$0xff] }
 0x19f   :  { %915 = vst.msk [vmem:[#allocation2 + $0x178] sm:$0xff] %vm867_vm2, %v770_v49  ;;  %v9001_v49 = vld [vmem:[%s15082_s0 + $0x81] sm:$0xff] }
 0x1a2   :  { %1121 = vrot.lane.b32.xlu2 %v8958_v41, %s9465_s14  ;;  %1119 = vrot.lane.b32.xlu1 %v10036_v9, %s9465_s14 }
 0x1a3   :  { %1117 = vrot.lane.b32.xlu0 %v10048_v14, %s9465_s14 }
 0x1a4   :  { %v798_v20 = vpop.permute.xlu2 %797  ;;  %v778_v61 = vpop.permute.xlu1 %777 }
 0x1a5   :  { %929 = vst.msk [vmem:[#allocation2 + $0x1e8] sm:$0xff] %vm867_vm2, %v798_v20  ;;  %v776_v0 = vpop.permute.xlu0 %775 }
 0x1a6   :  { %919 = vst.msk [vmem:[#allocation2 + $0x198] sm:$0xff] %vm867_vm2, %v778_v61 }
 0x1a7   :  { %918 = vst.msk [vmem:[#allocation2 + $0x190] sm:$0xff] %vm867_vm2, %v776_v0  ;;  %v9006_v0 = vld [vmem:[%s15082_s0 + $0xc1] sm:$0xff] }
 0x1aa   :  { %1127 = vrot.lane.b32.xlu2 %v9958_v45, %s9465_s14  ;;  %1125 = vrot.lane.b32.xlu1 %v10072_v23, %s9465_s14 }
 0x1ab   :  { %1123 = vrot.lane.b32.xlu0 %v8959_v42, %s9465_s14  ;;  %v9005_v42 = vld [vmem:[%s15082_s0 + $0xb1] sm:$0xff] }
 0x1ac   :  { %v1062_v9 = vpop.permute.xlu2 %1061  ;;  %v784_v14 = vpop.permute.xlu1 %783 }
 0x1ad   :  { %1254 = vst.msk [vmem:[#allocation2] sm:$0xff] %vm1253_vm3, %v1062_v9  ;;  %v782_v63 = vpop.permute.xlu0 %781  ;;  %v9004_v9 = vld [vmem:[%s15082_s0 + $0xa9] sm:$0xff] }
 0x1ae   :  { %922 = vst.msk [vmem:[#allocation2 + $0x1b0] sm:$0xff] %vm867_vm2, %v784_v14 }
 0x1af   :  { %921 = vst.msk [vmem:[#allocation2 + $0x1a8] sm:$0xff] %vm867_vm2, %v782_v63 }
 0x1b2   :  { %1133 = vrot.lane.b32.xlu2 %v9994_v60, %s9465_s14  ;;  %1131 = vrot.lane.b32.xlu1 %v10105_v40, %s9465_s14 }
 0x1b3   :  { %1129 = vrot.lane.b32.xlu0 %v10117_v47, %s9465_s14 }
 0x1b4   :  { %v1068_v45 = vpop.permute.xlu2 %1067  ;;  %v790_v23 = vpop.permute.xlu1 %789 }
 0x1b5   :  { %1257 = vst.msk [vmem:[#allocation2 + $0x18] sm:$0xff] %vm1253_vm3, %v1068_v45  ;;  %v788_v19 = vpop.permute.xlu0 %787 }
 0x1b6   :  { %925 = vst.msk [vmem:[#allocation2 + $0x1c8] sm:$0xff] %vm867_vm2, %v790_v23  ;;  %v9009_v23 = vld [vmem:[%s15082_s0 + $0xe1] sm:$0xff] }
 0x1b7   :  { %924 = vst.msk [vmem:[#allocation2 + $0x1c0] sm:$0xff] %vm867_vm2, %v788_v19  ;;  %v9008_v19 = vld [vmem:[%s15082_s0 + $0xd9] sm:$0xff] }
 0x1ba   :  { %1139 = vrot.lane.b32.xlu2 %v10030_v8, %s9465_s14  ;;  %1137 = vrot.lane.b32.xlu1 %v10141_v62, %s9465_s14 }
 0x1bb   :  { %1135 = vrot.lane.b32.xlu0 %v10153_v4, %s9465_s14 }
 0x1bc   :  { %v1074_v60 = vpop.permute.xlu2 %1073  ;;  %v796_v40 = vpop.permute.xlu1 %795 }
 0x1bd   :  { %1260 = vst.msk [vmem:[#allocation2 + $0x30] sm:$0xff] %vm1253_vm3, %v1074_v60  ;;  %v794_v47 = vpop.permute.xlu0 %793  ;;  %v9007_v60 = vld [vmem:[%s15082_s0 + $0xc9] sm:$0xff] }
 0x1be   :  { %928 = vst.msk [vmem:[#allocation2 + $0x1e0] sm:$0xff] %vm867_vm2, %v796_v40 }
 0x1bf   :  { %927 = vst.msk [vmem:[#allocation2 + $0x1d8] sm:$0xff] %vm867_vm2, %v794_v47 }
 0x1c2   :  { %1145 = vrot.lane.b32.xlu2 %v10066_v22, %s9465_s14  ;;  %1143 = vrot.lane.b32.xlu1 %v10177_v17, %s9465_s14 }
 0x1c3   :  { %1141 = vrot.lane.b32.xlu0 %v10189_v26, %s9465_s14 }
 0x1c4   :  { %v1080_v8 = vpop.permute.xlu2 %1079  ;;  %v802_v62 = vpop.permute.xlu1 %801 }
 0x1c5   :  { %1263 = vst.msk [vmem:[#allocation2 + $0x48] sm:$0xff] %vm1253_vm3, %v1080_v8  ;;  %v800_v4 = vpop.permute.xlu0 %799 }
 0x1c6   :  { %931 = vst.msk [vmem:[#allocation2 + $0x1f8] sm:$0xff] %vm867_vm2, %v802_v62  ;;  %v9012_v62 = vld [vmem:[%s15082_s0 + $0x109] sm:$0xff] }
 0x1c7   :  { %930 = vst.msk [vmem:[#allocation2 + $0x1f0] sm:$0xff] %vm867_vm2, %v800_v4  ;;  %v9011_v4 = vld [vmem:[%s15082_s0 + $0xf9] sm:$0xff]  ;;  %vm6798_vm2 = vcmask 1046534  }
 0x1ca   :  { %1151 = vrot.lane.b32.xlu2 %v10099_v39, %s9465_s14  ;;  %1149 = vrot.lane.b32.xlu1 %v10213_v35, %s9465_s14 }
 0x1cb   :  { %1147 = vrot.lane.b32.xlu0 %v10225_v48, %s9465_s14 }
 0x1cc   :  { %v1086_v22 = vpop.permute.xlu2 %1085  ;;  %v1066_v17 = vpop.permute.xlu1 %1065 }
 0x1cd   :  { %1266 = vst.msk [vmem:[#allocation2 + $0x60] sm:$0xff] %vm1253_vm3, %v1086_v22  ;;  %v1064_v26 = vpop.permute.xlu0 %1063  ;;  %v9010_v22 = vld [vmem:[%s15082_s0 + $0xf1] sm:$0xff] }
 0x1ce   :  { %1256 = vst.msk [vmem:[#allocation2 + $0x10] sm:$0xff] %vm1253_vm3, %v1066_v17 }
 0x1cf   :  { %1255 = vst.msk [vmem:[#allocation2 + $0x8] sm:$0xff] %vm1253_vm3, %v1064_v26 }
 0x1d2   :  { %1157 = vrot.lane.b32.xlu2 %v10135_v56, %s9465_s14  ;;  %1155 = vrot.lane.b32.xlu1 %v10249_v5, %s9465_s14 }
 0x1d3   :  { %1153 = vrot.lane.b32.xlu0 %v10261_v13, %s9465_s14 }
 0x1d4   :  { %v1092_v39 = vpop.permute.xlu2 %1091  ;;  %v1072_v35 = vpop.permute.xlu1 %1071 }
 0x1d5   :  { %1269 = vst.msk [vmem:[#allocation2 + $0x78] sm:$0xff] %vm1253_vm3, %v1092_v39  ;;  %v1070_v48 = vpop.permute.xlu0 %1069 }
 0x1d6   :  { %1259 = vst.msk [vmem:[#allocation2 + $0x28] sm:$0xff] %vm1253_vm3, %v1072_v35  ;;  %v9015_v35 = vld [vmem:[%s15082_s0 + $0x129] sm:$0xff] }
 0x1d7   :  { %1258 = vst.msk [vmem:[#allocation2 + $0x20] sm:$0xff] %vm1253_vm3, %v1070_v48  ;;  %v9014_v48 = vld [vmem:[%s15082_s0 + $0x121] sm:$0xff] }
 0x1da   :  { %1163 = vrot.lane.b32.xlu2 %v10171_v16, %s9465_s14  ;;  %1161 = vrot.lane.b32.xlu1 %v10285_v31, %s9465_s14 }
 0x1db   :  { %1159 = vrot.lane.b32.xlu0 %v10297_v53, %s9465_s14 }
 0x1dc   :  { %v1098_v56 = vpop.permute.xlu2 %1097  ;;  %v1078_v5 = vpop.permute.xlu1 %1077 }
 0x1dd   :  { %1272 = vst.msk [vmem:[#allocation2 + $0x90] sm:$0xff] %vm1253_vm3, %v1098_v56  ;;  %v1076_v13 = vpop.permute.xlu0 %1075  ;;  %v9013_v56 = vld [vmem:[%s15082_s0 + $0x111] sm:$0xff] }
 0x1de   :  { %1262 = vst.msk [vmem:[#allocation2 + $0x40] sm:$0xff] %vm1253_vm3, %v1078_v5 }
 0x1df   :  { %1261 = vst.msk [vmem:[#allocation2 + $0x38] sm:$0xff] %vm1253_vm3, %v1076_v13 }
 0x1e2   :  { %1169 = vrot.lane.b32.xlu2 %v10207_v34, %s9465_s14  ;;  %1167 = vrot.lane.b32.xlu1 %v10315_v10, %s9465_s14  ;;  %v15104_v34 = vld [vmem:[#allocation9_spill] sm:$0xff] }
 0x1e3   :  { %1165 = vrot.lane.b32.xlu0 %v10321_v18, %s9465_s14 }
 0x1e4   :  { %v1104_v16 = vpop.permute.xlu2 %1103  ;;  %v1084_v31 = vpop.permute.xlu1 %1083 }
 0x1e5   :  { %1275 = vst.msk [vmem:[#allocation2 + $0xa8] sm:$0xff] %vm1253_vm3, %v1104_v16  ;;  %v1082_v53 = vpop.permute.xlu0 %1081 }
 0x1e6   :  { %1265 = vst.msk [vmem:[#allocation2 + $0x58] sm:$0xff] %vm1253_vm3, %v1084_v31  ;;  %v10891_v31 = vld [vmem:[%s15082_s0 + $0x151] sm:$0xff] }
 0x1e7   :  { %1264 = vst.msk [vmem:[#allocation2 + $0x50] sm:$0xff] %vm1253_vm3, %v1082_v53  ;;  %v9017_v53 = vld [vmem:[%s15082_s0 + $0x141] sm:$0xff] }
 0x1ea   :  { %1175 = vrot.lane.b32.xlu2 %v10243_v1, %s9465_s14  ;;  %1173 = vrot.lane.b32.xlu1 %v10344_v55, %s9465_s14 }
 0x1eb   :  { %1171 = vrot.lane.b32.xlu0 %v15104_v34, %s9465_s14  ;;  %v9016_v34 = vld [vmem:[%s15082_s0 + $0x139] sm:$0xff] }
 0x1ec   :  { %v1110_v10 = vpop.permute.xlu2 %1109  ;;  %v1090_v18 = vpop.permute.xlu1 %1089 }
 0x1ed   :  { %1278 = vst.msk [vmem:[#allocation2 + $0xc0] sm:$0xff] %vm1253_vm3, %v1110_v10  ;;  %v1088_v27 = vpop.permute.xlu0 %1087 }
 0x1ee   :  { %1268 = vst.msk [vmem:[#allocation2 + $0x70] sm:$0xff] %vm1253_vm3, %v1090_v18 }
 0x1ef   :  { %1267 = vst.msk [vmem:[#allocation2 + $0x68] sm:$0xff] %vm1253_vm3, %v1088_v27 }
 0x1f2   :  { %1181 = vrot.lane.b32.xlu2 %v15105_v38, %s9465_s14  ;;  %1179 = vrot.lane.b32.xlu1 %v10373_v54, %s9465_s14  ;;  %v8990_v54 = vld [vmem:[%s15082_s0 + $0x330] sm:$0xff] }
 0x1f3   :  { %1177 = vrot.lane.b32.xlu0 %v10379_v7, %s9465_s14  ;;  %v15106_v7 = vld [vmem:[#allocation10_spill] sm:$0xff] }
 0x1f4   :  { %v1116_v1 = vpop.permute.xlu2 %1115  ;;  %v1096_v55 = vpop.permute.xlu1 %1095  ;;  %v9021_v38 = vld [vmem:[%s15082_s0 + $0x171] sm:$0xff] }
 0x1f5   :  { %1281 = vst.msk [vmem:[#allocation2 + $0xd8] sm:$0xff] %vm1253_vm3, %v1116_v1  ;;  %v1094_v29 = vpop.permute.xlu0 %1093  ;;  %v9020_v1 = vld [vmem:[%s15082_s0 + $0x169] sm:$0xff] }
 0x1f6   :  { %1271 = vst.msk [vmem:[#allocation2 + $0x88] sm:$0xff] %vm1253_vm3, %v1096_v55  ;;  %v10915_v55 = vld [vmem:[%s15082_s0 + $0x159] sm:$0xff] }
 0x1f7   :  { %1270 = vst.msk [vmem:[#allocation2 + $0x80] sm:$0xff] %vm1253_vm3, %v1094_v29 }
 0x1fa   :  { %1187 = vrot.lane.b32.xlu2 %v8991_v30, %s9465_s14  ;;  %1185 = vrot.lane.b32.xlu1 %v8990_v54, %s9465_s14 }
 0x1fb   :  { %1183 = vrot.lane.b32.xlu0 %v15106_v7, %s9465_s14  ;;  %v9024_v7 = vld [vmem:[%s15082_s0 + $0x1c9] sm:$0xff] }
 0x1fc   :  { %v1122_v24 = vpop.permute.xlu2 %1121  ;;  %v1102_v28 = vpop.permute.xlu1 %1101 }
 0x1fd   :  { %1284 = vst.msk [vmem:[#allocation2 + $0xf0] sm:$0xff] %vm1253_vm3, %v1122_v24  ;;  %v1100_v44 = vpop.permute.xlu0 %1099  ;;  %v9023_v24 = vld [vmem:[%s15082_s0 + $0x189] sm:$0xff] }
 0x1fe   :  { %1274 = vst.msk [vmem:[#allocation2 + $0xa0] sm:$0xff] %vm1253_vm3, %v1102_v28  ;;  %v9022_v28 = vld [vmem:[%s15082_s0 + $0x181] sm:$0xff] }
 0x1ff   :  { %1273 = vst.msk [vmem:[#allocation2 + $0x98] sm:$0xff] %vm1253_vm3, %v1100_v44 }
 0x202   :  { %1450 = vrot.lane.b32.xlu2 %v8994_v32, %s9466_s28  ;;  %1448 = vrot.lane.b32.xlu1 %v8993_v51, %s9466_s28 }
 0x203   :  { %1446 = vrot.lane.b32.xlu0 %v8992_v52, %s9466_s28  ;;  %v9027_v52 = vld [vmem:[%s15082_s0 + $0x1e9] sm:$0xff] }
 0x204   :  { %v1128_v36 = vpop.permute.xlu2 %1127  ;;  %v1108_v58 = vpop.permute.xlu1 %1107 }
 0x205   :  { %1287 = vst.msk [vmem:[#allocation2 + $0x108] sm:$0xff] %vm1253_vm3, %v1128_v36  ;;  %v1106_v59 = vpop.permute.xlu0 %1105  ;;  %v9026_v36 = vld [vmem:[%s15082_s0 + $0x1e1] sm:$0xff] }
 0x206   :  { %1277 = vst.msk [vmem:[#allocation2 + $0xb8] sm:$0xff] %vm1253_vm3, %v1108_v58  ;;  %v9025_v58 = vld [vmem:[%s15082_s0 + $0x1d1] sm:$0xff] }
 0x207   :  { %1276 = vst.msk [vmem:[#allocation2 + $0xb0] sm:$0xff] %vm1253_vm3, %v1106_v59 }
 0x20a   :  { %1456 = vrot.lane.b32.xlu2 %v8997_v43, %s9466_s28  ;;  %1454 = vrot.lane.b32.xlu1 %v8996_v3, %s9466_s28 }
 0x20b   :  { %1452 = vrot.lane.b32.xlu0 %v8995_v6, %s9466_s28  ;;  %v9030_v6 = vld [vmem:[%s15082_s0 + $0x211] sm:$0xff] }
 0x20c   :  { %v1134_v50 = vpop.permute.xlu2 %1133  ;;  %v1114_v12 = vpop.permute.xlu1 %1113 }
 0x20d   :  { %1290 = vst.msk [vmem:[#allocation2 + $0x120] sm:$0xff] %vm1253_vm3, %v1134_v50  ;;  %v1112_v15 = vpop.permute.xlu0 %1111  ;;  %v9029_v50 = vld [vmem:[%s15082_s0 + $0x201] sm:$0xff] }
 0x20e   :  { %1280 = vst.msk [vmem:[#allocation2 + $0xd0] sm:$0xff] %vm1253_vm3, %v1114_v12  ;;  %v9028_v12 = vld [vmem:[%s15082_s0 + $0x1f9] sm:$0xff] }
 0x20f   :  { %1279 = vst.msk [vmem:[#allocation2 + $0xc8] sm:$0xff] %vm1253_vm3, %v1112_v15 }
 0x212   :  { %1462 = vrot.lane.b32.xlu2 %v9000_v57, %s9466_s28  ;;  %1460 = vrot.lane.b32.xlu1 %v8999_v21, %s9466_s28 }
 0x213   :  { %1458 = vrot.lane.b32.xlu0 %v8998_v25, %s9466_s28  ;;  %v9033_v25 = vld [vmem:[%s15082_s0 + $0x231] sm:$0xff] }
 0x214   :  { %v1140_v2 = vpop.permute.xlu2 %1139  ;;  %v1120_v33 = vpop.permute.xlu1 %1119 }
 0x215   :  { %1293 = vst.msk [vmem:[#allocation2 + $0x138] sm:$0xff] %vm1253_vm3, %v1140_v2  ;;  %v1118_v37 = vpop.permute.xlu0 %1117  ;;  %v9032_v2 = vld [vmem:[%s15082_s0 + $0x229] sm:$0xff] }
 0x216   :  { %1283 = vst.msk [vmem:[#allocation2 + $0xe8] sm:$0xff] %vm1253_vm3, %v1120_v33  ;;  %v9031_v33 = vld [vmem:[%s15082_s0 + $0x219] sm:$0xff] }
 0x217   :  { %1282 = vst.msk [vmem:[#allocation2 + $0xe0] sm:$0xff] %vm1253_vm3, %v1118_v37 }
 0x21a   :  { %1468 = vrot.lane.b32.xlu2 %v9003_v11, %s9466_s28  ;;  %1466 = vrot.lane.b32.xlu1 %v9002_v46, %s9466_s28 }
 0x21b   :  { %1464 = vrot.lane.b32.xlu0 %v9001_v49, %s9466_s28  ;;  %v9036_v49 = vld [vmem:[%s15082_s0 + $0x259] sm:$0xff] }
 0x21c   :  { %v1146_v41 = vpop.permute.xlu2 %1145  ;;  %v1126_v20 = vpop.permute.xlu1 %1125 }
 0x21d   :  { %1296 = vst.msk [vmem:[#allocation2 + $0x150] sm:$0xff] %vm1253_vm3, %v1146_v41  ;;  %v1124_v61 = vpop.permute.xlu0 %1123  ;;  %v9035_v41 = vld [vmem:[%s15082_s0 + $0x249] sm:$0xff] }
 0x21e   :  { %1286 = vst.msk [vmem:[#allocation2 + $0x100] sm:$0xff] %vm1253_vm3, %v1126_v20  ;;  %v9034_v20 = vld [vmem:[%s15082_s0 + $0x241] sm:$0xff] }
 0x21f   :  { %1285 = vst.msk [vmem:[#allocation2 + $0xf8] sm:$0xff] %vm1253_vm3, %v1124_v61 }
 0x222   :  { %1474 = vrot.lane.b32.xlu2 %v9006_v0, %s9466_s28  ;;  %1472 = vrot.lane.b32.xlu1 %v9005_v42, %s9466_s28 }
 0x223   :  { %1470 = vrot.lane.b32.xlu0 %v9004_v9, %s9466_s28  ;;  %v9039_v9 = vld [vmem:[%s15082_s0 + $0x279] sm:$0xff] }
 0x224   :  { %v1152_v14 = vpop.permute.xlu2 %1151  ;;  %v1132_v63 = vpop.permute.xlu1 %1131 }
 0x225   :  { %1299 = vst.msk [vmem:[#allocation2 + $0x168] sm:$0xff] %vm1253_vm3, %v1152_v14  ;;  %v1130_v45 = vpop.permute.xlu0 %1129  ;;  %v9038_v14 = vld [vmem:[%s15082_s0 + $0x271] sm:$0xff] }
 0x226   :  { %1289 = vst.msk [vmem:[#allocation2 + $0x118] sm:$0xff] %vm1253_vm3, %v1132_v63  ;;  %v9037_v63 = vld [vmem:[%s15082_s0 + $0x261] sm:$0xff] }
 0x227   :  { %1288 = vst.msk [vmem:[#allocation2 + $0x110] sm:$0xff] %vm1253_vm3, %v1130_v45 }
 0x22a   :  { %1480 = vrot.lane.b32.xlu2 %v9009_v23, %s9466_s28  ;;  %1478 = vrot.lane.b32.xlu1 %v9008_v19, %s9466_s28 }
 0x22b   :  { %1476 = vrot.lane.b32.xlu0 %v9007_v60, %s9466_s28  ;;  %v9042_v60 = vld [vmem:[%s15082_s0 + $0x2a1] sm:$0xff] }
 0x22c   :  { %v1158_v40 = vpop.permute.xlu2 %1157  ;;  %v1138_v47 = vpop.permute.xlu1 %1137 }
 0x22d   :  { %1302 = vst.msk [vmem:[#allocation2 + $0x180] sm:$0xff] %vm1253_vm3, %v1158_v40  ;;  %v1136_v8 = vpop.permute.xlu0 %1135  ;;  %v9041_v40 = vld [vmem:[%s15082_s0 + $0x291] sm:$0xff] }
 0x22e   :  { %1292 = vst.msk [vmem:[#allocation2 + $0x130] sm:$0xff] %vm1253_vm3, %v1138_v47  ;;  %v9040_v47 = vld [vmem:[%s15082_s0 + $0x289] sm:$0xff] }
 0x22f   :  { %1291 = vst.msk [vmem:[#allocation2 + $0x128] sm:$0xff] %vm1253_vm3, %v1136_v8 }
 0x232   :  { %1486 = vrot.lane.b32.xlu2 %v9012_v62, %s9466_s28  ;;  %1484 = vrot.lane.b32.xlu1 %v9011_v4, %s9466_s28 }
 0x233   :  { %1482 = vrot.lane.b32.xlu0 %v9010_v22, %s9466_s28  ;;  %v9045_v22 = vld [vmem:[%s15082_s0 + $0x2c1] sm:$0xff] }
 0x234   :  { %v1164_v17 = vpop.permute.xlu2 %1163  ;;  %v1144_v26 = vpop.permute.xlu1 %1143 }
 0x235   :  { %1305 = vst.msk [vmem:[#allocation2 + $0x198] sm:$0xff] %vm1253_vm3, %v1164_v17  ;;  %v1142_v39 = vpop.permute.xlu0 %1141  ;;  %v9044_v17 = vld [vmem:[%s15082_s0 + $0x2b9] sm:$0xff] }
 0x236   :  { %1295 = vst.msk [vmem:[#allocation2 + $0x148] sm:$0xff] %vm1253_vm3, %v1144_v26  ;;  %v9043_v26 = vld [vmem:[%s15082_s0 + $0x2a9] sm:$0xff] }
 0x237   :  { %1294 = vst.msk [vmem:[#allocation2 + $0x140] sm:$0xff] %vm1253_vm3, %v1142_v39 }
 0x23a   :  { %1492 = vrot.lane.b32.xlu2 %v9015_v35, %s9466_s28  ;;  %1490 = vrot.lane.b32.xlu1 %v9014_v48, %s9466_s28 }
 0x23b   :  { %1488 = vrot.lane.b32.xlu0 %v9013_v56, %s9466_s28  ;;  %v9048_v56 = vld [vmem:[%s15082_s0 + $0x2e9] sm:$0xff] }
 0x23c   :  { %v1170_v5 = vpop.permute.xlu2 %1169  ;;  %v1150_v13 = vpop.permute.xlu1 %1149 }
 0x23d   :  { %1308 = vst.msk [vmem:[#allocation2 + $0x1b0] sm:$0xff] %vm1253_vm3, %v1170_v5  ;;  %v1148_v16 = vpop.permute.xlu0 %1147  ;;  %v9047_v5 = vld [vmem:[%s15082_s0 + $0x2d9] sm:$0xff] }
 0x23e   :  { %1298 = vst.msk [vmem:[#allocation2 + $0x160] sm:$0xff] %vm1253_vm3, %v1150_v13  ;;  %v9046_v13 = vld [vmem:[%s15082_s0 + $0x2d1] sm:$0xff] }
 0x23f   :  { %1297 = vst.msk [vmem:[#allocation2 + $0x158] sm:$0xff] %vm1253_vm3, %v1148_v16 }
 0x242   :  { %1498 = vrot.lane.b32.xlu2 %v10891_v31, %s9466_s28  ;;  %1496 = vrot.lane.b32.xlu1 %v9017_v53, %s9466_s28 }
 0x243   :  { %1494 = vrot.lane.b32.xlu0 %v9016_v34, %s9466_s28 }
 0x244   :  { %v1176_v10 = vpop.permute.xlu2 %1175  ;;  %v1156_v18 = vpop.permute.xlu1 %1155 }
 0x245   :  { %1311 = vst.msk [vmem:[#allocation2 + $0x1c8] sm:$0xff] %vm1253_vm3, %v1176_v10  ;;  %v1154_v27 = vpop.permute.xlu0 %1153  ;;  %v9051_v10 = vld [vmem:[%s15082_s0 + $0x309] sm:$0xff] }
 0x246   :  { %1301 = vst.msk [vmem:[#allocation2 + $0x178] sm:$0xff] %vm1253_vm3, %v1156_v18  ;;  %v9050_v18 = vld [vmem:[%s15082_s0 + $0x301] sm:$0xff] }
 0x247   :  { %1300 = vst.msk [vmem:[#allocation2 + $0x170] sm:$0xff] %vm1253_vm3, %v1154_v27  ;;  %v9049_v27 = vld [vmem:[%s15082_s0 + $0x2f1] sm:$0xff] }
 0x24a   :  { %1504 = vrot.lane.b32.xlu2 %v9021_v38, %s9466_s28  ;;  %1502 = vrot.lane.b32.xlu1 %v9020_v1, %s9466_s28 }
 0x24b   :  { %1500 = vrot.lane.b32.xlu0 %v10915_v55, %s9466_s28 }
 0x24c   :  { %v1182_v29 = vpop.permute.xlu2 %1181  ;;  %v1162_v30 = vpop.permute.xlu1 %1161 }
 0x24d   :  { %1314 = vst.msk [vmem:[#allocation2 + $0x1e0] sm:$0xff] %vm1253_vm3, %v1182_v29  ;;  %v1160_v54 = vpop.permute.xlu0 %1159 }
 0x24e   :  { %1304 = vst.msk [vmem:[#allocation2 + $0x190] sm:$0xff] %vm1253_vm3, %v1162_v30  ;;  %v9054_v30 = vld [vmem:[%s15082_s0 + $0x331] sm:$0xff] }
 0x24f   :  { %1303 = vst.msk [vmem:[#allocation2 + $0x188] sm:$0xff] %vm1253_vm3, %v1160_v54  ;;  %v9053_v54 = vld [vmem:[%s15082_s0 + $0x321] sm:$0xff] }
 0x252   :  { %1510 = vrot.lane.b32.xlu2 %v9024_v7, %s9466_s28  ;;  %1508 = vrot.lane.b32.xlu1 %v9023_v24, %s9466_s28  ;;  %v9052_v7 = vld [vmem:[%s15082_s0 + $0x319] sm:$0xff] }
 0x253   :  { %1506 = vrot.lane.b32.xlu0 %v9022_v28, %s9466_s28 }
 0x254   :  { %v1188_v44 = vpop.permute.xlu2 %1187  ;;  %v1168_v32 = vpop.permute.xlu1 %1167 }
 0x255   :  { %1317 = vst.msk [vmem:[#allocation2 + $0x1f8] sm:$0xff] %vm1253_vm3, %v1188_v44  ;;  %v1166_v51 = vpop.permute.xlu0 %1165 }
 0x256   :  { %1307 = vst.msk [vmem:[#allocation2 + $0x1a8] sm:$0xff] %vm1253_vm3, %v1168_v32  ;;  %v9057_v32 = vld [vmem:[%s15082_s0 + $0x22] sm:$0xff] }
 0x257   :  { %1306 = vst.msk [vmem:[#allocation2 + $0x1a0] sm:$0xff] %vm1253_vm3, %v1166_v51  ;;  %v9056_v51 = vld [vmem:[%s15082_s0 + $0x1a] sm:$0xff] }
 0x25a   :  { %1516 = vrot.lane.b32.xlu2 %v9027_v52, %s9466_s28  ;;  %1514 = vrot.lane.b32.xlu1 %v9026_v36, %s9466_s28  ;;  %v9055_v52 = vld [vmem:[%s15082_s0 + $0x339] sm:$0xff] }
 0x25b   :  { %1512 = vrot.lane.b32.xlu0 %v9025_v58, %s9466_s28 }
 0x25c   :  { %v1451_v59 = vpop.permute.xlu2 %1450  ;;  %v1174_v43 = vpop.permute.xlu1 %1173 }
 0x25d   :  { %1641 = vst.msk [vmem:[#allocation2 + $0x10] sm:$0xff] %vm1638_vm4, %v1451_v59  ;;  %v1172_v3 = vpop.permute.xlu0 %1171 }
 0x25e   :  { %1310 = vst.msk [vmem:[#allocation2 + $0x1c0] sm:$0xff] %vm1253_vm3, %v1174_v43  ;;  %v11107_v43 = vld [vmem:[%s15082_s0 + $0x4a] sm:$0xff] }
 0x25f   :  { %1309 = vst.msk [vmem:[#allocation2 + $0x1b8] sm:$0xff] %vm1253_vm3, %v1172_v3  ;;  %v11112_v3 = vld [vmem:[%s15082_s0 + $0x3a] sm:$0xff] }
 0x262   :  { %1522 = vrot.lane.b32.xlu2 %v9030_v6, %s9466_s28  ;;  %1520 = vrot.lane.b32.xlu1 %v9029_v50, %s9466_s28  ;;  %v11117_v6 = vld [vmem:[%s15082_s0 + $0x32] sm:$0xff] }
 0x263   :  { %1518 = vrot.lane.b32.xlu0 %v9028_v12, %s9466_s28 }
 0x264   :  { %v1457_v15 = vpop.permute.xlu2 %1456  ;;  %v1180_v57 = vpop.permute.xlu1 %1179 }
 0x265   :  { %1644 = vst.msk [vmem:[#allocation2 + $0x28] sm:$0xff] %vm1638_vm4, %v1457_v15  ;;  %v1178_v21 = vpop.permute.xlu0 %1177 }
 0x266   :  { %1313 = vst.msk [vmem:[#allocation2 + $0x1d8] sm:$0xff] %vm1253_vm3, %v1180_v57  ;;  %v11131_v57 = vld [vmem:[%s15082_s0 + $0x6a] sm:$0xff] }
 0x267   :  { %1312 = vst.msk [vmem:[#allocation2 + $0x1d0] sm:$0xff] %vm1253_vm3, %v1178_v21  ;;  %v11136_v21 = vld [vmem:[%s15082_s0 + $0x62] sm:$0xff] }
 0x26a   :  { %1528 = vrot.lane.b32.xlu2 %v9033_v25, %s9466_s28  ;;  %1526 = vrot.lane.b32.xlu1 %v9032_v2, %s9466_s28  ;;  %v11141_v25 = vld [vmem:[%s15082_s0 + $0x52] sm:$0xff] }
 0x26b   :  { %1524 = vrot.lane.b32.xlu0 %v9031_v33, %s9466_s28 }
 0x26c   :  { %v1463_v37 = vpop.permute.xlu2 %1462  ;;  %v1186_v11 = vpop.permute.xlu1 %1185 }
 0x26d   :  { %1647 = vst.msk [vmem:[#allocation2 + $0x40] sm:$0xff] %vm1638_vm4, %v1463_v37  ;;  %v1184_v46 = vpop.permute.xlu0 %1183 }
 0x26e   :  { %1316 = vst.msk [vmem:[#allocation2 + $0x1f0] sm:$0xff] %vm1253_vm3, %v1186_v11  ;;  %v11155_v11 = vld [vmem:[%s15082_s0 + $0x92] sm:$0xff] }
 0x26f   :  { %1315 = vst.msk [vmem:[#allocation2 + $0x1e8] sm:$0xff] %vm1253_vm3, %v1184_v46  ;;  %v11160_v46 = vld [vmem:[%s15082_s0 + $0x82] sm:$0xff]  ;;  %vm15100_vm3 = vcmask 1047559  }
 0x272   :  { %1534 = vrot.lane.b32.xlu2 %v9036_v49, %s9466_s28  ;;  %1532 = vrot.lane.b32.xlu1 %v9035_v41, %s9466_s28  ;;  %v11165_v49 = vld [vmem:[%s15082_s0 + $0x7a] sm:$0xff] }
 0x273   :  { %1530 = vrot.lane.b32.xlu0 %v9034_v20, %s9466_s28 }
 0x274   :  { %v1469_v61 = vpop.permute.xlu2 %1468  ;;  %v1449_v0 = vpop.permute.xlu1 %1448 }
 0x275   :  { %1650 = vst.msk [vmem:[#allocation2 + $0x58] sm:$0xff] %vm1638_vm4, %v1469_v61  ;;  %v1447_v42 = vpop.permute.xlu0 %1446 }
 0x276   :  { %1640 = vst.msk [vmem:[#allocation2 + $0x8] sm:$0xff] %vm1638_vm4, %v1449_v0  ;;  %v11179_v0 = vld [vmem:[%s15082_s0 + $0xb2] sm:$0xff] }
 0x277   :  { %1639 = vst.msk [vmem:[#allocation2] sm:$0xff] %vm1638_vm4, %v1447_v42  ;;  %v11184_v42 = vld [vmem:[%s15082_s0 + $0xaa] sm:$0xff] }
 0x27a   :  { %1540 = vrot.lane.b32.xlu2 %v9039_v9, %s9466_s28  ;;  %1538 = vrot.lane.b32.xlu1 %v9038_v14, %s9466_s28  ;;  %v11189_v9 = vld [vmem:[%s15082_s0 + $0x9a] sm:$0xff] }
 0x27b   :  { %1536 = vrot.lane.b32.xlu0 %v9037_v63, %s9466_s28 }
 0x27c   :  { %v1475_v45 = vpop.permute.xlu2 %1474  ;;  %v1455_v23 = vpop.permute.xlu1 %1454 }
 0x27d   :  { %1653 = vst.msk [vmem:[#allocation2 + $0x70] sm:$0xff] %vm1638_vm4, %v1475_v45  ;;  %v1453_v19 = vpop.permute.xlu0 %1452 }
 0x27e   :  { %1643 = vst.msk [vmem:[#allocation2 + $0x20] sm:$0xff] %vm1638_vm4, %v1455_v23  ;;  %v9072_v23 = vld [vmem:[%s15082_s0 + $0xda] sm:$0xff] }
 0x27f   :  { %1642 = vst.msk [vmem:[#allocation2 + $0x18] sm:$0xff] %vm1638_vm4, %v1453_v19  ;;  %v9071_v19 = vld [vmem:[%s15082_s0 + $0xca] sm:$0xff] }
 0x282   :  { %1546 = vrot.lane.b32.xlu2 %v9042_v60, %s9466_s28  ;;  %1544 = vrot.lane.b32.xlu1 %v9041_v40, %s9466_s28  ;;  %v11209_v60 = vld [vmem:[%s15082_s0 + $0xc2] sm:$0xff] }
 0x283   :  { %1542 = vrot.lane.b32.xlu0 %v9040_v47, %s9466_s28 }
 0x284   :  { %v1481_v8 = vpop.permute.xlu2 %1480  ;;  %v1461_v62 = vpop.permute.xlu1 %1460 }
 0x285   :  { %1656 = vst.msk [vmem:[#allocation2 + $0x88] sm:$0xff] %vm1638_vm4, %v1481_v8  ;;  %v1459_v4 = vpop.permute.xlu0 %1458 }
 0x286   :  { %1646 = vst.msk [vmem:[#allocation2 + $0x38] sm:$0xff] %vm1638_vm4, %v1461_v62  ;;  %v9075_v62 = vld [vmem:[%s15082_s0 + $0xfa] sm:$0xff] }
 0x287   :  { %1645 = vst.msk [vmem:[#allocation2 + $0x30] sm:$0xff] %vm1638_vm4, %v1459_v4  ;;  %v9074_v4 = vld [vmem:[%s15082_s0 + $0xf2] sm:$0xff] }
 0x28a   :  { %1552 = vrot.lane.b32.xlu2 %v9045_v22, %s9466_s28  ;;  %1550 = vrot.lane.b32.xlu1 %v9044_v17, %s9466_s28  ;;  %v9073_v22 = vld [vmem:[%s15082_s0 + $0xe2] sm:$0xff] }
 0x28b   :  { %1548 = vrot.lane.b32.xlu0 %v9043_v26, %s9466_s28 }
 0x28c   :  { %v1487_v39 = vpop.permute.xlu2 %1486  ;;  %v1467_v35 = vpop.permute.xlu1 %1466 }
 0x28d   :  { %1659 = vst.msk [vmem:[#allocation2 + $0xa0] sm:$0xff] %vm1638_vm4, %v1487_v39  ;;  %v1465_v48 = vpop.permute.xlu0 %1464 }
 0x28e   :  { %1649 = vst.msk [vmem:[#allocation2 + $0x50] sm:$0xff] %vm1638_vm4, %v1467_v35  ;;  %v9078_v35 = vld [vmem:[%s15082_s0 + $0x122] sm:$0xff] }
 0x28f   :  { %1648 = vst.msk [vmem:[#allocation2 + $0x48] sm:$0xff] %vm1638_vm4, %v1465_v48  ;;  %v9077_v48 = vld [vmem:[%s15082_s0 + $0x112] sm:$0xff] }
 0x292   :  { %1558 = vrot.lane.b32.xlu2 %v9048_v56, %s9466_s28  ;;  %1556 = vrot.lane.b32.xlu1 %v9047_v5, %s9466_s28  ;;  %v9076_v56 = vld [vmem:[%s15082_s0 + $0x10a] sm:$0xff] }
 0x293   :  { %1554 = vrot.lane.b32.xlu0 %v9046_v13, %s9466_s28 }
 0x294   :  { %v1493_v16 = vpop.permute.xlu2 %1492  ;;  %v1473_v53 = vpop.permute.xlu1 %1472 }
 0x295   :  { %1662 = vst.msk [vmem:[#allocation2 + $0xb8] sm:$0xff] %vm1638_vm4, %v1493_v16  ;;  %v1471_v34 = vpop.permute.xlu0 %1470 }
 0x296   :  { %1652 = vst.msk [vmem:[#allocation2 + $0x68] sm:$0xff] %vm1638_vm4, %v1473_v53  ;;  %v9081_v53 = vld [vmem:[%s15082_s0 + $0x142] sm:$0xff] }
 0x297   :  { %1651 = vst.msk [vmem:[#allocation2 + $0x60] sm:$0xff] %vm1638_vm4, %v1471_v34  ;;  %v9080_v34 = vld [vmem:[%s15082_s0 + $0x13a] sm:$0xff] }
 0x29a   :  { %1564 = vrot.lane.b32.xlu2 %v9051_v10, %s9466_s28  ;;  %1562 = vrot.lane.b32.xlu1 %v9050_v18, %s9466_s28  ;;  %v9079_v10 = vld [vmem:[%s15082_s0 + $0x12a] sm:$0xff] }
 0x29b   :  { %1560 = vrot.lane.b32.xlu0 %v9049_v27, %s9466_s28 }
 0x29c   :  { %v1499_v38 = vpop.permute.xlu2 %1498  ;;  %v1479_v1 = vpop.permute.xlu1 %1478 }
 0x29d   :  { %1665 = vst.msk [vmem:[#allocation2 + $0xd0] sm:$0xff] %vm1638_vm4, %v1499_v38  ;;  %v1477_v29 = vpop.permute.xlu0 %1476 }
 0x29e   :  { %1655 = vst.msk [vmem:[#allocation2 + $0x80] sm:$0xff] %vm1638_vm4, %v1479_v1  ;;  %v11266_v1 = vld [vmem:[%s15082_s0 + $0x16a] sm:$0xff] }
 0x29f   :  { %1654 = vst.msk [vmem:[#allocation2 + $0x78] sm:$0xff] %vm1638_vm4, %v1477_v29  ;;  %v11271_v29 = vld [vmem:[%s15082_s0 + $0x15a] sm:$0xff] }
 0x2a2   :  { %1570 = vrot.lane.b32.xlu2 %v9054_v30, %s9466_s28  ;;  %1568 = vrot.lane.b32.xlu1 %v9053_v54, %s9466_s28  ;;  %v11276_v30 = vld [vmem:[%s15082_s0 + $0x152] sm:$0xff] }
 0x2a3   :  { %1566 = vrot.lane.b32.xlu0 %v9052_v7, %s9466_s28 }
 0x2a4   :  { %v1505_v24 = vpop.permute.xlu2 %1504  ;;  %v1485_v28 = vpop.permute.xlu1 %1484 }
 0x2a5   :  { %1668 = vst.msk [vmem:[#allocation2 + $0xe8] sm:$0xff] %vm1638_vm4, %v1505_v24  ;;  %v1483_v44 = vpop.permute.xlu0 %1482 }
 0x2a6   :  { %1658 = vst.msk [vmem:[#allocation2 + $0x98] sm:$0xff] %vm1638_vm4, %v1485_v28  ;;  %v11290_v28 = vld [vmem:[%s15082_s0 + $0x18a] sm:$0xff] }
 0x2a7   :  { %1657 = vst.msk [vmem:[#allocation2 + $0x90] sm:$0xff] %vm1638_vm4, %v1483_v44  ;;  %v11295_v44 = vld [vmem:[%s15082_s0 + $0x182] sm:$0xff] }
 0x2aa   :  { %1833 = vrot.lane.b32.xlu2 %v9057_v32, %s9467_s13  ;;  %1831 = vrot.lane.b32.xlu1 %v9056_v51, %s9467_s13  ;;  %v11300_v32 = vld [vmem:[%s15082_s0 + $0x172] sm:$0xff] }
 0x2ab   :  { %1572 = vrot.lane.b32.xlu0 %v9055_v52, %s9466_s28 }
 0x2ac   :  { %v1511_v36 = vpop.permute.xlu2 %1510  ;;  %v1491_v58 = vpop.permute.xlu1 %1490 }
 0x2ad   :  { %1671 = vst.msk [vmem:[#allocation2 + $0x100] sm:$0xff] %vm1638_vm4, %v1511_v36  ;;  %v1489_v59 = vpop.permute.xlu0 %1488 }
 0x2ae   :  { %1661 = vst.msk [vmem:[#allocation2 + $0xb0] sm:$0xff] %vm1638_vm4, %v1491_v58  ;;  %v11314_v58 = vld [vmem:[%s15082_s0 + $0x1e2] sm:$0xff] }
 0x2af   :  { %1660 = vst.msk [vmem:[#allocation2 + $0xa8] sm:$0xff] %vm1638_vm4, %v1489_v59  ;;  %v9089_v59 = vld [vmem:[%s15082_s0 + $0x1d2] sm:$0xff] }
 0x2b2   :  { %1839 = vrot.lane.b32.xlu2 %v11107_v43, %s9467_s13  ;;  %1837 = vrot.lane.b32.xlu1 %v11112_v3, %s9467_s13 }
 0x2b3   :  { %1835 = vrot.lane.b32.xlu0 %v11117_v6, %s9467_s13 }
 0x2b4   :  { %v1517_v50 = vpop.permute.xlu2 %1516  ;;  %v1497_v12 = vpop.permute.xlu1 %1496 }
 0x2b5   :  { %1674 = vst.msk [vmem:[#allocation2 + $0x118] sm:$0xff] %vm1638_vm4, %v1517_v50  ;;  %v1495_v15 = vpop.permute.xlu0 %1494  ;;  %v9088_v50 = vld [vmem:[%s15082_s0 + $0x1ca] sm:$0xff] }
 0x2b6   :  { %1664 = vst.msk [vmem:[#allocation2 + $0xc8] sm:$0xff] %vm1638_vm4, %v1497_v12 }
 0x2b7   :  { %1663 = vst.msk [vmem:[#allocation2 + $0xc0] sm:$0xff] %vm1638_vm4, %v1495_v15 }
 0x2ba   :  { %1845 = vrot.lane.b32.xlu2 %v11131_v57, %s9467_s13  ;;  %1843 = vrot.lane.b32.xlu1 %v11136_v21, %s9467_s13 }
 0x2bb   :  { %1841 = vrot.lane.b32.xlu0 %v11141_v25, %s9467_s13 }
 0x2bc   :  { %v1523_v2 = vpop.permute.xlu2 %1522  ;;  %v1503_v33 = vpop.permute.xlu1 %1502 }
 0x2bd   :  { %1677 = vst.msk [vmem:[#allocation2 + $0x130] sm:$0xff] %vm1638_vm4, %v1523_v2  ;;  %v1501_v37 = vpop.permute.xlu0 %1500 }
 0x2be   :  { %1667 = vst.msk [vmem:[#allocation2 + $0xe0] sm:$0xff] %vm1638_vm4, %v1503_v33  ;;  %v9093_v33 = vld [vmem:[%s15082_s0 + $0x202] sm:$0xff] }
 0x2bf   :  { %1666 = vst.msk [vmem:[#allocation2 + $0xd8] sm:$0xff] %vm1638_vm4, %v1501_v37  ;;  %v9092_v37 = vld [vmem:[%s15082_s0 + $0x1fa] sm:$0xff] }
 0x2c2   :  { %1851 = vrot.lane.b32.xlu2 %v11155_v11, %s9467_s13  ;;  %1849 = vrot.lane.b32.xlu1 %v11160_v46, %s9467_s13 }
 0x2c3   :  { %1847 = vrot.lane.b32.xlu0 %v11165_v49, %s9467_s13 }
 0x2c4   :  { %v1529_v41 = vpop.permute.xlu2 %1528  ;;  %v1509_v20 = vpop.permute.xlu1 %1508 }
 0x2c5   :  { %1680 = vst.msk [vmem:[#allocation2 + $0x148] sm:$0xff] %vm1638_vm4, %v1529_v41  ;;  %v1507_v61 = vpop.permute.xlu0 %1506  ;;  %v11338_v41 = vld [vmem:[%s15082_s0 + $0x1ea] sm:$0xff] }
 0x2c6   :  { %1670 = vst.msk [vmem:[#allocation2 + $0xf8] sm:$0xff] %vm1638_vm4, %v1509_v20 }
 0x2c7   :  { %1669 = vst.msk [vmem:[#allocation2 + $0xf0] sm:$0xff] %vm1638_vm4, %v1507_v61 }
 0x2ca   :  { %1857 = vrot.lane.b32.xlu2 %v11179_v0, %s9467_s13  ;;  %1855 = vrot.lane.b32.xlu1 %v11184_v42, %s9467_s13 }
 0x2cb   :  { %1853 = vrot.lane.b32.xlu0 %v11189_v9, %s9467_s13 }
 0x2cc   :  { %v1535_v14 = vpop.permute.xlu2 %1534  ;;  %v1515_v63 = vpop.permute.xlu1 %1514 }
 0x2cd   :  { %1683 = vst.msk [vmem:[#allocation2 + $0x160] sm:$0xff] %vm1638_vm4, %v1535_v14  ;;  %v1513_v45 = vpop.permute.xlu0 %1512 }
 0x2ce   :  { %1673 = vst.msk [vmem:[#allocation2 + $0x110] sm:$0xff] %vm1638_vm4, %v1515_v63  ;;  %v9096_v63 = vld [vmem:[%s15082_s0 + $0x22a] sm:$0xff] }
 0x2cf   :  { %1672 = vst.msk [vmem:[#allocation2 + $0x108] sm:$0xff] %vm1638_vm4, %v1513_v45  ;;  %v9095_v45 = vld [vmem:[%s15082_s0 + $0x21a] sm:$0xff] }
 0x2d2   :  { %1863 = vrot.lane.b32.xlu2 %v9072_v23, %s9467_s13  ;;  %1861 = vrot.lane.b32.xlu1 %v9071_v19, %s9467_s13  ;;  %v9094_v23 = vld [vmem:[%s15082_s0 + $0x212] sm:$0xff] }
 0x2d3   :  { %1859 = vrot.lane.b32.xlu0 %v11209_v60, %s9467_s13 }
 0x2d4   :  { %v1541_v40 = vpop.permute.xlu2 %1540  ;;  %v1521_v47 = vpop.permute.xlu1 %1520 }
 0x2d5   :  { %1686 = vst.msk [vmem:[#allocation2 + $0x178] sm:$0xff] %vm1638_vm4, %v1541_v40  ;;  %v1519_v8 = vpop.permute.xlu0 %1518 }
 0x2d6   :  { %1676 = vst.msk [vmem:[#allocation2 + $0x128] sm:$0xff] %vm1638_vm4, %v1521_v47 }
 0x2d7   :  { %1675 = vst.msk [vmem:[#allocation2 + $0x120] sm:$0xff] %vm1638_vm4, %v1519_v8  ;;  %v9099_v8 = vld [vmem:[%s15082_s0 + $0x24a] sm:$0xff] }
 0x2da   :  { %1869 = vrot.lane.b32.xlu2 %v9075_v62, %s9467_s13  ;;  %1867 = vrot.lane.b32.xlu1 %v9074_v4, %s9467_s13  ;;  %v9098_v62 = vld [vmem:[%s15082_s0 + $0x242] sm:$0xff]  ;;  %v9097_v4 = vld [vmem:[%s15082_s0 + $0x232] sm:$0xff] }
 0x2db   :  { %1865 = vrot.lane.b32.xlu0 %v9073_v22, %s9467_s13 }
 0x2dc   :  { %v1547_v17 = vpop.permute.xlu2 %1546  ;;  %v1527_v26 = vpop.permute.xlu1 %1526 }
 0x2dd   :  { %1689 = vst.msk [vmem:[#allocation2 + $0x190] sm:$0xff] %vm1638_vm4, %v1547_v17  ;;  %v1525_v39 = vpop.permute.xlu0 %1524 }
 0x2de   :  { %1679 = vst.msk [vmem:[#allocation2 + $0x140] sm:$0xff] %vm1638_vm4, %v1527_v26 }
 0x2df   :  { %1678 = vst.msk [vmem:[#allocation2 + $0x138] sm:$0xff] %vm1638_vm4, %v1525_v39  ;;  %v11380_v39 = vld [vmem:[%s15082_s0 + $0x272] sm:$0xff] }
 0x2e2   :  { %1875 = vrot.lane.b32.xlu2 %v9078_v35, %s9467_s13  ;;  %1873 = vrot.lane.b32.xlu1 %v9077_v48, %s9467_s13  ;;  %v9101_v35 = vld [vmem:[%s15082_s0 + $0x262] sm:$0xff]  ;;  %v9100_v48 = vld [vmem:[%s15082_s0 + $0x25a] sm:$0xff] }
 0x2e3   :  { %1871 = vrot.lane.b32.xlu0 %v9076_v56, %s9467_s13 }
 0x2e4   :  { %v1553_v5 = vpop.permute.xlu2 %1552  ;;  %v1533_v13 = vpop.permute.xlu1 %1532 }
 0x2e5   :  { %1692 = vst.msk [vmem:[#allocation2 + $0x1a8] sm:$0xff] %vm1638_vm4, %v1553_v5  ;;  %v1531_v16 = vpop.permute.xlu0 %1530 }
 0x2e6   :  { %1682 = vst.msk [vmem:[#allocation2 + $0x158] sm:$0xff] %vm1638_vm4, %v1533_v13 }
 0x2e7   :  { %1681 = vst.msk [vmem:[#allocation2 + $0x150] sm:$0xff] %vm1638_vm4, %v1531_v16  ;;  %v11398_v16 = vld [vmem:[%s15082_s0 + $0x292] sm:$0xff] }
 0x2ea   :  { %1881 = vrot.lane.b32.xlu2 %v9081_v53, %s9467_s13  ;;  %1879 = vrot.lane.b32.xlu1 %v9080_v34, %s9467_s13  ;;  %v11403_v53 = vld [vmem:[%s15082_s0 + $0x28a] sm:$0xff]  ;;  %v11408_v34 = vld [vmem:[%s15082_s0 + $0x27a] sm:$0xff] }
 0x2eb   :  { %1877 = vrot.lane.b32.xlu0 %v9079_v10, %s9467_s13 }
 0x2ec   :  { %v1559_v18 = vpop.permute.xlu2 %1558  ;;  %v1539_v27 = vpop.permute.xlu1 %1538 }
 0x2ed   :  { %1695 = vst.msk [vmem:[#allocation2 + $0x1c0] sm:$0xff] %vm1638_vm4, %v1559_v18  ;;  %v1537_v38 = vpop.permute.xlu0 %1536 }
 0x2ee   :  { %1685 = vst.msk [vmem:[#allocation2 + $0x170] sm:$0xff] %vm1638_vm4, %v1539_v27 }
 0x2ef   :  { %1684 = vst.msk [vmem:[#allocation2 + $0x168] sm:$0xff] %vm1638_vm4, %v1537_v38  ;;  %v9108_v38 = vld [vmem:[%s15082_s0 + $0x2ba] sm:$0xff] }
 0x2f2   :  { %1887 = vrot.lane.b32.xlu2 %v11266_v1, %s9467_s13  ;;  %1885 = vrot.lane.b32.xlu1 %v11271_v29, %s9467_s13 }
 0x2f3   :  { %1883 = vrot.lane.b32.xlu0 %v11276_v30, %s9467_s13 }
 0x2f4   :  { %v1565_v54 = vpop.permute.xlu2 %1564  ;;  %v1545_v7 = vpop.permute.xlu1 %1544 }
 0x2f5   :  { %1698 = vst.msk [vmem:[#allocation2 + $0x1d8] sm:$0xff] %vm1638_vm4, %v1565_v54  ;;  %v1543_v24 = vpop.permute.xlu0 %1542  ;;  %v9107_v54 = vld [vmem:[%s15082_s0 + $0x2aa] sm:$0xff] }
 0x2f6   :  { %1688 = vst.msk [vmem:[#allocation2 + $0x188] sm:$0xff] %vm1638_vm4, %v1545_v7  ;;  %v11428_v7 = vld [vmem:[%s15082_s0 + $0x2a2] sm:$0xff] }
 0x2f7   :  { %1687 = vst.msk [vmem:[#allocation2 + $0x180] sm:$0xff] %vm1638_vm4, %v1543_v24 }
 0x2fa   :  { %1893 = vrot.lane.b32.xlu2 %v11290_v28, %s9467_s13  ;;  %1891 = vrot.lane.b32.xlu1 %v11295_v44, %s9467_s13 }
 0x2fb   :  { %1889 = vrot.lane.b32.xlu0 %v11300_v32, %s9467_s13 }
 0x2fc   :  { %v1571_v51 = vpop.permute.xlu2 %1570  ;;  %v1551_v52 = vpop.permute.xlu1 %1550 }
 0x2fd   :  { %1701 = vst.msk [vmem:[#allocation2 + $0x1f0] sm:$0xff] %vm1638_vm4, %v1571_v51  ;;  %v1549_v36 = vpop.permute.xlu0 %1548 }
 0x2fe   :  { %1691 = vst.msk [vmem:[#allocation2 + $0x1a0] sm:$0xff] %vm1638_vm4, %v1551_v52 }
 0x2ff   :  { %1690 = vst.msk [vmem:[#allocation2 + $0x198] sm:$0xff] %vm1638_vm4, %v1549_v36  ;;  %v9111_v36 = vld [vmem:[%s15082_s0 + $0x2da] sm:$0xff] }
 0x302   :  { %1899 = vrot.lane.b32.xlu2 %v11314_v58, %s9467_s13  ;;  %1897 = vrot.lane.b32.xlu1 %v9089_v59, %s9467_s13  ;;  %v9110_v59 = vld [vmem:[%s15082_s0 + $0x2d2] sm:$0xff] }
 0x303   :  { %1895 = vrot.lane.b32.xlu0 %v9088_v50, %s9467_s13  ;;  %v9109_v50 = vld [vmem:[%s15082_s0 + $0x2c2] sm:$0xff] }
 0x304   :  { %v1834_v12 = vpop.permute.xlu2 %1833  ;;  %v1557_v15 = vpop.permute.xlu1 %1556 }
 0x305   :  { %2025 = vst.msk [vmem:[#allocation2 + $0x8] sm:$0xff] %vm2023_vm5, %v1834_v12  ;;  %v1555_v2 = vpop.permute.xlu0 %1554 }
 0x306   :  { %1694 = vst.msk [vmem:[#allocation2 + $0x1b8] sm:$0xff] %vm1638_vm4, %v1557_v15 }
 0x307   :  { %1693 = vst.msk [vmem:[#allocation2 + $0x1b0] sm:$0xff] %vm1638_vm4, %v1555_v2 }
 0x30a   :  { %1905 = vrot.lane.b32.xlu2 %v9093_v33, %s9467_s13  ;;  %1903 = vrot.lane.b32.xlu1 %v9092_v37, %s9467_s13  ;;  %v9114_v33 = vld [vmem:[%s15082_s0 + $0x302] sm:$0xff]  ;;  %v9113_v37 = vld [vmem:[%s15082_s0 + $0x2f2] sm:$0xff] }
 0x30b   :  { %1901 = vrot.lane.b32.xlu0 %v11338_v41, %s9467_s13 }
 0x30c   :  { %v1840_v20 = vpop.permute.xlu2 %1839  ;;  %v1563_v61 = vpop.permute.xlu1 %1562 }
 0x30d   :  { %2028 = vst.msk [vmem:[#allocation2 + $0x20] sm:$0xff] %vm2023_vm5, %v1840_v20  ;;  %v1561_v14 = vpop.permute.xlu0 %1560  ;;  %v9112_v20 = vld [vmem:[%s15082_s0 + $0x2ea] sm:$0xff] }
 0x30e   :  { %1697 = vst.msk [vmem:[#allocation2 + $0x1d0] sm:$0xff] %vm1638_vm4, %v1563_v61 }
 0x30f   :  { %1696 = vst.msk [vmem:[#allocation2 + $0x1c8] sm:$0xff] %vm1638_vm4, %v1561_v14 }
 0x312   :  { %1911 = vrot.lane.b32.xlu2 %v9096_v63, %s9467_s13  ;;  %1909 = vrot.lane.b32.xlu1 %v9095_v45, %s9467_s13  ;;  %v9117_v45 = vld [vmem:[%s15082_s0 + $0x322] sm:$0xff] }
 0x313   :  { %1907 = vrot.lane.b32.xlu0 %v9094_v23, %s9467_s13  ;;  %v9116_v23 = vld [vmem:[%s15082_s0 + $0x31a] sm:$0xff] }
 0x314   :  { %v1846_v19 = vpop.permute.xlu2 %1845  ;;  %v1569_v40 = vpop.permute.xlu1 %1568 }
 0x315   :  { %2031 = vst.msk [vmem:[#allocation2 + $0x38] sm:$0xff] %vm2023_vm5, %v1846_v19  ;;  %v1567_v47 = vpop.permute.xlu0 %1566  ;;  %v9115_v19 = vld [vmem:[%s15082_s0 + $0x30a] sm:$0xff] }
 0x316   :  { %1700 = vst.msk [vmem:[#allocation2 + $0x1e8] sm:$0xff] %vm1638_vm4, %v1569_v40 }
 0x317   :  { %1699 = vst.msk [vmem:[#allocation2 + $0x1e0] sm:$0xff] %vm1638_vm4, %v1567_v47 }
 0x31a   :  { %1917 = vrot.lane.b32.xlu2 %v9099_v8, %s9467_s13  ;;  %1915 = vrot.lane.b32.xlu1 %v9098_v62, %s9467_s13  ;;  %v9120_v62 = vld [vmem:[%s15082_s0 + $0x30] sm:$0xff] }
 0x31b   :  { %1913 = vrot.lane.b32.xlu0 %v9097_v4, %s9467_s13  ;;  %v9119_v4 = vld [vmem:[%s15082_s0 + $0x33a] sm:$0xff] }
 0x31c   :  { %v1852_v22 = vpop.permute.xlu2 %1851  ;;  %v1832_v17 = vpop.permute.xlu1 %1831 }
 0x31d   :  { %2034 = vst.msk [vmem:[#allocation2 + $0x50] sm:$0xff] %vm2023_vm5, %v1852_v22  ;;  %v1573_v26 = vpop.permute.xlu0 %1572  ;;  %v9118_v22 = vld [vmem:[%s15082_s0 + $0x332] sm:$0xff] }
 0x31e   :  { %2024 = vst.msk [vmem:[#allocation2] sm:$0xff] %vm2023_vm5, %v1832_v17 }
 0x31f   :  { %1702 = vst.msk [vmem:[#allocation2 + $0x1f8] sm:$0xff] %vm1638_vm4, %v1573_v26  ;;  %vm6613_vm4 = vcmask 57344  }
 0x322   :  { %1923 = vrot.lane.b32.xlu2 %v11380_v39, %s9467_s13  ;;  %1921 = vrot.lane.b32.xlu1 %v9101_v35, %s9467_s13 }
 0x323   :  { %1919 = vrot.lane.b32.xlu0 %v9100_v48, %s9467_s13  ;;  %v9184_v48 = vld [vmem:[%s15082_s0 + $0x31] sm:$0xff] }
 0x324   :  { %v1858_v56 = vpop.permute.xlu2 %1857  ;;  %v1838_v5 = vpop.permute.xlu1 %1837 }
 0x325   :  { %2037 = vst.msk [vmem:[#allocation2 + $0x68] sm:$0xff] %vm2023_vm5, %v1858_v56  ;;  %v1836_v13 = vpop.permute.xlu0 %1835  ;;  %v9121_v56 = vld [vmem:[%s15082_s0 + $0x38] sm:$0xff] }
 0x326   :  { %2027 = vst.msk [vmem:[#allocation2 + $0x18] sm:$0xff] %vm2023_vm5, %v1838_v5 }
 0x327   :  { %2026 = vst.msk [vmem:[#allocation2 + $0x10] sm:$0xff] %vm2023_vm5, %v1836_v13 }
 0x32a   :  { %1929 = vrot.lane.b32.xlu2 %v11398_v16, %s9467_s13  ;;  %1927 = vrot.lane.b32.xlu1 %v11403_v53, %s9467_s13 }
 0x32b   :  { %1925 = vrot.lane.b32.xlu0 %v11408_v34, %s9467_s13 }
 0x32c   :  { %v1864_v10 = vpop.permute.xlu2 %1863  ;;  %v1844_v18 = vpop.permute.xlu1 %1843 }
 0x32d   :  { %2040 = vst.msk [vmem:[#allocation2 + $0x80] sm:$0xff] %vm2023_vm5, %v1864_v10  ;;  %v1842_v27 = vpop.permute.xlu0 %1841 }
 0x32e   :  { %2030 = vst.msk [vmem:[#allocation2 + $0x30] sm:$0xff] %vm2023_vm5, %v1844_v18  ;;  %v9122_v18 = vld [vmem:[%s15082_s0 + $0x48] sm:$0xff] }
 0x32f   :  { %2029 = vst.msk [vmem:[#allocation2 + $0x28] sm:$0xff] %vm2023_vm5, %v1842_v27 }
 0x332   :  { %1935 = vrot.lane.b32.xlu2 %v9108_v38, %s9467_s13  ;;  %1933 = vrot.lane.b32.xlu1 %v9107_v54, %s9467_s13 }
 0x333   :  { %1931 = vrot.lane.b32.xlu0 %v11428_v7, %s9467_s13 }
 0x334   :  { %v1870_v24 = vpop.permute.xlu2 %1869  ;;  %v1850_v51 = vpop.permute.xlu1 %1849 }
 0x335   :  { %2043 = vst.msk [vmem:[#allocation2 + $0x98] sm:$0xff] %vm2023_vm5, %v1870_v24  ;;  %v1848_v52 = vpop.permute.xlu0 %1847  ;;  %v9123_v24 = vld [vmem:[%s15082_s0 + $0x50] sm:$0xff] }
 0x336   :  { %2033 = vst.msk [vmem:[#allocation2 + $0x48] sm:$0xff] %vm2023_vm5, %v1850_v51  ;;  %v9186_v51 = vld [vmem:[%s15082_s0 + $0x49] sm:$0xff] }
 0x337   :  { %2032 = vst.msk [vmem:[#allocation2 + $0x40] sm:$0xff] %vm2023_vm5, %v1848_v52 }
 0x33a   :  { %1941 = vrot.lane.b32.xlu2 %v9111_v36, %s9467_s13  ;;  %1939 = vrot.lane.b32.xlu1 %v9110_v59, %s9467_s13  ;;  %v9124_v59 = vld [vmem:[%s15082_s0 + $0x60] sm:$0xff] }
 0x33b   :  { %1937 = vrot.lane.b32.xlu0 %v9109_v50, %s9467_s13  ;;  %v9187_v50 = vld [vmem:[%s15082_s0 + $0x51] sm:$0xff] }
 0x33c   :  { %v1876_v12 = vpop.permute.xlu2 %1875  ;;  %v1856_v15 = vpop.permute.xlu1 %1855 }
 0x33d   :  { %2046 = vst.msk [vmem:[#allocation2 + $0xb0] sm:$0xff] %vm2023_vm5, %v1876_v12  ;;  %v1854_v2 = vpop.permute.xlu0 %1853 }
 0x33e   :  { %2036 = vst.msk [vmem:[#allocation2 + $0x60] sm:$0xff] %vm2023_vm5, %v1856_v15 }
 0x33f   :  { %2035 = vst.msk [vmem:[#allocation2 + $0x58] sm:$0xff] %vm2023_vm5, %v1854_v2  ;;  %v9125_v2 = vld [vmem:[%s15082_s0 + $0x68] sm:$0xff] }
 0x342   :  { %1947 = vrot.lane.b32.xlu2 %v9114_v33, %s9467_s13  ;;  %1945 = vrot.lane.b32.xlu1 %v9113_v37, %s9467_s13  ;;  %v9188_v33 = vld [vmem:[%s15082_s0 + $0x61] sm:$0xff] }
 0x343   :  { %1943 = vrot.lane.b32.xlu0 %v9112_v20, %s9467_s13 }
 0x344   :  { %v1882_v61 = vpop.permute.xlu2 %1881  ;;  %v1862_v14 = vpop.permute.xlu1 %1861 }
 0x345   :  { %2049 = vst.msk [vmem:[#allocation2 + $0xc8] sm:$0xff] %vm2023_vm5, %v1882_v61  ;;  %v1860_v63 = vpop.permute.xlu0 %1859  ;;  %v9144_v61 = vld [vmem:[%s15082_s0 + $0x150] sm:$0xff] }
 0x346   :  { %2039 = vst.msk [vmem:[#allocation2 + $0x78] sm:$0xff] %vm2023_vm5, %v1862_v14  ;;  %v9189_v14 = vld [vmem:[%s15082_s0 + $0x69] sm:$0xff] }
 0x347   :  { %2038 = vst.msk [vmem:[#allocation2 + $0x70] sm:$0xff] %vm2023_vm5, %v1860_v63 }
 0x34a   :  { %1953 = vrot.lane.b32.xlu2 %v9117_v45, %s9467_s13  ;;  %1951 = vrot.lane.b32.xlu1 %v9116_v23, %s9467_s13  ;;  %v9126_v23 = vld [vmem:[%s15082_s0 + $0x78] sm:$0xff] }
 0x34b   :  { %1949 = vrot.lane.b32.xlu0 %v9115_v19, %s9467_s13 }
 0x34c   :  { %v1888_v40 = vpop.permute.xlu2 %1887  ;;  %v1868_v47 = vpop.permute.xlu1 %1867 }
 0x34d   :  { %2052 = vst.msk [vmem:[#allocation2 + $0xe0] sm:$0xff] %vm2023_vm5, %v1888_v40  ;;  %v1866_v8 = vpop.permute.xlu0 %1865 }
 0x34e   :  { %2042 = vst.msk [vmem:[#allocation2 + $0x90] sm:$0xff] %vm2023_vm5, %v1868_v47  ;;  %v9145_v47 = vld [vmem:[%s15082_s0 + $0x158] sm:$0xff] }
 0x34f   :  { %2041 = vst.msk [vmem:[#allocation2 + $0x88] sm:$0xff] %vm2023_vm5, %v1866_v8 }
 0x352   :  { %2217 = vrot.lane.b32.xlu2 %v9120_v62, %s9468_s20  ;;  %1957 = vrot.lane.b32.xlu1 %v9119_v4, %s9467_s13  ;;  %v9127_v4 = vld [vmem:[%s15082_s0 + $0x80] sm:$0xff] }
 0x353   :  { %1955 = vrot.lane.b32.xlu0 %v9118_v22, %s9467_s13  ;;  %s9470_s13 = smov 21  }
 0x354   :  { %v1894_v17 = vpop.permute.xlu2 %1893  ;;  %v1874_v26 = vpop.permute.xlu1 %1873 }
 0x355   :  { %2055 = vst.msk [vmem:[#allocation2 + $0xf8] sm:$0xff] %vm2023_vm5, %v1894_v17  ;;  %v1872_v35 = vpop.permute.xlu0 %1871 }
 0x356   :  { %2045 = vst.msk [vmem:[#allocation2 + $0xa8] sm:$0xff] %vm2023_vm5, %v1874_v26  ;;  %v9146_v26 = vld [vmem:[%s15082_s0 + $0x168] sm:$0xff] }
 0x357   :  { %2044 = vst.msk [vmem:[#allocation2 + $0xa0] sm:$0xff] %vm2023_vm5, %v1872_v35 }
 0x35a   :  { %2987 = vrot.lane.b32.xlu2 %v11117_v6, %s9469_s25  ;;  %2602 = vrot.lane.b32.xlu1 %v9184_v48, %s9470_s13  ;;  %v9185_v6 = vld [vmem:[%s15082_s0 + $0x39] sm:$0xff] }
 0x35b   :  { %2219 = vrot.lane.b32.xlu0 %v9121_v56, %s9468_s20  ;;  %v9128_v56 = vld [vmem:[%s15082_s0 + $0x90] sm:$0xff] }
 0x35c   :  { %v1900_v5 = vpop.permute.xlu2 %1899  ;;  %v1880_v13 = vpop.permute.xlu1 %1879 }
 0x35d   :  { %2058 = vst.msk [vmem:[#allocation2 + $0x110] sm:$0xff] %vm2023_vm5, %v1900_v5  ;;  %v1878_v10 = vpop.permute.xlu0 %1877  ;;  %v9210_v5 = vld [vmem:[%s15082_s0 + $0x169] sm:$0xff] }
 0x35e   :  { %2048 = vst.msk [vmem:[#allocation2 + $0xc0] sm:$0xff] %vm2023_vm5, %v1880_v13 }
 0x35f   :  { %2047 = vst.msk [vmem:[#allocation2 + $0xb8] sm:$0xff] %vm2023_vm5, %v1878_v10 }
 0x362   :  { %2221 = vrot.lane.b32.xlu2 %v9122_v18, %s9468_s20  ;;  %2989 = vrot.lane.b32.xlu1 %v11112_v3, %s9469_s25  ;;  %v9147_v18 = vld [vmem:[%s15082_s0 + $0x170] sm:$0xff] }
 0x363   :  { %2604 = vrot.lane.b32.xlu0 %v9185_v6, %s9470_s13  ;;  %v3311_v6 = vld [vmem:[%s15083_s1 + $0x18] sm:$0x7] }
 0x364   :  { %v1906_v27 = vpop.permute.xlu2 %1905  ;;  %v1886_v38 = vpop.permute.xlu1 %1885  ;;  %9312 = vmatpush.msk.msra.mxu0 %vm3505_vm7, %v3311_v6  ;;  %9397 = vmatpush.msk.msra.mxu2 %vm3505_vm7, %v3311_v6 }
 0x365   :  { %2061 = vst.msk [vmem:[#allocation2 + $0x128] sm:$0xff] %vm2023_vm5, %v1906_v27  ;;  %v1884_v54 = vpop.permute.xlu0 %1883  ;;  %v3310_v27 = vld [vmem:[%s15083_s1 + $0x10] sm:$0xff]  ;;  %9398 = vmatpush.msk.msra.mxu3 %vm3505_vm7, %v3311_v6  ;;  %9396 = vmatpush.msk.msra.mxu1 %vm3505_vm7, %v3311_v6  ;;  %vm15099_vm7 = vcmask 261312  }
 0x366   :  { %2051 = vst.msk [vmem:[#allocation2 + $0xd8] sm:$0xff] %vm2023_vm5, %v1886_v38  ;;  %3522 = vmatpush.msra.mxu0 %v3310_v27  ;;  %v3309_v38 = vld [vmem:[%s15083_s1 + $0x8] sm:$0xff]  ;;  %9400 = vmatpush.msra.mxu2 %v3310_v27 }
 0x367   :  { %2050 = vst.msk [vmem:[#allocation2 + $0xd0] sm:$0xff] %vm2023_vm5, %v1884_v54  ;;  %9401 = vmatpush.msra.mxu3 %v3310_v27  ;;  %9399 = vmatpush.msra.mxu1 %v3310_v27 }
 0x368   :  { %3523 = vmatpush.msra.mxu0 %v3309_v38  ;;  %9403 = vmatpush.msra.mxu2 %v3309_v38 }
 0x369   :  { %9404 = vmatpush.msra.mxu3 %v3309_v38  ;;  %9402 = vmatpush.msra.mxu1 %v3309_v38  ;;  %v9151_v38 = vld [vmem:[%s15082_s0 + $0x1a0] sm:$0xff] }
 0x36a   :  { %2223 = vrot.lane.b32.xlu2 %v9123_v24, %s9468_s20  ;;  %2991 = vrot.lane.b32.xlu1 %v11107_v43, %s9469_s25 }
 0x36b   :  { %2606 = vrot.lane.b32.xlu0 %v9186_v51, %s9470_s13 }
 0x36c   :  { %v1912_v3 = vpop.permute.xlu2 %1911  ;;  %v1892_v52 = vpop.permute.xlu1 %1891 }
 0x36d   :  { %2064 = vst.msk [vmem:[#allocation2 + $0x140] sm:$0xff] %vm2023_vm5, %v1912_v3  ;;  %v1890_v36 = vpop.permute.xlu0 %1889  ;;  %v3308_v3 = vld [vmem:[%s15083_s1] sm:$0xff]  ;;  %s9474_s1 = smov 16  }
 0x36e   :  { %2054 = vst.msk [vmem:[#allocation2 + $0xf0] sm:$0xff] %vm2023_vm5, %v1892_v52  ;;  %v9211_v52 = vld [vmem:[%s15082_s0 + $0x171] sm:$0xff]  ;;  %3524 = vmatpush.msra.mxu0 %v3308_v3  ;;  %9406 = vmatpush.msra.mxu2 %v3308_v3 }
 0x36f   :  { %2053 = vst.msk [vmem:[#allocation2 + $0xe8] sm:$0xff] %vm2023_vm5, %v1890_v36  ;;  %9407 = vmatpush.msra.mxu3 %v3308_v3  ;;  %9405 = vmatpush.msra.mxu1 %v3308_v3  ;;  %v9215_v3 = vld [vmem:[%s15082_s0 + $0x1a1] sm:$0xff] }
 0x372   :  { %2225 = vrot.lane.b32.xlu2 %v9124_v59, %s9468_s20  ;;  %2993 = vrot.lane.b32.xlu1 %v11141_v25, %s9469_s25 }
 0x373   :  { %2608 = vrot.lane.b32.xlu0 %v9187_v50, %s9470_s13 }
 0x374   :  { %v1918_v43 = vpop.permute.xlu2 %1917  ;;  %v1898_v12 = vpop.permute.xlu1 %1897 }
 0x375   :  { %2067 = vst.msk [vmem:[#allocation2 + $0x158] sm:$0xff] %vm2023_vm5, %v1918_v43  ;;  %v1896_v15 = vpop.permute.xlu0 %1895  ;;  %v9148_v43 = vld [vmem:[%s15082_s0 + $0x180] sm:$0xff] }
 0x376   :  { %2057 = vst.msk [vmem:[#allocation2 + $0x108] sm:$0xff] %vm2023_vm5, %v1898_v12 }
 0x377   :  { %2056 = vst.msk [vmem:[#allocation2 + $0x100] sm:$0xff] %vm2023_vm5, %v1896_v15 }
 0x37a   :  { %2227 = vrot.lane.b32.xlu2 %v9125_v2, %s9468_s20  ;;  %2995 = vrot.lane.b32.xlu1 %v11136_v21, %s9469_s25 }
 0x37b   :  { %2610 = vrot.lane.b32.xlu0 %v9188_v33, %s9470_s13  ;;  %v9130_v33 = vld [vmem:[%s15082_s0 + $0xa8] sm:$0xff] }
 0x37c   :  { %v1924_v25 = vpop.permute.xlu2 %1923  ;;  %v1904_v37 = vpop.permute.xlu1 %1903 }
 0x37d   :  { %2070 = vst.msk [vmem:[#allocation2 + $0x170] sm:$0xff] %vm2023_vm5, %v1924_v25  ;;  %v1902_v20 = vpop.permute.xlu0 %1901  ;;  %v9212_v25 = vld [vmem:[%s15082_s0 + $0x181] sm:$0xff] }
 0x37e   :  { %2060 = vst.msk [vmem:[#allocation2 + $0x120] sm:$0xff] %vm2023_vm5, %v1904_v37 }
 0x37f   :  { %2059 = vst.msk [vmem:[#allocation2 + $0x118] sm:$0xff] %vm2023_vm5, %v1902_v20 }
 0x382   :  { %2265 = vrot.lane.b32.xlu2 %v9144_v61, %s9468_s20  ;;  %2997 = vrot.lane.b32.xlu1 %v11131_v57, %s9469_s25  ;;  %v9149_v61 = vld [vmem:[%s15082_s0 + $0x188] sm:$0xff] }
 0x383   :  { %2612 = vrot.lane.b32.xlu0 %v9189_v14, %s9470_s13 }
 0x384   :  { %v1930_v21 = vpop.permute.xlu2 %1929  ;;  %v1910_v63 = vpop.permute.xlu1 %1909 }
 0x385   :  { %2073 = vst.msk [vmem:[#allocation2 + $0x188] sm:$0xff] %vm2023_vm5, %v1930_v21  ;;  %v1908_v45 = vpop.permute.xlu0 %1907 }
 0x386   :  { %2063 = vst.msk [vmem:[#allocation2 + $0x138] sm:$0xff] %vm2023_vm5, %v1910_v63 }
 0x387   :  { %2062 = vst.msk [vmem:[#allocation2 + $0x130] sm:$0xff] %vm2023_vm5, %v1908_v45 }
 0x38a   :  { %3035 = vrot.lane.b32.xlu2 %v11276_v30, %s9469_s25  ;;  %2229 = vrot.lane.b32.xlu1 %v9126_v23, %s9468_s20  ;;  %v9190_v30 = vld [vmem:[%s15082_s0 + $0x79] sm:$0xff]  ;;  %v9228_v23 = vld [vmem:[%s15082_s0 + $0x271] sm:$0xff] }
 0x38b   :  { %2650 = vrot.lane.b32.xlu0 %v10891_v31, %s9470_s13 }
 0x38c   :  { %v1936_v57 = vpop.permute.xlu2 %1935  ;;  %v1916_v19 = vpop.permute.xlu1 %1915 }
 0x38d   :  { %2076 = vst.msk [vmem:[#allocation2 + $0x1a0] sm:$0xff] %vm2023_vm5, %v1936_v57  ;;  %v1914_v40 = vpop.permute.xlu0 %1913  ;;  %v9164_v57 = vld [vmem:[%s15082_s0 + $0x270] sm:$0xff] }
 0x38e   :  { %2066 = vst.msk [vmem:[#allocation2 + $0x150] sm:$0xff] %vm2023_vm5, %v1916_v19 }
 0x38f   :  { %2065 = vst.msk [vmem:[#allocation2 + $0x148] sm:$0xff] %vm2023_vm5, %v1914_v40 }
 0x392   :  { %2267 = vrot.lane.b32.xlu2 %v9145_v47, %s9468_s20  ;;  %2999 = vrot.lane.b32.xlu1 %v11165_v49, %s9469_s25 }
 0x393   :  { %2614 = vrot.lane.b32.xlu0 %v9190_v30, %s9470_s13 }
 0x394   :  { %v1942_v31 = vpop.permute.xlu2 %1941  ;;  %v1922_v8 = vpop.permute.xlu1 %1921 }
 0x395   :  { %2079 = vst.msk [vmem:[#allocation2 + $0x1b8] sm:$0xff] %vm2023_vm5, %v1942_v31  ;;  %v1920_v62 = vpop.permute.xlu0 %1919  ;;  %v9131_v31 = vld [vmem:[%s15082_s0 + $0xb0] sm:$0xff] }
 0x396   :  { %2069 = vst.msk [vmem:[#allocation2 + $0x168] sm:$0xff] %vm2023_vm5, %v1922_v8 }
 0x397   :  { %2068 = vst.msk [vmem:[#allocation2 + $0x160] sm:$0xff] %vm2023_vm5, %v1920_v62 }
 0x39a   :  { %3037 = vrot.lane.b32.xlu2 %v11271_v29, %s9469_s25  ;;  %2231 = vrot.lane.b32.xlu1 %v9127_v4, %s9468_s20  ;;  %v9191_v29 = vld [vmem:[%s15082_s0 + $0x81] sm:$0xff] }
 0x39b   :  { %2652 = vrot.lane.b32.xlu0 %v10915_v55, %s9470_s13 }
 0x39c   :  { %v1948_v49 = vpop.permute.xlu2 %1947  ;;  %v1928_v22 = vpop.permute.xlu1 %1927 }
 0x39d   :  { %2082 = vst.msk [vmem:[#allocation2 + $0x1d0] sm:$0xff] %vm2023_vm5, %v1948_v49  ;;  %v1926_v17 = vpop.permute.xlu0 %1925 }
 0x39e   :  { %2072 = vst.msk [vmem:[#allocation2 + $0x180] sm:$0xff] %vm2023_vm5, %v1928_v22  ;;  %v9150_v22 = vld [vmem:[%s15082_s0 + $0x198] sm:$0xff] }
 0x39f   :  { %2071 = vst.msk [vmem:[#allocation2 + $0x178] sm:$0xff] %vm2023_vm5, %v1926_v17 }
 0x3a2   :  { %2269 = vrot.lane.b32.xlu2 %v9146_v26, %s9468_s20  ;;  %3001 = vrot.lane.b32.xlu1 %v11160_v46, %s9469_s25 }
 0x3a3   :  { %2616 = vrot.lane.b32.xlu0 %v9191_v29, %s9470_s13 }
 0x3a4   :  { %v1954_v55 = vpop.permute.xlu2 %1953  ;;  %v1934_v35 = vpop.permute.xlu1 %1933 }
 0x3a5   :  { %2085 = vst.msk [vmem:[#allocation2 + $0x1e8] sm:$0xff] %vm2023_vm5, %v1954_v55  ;;  %v1932_v48 = vpop.permute.xlu0 %1931  ;;  %v9229_v55 = vld [vmem:[%s15082_s0 + $0x279] sm:$0xff] }
 0x3a6   :  { %2075 = vst.msk [vmem:[#allocation2 + $0x198] sm:$0xff] %vm2023_vm5, %v1934_v35  ;;  %v9165_v35 = vld [vmem:[%s15082_s0 + $0x278] sm:$0xff] }
 0x3a7   :  { %2074 = vst.msk [vmem:[#allocation2 + $0x190] sm:$0xff] %vm2023_vm5, %v1932_v48 }
 0x3aa   :  { %3039 = vrot.lane.b32.xlu2 %v11266_v1, %s9469_s25  ;;  %2233 = vrot.lane.b32.xlu1 %v9128_v56, %s9468_s20  ;;  %v9192_v1 = vld [vmem:[%s15082_s0 + $0x91] sm:$0xff] }
 0x3ab   :  { %2654 = vrot.lane.b32.xlu0 %v9210_v5, %s9470_s13 }
 0x3ac   :  { %v2218_v46 = vpop.permute.xlu2 %2217  ;;  %v1940_v13 = vpop.permute.xlu1 %1939 }
 0x3ad   :  { %2410 = vst.msk [vmem:[#allocation2] sm:$0xff] %vm2409_vm6, %v2218_v46  ;;  %v1938_v10 = vpop.permute.xlu0 %1937 }
 0x3ae   :  { %2078 = vst.msk [vmem:[#allocation2 + $0x1b0] sm:$0xff] %vm2023_vm5, %v1940_v13  ;;  %v9278_v13 = vld [vmem:[%s15082_s0 + $0x19a] sm:$0xff] }
 0x3af   :  { %2077 = vst.msk [vmem:[#allocation2 + $0x1a8] sm:$0xff] %vm2023_vm5, %v1938_v10  ;;  %v9132_v10 = vld [vmem:[%s15082_s0 + $0xc0] sm:$0xff] }
 0x3b2   :  { %2271 = vrot.lane.b32.xlu2 %v9147_v18, %s9468_s20  ;;  %3003 = vrot.lane.b32.xlu1 %v11155_v11, %s9469_s25  ;;  %v9129_v11 = vld [vmem:[%s15082_s0 + $0x98] sm:$0xff] }
 0x3b3   :  { %2618 = vrot.lane.b32.xlu0 %v9192_v1, %s9470_s13 }
 0x3b4   :  { %v2988_v54 = vpop.permute.xlu2 %2987  ;;  %v1946_v24 = vpop.permute.xlu1 %1945 }
 0x3b5   :  { %2081 = vst.msk [vmem:[#allocation2 + $0x1c8] sm:$0xff] %vm2023_vm5, %v1946_v24  ;;  %v1944_v51 = vpop.permute.xlu0 %1943 }
 0x3b6   :  { %2080 = vst.msk [vmem:[#allocation2 + $0x1c0] sm:$0xff] %vm2023_vm5, %v1944_v51 }
 0x3ba   :  { %3041 = vrot.lane.b32.xlu2 %v11300_v32, %s9469_s25  ;;  %2235 = vrot.lane.b32.xlu1 %v9129_v11, %s9468_s20  ;;  %v9193_v32 = vld [vmem:[%s15082_s0 + $0x99] sm:$0xff]  ;;  %v9230_v11 = vld [vmem:[%s15082_s0 + $0x289] sm:$0xff] }
 0x3bb   :  { %2656 = vrot.lane.b32.xlu0 %v9211_v52, %s9470_s13 }
 0x3bc   :  { %v2222_v36 = vpop.permute.xlu2 %2221  ;;  %v1952_v59 = vpop.permute.xlu1 %1951 }
 0x3bd   :  { %2412 = vst.msk [vmem:[#allocation2 + $0x10] sm:$0xff] %vm2409_vm6, %v2222_v36  ;;  %v1950_v50 = vpop.permute.xlu0 %1949 }
 0x3be   :  { %2084 = vst.msk [vmem:[#allocation2 + $0x1e0] sm:$0xff] %vm2023_vm5, %v1952_v59 }
 0x3bf   :  { %2083 = vst.msk [vmem:[#allocation2 + $0x1d8] sm:$0xff] %vm2023_vm5, %v1950_v50 }
 0x3c2   :  { %2273 = vrot.lane.b32.xlu2 %v9148_v43, %s9468_s20  ;;  %3005 = vrot.lane.b32.xlu1 %v11189_v9, %s9469_s25 }
 0x3c3   :  { %2620 = vrot.lane.b32.xlu0 %v9193_v32, %s9470_s13  ;;  %v9279_v32 = vld [vmem:[%s15082_s0 + $0x1a2] sm:$0xff] }
 0x3c4   :  { %v2224_v12 = vpop.permute.xlu2 %2223  ;;  %v1958_v15 = vpop.permute.xlu1 %1957 }
 0x3c5   :  { %2413 = vst.msk [vmem:[#allocation2 + $0x18] sm:$0xff] %vm2409_vm6, %v2224_v12  ;;  %v1956_v2 = vpop.permute.xlu0 %1955  ;;  %v9133_v12 = vld [vmem:[%s15082_s0 + $0xc8] sm:$0xff] }
 0x3c6   :  { %2087 = vst.msk [vmem:[#allocation2 + $0x1f8] sm:$0xff] %vm2023_vm5, %v1958_v15 }
 0x3c7   :  { %2086 = vst.msk [vmem:[#allocation2 + $0x1f0] sm:$0xff] %vm2023_vm5, %v1956_v2  ;;  %vm15098_vm5 = vcmask 130112  }
 0x3ca   :  { %3043 = vrot.lane.b32.xlu2 %v11295_v44, %s9469_s25  ;;  %2237 = vrot.lane.b32.xlu1 %v9130_v33, %s9468_s20  ;;  %v9194_v44 = vld [vmem:[%s15082_s0 + $0xa9] sm:$0xff] }
 0x3cb   :  { %2658 = vrot.lane.b32.xlu0 %v9212_v25, %s9470_s13  ;;  %v9152_v25 = vld [vmem:[%s15082_s0 + $0x1e0] sm:$0xff] }
 0x3cc   :  { %v2226_v9 = vpop.permute.xlu2 %2225  ;;  %v2603_v37 = vpop.permute.xlu1 %2602 }
 0x3cd   :  { %2414 = vst.msk [vmem:[#allocation2 + $0x20] sm:$0xff] %vm2409_vm6, %v2226_v9  ;;  %v2220_v20 = vpop.permute.xlu0 %2219  ;;  %v9261_v9 = vld [vmem:[%s15082_s0 + $0xca] sm:$0xff] }
 0x3ce   :  { %2795 = vst.msk [vmem:[#allocation2] sm:$0xff] %vm2794_vm8, %v2603_v37  ;;  %v9197_v37 = vld [vmem:[%s15082_s0 + $0xc9] sm:$0xff] }
 0x3cf   :  { %3180 = vst.msk [vmem:[#allocation2] sm:$0xff] %vm3179_vm9, %v2988_v54 }
 0x3d0   :  { %2411 = vst.msk [vmem:[#allocation2 + $0x8] sm:$0xff] %vm2409_vm6, %v2220_v20 }
 0x3d2   :  { %2275 = vrot.lane.b32.xlu2 %v9149_v61, %s9468_s20  ;;  %3007 = vrot.lane.b32.xlu1 %v11184_v42, %s9469_s25  ;;  %v9213_v42 = vld [vmem:[%s15082_s0 + $0x189] sm:$0xff] }
 0x3d3   :  { %2622 = vrot.lane.b32.xlu0 %v9194_v44, %s9470_s13 }
 0x3d4   :  { %v2228_v14 = vpop.permute.xlu2 %2227  ;;  %v2990_v21 = vpop.permute.xlu1 %2989 }
 0x3d5   :  { %2415 = vst.msk [vmem:[#allocation2 + $0x28] sm:$0xff] %vm2409_vm6, %v2228_v14  ;;  %v2605_v63 = vpop.permute.xlu0 %2604 }
 0x3d6   :  { %2796 = vst.msk [vmem:[#allocation2 + $0x8] sm:$0xff] %vm2794_vm8, %v2605_v63  ;;  %v3244_v45 = vld [vmem:[#allocation2] sm:$0xff] }
 0x3d7   :  { %3181 = vst.msk [vmem:[#allocation2 + $0x8] sm:$0xff] %vm3179_vm9, %v2990_v21  ;;  %9313 = vmatmul.msk.f32.vlgmr.msra.gmra.mxu0 %vm3312_vm10, %v3244_v45  ;;  %v9231_v21 = vld [vmem:[%s15082_s0 + $0x291] sm:$0xff]  ;;  %v9216_v63 = vld [vmem:[%s15082_s0 + $0x1e1] sm:$0xff] }
 0x3d8   :  { %v9167_v45 = vld [vmem:[%s15082_s0 + $0x290] sm:$0xff] }
 0x3da   :  { %2690 = vrot.lane.b32.xlu2 %v9228_v23, %s9470_s13  ;;  %2660 = vrot.lane.b32.xlu1 %v9213_v42, %s9470_s13 }
 0x3db   :  { %2305 = vrot.lane.b32.xlu0 %v9164_v57, %s9468_s20 }
 0x3dc   :  { %v2266_v19 = vpop.permute.xlu2 %2265  ;;  %v2992_v40 = vpop.permute.xlu1 %2991 }
 0x3dd   :  { %2434 = vst.msk [vmem:[#allocation2 + $0xc0] sm:$0xff] %vm2409_vm6, %v2266_v19  ;;  %v2607_v47 = vpop.permute.xlu0 %2606 }
 0x3de   :  { %2797 = vst.msk [vmem:[#allocation2 + $0x10] sm:$0xff] %vm2794_vm8, %v2607_v47  ;;  %v3245_v30 = vld [vmem:[#allocation2 + $0x8] sm:$0xff] }
 0x3df   :  { %3182 = vst.msk [vmem:[#allocation2 + $0x10] sm:$0xff] %vm3179_vm9, %v2992_v40  ;;  %9314 = vmatmul.msk.f32.gmra.mxu0 %vm3312_vm10, %v3245_v30  ;;  %v9134_v40 = vld [vmem:[%s15082_s0 + $0xd8] sm:$0xff] }
 0x3e2   :  { %3075 = vrot.lane.b32.xlu2 %v11380_v39, %s9469_s25  ;;  %3045 = vrot.lane.b32.xlu1 %v11290_v28, %s9469_s25  ;;  %v9195_v28 = vld [vmem:[%s15082_s0 + $0xb1] sm:$0xff] }
 0x3e3   :  { %2239 = vrot.lane.b32.xlu0 %v9131_v31, %s9468_s20 }
 0x3e4   :  { %v3036_v8 = vpop.permute.xlu2 %3035  ;;  %v2994_v62 = vpop.permute.xlu1 %2993 }
 0x3e5   :  { %v2609_v4 = vpop.permute.xlu0 %2608 }
 0x3e6   :  { %2798 = vst.msk [vmem:[#allocation2 + $0x18] sm:$0xff] %vm2794_vm8, %v2609_v4  ;;  %v3246_v49 = vld [vmem:[#allocation2 + $0x10] sm:$0xff] }
 0x3e7   :  { %3183 = vst.msk [vmem:[#allocation2 + $0x18] sm:$0xff] %vm3179_vm9, %v2994_v62  ;;  %9315 = vmatmul.msk.f32.gmra.mxu0 %vm3312_vm10, %v3246_v49  ;;  %v9153_v62 = vld [vmem:[%s15082_s0 + $0x1e8] sm:$0xff] }
 0x3ea   :  { %2277 = vrot.lane.b32.xlu2 %v9150_v22, %s9468_s20  ;;  %3009 = vrot.lane.b32.xlu1 %v11179_v0, %s9469_s25  ;;  %v9214_v0 = vld [vmem:[%s15082_s0 + $0x199] sm:$0xff] }
 0x3eb   :  { %2624 = vrot.lane.b32.xlu0 %v9195_v28, %s9470_s13 }
 0x3ec   :  { %v2268_v39 = vpop.permute.xlu2 %2267  ;;  %v2996_v17 = vpop.permute.xlu1 %2995 }
 0x3ed   :  { %2435 = vst.msk [vmem:[#allocation2 + $0xc8] sm:$0xff] %vm2409_vm6, %v2268_v39  ;;  %v2611_v26 = vpop.permute.xlu0 %2610  ;;  %v9232_v39 = vld [vmem:[%s15082_s0 + $0x2a1] sm:$0xff] }
 0x3ee   :  { %2799 = vst.msk [vmem:[#allocation2 + $0x20] sm:$0xff] %vm2794_vm8, %v2611_v26  ;;  %v3247_v29 = vld [vmem:[#allocation2 + $0x18] sm:$0xff]  ;;  %v9168_v26 = vld [vmem:[%s15082_s0 + $0x2a0] sm:$0xff] }
 0x3ef   :  { %3184 = vst.msk [vmem:[#allocation2 + $0x20] sm:$0xff] %vm3179_vm9, %v2996_v17  ;;  %9316 = vmatmul.msk.f32.gmra.mxu0 %vm3312_vm10, %v3247_v29  ;;  %v9217_v17 = vld [vmem:[%s15082_s0 + $0x1e9] sm:$0xff] }
 0x3f2   :  { %2692 = vrot.lane.b32.xlu2 %v9229_v55, %s9470_s13  ;;  %2662 = vrot.lane.b32.xlu1 %v9214_v0, %s9470_s13 }
 0x3f3   :  { %2307 = vrot.lane.b32.xlu0 %v9165_v35, %s9468_s20 }
 0x3f4   :  { %v3038_v48 = vpop.permute.xlu2 %3037  ;;  %v2998_v56 = vpop.permute.xlu1 %2997 }
 0x3f5   :  { %v2613_v5 = vpop.permute.xlu0 %2612 }
 0x3f6   :  { %2800 = vst.msk [vmem:[#allocation2 + $0x28] sm:$0xff] %vm2794_vm8, %v2613_v5  ;;  %v3248_v46 = vld [vmem:[#allocation2 + $0x20] sm:$0xff] }
 0x3f7   :  { %3185 = vst.msk [vmem:[#allocation2 + $0x28] sm:$0xff] %vm3179_vm9, %v2998_v56  ;;  %9317 = vmatmul.msk.f32.gmra.mxu0 %vm3312_vm10, %v3248_v46 }
 0x3fa   :  { %3077 = vrot.lane.b32.xlu2 %v11408_v34, %s9469_s25  ;;  %3047 = vrot.lane.b32.xlu1 %v9278_v13, %s9469_s25  ;;  %v9196_v34 = vld [vmem:[%s15082_s0 + $0xc1] sm:$0xff] }
 0x3fb   :  { %2241 = vrot.lane.b32.xlu0 %v9132_v10, %s9468_s20  ;;  %v9154_v10 = vld [vmem:[%s15082_s0 + $0x1f8] sm:$0xff] }
 0x3fc   :  { %v2270_v18 = vpop.permute.xlu2 %2269  ;;  %v2230_v1 = vpop.permute.xlu1 %2229 }
 0x3fd   :  { %2436 = vst.msk [vmem:[#allocation2 + $0xd0] sm:$0xff] %vm2409_vm6, %v2270_v18  ;;  %v2651_v6 = vpop.permute.xlu0 %2650 }
 0x3fe   :  { %2416 = vst.msk [vmem:[#allocation2 + $0x30] sm:$0xff] %vm2409_vm6, %v2230_v1  ;;  %v3249_v27 = vld [vmem:[#allocation2 + $0x28] sm:$0xff] }
 0x3ff   :  { %2819 = vst.msk [vmem:[#allocation2 + $0xc0] sm:$0xff] %vm2794_vm8, %v2651_v6  ;;  %9318 = vmatmul.msk.f32.gmra.mxu0 %vm3312_vm10, %v3249_v27 }
 0x400   :  { %3204 = vst.msk [vmem:[#allocation2 + $0xc0] sm:$0xff] %vm3179_vm9, %v3036_v8 }
 0x402   :  { %2279 = vrot.lane.b32.xlu2 %v9151_v38, %s9468_s20  ;;  %3011 = vrot.lane.b32.xlu1 %v11209_v60, %s9469_s25  ;;  %v9166_v60 = vld [vmem:[%s15082_s0 + $0x288] sm:$0xff] }
 0x403   :  { %2626 = vrot.lane.b32.xlu0 %v9196_v34, %s9470_s13  ;;  %v9233_v38 = vld [vmem:[%s15082_s0 + $0x2a9] sm:$0xff]  ;;  %v9218_v34 = vld [vmem:[%s15082_s0 + $0x1f9] sm:$0xff] }
 0x404   :  { %v3040_v54 = vpop.permute.xlu2 %3039  ;;  %v3000_v24 = vpop.permute.xlu1 %2999 }
 0x405   :  { %v2615_v51 = vpop.permute.xlu0 %2614 }
 0x406   :  { %2801 = vst.msk [vmem:[#allocation2 + $0x30] sm:$0xff] %vm2794_vm8, %v2615_v51 }
 0x407   :  { %3186 = vst.msk [vmem:[#allocation2 + $0x30] sm:$0xff] %vm3179_vm9, %v3000_v24  ;;  %v3268_v52 = vld [vmem:[#allocation2 + $0xc0] sm:$0xff] }
 0x408   :  { %9337 = vmatmul.msk.f32.vlgmr.msra.gmra.mxu2 %vm3312_vm10, %v3268_v52 }
 0x40a   :  { %2694 = vrot.lane.b32.xlu2 %v9230_v11, %s9470_s13  ;;  %2664 = vrot.lane.b32.xlu1 %v9215_v3, %s9470_s13 }
 0x40b   :  { %2309 = vrot.lane.b32.xlu0 %v9166_v60, %s9468_s20 }
 0x40c   :  { %v2272_v36 = vpop.permute.xlu2 %2271  ;;  %v2232_v59 = vpop.permute.xlu1 %2231 }
 0x40d   :  { %2437 = vst.msk [vmem:[#allocation2 + $0xd8] sm:$0xff] %vm2409_vm6, %v2272_v36  ;;  %v2653_v50 = vpop.permute.xlu0 %2652 }
 0x40e   :  { %2417 = vst.msk [vmem:[#allocation2 + $0x38] sm:$0xff] %vm2409_vm6, %v2232_v59  ;;  %v3250_v43 = vld [vmem:[#allocation2 + $0x30] sm:$0xff] }
 0x40f   :  { %2820 = vst.msk [vmem:[#allocation2 + $0xc8] sm:$0xff] %vm2794_vm8, %v2653_v50  ;;  %9319 = vmatmul.msk.f32.gmra.mxu0 %vm3312_vm10, %v3250_v43  ;;  %v9297_v43 = vld [vmem:[%s15082_s0 + $0x2aa] sm:$0xff] }
 0x410   :  { %3205 = vst.msk [vmem:[#allocation2 + $0xc8] sm:$0xff] %vm3179_vm9, %v3038_v48  ;;  %v9135_v48 = vld [vmem:[%s15082_s0 + $0xe0] sm:$0xff] }
 0x412   :  { %3079 = vrot.lane.b32.xlu2 %v11403_v53, %s9469_s25  ;;  %3049 = vrot.lane.b32.xlu1 %v9279_v32, %s9469_s25 }
 0x413   :  { %2243 = vrot.lane.b32.xlu0 %v9133_v12, %s9468_s20 }
 0x414   :  { %v3042_v15 = vpop.permute.xlu2 %3041  ;;  %v3002_v2 = vpop.permute.xlu1 %3001 }
 0x415   :  { %v2617_v33 = vpop.permute.xlu0 %2616 }
 0x416   :  { %2802 = vst.msk [vmem:[#allocation2 + $0x38] sm:$0xff] %vm2794_vm8, %v2617_v33 }
 0x417   :  { %3187 = vst.msk [vmem:[#allocation2 + $0x38] sm:$0xff] %vm3179_vm9, %v3002_v2  ;;  %v3269_v53 = vld [vmem:[#allocation2 + $0xc8] sm:$0xff]  ;;  %v9282_v2 = vld [vmem:[%s15082_s0 + $0x1fa] sm:$0xff] }
 0x418   :  { %9338 = vmatmul.msk.f32.gmra.mxu2 %vm3312_vm10, %v3269_v53 }
 0x41a   :  { %2281 = vrot.lane.b32.xlu2 %v9152_v25, %s9468_s20  ;;  %3013 = vrot.lane.b32.xlu1 %v9261_v9, %s9469_s25 }
 0x41b   :  { %2628 = vrot.lane.b32.xlu0 %v9197_v37, %s9470_s13 }
 0x41c   :  { %v2274_v20 = vpop.permute.xlu2 %2273  ;;  %v2234_v61 = vpop.permute.xlu1 %2233 }
 0x41d   :  { %2438 = vst.msk [vmem:[#allocation2 + $0xe0] sm:$0xff] %vm2409_vm6, %v2274_v20  ;;  %v2655_v44 = vpop.permute.xlu0 %2654  ;;  %v9136_v20 = vld [vmem:[%s15082_s0 + $0xf0] sm:$0xff] }
 0x41e   :  { %2418 = vst.msk [vmem:[#allocation2 + $0x40] sm:$0xff] %vm2409_vm6, %v2234_v61  ;;  %v3251_v14 = vld [vmem:[#allocation2 + $0x38] sm:$0xff] }
 0x41f   :  { %2821 = vst.msk [vmem:[#allocation2 + $0xd0] sm:$0xff] %vm2794_vm8, %v2655_v44  ;;  %9320 = vmatmul.msk.f32.gmra.mxu0 %vm3312_vm10, %v3251_v14 }
 0x420   :  { %3206 = vst.msk [vmem:[#allocation2 + $0xd0] sm:$0xff] %vm3179_vm9, %v3040_v54  ;;  %v9169_v54 = vld [vmem:[%s15082_s0 + $0x2a8] sm:$0xff] }
 0x422   :  { %2696 = vrot.lane.b32.xlu2 %v9231_v21, %s9470_s13  ;;  %2666 = vrot.lane.b32.xlu1 %v9216_v63, %s9470_s13 }
 0x423   :  { %2311 = vrot.lane.b32.xlu0 %v9167_v45, %s9468_s20 }
 0x424   :  { %v3044_v23 = vpop.permute.xlu2 %3043  ;;  %v3004_v42 = vpop.permute.xlu1 %3003 }
 0x425   :  { %v2619_v57 = vpop.permute.xlu0 %2618 }
 0x426   :  { %2803 = vst.msk [vmem:[#allocation2 + $0x40] sm:$0xff] %vm2794_vm8, %v2619_v57 }
 0x427   :  { %3188 = vst.msk [vmem:[#allocation2 + $0x40] sm:$0xff] %vm3179_vm9, %v3004_v42  ;;  %v3270_v19 = vld [vmem:[#allocation2 + $0xd0] sm:$0xff] }
 0x428   :  { %9339 = vmatmul.msk.f32.gmra.mxu2 %vm3312_vm10, %v3270_v19 }
 0x42a   :  { %3081 = vrot.lane.b32.xlu2 %v11398_v16, %s9469_s25  ;;  %3051 = vrot.lane.b32.xlu1 %v11314_v58, %s9469_s25  ;;  %v9262_v58 = vld [vmem:[%s15082_s0 + $0xda] sm:$0xff] }
 0x42b   :  { %2245 = vrot.lane.b32.xlu0 %v9134_v40, %s9468_s20  ;;  %v9198_v16 = vld [vmem:[%s15082_s0 + $0xd9] sm:$0xff] }
 0x42c   :  { %v2276_v47 = vpop.permute.xlu2 %2275  ;;  %v2236_v30 = vpop.permute.xlu1 %2235 }
 0x42d   :  { %2439 = vst.msk [vmem:[#allocation2 + $0xe8] sm:$0xff] %vm2409_vm6, %v2276_v47  ;;  %v2657_v31 = vpop.permute.xlu0 %2656 }
 0x42e   :  { %2419 = vst.msk [vmem:[#allocation2 + $0x48] sm:$0xff] %vm2409_vm6, %v2236_v30  ;;  %v3252_v8 = vld [vmem:[#allocation2 + $0x40] sm:$0xff] }
 0x42f   :  { %2822 = vst.msk [vmem:[#allocation2 + $0xd8] sm:$0xff] %vm2794_vm8, %v2657_v31  ;;  %9321 = vmatmul.msk.f32.gmra.mxu0 %vm3312_vm10, %v3252_v8 }
 0x430   :  { %3207 = vst.msk [vmem:[#allocation2 + $0xd8] sm:$0xff] %vm3179_vm9, %v3042_v15 }
 0x432   :  { %2283 = vrot.lane.b32.xlu2 %v9153_v62, %s9468_s20  ;;  %3015 = vrot.lane.b32.xlu1 %v9262_v58, %s9469_s25 }
 0x433   :  { %2630 = vrot.lane.b32.xlu0 %v9198_v16, %s9470_s13 }
 0x434   :  { %v2691_v4 = vpop.permute.xlu2 %2690  ;;  %v3006_v49 = vpop.permute.xlu1 %3005 }
 0x435   :  { %v2621_v22 = vpop.permute.xlu0 %2620 }
 0x436   :  { %2804 = vst.msk [vmem:[#allocation2 + $0x48] sm:$0xff] %vm2794_vm8, %v2621_v22 }
 0x437   :  { %3189 = vst.msk [vmem:[#allocation2 + $0x48] sm:$0xff] %vm3179_vm9, %v3006_v49  ;;  %v3271_v28 = vld [vmem:[#allocation2 + $0xd8] sm:$0xff] }
 0x438   :  { %9340 = vmatmul.msk.f32.gmra.mxu2 %vm3312_vm10, %v3271_v28  ;;  %v9155_v28 = vld [vmem:[%s15082_s0 + $0x200] sm:$0xff] }
 0x43a   :  { %2698 = vrot.lane.b32.xlu2 %v9232_v39, %s9470_s13  ;;  %2668 = vrot.lane.b32.xlu1 %v9217_v17, %s9470_s13 }
 0x43b   :  { %2313 = vrot.lane.b32.xlu0 %v9168_v26, %s9468_s20 }
 0x43c   :  { %v3076_v29 = vpop.permute.xlu2 %3075  ;;  %v2238_v55 = vpop.permute.xlu1 %2237 }
 0x43d   :  { %2420 = vst.msk [vmem:[#allocation2 + $0x50] sm:$0xff] %vm2409_vm6, %v2238_v55  ;;  %v2659_v0 = vpop.permute.xlu0 %2658  ;;  %v9264_v55 = vld [vmem:[%s15082_s0 + $0xf2] sm:$0xff] }
 0x43e   :  { %2823 = vst.msk [vmem:[#allocation2 + $0xe0] sm:$0xff] %vm2794_vm8, %v2659_v0  ;;  %v3253_v35 = vld [vmem:[#allocation2 + $0x48] sm:$0xff] }
 0x43f   :  { %3208 = vst.msk [vmem:[#allocation2 + $0xe0] sm:$0xff] %vm3179_vm9, %v3044_v23  ;;  %9322 = vmatmul.msk.f32.gmra.mxu0 %vm3312_vm10, %v3253_v35 }
 0x442   :  { %3083 = vrot.lane.b32.xlu2 %v11428_v7, %s9469_s25  ;;  %3053 = vrot.lane.b32.xlu1 %v11338_v41, %s9469_s25  ;;  %v9263_v41 = vld [vmem:[%s15082_s0 + $0xe2] sm:$0xff] }
 0x443   :  { %2247 = vrot.lane.b32.xlu0 %v9135_v48, %s9468_s20  ;;  %v9199_v7 = vld [vmem:[%s15082_s0 + $0xe1] sm:$0xff] }
 0x444   :  { %v2278_v56 = vpop.permute.xlu2 %2277  ;;  %v3008_v5 = vpop.permute.xlu1 %3007 }
 0x445   :  { %2440 = vst.msk [vmem:[#allocation2 + $0xf0] sm:$0xff] %vm2409_vm6, %v2278_v56  ;;  %v2623_v46 = vpop.permute.xlu0 %2622 }
 0x446   :  { %2805 = vst.msk [vmem:[#allocation2 + $0x50] sm:$0xff] %vm2794_vm8, %v2623_v46  ;;  %v3272_v13 = vld [vmem:[#allocation2 + $0xe0] sm:$0xff] }
 0x447   :  { %3190 = vst.msk [vmem:[#allocation2 + $0x50] sm:$0xff] %vm3179_vm9, %v3008_v5  ;;  %9341 = vmatmul.msk.f32.gmra.mxu2 %vm3312_vm10, %v3272_v13  ;;  %v9200_v5 = vld [vmem:[%s15082_s0 + $0xf1] sm:$0xff] }
 0x44a   :  { %2285 = vrot.lane.b32.xlu2 %v9154_v10, %s9468_s20  ;;  %3017 = vrot.lane.b32.xlu1 %v9263_v41, %s9469_s25 }
 0x44b   :  { %2632 = vrot.lane.b32.xlu0 %v9199_v7, %s9470_s13 }
 0x44c   :  { %v11932_v18 = vpop.permute.xlu2 %2692  ;;  %v2661_v1 = vpop.permute.xlu1 %2660 }
 0x44d   :  { %2824 = vst.msk [vmem:[#allocation2 + $0xe8] sm:$0xff] %vm2794_vm8, %v2661_v1  ;;  %v2306_v6 = vpop.permute.xlu0 %2305 }
 0x44e   :  { %2454 = vst.msk [vmem:[#allocation2 + $0x160] sm:$0xff] %vm2409_vm6, %v2306_v6  ;;  %v3254_v27 = vld [vmem:[#allocation2 + $0x50] sm:$0xff] }
 0x44f   :  { %2839 = vst.msk [vmem:[#allocation2 + $0x160] sm:$0xff] %vm2794_vm8, %v2691_v4  ;;  %9323 = vmatmul.msk.f32.gmra.mxu0 %vm3312_vm10, %v3254_v27 }
 0x450   :  { %3224 = vst.msk [vmem:[#allocation2 + $0x160] sm:$0xff] %vm3179_vm9, %v3076_v29 }
 0x452   :  { %2700 = vrot.lane.b32.xlu2 %v9233_v38, %s9470_s13  ;;  %2670 = vrot.lane.b32.xlu1 %v9218_v34, %s9470_s13 }
 0x453   :  { %2315 = vrot.lane.b32.xlu0 %v9169_v54, %s9468_s20 }
 0x454   :  { %v3526_v24 = vpop.f32.mrf.mxu0  ;;  %v11951_v51 = vpop.permute.xlu2 %3077 }
 0x455   :  { %v3782_v11 = vrot.slane %v3526_v24, 2  ;;  %v3783_v3 = vrot.slane %v3526_v24, 4  ;;  %v3784_v52 = vrot.slane %v3526_v24, 6  ;;  %v4167_v60 = vsel %vm4166_vm11, %v3526_v24, -inf  ;;  %v3046_v36 = vpop.permute.xlu1 %3045  ;;  %v2240_v59 = vpop.permute.xlu0 %2239 }
 0x456   :  { %v4168_v50 = vrot.slane %v4167_v60, 4  ;;  %3209 = vst.msk [vmem:[#allocation2 + $0xe8] sm:$0xff] %vm3179_vm9, %v3046_v36 }
 0x457   :  { %v4174_v32 = vsel %vm4166_vm11, %v3782_v11, -inf  ;;  %v4181_v12 = vsel %vm4166_vm11, %v3783_v3, -inf  ;;  %v4188_v15 = vsel %vm4166_vm11, %v3784_v52, -inf  ;;  %2421 = vst.msk [vmem:[#allocation2 + $0x58] sm:$0xff] %vm2409_vm6, %v2240_v59  ;;  %v3288_v33 = vld [vmem:[#allocation2 + $0x160] sm:$0xff] }
 0x458   :  { %v4169_v25 = vmax.f32 %v4167_v60, %v4168_v50  ;;  %v4175_v9 = vrot.slane %v4174_v32, 4  ;;  %v4182_v53 = vrot.slane %v4181_v12, 4  ;;  %v4189_v37 = vrot.slane %v4188_v15, 4  ;;  %9357 = vmatmul.msk.f32.vlgmr.msra.gmra.mxu3 %vm3312_vm10, %v3288_v33 }
 0x45a   :  { %v4170_v61 = vrot.slane %v4169_v25, 2  ;;  %v4176_v44 = vmax.f32 %v4174_v32, %v4175_v9  ;;  %v4183_v14 = vmax.f32 %v4181_v12, %v4182_v53  ;;  %v4190_v21 = vmax.f32 %v4188_v15, %v4189_v37  ;;  %3085 = vrot.lane.b32.xlu2 %v9297_v43, %s9469_s25  ;;  %3055 = vrot.lane.b32.xlu1 %v9282_v2, %s9469_s25 }
 0x45b   :  { %2249 = vrot.lane.b32.xlu0 %v9136_v20, %s9468_s20  ;;  %v9234_v20 = vld [vmem:[%s15082_s0 + $0x2b9] sm:$0xff] }
 0x45c   :  { %v4171_v63 = vmax.f32 %v4169_v25, %v4170_v61  ;;  %v4177_v45 = vrot.slane %v4176_v44, 2  ;;  %v4184_v23 = vrot.slane %v4183_v14, 2  ;;  %v4191_v42 = vrot.slane %v4190_v21, 2  ;;  %v3529_v57 = vpop.f32.mrf.mxu0  ;;  %v2280_v19 = vpop.permute.xlu2 %2279  ;;  %v9219_v61 = vld [vmem:[%s15082_s0 + $0x201] sm:$0xff] }
 0x45d   :  { %v3785_v40 = vrot.slane %v3529_v57, 2  ;;  %v3786_v47 = vrot.slane %v3529_v57, 4  ;;  %v3787_v30 = vrot.slane %v3529_v57, 6  ;;  %v4195_v31 = vsel %vm4166_vm11, %v3529_v57, -inf  ;;  %2441 = vst.msk [vmem:[#allocation2 + $0xf8] sm:$0xff] %vm2409_vm6, %v2280_v19  ;;  %v3010_v8 = vpop.permute.xlu1 %3009  ;;  %v2625_v62 = vpop.permute.xlu0 %2624  ;;  %v3273_v58 = vld [vmem:[#allocation2 + $0xe8] sm:$0xff] }
 0x45e   :  { %v4172_v16 = vrot.slane %v4171_v63, 1  ;;  %v4178_v4 = vmax.f32 %v4176_v44, %v4177_v45  ;;  %v4185_v49 = vmax.f32 %v4183_v14, %v4184_v23  ;;  %v4192_v22 = vmax.f32 %v4190_v21, %v4191_v42  ;;  %2806 = vst.msk [vmem:[#allocation2 + $0x58] sm:$0xff] %vm2794_vm8, %v2625_v62  ;;  %9342 = vmatmul.msk.f32.gmra.mxu2 %vm3312_vm10, %v3273_v58  ;;  %v9170_v45 = vld [vmem:[%s15082_s0 + $0x2b8] sm:$0xff] }
 0x45f   :  { %v4196_v39 = vrot.slane %v4195_v31, 4  ;;  %v4202_v17 = vsel %vm4166_vm11, %v3785_v40, -inf  ;;  %v4209_v26 = vsel %vm4166_vm11, %v3786_v47, -inf  ;;  %v4216_v29 = vsel %vm4166_vm11, %v3787_v30, -inf  ;;  %3191 = vst.msk [vmem:[#allocation2 + $0x58] sm:$0xff] %vm3179_vm9, %v3010_v8 }
 0x460   :  { %v4173_v0 = vmax.f32 %v4171_v63, %v4172_v16  ;;  %v4179_v35 = vrot.slane %v4178_v4, 1  ;;  %v4186_v48 = vrot.slane %v4185_v49, 1  ;;  %v4193_v56 = vrot.slane %v4192_v22, 1 }
 0x461   :  { %v4197_v46 = vmax.f32 %v4195_v31, %v4196_v39  ;;  %v4203_v13 = vrot.slane %v4202_v17, 4  ;;  %v4210_v10 = vrot.slane %v4209_v26, 4  ;;  %v4217_v41 = vrot.slane %v4216_v29, 4 }
 0x462   :  { %2287 = vrot.lane.b32.xlu2 %v9155_v28, %s9468_s20  ;;  %3019 = vrot.lane.b32.xlu1 %v9264_v55, %s9469_s25  ;;  %v4180_v38 = vmax.f32 %v4178_v4, %v4179_v35  ;;  %v4187_v34 = vmax.f32 %v4185_v49, %v4186_v48  ;;  %v4194_v54 = vmax.f32 %v4192_v22, %v4193_v56  ;;  %v11993_v24 = vsel %vm5959_vm12, %v4173_v0, -inf }
 0x463   :  { %v4198_v7 = vrot.slane %v4197_v46, 2  ;;  %v4204_v1 = vmax.f32 %v4202_v17, %v4203_v13  ;;  %v4211_v6 = vmax.f32 %v4209_v26, %v4210_v10  ;;  %v4218_v27 = vmax.f32 %v4216_v29, %v4217_v41  ;;  %2634 = vrot.lane.b32.xlu0 %v9200_v5, %s9470_s13 }
 0x464   :  { %v3532_v11 = vpop.f32.mrf.mxu0  ;;  %v11995_v3 = vpop.permute.xlu2 %2694  ;;  %v12023_v8 = vsel %vm5959_vm12, %v4187_v34, -inf  ;;  %v12029_v39 = vsel %vm5959_vm12, %v4194_v54, -inf  ;;  %v9137_v54 = vld [vmem:[%s15082_s0 + $0xf8] sm:$0xff] }
 0x465   :  { %v4199_v52 = vmax.f32 %v4197_v46, %v4198_v7  ;;  %v4205_v60 = vrot.slane %v4204_v1, 2  ;;  %v4212_v36 = vrot.slane %v4211_v6, 2  ;;  %v4219_v59 = vrot.slane %v4218_v27, 2  ;;  %v2663_v50 = vpop.permute.xlu1 %2662  ;;  %v2308_v43 = vpop.permute.xlu0 %2307  ;;  %v9298_v46 = vld [vmem:[%s15082_s0 + $0x2ba] sm:$0xff] }
 0x466   :  { %v3788_v32 = vrot.slane %v3532_v11, 2  ;;  %v3789_v12 = vrot.slane %v3532_v11, 4  ;;  %v3790_v15 = vrot.slane %v3532_v11, 6  ;;  %v4223_v2 = vsel %vm4166_vm11, %v3532_v11, -inf  ;;  %2825 = vst.msk [vmem:[#allocation2 + $0xf0] sm:$0xff] %vm2794_vm8, %v2663_v50  ;;  %v3255_v33 = vld [vmem:[#allocation2 + $0x58] sm:$0xff] }
 0x467   :  { %v4200_v25 = vrot.slane %v4199_v52, 1  ;;  %v4206_v9 = vmax.f32 %v4204_v1, %v4205_v60  ;;  %v4213_v53 = vmax.f32 %v4211_v6, %v4212_v36  ;;  %v4220_v37 = vmax.f32 %v4218_v27, %v4219_v59  ;;  %2455 = vst.msk [vmem:[#allocation2 + $0x168] sm:$0xff] %vm2409_vm6, %v2308_v43  ;;  %9324 = vmatmul.msk.f32.gmra.mxu0 %vm3312_vm10, %v3255_v33  ;;  %v9283_v1 = vld [vmem:[%s15082_s0 + $0x202] sm:$0xff] }
 0x468   :  { %v4224_v44 = vrot.slane %v4223_v2, 4  ;;  %v4230_v14 = vsel %vm4166_vm11, %v3788_v32, -inf  ;;  %v4237_v21 = vsel %vm4166_vm11, %v3789_v12, -inf  ;;  %v4244_v63 = vsel %vm4166_vm11, %v3790_v15, -inf  ;;  %2840 = vst.msk [vmem:[#allocation2 + $0x168] sm:$0xff] %vm2794_vm8, %v11932_v18 }
 0x469   :  { %v4201_v23 = vmax.f32 %v4199_v52, %v4200_v25  ;;  %v4207_v42 = vrot.slane %v4206_v9, 1  ;;  %v4214_v57 = vrot.slane %v4213_v53, 1  ;;  %v4221_v19 = vrot.slane %v4220_v37, 1  ;;  %3225 = vst.msk [vmem:[#allocation2 + $0x168] sm:$0xff] %vm3179_vm9, %v11951_v51 }
 0x46a   :  { %v4225_v40 = vmax.f32 %v4223_v2, %v4224_v44  ;;  %v4231_v47 = vrot.slane %v4230_v14, 4  ;;  %v4238_v30 = vrot.slane %v4237_v21, 4  ;;  %v4245_v31 = vrot.slane %v4244_v63, 4  ;;  %2702 = vrot.lane.b32.xlu2 %v9234_v20, %s9470_s13  ;;  %2672 = vrot.lane.b32.xlu1 %v9219_v61, %s9470_s13 }
 0x46b   :  { %v12020_v18 = vsel %vm5959_vm12, %v4180_v38, -inf  ;;  %v4208_v62 = vmax.f32 %v4206_v9, %v4207_v42  ;;  %v4215_v58 = vmax.f32 %v4213_v53, %v4214_v57  ;;  %2317 = vrot.lane.b32.xlu0 %v9170_v45, %s9468_s20  ;;  %v4222_v17 = vmax.f32 %v4220_v37, %v4221_v19 }
 0x46c   :  { %v4226_v16 = vrot.slane %v4225_v40, 2  ;;  %v4232_v51 = vmax.f32 %v4230_v14, %v4231_v47  ;;  %v4239_v4 = vmax.f32 %v4237_v21, %v4238_v30  ;;  %v4246_v49 = vmax.f32 %v4244_v63, %v4245_v31  ;;  %v3535_v22 = vpop.f32.mrf.mxu0  ;;  %v12026_v28 = vpop.permute.xlu2 %3079  ;;  %v12064_v14 = vld [vmem:[%s15084_s2] ss:$0 sm:$0xff] }
 0x46d   :  { %v12032_v26 = vsel %vm5959_vm12, %v4201_v23, -inf  ;;  %v12035_v29 = vsel %vm5959_vm12, %v4208_v62, -inf  ;;  %v3048_v55 = vpop.permute.xlu1 %3047  ;;  %v2242_v0 = vpop.permute.xlu0 %2241  ;;  %v12042_v13 = vsel %vm5959_vm12, %v4215_v58, -inf  ;;  %v3791_v10 = vrot.slane %v3535_v22, 2 }
 0x46e   :  { %v4227_v35 = vmax.f32 %v4225_v40, %v4226_v16  ;;  %v4233_v48 = vrot.slane %v4232_v51, 2  ;;  %v4240_v56 = vrot.slane %v4239_v4, 2  ;;  %v4247_v5 = vrot.slane %v4246_v49, 2  ;;  %3210 = vst.msk [vmem:[#allocation2 + $0xf0] sm:$0xff] %vm3179_vm9, %v3048_v55  ;;  %v9156_v16 = vld [vmem:[%s15082_s0 + $0x210] sm:$0xff] }
 0x46f   :  { %v3792_v41 = vrot.slane %v3535_v22, 4  ;;  %v3793_v7 = vrot.slane %v3535_v22, 6  ;;  %2422 = vst.msk [vmem:[#allocation2 + $0x60] sm:$0xff] %vm2409_vm6, %v2242_v0  ;;  %v4251_v52 = vsel %vm4166_vm11, %v3535_v22, -inf  ;;  %v4258_v60 = vsel %vm4166_vm11, %v3791_v10, -inf }
 0x470   :  { %v4228_v6 = vrot.slane %v4227_v35, 1  ;;  %v4234_v27 = vmax.f32 %v4232_v51, %v4233_v48  ;;  %v4241_v38 = vmax.f32 %v4239_v4, %v4240_v56  ;;  %v4248_v34 = vmax.f32 %v4246_v49, %v4247_v5  ;;  %v3289_v11 = vld [vmem:[#allocation2 + $0x168] sm:$0xff] }
 0x471   :  { %v4265_v36 = vsel %vm4166_vm11, %v3792_v41, -inf  ;;  %v4272_v59 = vsel %vm4166_vm11, %v3793_v7, -inf  ;;  %9358 = vmatmul.msk.f32.gmra.mxu3 %vm3312_vm10, %v3289_v11  ;;  %v4252_v15 = vrot.slane %v4251_v52, 4  ;;  %v4259_v2 = vrot.slane %v4258_v60, 4 }
 0x472   :  { %v4229_v50 = vmax.f32 %v4227_v35, %v4228_v6  ;;  %v4235_v43 = vrot.slane %v4234_v27, 1  ;;  %v4242_v32 = vrot.slane %v4241_v38, 1  ;;  %v4249_v12 = vrot.slane %v4248_v34, 1  ;;  %3087 = vrot.lane.b32.xlu2 %v9298_v46, %s9469_s25  ;;  %3057 = vrot.lane.b32.xlu1 %v9283_v1, %s9469_s25 }
 0x473   :  { %v4266_v33 = vrot.slane %v4265_v36, 4  ;;  %v4273_v25 = vrot.slane %v4272_v59, 4  ;;  %2251 = vrot.lane.b32.xlu0 %v9137_v54, %s9468_s20  ;;  %v4253_v21 = vmax.f32 %v4251_v52, %v4252_v15  ;;  %v4260_v63 = vmax.f32 %v4258_v60, %v4259_v2 }
 0x474   :  { %v4236_v9 = vmax.f32 %v4234_v27, %v4235_v43  ;;  %v4243_v53 = vmax.f32 %v4241_v38, %v4242_v32  ;;  %v4250_v37 = vmax.f32 %v4248_v34, %v4249_v12  ;;  %v5961_v20 = vsel %vm5959_vm12, %v4229_v50, -inf  ;;  %v2282_v61 = vpop.permute.xlu2 %2281  ;;  %v3538_v38 = vpop.f32.mrf.mxu0 }
 0x475   :  { %v5962_v44 = vmax.f32 %v11993_v24, %v5961_v20  ;;  %v4267_v45 = vmax.f32 %v4265_v36, %v4266_v33  ;;  %2442 = vst.msk [vmem:[#allocation2 + $0x100] sm:$0xff] %vm2409_vm6, %v2282_v61  ;;  %v3012_v23 = vpop.permute.xlu1 %3011  ;;  %v2627_v42 = vpop.permute.xlu0 %2626  ;;  %v3274_v57 = vld [vmem:[#allocation2 + $0xf0] sm:$0xff]  ;;  %v4274_v24 = vmax.f32 %v4272_v59, %v4273_v25  ;;  %v12073_v30 = vsel %vm5959_vm12, %v4222_v17, -inf  ;;  %v9265_v17 = vld [vmem:[%s15082_s0 + $0xfa] sm:$0xff] }
 0x476   :  { %v5964_v19 = vsel %vm5959_vm12, %v4236_v9, -inf  ;;  %v5967_v40 = vsel %vm5959_vm12, %v4243_v53, -inf  ;;  %v5970_v47 = vsel %vm5959_vm12, %v4250_v37, -inf  ;;  %2807 = vst.msk [vmem:[#allocation2 + $0x60] sm:$0xff] %vm2794_vm8, %v2627_v42  ;;  %9343 = vmatmul.msk.f32.gmra.mxu2 %vm3312_vm10, %v3274_v57  ;;  %v4254_v51 = vrot.slane %v4253_v21, 2  ;;  %v9235_v25 = vld [vmem:[%s15082_s0 + $0x2c1] sm:$0xff] }
 0x477   :  { %v5965_v31 = vmax.f32 %v12020_v18, %v5964_v19  ;;  %v5968_v62 = vmax.f32 %v12023_v8, %v5967_v40  ;;  %v5971_v58 = vmax.f32 %v12029_v39, %v5970_v47  ;;  %3192 = vst.msk [vmem:[#allocation2 + $0x60] sm:$0xff] %vm3179_vm9, %v3012_v23  ;;  %v4261_v4 = vrot.slane %v4260_v63, 2  ;;  %v9201_v18 = vld [vmem:[%s15082_s0 + $0xf9] sm:$0xff]  ;;  %v9220_v61 = vld [vmem:[%s15082_s0 + $0x211] sm:$0xff] }
 0x478   :  { %v4268_v49 = vrot.slane %v4267_v45, 2  ;;  %v4275_v22 = vrot.slane %v4274_v24, 2  ;;  %v6348_v8 = vadd.f32 %v12064_v14, %v5962_v44  ;;  %v4255_v35 = vmax.f32 %v4253_v21, %v4254_v51  ;;  %v9171_v23 = vld [vmem:[%s15082_s0 + $0x2c0] sm:$0xff] }
 0x479   :  { %v6349_v39 = vadd.f32 %v12064_v14, %v5965_v31  ;;  %v6350_v55 = vadd.f32 %v12064_v14, %v5968_v62  ;;  %v6351_v0 = vadd.f32 %v12064_v14, %v5971_v58  ;;  %v4262_v48 = vmax.f32 %v4260_v63, %v4261_v4 }
 0x47a   :  { %v4269_v56 = vmax.f32 %v4267_v45, %v4268_v49  ;;  %v4276_v5 = vmax.f32 %v4274_v24, %v4275_v22  ;;  %2289 = vrot.lane.b32.xlu2 %v9156_v16, %s9468_s20  ;;  %3021 = vrot.lane.b32.xlu1 %v9265_v17, %s9469_s25  ;;  %v4256_v7 = vrot.slane %v4255_v35, 1  ;;  %v6476_v54 = vmax.f32 %v6348_v8, 0.0 }
 0x47b   :  { %v6477_v46 = vmax.f32 %v6349_v39, 0.0  ;;  %v6478_v10 = vmax.f32 %v6350_v55, 0.0  ;;  %v6479_v41 = vmax.f32 %v6351_v0, 0.0  ;;  %2636 = vrot.lane.b32.xlu0 %v9201_v18, %s9470_s13  ;;  %v4263_v1 = vrot.slane %v4262_v48, 1 }
 0x47c   :  { %v4270_v6 = vrot.slane %v4269_v56, 1  ;;  %v4277_v27 = vrot.slane %v4276_v5, 1  ;;  %v12095_v34 = vpop.permute.xlu2 %2696  ;;  %v4257_v59 = vmax.f32 %v4255_v35, %v4256_v7  ;;  %v3794_v33 = vrot.slane %v3538_v38, 2  ;;  %v3541_v39 = vpop.f32.mrf.mxu0 }
 0x47d   :  { %v6782_v11 = vrot.slane %v6477_v46, 7  ;;  %v6785_v52 = vrot.slane %v6478_v10, 6  ;;  %v2665_v60 = vpop.permute.xlu1 %2664  ;;  %v2310_v36 = vpop.permute.xlu0 %2309  ;;  %v4264_v50 = vmax.f32 %v4262_v48, %v4263_v1  ;;  %v6788_v2 = vrot.slane %v6479_v41, 5  ;;  %v9284_v1 = vld [vmem:[%s15082_s0 + $0x212] sm:$0xff] }
 0x47e   :  { %v4271_v43 = vmax.f32 %v4269_v56, %v4270_v6  ;;  %v4278_v32 = vmax.f32 %v4276_v5, %v4277_v27  ;;  %2826 = vst.msk [vmem:[#allocation2 + $0xf8] sm:$0xff] %vm2794_vm8, %v2665_v60  ;;  %v3256_v12 = vld [vmem:[#allocation2 + $0x60] sm:$0xff]  ;;  %v5973_v53 = vsel %vm5959_vm12, %v4257_v59, -inf  ;;  %v3795_v42 = vrot.slane %v3538_v38, 4 }
 0x47f   :  { %v6784_v15 = vsel %vm15097_vm13, %v6782_v11, %v6476_v54  ;;  %2456 = vst.msk [vmem:[#allocation2 + $0x170] sm:$0xff] %vm2409_vm6, %v2310_v36  ;;  %9325 = vmatmul.msk.f32.gmra.mxu0 %vm3312_vm10, %v3256_v12  ;;  %v5976_v37 = vsel %vm5959_vm12, %v4264_v50, -inf  ;;  %v5974_v21 = vmax.f32 %v12032_v26, %v5973_v53  ;;  %v3796_v57 = vrot.slane %v3538_v38, 6  ;;  %v9299_v56 = vld [vmem:[%s15082_s0 + $0x2c2] sm:$0xff] }
 0x480   :  { %v6787_v9 = vsel %vm15096_vm14, %v6785_v52, %v6784_v15  ;;  %v5979_v20 = vsel %vm5959_vm12, %v4271_v43, -inf  ;;  %2841 = vst.msk [vmem:[#allocation2 + $0x170] sm:$0xff] %vm2794_vm8, %v11995_v3  ;;  %v5977_v63 = vmax.f32 %v12035_v29, %v5976_v37  ;;  %v5982_v3 = vsel %vm5959_vm12, %v4278_v32, -inf  ;;  %v9138_v54 = vld [vmem:[%s15082_s0 + $0x108] sm:$0xff] }
 0x481   :  { %v6790_v44 = vsel %vm15095_vm15, %v6788_v2, %v6787_v9  ;;  %v5980_v45 = vmax.f32 %v12042_v13, %v5979_v20  ;;  %3226 = vst.msk [vmem:[#allocation2 + $0x170] sm:$0xff] %vm3179_vm9, %v12026_v28  ;;  %v4279_v19 = vsel %vm4166_vm11, %v3538_v38, -inf  ;;  %v5983_v26 = vmax.f32 %v12073_v30, %v5982_v3 }
 0x482   :  { %2704 = vrot.lane.b32.xlu2 %v9235_v25, %s9470_s13  ;;  %v6352_v29 = vadd.f32 %v12064_v14, %v5974_v21  ;;  %v6353_v13 = vadd.f32 %v12064_v14, %v5977_v63  ;;  %2674 = vrot.lane.b32.xlu1 %v9220_v61, %s9470_s13  ;;  %v4280_v40 = vrot.slane %v4279_v19, 4  ;;  %v4286_v47 = vsel %vm4166_vm11, %v3794_v33, -inf }
 0x483   :  { %v6354_v28 = vadd.f32 %v12064_v14, %v5980_v45  ;;  %v4293_v24 = vsel %vm4166_vm11, %v3795_v42, -inf  ;;  %v4300_v31 = vsel %vm4166_vm11, %v3796_v57, -inf  ;;  %2319 = vrot.lane.b32.xlu0 %v9171_v23, %s9468_s20  ;;  %v6355_v30 = vadd.f32 %v12064_v14, %v5983_v26  ;;  %v9141_v42 = vld [vmem:[%s15082_s0 + $0x128] sm:$0xff] }
 0x484   :  { %v12134_v62 = vpop.permute.xlu2 %3081  ;;  %v6480_v58 = vmax.f32 %v6352_v29, 0.0  ;;  %v6481_v16 = vmax.f32 %v6353_v13, 0.0  ;;  %v4281_v22 = vmax.f32 %v4279_v19, %v4280_v40  ;;  %v4287_v17 = vrot.slane %v4286_v47, 4  ;;  %v9266_v19 = vld [vmem:[%s15082_s0 + $0x10a] sm:$0xff] }
 0x485   :  { %v6482_v51 = vmax.f32 %v6354_v28, 0.0  ;;  %v3050_v4 = vpop.permute.xlu1 %3049  ;;  %v2244_v49 = vpop.permute.xlu0 %2243  ;;  %v4294_v18 = vrot.slane %v4293_v24, 4  ;;  %v4301_v8 = vrot.slane %v4300_v31, 4  ;;  %v6483_v55 = vmax.f32 %v6355_v30, 0.0  ;;  %v9202_v28 = vld [vmem:[%s15082_s0 + $0x109] sm:$0xff] }
 0x486   :  { %3211 = vst.msk [vmem:[#allocation2 + $0xf8] sm:$0xff] %vm3179_vm9, %v3050_v4  ;;  %v6791_v0 = vrot.slane %v6480_v58, 4  ;;  %v6794_v35 = vrot.slane %v6481_v16, 3  ;;  %v4282_v5 = vrot.slane %v4281_v22, 2  ;;  %v4288_v46 = vmax.f32 %v4286_v47, %v4287_v17 }
 0x487   :  { %v6797_v48 = vrot.slane %v6482_v51, 2  ;;  %2423 = vst.msk [vmem:[#allocation2 + $0x68] sm:$0xff] %vm2409_vm6, %v2244_v49  ;;  %v4295_v10 = vmax.f32 %v4293_v24, %v4294_v18  ;;  %v4302_v41 = vmax.f32 %v4300_v31, %v4301_v8  ;;  %v3797_v27 = vrot.slane %v3541_v39, 2 }
 0x488   :  { %v3290_v7 = vld [vmem:[#allocation2 + $0x170] sm:$0xff]  ;;  %v6793_v6 = vsel %vm6792_vm0, %v6791_v0, %v6790_v44  ;;  %v3798_v38 = vrot.slane %v3541_v39, 4  ;;  %v6800_v52 = vrot.slane %v6483_v55, 1  ;;  %v4289_v60 = vrot.slane %v4288_v46, 2 }
 0x489   :  { %9359 = vmatmul.msk.f32.gmra.mxu3 %vm3312_vm10, %v3290_v7  ;;  %v6796_v11 = vsel %vm6795_vm1, %v6794_v35, %v6793_v6  ;;  %v4296_v59 = vrot.slane %v4295_v10, 2  ;;  %v3799_v50 = vrot.slane %v3541_v39, 6  ;;  %v4307_v43 = vsel %vm4166_vm11, %v3541_v39, -inf  ;;  %v9172_v7 = vld [vmem:[%s15082_s0 + $0x2d0] sm:$0xff] }
 0x48a   :  { %3089 = vrot.lane.b32.xlu2 %v9299_v56, %s9469_s25  ;;  %v6799_v36 = vsel %vm6798_vm2, %v6797_v48, %v6796_v11  ;;  %3059 = vrot.lane.b32.xlu1 %v9284_v1, %s9469_s25  ;;  %v4283_v12 = vmax.f32 %v4281_v22, %v4282_v5  ;;  %v4303_v15 = vrot.slane %v4302_v41, 2  ;;  %v4290_v33 = vmax.f32 %v4288_v46, %v4289_v60 }
 0x48b   :  { %v6802_v32 = vsel %vm15100_vm3, %v6800_v52, %v6799_v36  ;;  %2253 = vrot.lane.b32.xlu0 %v9138_v54, %s9468_s20  ;;  %v4308_v25 = vrot.slane %v4307_v43, 4  ;;  %v4314_v9 = vsel %vm4166_vm11, %v3797_v27, -inf  ;;  %v4321_v53 = vsel %vm4166_vm11, %v3798_v38, -inf  ;;  %v3598_v11 = vpop.f32.mrf.mxu2  ;;  %v9157_v52 = vld [vmem:[%s15082_s0 + $0x218] sm:$0xff] }
 0x48c   :  { %v2284_v2 = vpop.permute.xlu2 %2283  ;;  %7030 = vst.msk [vmem:[#allocation3 + $0x11] sm:$0xff] %vm5959_vm12, %v6802_v32  ;;  %v4315_v44 = vrot.slane %v4314_v9, 4  ;;  %v4297_v21 = vmax.f32 %v4295_v10, %v4296_v59  ;;  %v4322_v45 = vrot.slane %v4321_v53, 4  ;;  %v4328_v23 = vsel %vm4166_vm11, %v3799_v50, -inf  ;;  %v3544_v3 = vpop.f32.mrf.mxu0 }
 0x48d   :  { %v3014_v37 = vpop.permute.xlu1 %3013  ;;  %v2629_v20 = vpop.permute.xlu0 %2628  ;;  %v3275_v61 = vld [vmem:[#allocation2 + $0xf8] sm:$0xff]  ;;  %2443 = vst.msk [vmem:[#allocation2 + $0x108] sm:$0xff] %vm2409_vm6, %v2284_v2  ;;  %v4309_v63 = vmax.f32 %v4307_v43, %v4308_v25  ;;  %v4284_v57 = vrot.slane %v4283_v12, 1  ;;  %v4291_v26 = vrot.slane %v4290_v33, 1  ;;  %v4304_v29 = vmax.f32 %v4302_v41, %v4303_v15 }
 0x48e   :  { %9344 = vmatmul.msk.f32.gmra.mxu2 %vm3312_vm10, %v3275_v61  ;;  %2808 = vst.msk [vmem:[#allocation2 + $0x68] sm:$0xff] %vm2794_vm8, %v2629_v20  ;;  %v4329_v13 = vrot.slane %v4328_v23, 4  ;;  %v4316_v40 = vmax.f32 %v4314_v9, %v4315_v44  ;;  %v3800_v47 = vrot.slane %v3544_v3, 2  ;;  %v4298_v24 = vrot.slane %v4297_v21, 1 }
 0x48f   :  { %3193 = vst.msk [vmem:[#allocation2 + $0x68] sm:$0xff] %vm3179_vm9, %v3014_v37  ;;  %v4310_v31 = vrot.slane %v4309_v63, 2  ;;  %v4323_v30 = vmax.f32 %v4321_v53, %v4322_v45  ;;  %v4285_v58 = vmax.f32 %v4283_v12, %v4284_v57  ;;  %v3801_v16 = vrot.slane %v3544_v3, 4 }
 0x490   :  { %v3802_v51 = vrot.slane %v3544_v3, 6  ;;  %v4335_v4 = vsel %vm4166_vm11, %v3544_v3, -inf  ;;  %v4292_v22 = vmax.f32 %v4290_v33, %v4291_v26  ;;  %v4305_v17 = vrot.slane %v4304_v29, 1 }
 0x491   :  { %v4330_v18 = vmax.f32 %v4328_v23, %v4329_v13  ;;  %v4336_v8 = vrot.slane %v4335_v4, 4  ;;  %v4317_v0 = vrot.slane %v4316_v40, 2  ;;  %v4342_v35 = vsel %vm4166_vm11, %v3800_v47, -inf  ;;  %v9236_v47 = vld [vmem:[%s15082_s0 + $0x2d1] sm:$0xff] }
 0x492   :  { %2259 = vrot.lane.b32.xlu2 %v9141_v42, %s9468_s20  ;;  %3023 = vrot.lane.b32.xlu1 %v9266_v19, %s9469_s25  ;;  %v4349_v48 = vsel %vm4166_vm11, %v3801_v16, -inf  ;;  %v4356_v56 = vsel %vm4166_vm11, %v3802_v51, -inf  ;;  %v12184_v5 = vmax.f32 %v4297_v21, %v4298_v24  ;;  %v12186_v46 = vmax.f32 %v4309_v63, %v4310_v31  ;;  %v9221_v51 = vld [vmem:[%s15082_s0 + $0x219] sm:$0xff] }
 0x493   :  { %2638 = vrot.lane.b32.xlu0 %v9202_v28, %s9470_s13  ;;  %v4324_v10 = vrot.slane %v4323_v30, 2  ;;  %v4337_v41 = vmax.f32 %v4335_v4, %v4336_v8  ;;  %v12193_v6 = vsel %vm5959_vm12, %v4285_v58, -inf  ;;  %v4343_v27 = vrot.slane %v4342_v35, 4  ;;  %v9269_v8 = vld [vmem:[%s15082_s0 + $0x12a] sm:$0xff] }
 0x494   :  { %v12178_v49 = vpop.permute.xlu2 %2698  ;;  %v4350_v38 = vrot.slane %v4349_v48, 4  ;;  %v4357_v54 = vrot.slane %v4356_v56, 4  ;;  %v12201_v60 = vmax.f32 %v4304_v29, %v4305_v17  ;;  %v12204_v36 = vsel %vm5959_vm12, %v4292_v22, -inf }
 0x495   :  { %v2667_v39 = vpop.permute.xlu1 %2666  ;;  %v2312_v55 = vpop.permute.xlu0 %2311  ;;  %v4331_v59 = vrot.slane %v4330_v18, 2  ;;  %v4338_v50 = vrot.slane %v4337_v41, 2  ;;  %v12211_v43 = vmax.f32 %v4316_v40, %v4317_v0  ;;  %v4344_v32 = vmax.f32 %v4342_v35, %v4343_v27 }
 0x496   :  { %2827 = vst.msk [vmem:[#allocation2 + $0x100] sm:$0xff] %vm2794_vm8, %v2667_v39  ;;  %v3257_v1 = vld [vmem:[#allocation2 + $0x68] sm:$0xff]  ;;  %v4351_v12 = vmax.f32 %v4349_v48, %v4350_v38  ;;  %v4358_v15 = vmax.f32 %v4356_v56, %v4357_v54  ;;  %v4312_v2 = vrot.slane %v12186_v46, 1  ;;  %v12215_v33 = vmax.f32 %v4323_v30, %v4324_v10 }
 0x497   :  { %2457 = vst.msk [vmem:[#allocation2 + $0x178] sm:$0xff] %vm2409_vm6, %v2312_v55  ;;  %9326 = vmatmul.msk.f32.gmra.mxu0 %vm3312_vm10, %v3257_v1  ;;  %v4339_v25 = vmax.f32 %v4337_v41, %v4338_v50  ;;  %v3854_v9 = vrot.slane %v3598_v11, 2  ;;  %v3855_v20 = vrot.slane %v3598_v11, 4  ;;  %v12221_v44 = vmax.f32 %v4330_v18, %v4331_v59 }
 0x498   :  { %2842 = vst.msk [vmem:[#allocation2 + $0x178] sm:$0xff] %vm2794_vm8, %v12095_v34  ;;  %v9205_v34 = vld [vmem:[%s15082_s0 + $0x129] sm:$0xff]  ;;  %v4352_v53 = vrot.slane %v4351_v12, 2  ;;  %v4359_v37 = vrot.slane %v4358_v15, 2  ;;  %v3856_v63 = vrot.slane %v3598_v11, 6  ;;  %v4839_v45 = vsel %vm4166_vm11, %v3598_v11, -inf }
 0x499   :  { %3227 = vst.msk [vmem:[#allocation2 + $0x178] sm:$0xff] %vm3179_vm9, %v12134_v62  ;;  %v4345_v62 = vrot.slane %v4344_v32, 2  ;;  %v4340_v21 = vrot.slane %v4339_v25, 1  ;;  %v4840_v26 = vrot.slane %v4839_v45, 4  ;;  %v4846_v13 = vsel %vm4166_vm11, %v3854_v9, -inf }
 0x49a   :  { %2321 = vrot.lane.b32.xlu2 %v9172_v7, %s9468_s20  ;;  %2291 = vrot.lane.b32.xlu1 %v9157_v52, %s9468_s20  ;;  %v4353_v57 = vmax.f32 %v4351_v12, %v4352_v53  ;;  %v4360_v19 = vmax.f32 %v4358_v15, %v4359_v37  ;;  %v4853_v28 = vsel %vm4166_vm11, %v3855_v20, -inf  ;;  %v4860_v40 = vsel %vm4166_vm11, %v3856_v63, -inf  ;;  %v9139_v63 = vld [vmem:[%s15082_s0 + $0x110] sm:$0xff] }
 0x49b   :  { %2644 = vrot.lane.b32.xlu0 %v9205_v34, %s9470_s13  ;;  %v4346_v42 = vmax.f32 %v4344_v32, %v4345_v62  ;;  %v4341_v29 = vmax.f32 %v4339_v25, %v4340_v21  ;;  %v4841_v58 = vmax.f32 %v4839_v45, %v4840_v26  ;;  %v4847_v22 = vrot.slane %v4846_v13, 4 }
 0x49c   :  { %v12219_v61 = vpop.permute.xlu2 %3083  ;;  %v4354_v31 = vrot.slane %v4353_v57, 1  ;;  %v4361_v30 = vrot.slane %v4360_v19, 1  ;;  %v4854_v17 = vrot.slane %v4853_v28, 4  ;;  %v4861_v18 = vrot.slane %v4860_v40, 4  ;;  %v3547_v9 = vpop.f32.mrf.mxu0 }
 0x49d   :  { %v3052_v23 = vpop.permute.xlu1 %3051  ;;  %v2246_v3 = vpop.permute.xlu0 %2245  ;;  %v4347_v24 = vrot.slane %v4346_v42, 1  ;;  %v5985_v4 = vsel %vm5959_vm12, %v4341_v29, -inf  ;;  %v4319_v39 = vrot.slane %v12211_v43, 1  ;;  %v4326_v48 = vrot.slane %v12215_v33, 1 }
 0x49e   :  { %3212 = vst.msk [vmem:[#allocation2 + $0x100] sm:$0xff] %vm3179_vm9, %v3052_v23  ;;  %v4355_v0 = vmax.f32 %v4353_v57, %v4354_v31  ;;  %v4362_v35 = vmax.f32 %v4360_v19, %v4361_v30  ;;  %v4333_v56 = vrot.slane %v12221_v44, 1  ;;  %v5986_v10 = vmax.f32 %v12193_v6, %v5985_v4 }
 0x49f   :  { %2424 = vst.msk [vmem:[#allocation2 + $0x70] sm:$0xff] %vm2409_vm6, %v2246_v3  ;;  %v4348_v55 = vmax.f32 %v4346_v42, %v4347_v24  ;;  %v4842_v41 = vrot.slane %v4841_v58, 2  ;;  %v4848_v38 = vmax.f32 %v4846_v13, %v4847_v22  ;;  %v5990_v11 = vsel %vm5959_vm12, %v12184_v5, -inf }
 0x4a0   :  { %v3291_v16 = vld [vmem:[#allocation2 + $0x178] sm:$0xff]  ;;  %v5991_v1 = vsel %vm5959_vm12, %v4355_v0, -inf  ;;  %v5994_v27 = vsel %vm5959_vm12, %v4362_v35, -inf  ;;  %v5993_v52 = vsel %vm5959_vm12, %v12201_v60, -inf  ;;  %v4855_v6 = vmax.f32 %v4853_v28, %v4854_v17 }
 0x4a1   :  { %9360 = vmatmul.msk.f32.gmra.mxu3 %vm3312_vm10, %v3291_v16  ;;  %v5988_v7 = vsel %vm5959_vm12, %v4348_v55, -inf  ;;  %v4862_v59 = vmax.f32 %v4860_v40, %v4861_v18  ;;  %v5992_v15 = vmax.f32 %v5990_v11, %v5991_v1  ;;  %v5995_v25 = vmax.f32 %v5993_v52, %v5994_v27  ;;  %v9267_v27 = vld [vmem:[%s15082_s0 + $0x112] sm:$0xff] }
 0x4a2   :  { %2706 = vrot.lane.b32.xlu2 %v9236_v47, %s9470_s13  ;;  %2676 = vrot.lane.b32.xlu1 %v9221_v51, %s9470_s13  ;;  %v5989_v12 = vmax.f32 %v12204_v36, %v5988_v7  ;;  %v4313_v5 = vmax.f32 %v12186_v46, %v4312_v2  ;;  %v4320_v60 = vmax.f32 %v12211_v43, %v4319_v39  ;;  %v9300_v36 = vld [vmem:[%s15082_s0 + $0x2d2] sm:$0xff]  ;;  %v4849_v21 = vrot.slane %v4848_v38, 2  ;;  %v9285_v46 = vld [vmem:[%s15082_s0 + $0x21a] sm:$0xff]  ;;  %v3601_v47 = vpop.f32.mrf.mxu2 }
 0x4a3   :  { %3029 = vrot.lane.b32.xlu0 %v9269_v8, %s9469_s25  ;;  %v4327_v62 = vmax.f32 %v12215_v33, %v4326_v48  ;;  %v4843_v53 = vmax.f32 %v4841_v58, %v4842_v41  ;;  %v4334_v37 = vmax.f32 %v12221_v44, %v4333_v56  ;;  %v12269_v20 = vadd.f32 %v12064_v14, %v5986_v10  ;;  %v9142_v56 = vld [vmem:[%s15082_s0 + $0x138] sm:$0xff] }
 0x4a4   :  { %v2286_v54 = vpop.permute.xlu2 %2285  ;;  %v4856_v43 = vrot.slane %v4855_v6, 2  ;;  %v4863_v2 = vrot.slane %v4862_v59, 2  ;;  %v3803_v33 = vrot.slane %v3547_v9, 2  ;;  %v6357_v45 = vadd.f32 %v12064_v14, %v5989_v12 }
 0x4a5   :  { %2444 = vst.msk [vmem:[#allocation2 + $0x110] sm:$0xff] %vm2409_vm6, %v2286_v54  ;;  %v3016_v50 = vpop.permute.xlu1 %3015  ;;  %v2631_v34 = vpop.permute.xlu0 %2630  ;;  %v3276_v32 = vld [vmem:[#allocation2 + $0x100] sm:$0xff]  ;;  %v12279_v23 = vadd.f32 %v12064_v14, %v5992_v15  ;;  %v12282_v44 = vadd.f32 %v12064_v14, %v5995_v25  ;;  %v3804_v3 = vrot.slane %v3547_v9, 4  ;;  %v12286_v42 = vsel %vm5959_vm12, %v4313_v5, -inf }
 0x4a6   :  { %2809 = vst.msk [vmem:[#allocation2 + $0x70] sm:$0xff] %vm2794_vm8, %v2631_v34  ;;  %9345 = vmatmul.msk.f32.gmra.mxu2 %vm3312_vm10, %v3276_v32  ;;  %v12289_v57 = vsel %vm5959_vm12, %v4320_v60, -inf  ;;  %v12292_v19 = vsel %vm5959_vm12, %v4327_v62, -inf  ;;  %v4844_v26 = vrot.slane %v4843_v53, 1  ;;  %v12296_v29 = vsel %vm5959_vm12, %v4334_v37, -inf }
 0x4a7   :  { %3194 = vst.msk [vmem:[#allocation2 + $0x70] sm:$0xff] %vm3179_vm9, %v3016_v50  ;;  %v6484_v13 = vmax.f32 %v12269_v20, 0.0  ;;  %v12299_v28 = vmax.f32 %v4848_v38, %v4849_v21  ;;  %v3805_v40 = vrot.slane %v3547_v9, 6  ;;  %v12304_v31 = vmax.f32 %v4855_v6, %v4856_v43  ;;  %v9203_v6 = vld [vmem:[%s15082_s0 + $0x111] sm:$0xff] }
 0x4a8   :  { %v4363_v30 = vsel %vm4166_vm11, %v3547_v9, -inf  ;;  %v4370_v58 = vsel %vm4166_vm11, %v3803_v33, -inf  ;;  %v4377_v16 = vsel %vm4166_vm11, %v3804_v3, -inf  ;;  %v6485_v22 = vmax.f32 %v6357_v45, 0.0 }
 0x4a9   :  { %v6486_v17 = vmax.f32 %v12279_v23, 0.0  ;;  %v6487_v18 = vmax.f32 %v12282_v44, 0.0  ;;  %v12311_v8 = vmax.f32 %v4862_v59, %v4863_v2  ;;  %v12314_v55 = vmax.f32 %v4843_v53, %v4844_v26 }
 0x4aa   :  { %3091 = vrot.lane.b32.xlu2 %v9300_v36, %s9469_s25  ;;  %3061 = vrot.lane.b32.xlu1 %v9285_v46, %s9469_s25  ;;  %v4364_v0 = vrot.slane %v4363_v30, 4  ;;  %v4371_v35 = vrot.slane %v4370_v58, 4  ;;  %v4378_v48 = vrot.slane %v4377_v16, 4  ;;  %v4384_v10 = vsel %vm4166_vm11, %v3805_v40, -inf }
 0x4ab   :  { %2255 = vrot.lane.b32.xlu0 %v9139_v63, %s9468_s20  ;;  %v3857_v41 = vrot.slane %v3601_v47, 2  ;;  %v3858_v7 = vrot.slane %v3601_v47, 4  ;;  %v3859_v1 = vrot.slane %v3601_v47, 6  ;;  %v4385_v52 = vrot.slane %v4384_v10, 4 }
 0x4ac   :  { %v12302_v24 = vpop.permute.xlu2 %2700  ;;  %v4365_v38 = vmax.f32 %v4363_v30, %v4364_v0  ;;  %v4372_v54 = vmax.f32 %v4370_v58, %v4371_v35  ;;  %v4379_v11 = vmax.f32 %v4377_v16, %v4378_v48  ;;  %v6803_v59 = vrot.slane %v6485_v22, 7  ;;  %v9173_v22 = vld [vmem:[%s15082_s0 + $0x2d8] sm:$0xff] }
 0x4ad   :  { %v2669_v51 = vpop.permute.xlu1 %2668  ;;  %v2314_v4 = vpop.permute.xlu0 %2313  ;;  %v4851_v50 = vrot.slane %v12299_v28, 1  ;;  %v4874_v34 = vsel %vm4166_vm11, %v3857_v41, -inf  ;;  %v4386_v25 = vmax.f32 %v4384_v10, %v4385_v52  ;;  %v4881_v5 = vsel %vm4166_vm11, %v3858_v7, -inf }
 0x4ae   :  { %2828 = vst.msk [vmem:[#allocation2 + $0x108] sm:$0xff] %vm2794_vm8, %v2669_v51  ;;  %v3258_v39 = vld [vmem:[#allocation2 + $0x70] sm:$0xff]  ;;  %v4366_v32 = vrot.slane %v4365_v38, 2  ;;  %v4373_v12 = vrot.slane %v4372_v54, 2  ;;  %v4380_v15 = vrot.slane %v4379_v11, 2  ;;  %v4875_v9 = vrot.slane %v4874_v34, 4 }
 0x4af   :  { %2458 = vst.msk [vmem:[#allocation2 + $0x180] sm:$0xff] %vm2409_vm6, %v2314_v4  ;;  %9327 = vmatmul.msk.f32.gmra.mxu0 %vm3312_vm10, %v3258_v39  ;;  %v4888_v60 = vsel %vm4166_vm11, %v3859_v1, -inf  ;;  %v4387_v20 = vrot.slane %v4386_v25, 2  ;;  %v6804_v43 = vsel %vm15097_vm13, %v6803_v59, %v6484_v13  ;;  %v6805_v2 = vrot.slane %v6486_v17, 6  ;;  %v9158_v17 = vld [vmem:[%s15082_s0 + $0x228] sm:$0xff]  ;;  %v9206_v39 = vld [vmem:[%s15082_s0 + $0x139] sm:$0xff] }
 0x4b0   :  { %2843 = vst.msk [vmem:[#allocation2 + $0x180] sm:$0xff] %vm2794_vm8, %v12178_v49  ;;  %v4867_v49 = vsel %vm4166_vm11, %v3601_v47, -inf  ;;  %v4367_v53 = vmax.f32 %v4365_v38, %v4366_v32  ;;  %v4374_v36 = vmax.f32 %v4372_v54, %v4373_v12  ;;  %v4381_v37 = vmax.f32 %v4379_v11, %v4380_v15 }
 0x4b1   :  { %3228 = vst.msk [vmem:[#allocation2 + $0x180] sm:$0xff] %vm3179_vm9, %v12219_v61  ;;  %v4868_v61 = vrot.slane %v4867_v49, 4  ;;  %v4858_v33 = vrot.slane %v12304_v31, 1  ;;  %v4865_v63 = vrot.slane %v12311_v8, 1  ;;  %v4388_v26 = vmax.f32 %v4386_v25, %v4387_v20 }
 0x4b2   :  { %2261 = vrot.lane.b32.xlu2 %v9142_v56, %s9468_s20  ;;  %3025 = vrot.lane.b32.xlu1 %v9267_v27, %s9469_s25  ;;  %v4368_v45 = vrot.slane %v4367_v53, 1  ;;  %v4375_v23 = vrot.slane %v4374_v36, 1  ;;  %v4382_v3 = vrot.slane %v4381_v37, 1  ;;  %v4876_v47 = vmax.f32 %v4874_v34, %v4875_v9  ;;  %v3604_v9 = vpop.f32.mrf.mxu2 }
 0x4b3   :  { %2640 = vrot.lane.b32.xlu0 %v9203_v6, %s9470_s13  ;;  %v4869_v40 = vmax.f32 %v4867_v49, %v4868_v61  ;;  %v4882_v30 = vrot.slane %v4881_v5, 4  ;;  %v4889_v58 = vrot.slane %v4888_v60, 4  ;;  %v4389_v4 = vrot.slane %v4388_v26, 1 }
 0x4b4   :  { %v12340_v62 = vpop.permute.xlu2 %3085  ;;  %v4369_v16 = vmax.f32 %v4367_v53, %v4368_v45  ;;  %v4376_v51 = vmax.f32 %v4374_v36, %v4375_v23  ;;  %v4383_v13 = vmax.f32 %v4381_v37, %v4382_v3  ;;  %v6806_v0 = vsel %vm15096_vm14, %v6805_v2, %v6804_v43  ;;  %v12402_v53 = vpop.f32.mrf.mxu0  ;;  %v9237_v36 = vld [vmem:[%s15082_s0 + $0x2d9] sm:$0xff] }
 0x4b5   :  { %v3054_v21 = vpop.permute.xlu1 %3053  ;;  %v2248_v46 = vpop.permute.xlu0 %2247  ;;  %v6807_v35 = vrot.slane %v6487_v18, 5  ;;  %v4852_v48 = vmax.f32 %v12299_v28, %v4851_v50  ;;  %v12362_v56 = vsel %vm5959_vm12, %v12314_v55, -inf  ;;  %v4390_v10 = vmax.f32 %v4388_v26, %v4389_v4  ;;  %v9270_v43 = vld [vmem:[%s15082_s0 + $0x13a] sm:$0xff] }
 0x4b6   :  { %3213 = vst.msk [vmem:[#allocation2 + $0x108] sm:$0xff] %vm3179_vm9, %v3054_v21  ;;  %v5997_v41 = vsel %vm5959_vm12, %v4369_v16, -inf  ;;  %v6000_v7 = vsel %vm5959_vm12, %v4376_v51, -inf  ;;  %v6003_v1 = vsel %vm5959_vm12, %v4383_v13, -inf  ;;  %v12372_v27 = vmax.f32 %v4881_v5, %v4882_v30 }
 0x4b7   :  { %2425 = vst.msk [vmem:[#allocation2 + $0x78] sm:$0xff] %vm2409_vm6, %v2248_v46  ;;  %v5998_v44 = vmax.f32 %v12286_v42, %v5997_v41  ;;  %v6001_v18 = vmax.f32 %v12289_v57, %v6000_v7  ;;  %v6004_v28 = vmax.f32 %v12292_v19, %v6003_v1  ;;  %v6006_v38 = vsel %vm5959_vm12, %v4390_v10, -inf }
 0x4b8   :  { %v4870_v54 = vrot.slane %v4869_v40, 2  ;;  %v4877_v11 = vrot.slane %v4876_v47, 2  ;;  %v12376_v52 = vmax.f32 %v4888_v60, %v4889_v58  ;;  %v6007_v42 = vmax.f32 %v12296_v29, %v6006_v38  ;;  %v3292_v30 = vld [vmem:[#allocation2 + $0x180] sm:$0xff] }
 0x4b9   :  { %v6360_v57 = vadd.f32 %v12064_v14, %v5998_v44  ;;  %v6361_v19 = vadd.f32 %v12064_v14, %v6001_v18  ;;  %v6362_v50 = vadd.f32 %v12064_v14, %v6004_v28  ;;  %v6808_v49 = vsel %vm15095_vm15, %v6807_v35, %v6806_v0  ;;  %9361 = vmatmul.msk.f32.gmra.mxu3 %vm3312_vm10, %v3292_v30 }
 0x4ba   :  { %2323 = vrot.lane.b32.xlu2 %v9173_v22, %s9468_s20  ;;  %2293 = vrot.lane.b32.xlu1 %v9158_v17, %s9468_s20  ;;  %v12386_v34 = vmax.f32 %v12304_v31, %v4858_v33  ;;  %v12389_v32 = vmax.f32 %v12311_v8, %v4865_v63  ;;  %v12392_v12 = vsel %vm5959_vm12, %v4852_v48, -inf  ;;  %v6363_v29 = vadd.f32 %v12064_v14, %v6007_v42  ;;  %v9222_v14 = vld [vmem:[%s15082_s0 + $0x229] sm:$0xff] }
 0x4bb   :  { %2646 = vrot.lane.b32.xlu0 %v9206_v39, %s9470_s13  ;;  %v6488_v15 = vmax.f32 %v6360_v57, 0.0  ;;  %v6489_v25 = vmax.f32 %v6361_v19, 0.0  ;;  %v6490_v61 = vmax.f32 %v6362_v50, 0.0  ;;  %v12396_v5 = vmax.f32 %v4869_v40, %v4870_v54  ;;  %v9286_v42 = vld [vmem:[%s15082_s0 + $0x22a] sm:$0xff] }
 0x4bc   :  { %v2288_v55 = vpop.permute.xlu2 %2287  ;;  %v12398_v60 = vmax.f32 %v4876_v47, %v4877_v11  ;;  %v4884_v31 = vrot.slane %v12372_v27, 2  ;;  %v4891_v8 = vrot.slane %v12376_v52, 2  ;;  %v6491_v37 = vmax.f32 %v6363_v29, 0.0 }
 0x4bd   :  { %2445 = vst.msk [vmem:[#allocation2 + $0x118] sm:$0xff] %vm2409_vm6, %v2288_v55  ;;  %v3018_v6 = vpop.permute.xlu1 %3017  ;;  %v2633_v59 = vpop.permute.xlu0 %2632  ;;  %v6809_v20 = vrot.slane %v6488_v15, 4  ;;  %v6811_v21 = vrot.slane %v6489_v25, 3  ;;  %v6813_v46 = vrot.slane %v6490_v61, 2  ;;  %v3277_v2 = vld [vmem:[#allocation2 + $0x108] sm:$0xff]  ;;  %v3860_v33 = vrot.slane %v3604_v9, 2 }
 0x4be   :  { %2810 = vst.msk [vmem:[#allocation2 + $0x78] sm:$0xff] %vm2794_vm8, %v2633_v59  ;;  %v3861_v63 = vrot.slane %v3604_v9, 4  ;;  %v3862_v45 = vrot.slane %v3604_v9, 6  ;;  %v4895_v23 = vsel %vm4166_vm11, %v3604_v9, -inf  ;;  %9346 = vmatmul.msk.f32.gmra.mxu2 %vm3312_vm10, %v3277_v2  ;;  %v6815_v26 = vrot.slane %v6491_v37, 1  ;;  %v9301_v59 = vld [vmem:[%s15082_s0 + $0x2da] sm:$0xff] }
 0x4bf   :  { %3195 = vst.msk [vmem:[#allocation2 + $0x78] sm:$0xff] %vm3179_vm9, %v3018_v6  ;;  %v6810_v3 = vsel %vm6792_vm0, %v6809_v20, %v6808_v49  ;;  %v4896_v40 = vrot.slane %v4895_v23, 4  ;;  %v3806_v47 = vrot.slane %v12402_v53, 2  ;;  %v4902_v16 = vsel %vm4166_vm11, %v3860_v33, -inf }
 0x4c0   :  { %v6812_v58 = vsel %vm6795_vm1, %v6811_v21, %v6810_v3  ;;  %v4909_v51 = vsel %vm4166_vm11, %v3861_v63, -inf  ;;  %v4916_v13 = vsel %vm4166_vm11, %v3862_v45, -inf  ;;  %v4903_v0 = vrot.slane %v4902_v16, 4 }
 0x4c1   :  { %v6814_v17 = vsel %vm6798_vm2, %v6813_v46, %v6812_v58  ;;  %v4897_v39 = vmax.f32 %v4895_v23, %v4896_v40  ;;  %v4910_v35 = vrot.slane %v4909_v51, 4  ;;  %v4885_v41 = vmax.f32 %v12372_v27, %v4884_v31 }
 0x4c2   :  { %2708 = vrot.lane.b32.xlu2 %v9237_v36, %s9470_s13  ;;  %2678 = vrot.lane.b32.xlu1 %v9222_v14, %s9470_s13  ;;  %v6816_v10 = vsel %vm15100_vm3, %v6815_v26, %v6814_v17  ;;  %v4917_v7 = vrot.slane %v4916_v13, 4  ;;  %v3807_v1 = vrot.slane %v12402_v53, 4  ;;  %v4904_v28 = vmax.f32 %v4902_v16, %v4903_v0 }
 0x4c3   :  { %3031 = vrot.lane.b32.xlu0 %v9270_v43, %s9469_s25  ;;  %7031 = vst.msk [vmem:[#allocation3 + $0x21] sm:$0xff] %vm5959_vm12, %v6816_v10  ;;  %v4898_v18 = vrot.slane %v4897_v39, 2  ;;  %v4911_v55 = vmax.f32 %v4909_v51, %v4910_v35  ;;  %v4391_v38 = vsel %vm4166_vm11, %v12402_v53, -inf  ;;  %v4398_v27 = vsel %vm4166_vm11, %v3806_v47, -inf }
 0x4c4   :  { %v12430_v44 = vpop.permute.xlu2 %2702  ;;  %v4918_v54 = vmax.f32 %v4916_v13, %v4917_v7  ;;  %v4392_v11 = vrot.slane %v4391_v38, 4  ;;  %v4405_v6 = vsel %vm4166_vm11, %v3807_v1, -inf  ;;  %v4905_v19 = vrot.slane %v4904_v28, 2  ;;  %v3607_v7 = vpop.f32.mrf.mxu2 }
 0x4c5   :  { %v2671_v4 = vpop.permute.xlu1 %2670  ;;  %v2316_v22 = vpop.permute.xlu0 %2315  ;;  %v4899_v57 = vmax.f32 %v4897_v39, %v4898_v18  ;;  %v4912_v50 = vrot.slane %v4911_v55, 2  ;;  %v4399_v49 = vrot.slane %v4398_v27, 4  ;;  %v4872_v29 = vrot.slane %v12396_v5, 1 }
 0x4c6   :  { %2829 = vst.msk [vmem:[#allocation2 + $0x110] sm:$0xff] %vm2794_vm8, %v2671_v4  ;;  %v3259_v48 = vld [vmem:[#allocation2 + $0x78] sm:$0xff]  ;;  %v4892_v15 = vmax.f32 %v12376_v52, %v4891_v8  ;;  %v4919_v25 = vrot.slane %v4918_v54, 2  ;;  %v3808_v61 = vrot.slane %v12402_v53, 6  ;;  %v4906_v31 = vmax.f32 %v4904_v28, %v4905_v19 }
 0x4c7   :  { %2459 = vst.msk [vmem:[#allocation2 + $0x188] sm:$0xff] %vm2409_vm6, %v2316_v22  ;;  %9328 = vmatmul.msk.f32.gmra.mxu0 %vm3312_vm10, %v3259_v48  ;;  %v4900_v9 = vrot.slane %v4899_v57, 1  ;;  %v4393_v36 = vmax.f32 %v4391_v38, %v4392_v11  ;;  %v4879_v14 = vrot.slane %v12398_v60, 1  ;;  %v4400_v20 = vmax.f32 %v4398_v27, %v4399_v49  ;;  %v9268_v49 = vld [vmem:[%s15082_s0 + $0x122] sm:$0xff] }
 0x4c8   :  { %2844 = vst.msk [vmem:[#allocation2 + $0x188] sm:$0xff] %vm2794_vm8, %v12302_v24  ;;  %v9140_v24 = vld [vmem:[%s15082_s0 + $0x120] sm:$0xff]  ;;  %v4920_v37 = vmax.f32 %v4918_v54, %v4919_v25  ;;  %v4406_v21 = vrot.slane %v4405_v6, 4  ;;  %v4886_v46 = vrot.slane %v4885_v41, 1  ;;  %v4907_v2 = vrot.slane %v4906_v31, 1 }
 0x4c9   :  { %3229 = vst.msk [vmem:[#allocation2 + $0x188] sm:$0xff] %vm3179_vm9, %v12340_v62  ;;  %v4913_v62 = vmax.f32 %v4911_v55, %v4912_v50  ;;  %v4901_v43 = vmax.f32 %v4899_v57, %v4900_v9  ;;  %v4873_v8 = vmax.f32 %v12396_v5, %v4872_v29  ;;  %v4893_v53 = vrot.slane %v4892_v15, 1  ;;  %v9143_v50 = vld [vmem:[%s15082_s0 + $0x140] sm:$0xff] }
 0x4ca   :  { %3093 = vrot.lane.b32.xlu2 %v9301_v59, %s9469_s25  ;;  %3063 = vrot.lane.b32.xlu1 %v9286_v42, %s9469_s25  ;;  %v4921_v33 = vrot.slane %v4920_v37, 1  ;;  %v4412_v63 = vsel %vm4166_vm11, %v3808_v61, -inf  ;;  %v4908_v45 = vmax.f32 %v4906_v31, %v4907_v2  ;;  %v4394_v26 = vrot.slane %v4393_v36, 2  ;;  %v3553_v61 = vpop.f32.mrf.mxu0  ;;  %v9204_v9 = vld [vmem:[%s15082_s0 + $0x121] sm:$0xff] }
 0x4cb   :  { %2257 = vrot.lane.b32.xlu0 %v9140_v24, %s9468_s20  ;;  %v4914_v52 = vrot.slane %v4913_v62, 1  ;;  %v6105_v3 = vsel %vm5959_vm12, %v4901_v43, -inf  ;;  %v4880_v40 = vmax.f32 %v12398_v60, %v4879_v14  ;;  %v4401_v30 = vrot.slane %v4400_v20, 2 }
 0x4cc   :  { %v4922_v47 = vmax.f32 %v4920_v37, %v4921_v33  ;;  %v4407_v58 = vmax.f32 %v4405_v6, %v4406_v21  ;;  %v12465_v16 = vpop.permute.xlu2 %3087  ;;  %v4887_v13 = vmax.f32 %v4885_v41, %v4886_v46  ;;  %v6108_v5 = vsel %vm5959_vm12, %v4908_v45, -inf }
 0x4cd   :  { %v4915_v23 = vmax.f32 %v4913_v62, %v4914_v52  ;;  %v3056_v51 = vpop.permute.xlu1 %3055  ;;  %v4413_v22 = vrot.slane %v4412_v63, 4  ;;  %v2250_v17 = vpop.permute.xlu0 %2249  ;;  %v6110_v39 = vsel %vm5959_vm12, %v12386_v34, -inf  ;;  %v4894_v0 = vmax.f32 %v4892_v15, %v4893_v53  ;;  %v12483_v34 = vld [vmem:[%s15084_s2] ss:$0 sm:$0xff] }
 0x4ce   :  { %3214 = vst.msk [vmem:[#allocation2 + $0x110] sm:$0xff] %vm3179_vm9, %v3056_v51  ;;  %v6106_v60 = vmax.f32 %v12362_v56, %v6105_v3  ;;  %v6109_v35 = vmax.f32 %v12392_v12, %v6108_v5  ;;  %v6114_v10 = vsel %vm5959_vm12, %v4922_v47, -inf  ;;  %v12476_v41 = vmax.f32 %v4393_v36, %v4394_v26 }
 0x4cf   :  { %v6111_v4 = vsel %vm5959_vm12, %v4915_v23, -inf  ;;  %2426 = vst.msk [vmem:[#allocation2 + $0x80] sm:$0xff] %vm2409_vm6, %v2250_v17  ;;  %v6113_v1 = vsel %vm5959_vm12, %v12389_v32, -inf  ;;  %v12486_v18 = vmax.f32 %v4400_v20, %v4401_v30  ;;  %v4408_v12 = vrot.slane %v4407_v58, 2 }
 0x4d0   :  { %v6112_v48 = vmax.f32 %v6110_v39, %v6111_v4  ;;  %v6397_v56 = vadd.f32 %v12483_v34, %v6109_v35  ;;  %v12489_v28 = vsel %vm5959_vm12, %v4873_v8, -inf  ;;  %v12492_v55 = vsel %vm5959_vm12, %v4880_v40, -inf  ;;  %v9174_v35 = vld [vmem:[%s15082_s0 + $0x2e8] sm:$0xff] }
 0x4d1   :  { %v12495_v38 = vsel %vm5959_vm12, %v4887_v13, -inf  ;;  %v12497_v32 = vmax.f32 %v4412_v63, %v4413_v22  ;;  %v12500_v54 = vsel %vm5959_vm12, %v4894_v0, -inf  ;;  %v6115_v11 = vmax.f32 %v6113_v1, %v6114_v10  ;;  %v9207_v10 = vld [vmem:[%s15082_s0 + $0x141] sm:$0xff] }
 0x4d2   :  { %v12503_v27 = vadd.f32 %v12483_v34, %v6106_v60  ;;  %v3863_v6 = vrot.slane %v3607_v7, 2  ;;  %v12506_v59 = vadd.f32 %v12483_v34, %v6112_v48  ;;  %v4396_v42 = vrot.slane %v12476_v41, 1  ;;  %2263 = vrot.lane.b32.xlu2 %v9143_v50, %s9468_s20  ;;  %3027 = vrot.lane.b32.xlu1 %v9268_v49, %s9469_s25  ;;  %v9159_v48 = vld [vmem:[%s15082_s0 + $0x230] sm:$0xff] }
 0x4d3   :  { %v3864_v57 = vrot.slane %v3607_v7, 4  ;;  %v3865_v19 = vrot.slane %v3607_v7, 6  ;;  %v6525_v24 = vmax.f32 %v6397_v56, 0.0  ;;  %v4403_v29 = vrot.slane %v12486_v18, 1  ;;  %2642 = vrot.lane.b32.xlu0 %v9204_v9, %s9470_s13 }
 0x4d4   :  { %v12516_v15 = vmax.f32 %v4407_v58, %v4408_v12  ;;  %v4923_v25 = vsel %vm4166_vm11, %v3607_v7, -inf  ;;  %v4415_v31 = vrot.slane %v12497_v32, 2  ;;  %v4930_v36 = vsel %vm4166_vm11, %v3863_v6, -inf  ;;  %v2290_v43 = vpop.permute.xlu2 %2289 }
 0x4d5   :  { %v4924_v62 = vrot.slane %v4923_v25, 4  ;;  %v4937_v14 = vsel %vm4166_vm11, %v3864_v57, -inf  ;;  %v12529_v37 = vadd.f32 %v12483_v34, %v6115_v11  ;;  %v6524_v20 = vmax.f32 %v12503_v27, 0.0  ;;  %v3020_v2 = vpop.permute.xlu1 %3019  ;;  %v3278_v52 = vld [vmem:[#allocation2 + $0x110] sm:$0xff]  ;;  %2446 = vst.msk [vmem:[#allocation2 + $0x120] sm:$0xff] %vm2409_vm6, %v2290_v43  ;;  %v2635_v45 = vpop.permute.xlu0 %2634 }
 0x4d6   :  { %v4931_v21 = vrot.slane %v4930_v36, 4  ;;  %v4938_v46 = vrot.slane %v4937_v14, 4  ;;  %v6526_v8 = vmax.f32 %v12506_v59, 0.0  ;;  %v4944_v33 = vsel %vm4166_vm11, %v3865_v19, -inf  ;;  %9347 = vmatmul.msk.f32.gmra.mxu2 %vm3312_vm10, %v3278_v52  ;;  %2811 = vst.msk [vmem:[#allocation2 + $0x80] sm:$0xff] %vm2794_vm8, %v2635_v45 }
 0x4d7   :  { %v4925_v53 = vmax.f32 %v4923_v25, %v4924_v62  ;;  %v3809_v63 = vrot.slane %v3553_v61, 2  ;;  %v6873_v23 = vrot.slane %v6525_v24, 7  ;;  %v4945_v40 = vrot.slane %v4944_v33, 4  ;;  %3196 = vst.msk [vmem:[#allocation2 + $0x80] sm:$0xff] %vm3179_vm9, %v3020_v2  ;;  %v3293_v25 = vld [vmem:[#allocation2 + $0x188] sm:$0xff] }
 0x4d8   :  { %v4932_v3 = vmax.f32 %v4930_v36, %v4931_v21  ;;  %v4939_v26 = vmax.f32 %v4937_v14, %v4938_v46  ;;  %v3810_v30 = vrot.slane %v3553_v61, 4  ;;  %v3811_v58 = vrot.slane %v3553_v61, 6  ;;  %9362 = vmatmul.msk.f32.gmra.mxu3 %vm3312_vm10, %v3293_v25 }
 0x4d9   :  { %v4926_v47 = vrot.slane %v4925_v53, 2  ;;  %v4419_v51 = vsel %vm4166_vm11, %v3553_v61, -inf  ;;  %v4946_v4 = vmax.f32 %v4944_v33, %v4945_v40  ;;  %v4426_v39 = vsel %vm4166_vm11, %v3809_v63, -inf }
 0x4da   :  { %v4933_v13 = vrot.slane %v4932_v3, 2  ;;  %v4940_v5 = vrot.slane %v4939_v26, 2  ;;  %v4420_v22 = vrot.slane %v4419_v51, 4  ;;  %v4433_v0 = vsel %vm4166_vm11, %v3810_v30, -inf  ;;  %2325 = vrot.lane.b32.xlu2 %v9174_v35, %s9468_s20  ;;  %2295 = vrot.lane.b32.xlu1 %v9159_v48, %s9468_s20 }
 0x4db   :  { %v4927_v17 = vmax.f32 %v4925_v53, %v4926_v47  ;;  %v4440_v60 = vsel %vm4166_vm11, %v3811_v58, -inf  ;;  %v4947_v56 = vrot.slane %v4946_v4, 2  ;;  %v4427_v27 = vrot.slane %v4426_v39, 4  ;;  %2648 = vrot.lane.b32.xlu0 %v9207_v10, %s9470_s13 }
 0x4dc   :  { %v4934_v7 = vmax.f32 %v4932_v3, %v4933_v13  ;;  %v4941_v1 = vmax.f32 %v4939_v26, %v4940_v5  ;;  %v4421_v12 = vmax.f32 %v4419_v51, %v4420_v22  ;;  %v4434_v6 = vrot.slane %v4433_v0, 4  ;;  %v3556_v5 = vpop.f32.mrf.mxu0 }
 0x4dd   :  { %v4928_v11 = vrot.slane %v4927_v17, 1  ;;  %v4441_v59 = vrot.slane %v4440_v60, 4  ;;  %v12557_v57 = vmax.f32 %v12476_v41, %v4396_v42  ;;  %v4948_v49 = vmax.f32 %v4946_v4, %v4947_v56  ;;  %v2673_v24 = vpop.permute.xlu1 %2672  ;;  %v2318_v14 = vpop.permute.xlu0 %2317 }
 0x4de   :  { %v4935_v19 = vrot.slane %v4934_v7, 1  ;;  %v4942_v50 = vrot.slane %v4941_v1, 1  ;;  %v6527_v61 = vmax.f32 %v12529_v37, 0.0  ;;  %v6874_v9 = vsel %vm15097_vm13, %v6873_v23, %v6524_v20  ;;  %2830 = vst.msk [vmem:[#allocation2 + $0x118] sm:$0xff] %vm2794_vm8, %v2673_v24  ;;  %v9238_v23 = vld [vmem:[%s15082_s0 + $0x2e9] sm:$0xff] }
 0x4df   :  { %v6875_v62 = vrot.slane %v6526_v8, 6  ;;  %v4929_v36 = vmax.f32 %v4927_v17, %v4928_v11  ;;  %v4949_v43 = vrot.slane %v4948_v49, 1  ;;  %v4422_v2 = vrot.slane %v4421_v12, 2  ;;  %2460 = vst.msk [vmem:[#allocation2 + $0x190] sm:$0xff] %vm2409_vm6, %v2318_v14 }
 0x4e0   :  { %v4936_v21 = vmax.f32 %v4934_v7, %v4935_v19  ;;  %v4943_v46 = vmax.f32 %v4941_v1, %v4942_v50  ;;  %v4428_v42 = vmax.f32 %v4426_v39, %v4427_v27  ;;  %v4435_v52 = vmax.f32 %v4433_v0, %v4434_v6  ;;  %2845 = vst.msk [vmem:[#allocation2 + $0x190] sm:$0xff] %vm2794_vm8, %v12430_v44  ;;  %v12607_v0 = vpop.permute.xlu2 %2704  ;;  %v3610_v27 = vpop.f32.mrf.mxu2 }
 0x4e1   :  { %v6117_v41 = vsel %vm5959_vm12, %v4929_v36, -inf  ;;  %v4442_v37 = vmax.f32 %v4440_v60, %v4441_v59  ;;  %v4950_v20 = vmax.f32 %v4948_v49, %v4949_v43  ;;  %3230 = vst.msk [vmem:[#allocation2 + $0x190] sm:$0xff] %vm3179_vm9, %v12465_v16  ;;  %v12575_v63 = vmax.f32 %v12486_v18, %v4403_v29  ;;  %v9223_v16 = vld [vmem:[%s15082_s0 + $0x231] sm:$0xff]  ;;  %v9271_v18 = vld [vmem:[%s15082_s0 + $0x142] sm:$0xff] }
 0x4e2   :  { %v6118_v8 = vmax.f32 %v12489_v28, %v6117_v41  ;;  %v6120_v53 = vsel %vm5959_vm12, %v4936_v21, -inf  ;;  %v6123_v33 = vsel %vm5959_vm12, %v4943_v46, -inf  ;;  %v12580_v45 = vmax.f32 %v12497_v32, %v4415_v31  ;;  %2710 = vrot.lane.b32.xlu2 %v9238_v23, %s9470_s13  ;;  %2680 = vrot.lane.b32.xlu1 %v9223_v16, %s9470_s13 }
 0x4e3   :  { %v6121_v44 = vmax.f32 %v12492_v55, %v6120_v53  ;;  %v6124_v28 = vmax.f32 %v12495_v38, %v6123_v33  ;;  %v6877_v29 = vrot.slane %v6527_v61, 5  ;;  %v6126_v32 = vsel %vm5959_vm12, %v4950_v20, -inf  ;;  %v3260_v38 = vld [vmem:[#allocation2 + $0x80] sm:$0xff]  ;;  %3033 = vrot.lane.b32.xlu0 %v9271_v18, %s9469_s25 }
 0x4e4   :  { %v6400_v31 = vadd.f32 %v12483_v34, %v6118_v8  ;;  %v12595_v55 = vmax.f32 %v4421_v12, %v4422_v2  ;;  %v6876_v3 = vsel %vm15096_vm14, %v6875_v62, %v6874_v9  ;;  %v6127_v26 = vmax.f32 %v12500_v54, %v6126_v32  ;;  %9329 = vmatmul.msk.f32.gmra.mxu0 %vm3312_vm10, %v3260_v38 }
 0x4e5   :  { %v6401_v40 = vadd.f32 %v12483_v34, %v6121_v44  ;;  %v6402_v47 = vadd.f32 %v12483_v34, %v6124_v28  ;;  %v4429_v58 = vrot.slane %v4428_v42, 2  ;;  %v4436_v51 = vrot.slane %v4435_v52, 2  ;;  %v3058_v4 = vpop.permute.xlu1 %3057  ;;  %v2252_v60 = vpop.permute.xlu0 %2251 }
 0x4e6   :  { %v6528_v30 = vmax.f32 %v6400_v31, 0.0  ;;  %v4443_v13 = vrot.slane %v4442_v37, 2  ;;  %v4410_v22 = vrot.slane %v12516_v15, 1  ;;  %v6403_v17 = vadd.f32 %v12483_v34, %v6127_v26  ;;  %3215 = vst.msk [vmem:[#allocation2 + $0x118] sm:$0xff] %vm3179_vm9, %v3058_v4 }
 0x4e7   :  { %v6529_v39 = vmax.f32 %v6401_v40, 0.0  ;;  %v6530_v54 = vmax.f32 %v6402_v47, 0.0  ;;  %v6878_v35 = vsel %vm15095_vm15, %v6877_v29, %v6876_v3  ;;  %v4417_v48 = vrot.slane %v12580_v45, 1  ;;  %2427 = vst.msk [vmem:[#allocation2 + $0x88] sm:$0xff] %vm2409_vm6, %v2252_v60 }
 0x4e8   :  { %v6879_v10 = vrot.slane %v6528_v30, 4  ;;  %v4424_v7 = vrot.slane %v12595_v55, 1  ;;  %v6531_v1 = vmax.f32 %v6403_v17, 0.0  ;;  %v3812_v11 = vrot.slane %v3556_v5, 2  ;;  %v3294_v6 = vld [vmem:[#allocation2 + $0x190] sm:$0xff]  ;;  %v12633_v3 = vpop.permute.xlu2 %3089 }
 0x4e9   :  { %v6881_v56 = vrot.slane %v6529_v39, 3  ;;  %v6883_v12 = vrot.slane %v6530_v54, 2  ;;  %v12615_v19 = vmax.f32 %v4428_v42, %v4429_v58  ;;  %v12617_v50 = vmax.f32 %v4435_v52, %v4436_v51  ;;  %9363 = vmatmul.msk.f32.gmra.mxu3 %vm3312_vm10, %v3294_v6 }
 0x4ea   :  { %v6880_v59 = vsel %vm6792_vm0, %v6879_v10, %v6878_v35  ;;  %v12619_v49 = vmax.f32 %v4442_v37, %v4443_v13  ;;  %v6885_v25 = vrot.slane %v6531_v1, 1  ;;  %v3813_v61 = vrot.slane %v3556_v5, 4 }
 0x4eb   :  { %v6882_v24 = vsel %vm6795_vm1, %v6881_v56, %v6880_v59  ;;  %v3814_v9 = vrot.slane %v3556_v5, 6  ;;  %v4447_v36 = vsel %vm4166_vm11, %v3556_v5, -inf  ;;  %v4454_v14 = vsel %vm4166_vm11, %v3812_v11, -inf }
 0x4ec   :  { %v6884_v62 = vsel %vm6798_vm2, %v6883_v12, %v6882_v24  ;;  %v3866_v21 = vrot.slane %v3610_v27, 2  ;;  %v4448_v43 = vrot.slane %v4447_v36, 4  ;;  %v4455_v2 = vrot.slane %v4454_v14, 4 }
 0x4ed   :  { %v6886_v46 = vsel %vm15100_vm3, %v6885_v25, %v6884_v62  ;;  %v4461_v41 = vsel %vm4166_vm11, %v3813_v61, -inf  ;;  %v4468_v52 = vsel %vm4166_vm11, %v3814_v9, -inf  ;;  %v3867_v37 = vrot.slane %v3610_v27, 4 }
 0x4ee   :  { %7036 = vst.msk [vmem:[#allocation3 + $0x71] sm:$0xff] %vm5959_vm12, %v6886_v46  ;;  %v4462_v42 = vrot.slane %v4461_v41, 4  ;;  %v3868_v20 = vrot.slane %v3610_v27, 6  ;;  %v4449_v8 = vmax.f32 %v4447_v36, %v4448_v43  ;;  %v4456_v53 = vmax.f32 %v4454_v14, %v4455_v2  ;;  %v9287_v14 = vld [vmem:[%s15082_s0 + $0x232] sm:$0xff] }
 0x4ef   :  { %v4469_v33 = vrot.slane %v4468_v52, 4  ;;  %v4951_v44 = vsel %vm4166_vm11, %v3610_v27, -inf  ;;  %v4958_v16 = vsel %vm4166_vm11, %v3866_v21, -inf  ;;  %v4965_v18 = vsel %vm4166_vm11, %v3867_v37, -inf  ;;  %3065 = vrot.lane.b32.xlu0 %v9287_v14, %s9469_s25  ;;  %v3022_v37 = vpop.permute.xlu1 %3021 }
 0x4f0   :  { %v4463_v28 = vmax.f32 %v4461_v41, %v4462_v42  ;;  %v4952_v23 = vrot.slane %v4951_v44, 4  ;;  %v4450_v29 = vrot.slane %v4449_v8, 2  ;;  %v4457_v32 = vrot.slane %v4456_v53, 2 }
 0x4f1   :  { %v4470_v31 = vmax.f32 %v4468_v52, %v4469_v33  ;;  %v4959_v38 = vrot.slane %v4958_v16, 4  ;;  %v4431_v26 = vrot.slane %v12615_v19, 1  ;;  %v4966_v30 = vrot.slane %v4965_v18, 4  ;;  %v2260_v52 = vpop.permute.xlu2 %2259 }
 0x4f2   :  { %v4464_v40 = vrot.slane %v4463_v28, 2  ;;  %v4953_v47 = vmax.f32 %v4951_v44, %v4952_v23  ;;  %v4451_v58 = vmax.f32 %v4449_v8, %v4450_v29  ;;  %v4458_v51 = vmax.f32 %v4456_v53, %v4457_v32  ;;  %2431 = vst.msk [vmem:[#allocation2 + $0xa8] sm:$0xff] %vm2409_vm6, %v2260_v52 }
 0x4f3   :  { %v4471_v13 = vrot.slane %v4470_v31, 2  ;;  %v4960_v5 = vmax.f32 %v4958_v16, %v4959_v38  ;;  %v4967_v39 = vmax.f32 %v4965_v18, %v4966_v30  ;;  %v4972_v54 = vsel %vm4166_vm11, %v3868_v20, -inf  ;;  %v3279_v20 = vld [vmem:[#allocation2 + $0x118] sm:$0xff] }
 0x4f4   :  { %v4465_v4 = vmax.f32 %v4463_v28, %v4464_v40  ;;  %v4954_v17 = vrot.slane %v4953_v47, 2  ;;  %v4452_v60 = vrot.slane %v4451_v58, 1  ;;  %v4459_v35 = vrot.slane %v4458_v51, 1  ;;  %9348 = vmatmul.msk.f32.gmra.mxu2 %vm3312_vm10, %v3279_v20 }
 0x4f5   :  { %v4472_v10 = vmax.f32 %v4470_v31, %v4471_v13  ;;  %v4961_v1 = vrot.slane %v4960_v5, 2  ;;  %v4411_v56 = vmax.f32 %v12516_v15, %v4410_v22  ;;  %v4438_v12 = vrot.slane %v12617_v50, 1  ;;  %v9160_v15 = vld [vmem:[%s15082_s0 + $0x240] sm:$0xff]  ;;  %v9302_v22 = vld [vmem:[%s15082_s0 + $0x2ea] sm:$0xff] }
 0x4f6   :  { %v4445_v11 = vrot.slane %v12619_v49, 1  ;;  %v4466_v27 = vrot.slane %v4465_v4, 1  ;;  %v4453_v6 = vmax.f32 %v4451_v58, %v4452_v60  ;;  %v4460_v59 = vmax.f32 %v4458_v51, %v4459_v35  ;;  %2297 = vrot.lane.b32.xlu2 %v9160_v15, %s9468_s20  ;;  %3095 = vrot.lane.b32.xlu1 %v9302_v22, %s9469_s25  ;;  %v9239_v13 = vld [vmem:[%s15082_s0 + $0x2f1] sm:$0xff] }
 0x4f7   :  { %v4473_v24 = vrot.slane %v4472_v10, 1  ;;  %v4973_v25 = vrot.slane %v4972_v54, 4  ;;  %v4418_v61 = vmax.f32 %v12580_v45, %v4417_v48  ;;  %v4425_v9 = vmax.f32 %v12595_v55, %v4424_v7 }
 0x4f8   :  { %v4955_v62 = vmax.f32 %v4953_v47, %v4954_v17  ;;  %v4968_v36 = vrot.slane %v4967_v39, 2  ;;  %v4432_v45 = vmax.f32 %v12615_v19, %v4431_v26  ;;  %v4467_v48 = vmax.f32 %v4465_v4, %v4466_v27  ;;  %v9175_v4 = vld [vmem:[%s15082_s0 + $0x2f0] sm:$0xff] }
 0x4f9   :  { %v4962_v21 = vmax.f32 %v4960_v5, %v4961_v1  ;;  %v6008_v55 = vsel %vm5959_vm12, %v12557_v57, -inf  ;;  %v6011_v7 = vsel %vm5959_vm12, %v12575_v63, -inf  ;;  %v4439_v46 = vmax.f32 %v12617_v50, %v4438_v12  ;;  %v3559_v50 = vpop.f32.mrf.mxu0  ;;  %v9224_v5 = vld [vmem:[%s15082_s0 + $0x241] sm:$0xff]  ;;  %2327 = vrot.lane.b32.xlu0 %v9175_v4, %s9468_s20 }
 0x4fa   :  { %v4446_v43 = vmax.f32 %v12619_v49, %v4445_v11  ;;  %v4474_v2 = vmax.f32 %v4472_v10, %v4473_v24  ;;  %v6009_v19 = vsel %vm5959_vm12, %v4453_v6, -inf  ;;  %v6012_v41 = vsel %vm5959_vm12, %v4460_v59, -inf  ;;  %v2637_v49 = vpop.permute.xlu0 %2636  ;;  %v2322_v59 = vpop.permute.xlu2 %2321 }
 0x4fb   :  { %v4974_v42 = vmax.f32 %v4972_v54, %v4973_v25  ;;  %v6014_v57 = vsel %vm5959_vm12, %v4411_v56, -inf  ;;  %v6017_v8 = vsel %vm5959_vm12, %v4418_v61, -inf  ;;  %v4956_v63 = vrot.slane %v4955_v62, 1  ;;  %2812 = vst.msk [vmem:[#allocation2 + $0x88] sm:$0xff] %vm2794_vm8, %v2637_v49  ;;  %v2675_v24 = vpop.permute.xlu1 %2674 }
 0x4fc   :  { %v4969_v53 = vmax.f32 %v4967_v39, %v4968_v36  ;;  %v12673_v33 = vsel %vm5959_vm12, %v4425_v9, -inf  ;;  %v12676_v44 = vsel %vm5959_vm12, %v4432_v45, -inf  ;;  %v6015_v28 = vsel %vm5959_vm12, %v4467_v48, -inf  ;;  %3197 = vst.msk [vmem:[#allocation2 + $0x88] sm:$0xff] %vm3179_vm9, %v3022_v37  ;;  %v12712_v36 = vpop.f32.mrf.mxu2 }
 0x4fd   :  { %v4963_v23 = vrot.slane %v4962_v21, 1  ;;  %v12682_v16 = vsel %vm5959_vm12, %v4439_v46, -inf  ;;  %v12685_v18 = vsel %vm5959_vm12, %v4446_v43, -inf  ;;  %v6010_v29 = vmax.f32 %v6008_v55, %v6009_v19  ;;  %2462 = vst.msk [vmem:[#allocation2 + $0x1a0] sm:$0xff] %vm2409_vm6, %v2322_v59 }
 0x4fe   :  { %v6013_v32 = vmax.f32 %v6011_v7, %v6012_v41  ;;  %v6018_v31 = vsel %vm5959_vm12, %v4474_v2, -inf  ;;  %v4975_v38 = vrot.slane %v4974_v42, 2  ;;  %v3815_v26 = vrot.slane %v3559_v50, 2  ;;  %2712 = vrot.lane.b32.xlu2 %v9239_v13, %s9470_s13  ;;  %2682 = vrot.lane.b32.xlu1 %v9224_v5, %s9470_s13  ;;  %2831 = vst.msk [vmem:[#allocation2 + $0x120] sm:$0xff] %vm2794_vm8, %v2675_v24 }
 0x4ff   :  { %v3816_v40 = vrot.slane %v3559_v50, 4  ;;  %v6016_v47 = vmax.f32 %v6014_v57, %v6015_v28  ;;  %v4957_v30 = vmax.f32 %v4955_v62, %v4956_v63  ;;  %v4970_v58 = vrot.slane %v4969_v53, 1  ;;  %v9161_v57 = vld [vmem:[%s15082_s0 + $0x248] sm:$0xff] }
 0x500   :  { %v3817_v51 = vrot.slane %v3559_v50, 6  ;;  %v4964_v17 = vmax.f32 %v4962_v21, %v4963_v23  ;;  %v4475_v39 = vsel %vm4166_vm11, %v3559_v50, -inf  ;;  %v4482_v54 = vsel %vm4166_vm11, %v3815_v26, -inf }
 0x501   :  { %v4489_v60 = vsel %vm4166_vm11, %v3816_v40, -inf  ;;  %v6019_v35 = vmax.f32 %v6017_v8, %v6018_v31  ;;  %v12704_v10 = vadd.f32 %v12483_v34, %v6010_v29  ;;  %v6365_v1 = vadd.f32 %v12483_v34, %v6013_v32  ;;  %v9303_v8 = vld [vmem:[%s15082_s0 + $0x2f2] sm:$0xff] }
 0x502   :  { %v4476_v56 = vrot.slane %v4475_v39, 4  ;;  %v12708_v12 = vmax.f32 %v4974_v42, %v4975_v38  ;;  %v4483_v11 = vrot.slane %v4482_v54, 4  ;;  %v4490_v27 = vrot.slane %v4489_v60, 4  ;;  %v2320_v15 = vpop.permute.xlu0 %2319 }
 0x503   :  { %v4496_v6 = vsel %vm4166_vm11, %v3817_v51, -inf  ;;  %v6366_v25 = vadd.f32 %v12483_v34, %v6016_v47  ;;  %v4971_v61 = vmax.f32 %v4969_v53, %v4970_v58  ;;  %v12716_v22 = vsel %vm5959_vm12, %v4957_v30, -inf  ;;  %2461 = vst.msk [vmem:[#allocation2 + $0x198] sm:$0xff] %vm2409_vm6, %v2320_v15  ;;  %v3261_v49 = vld [vmem:[#allocation2 + $0x88] sm:$0xff]  ;;  %v2707_v47 = vpop.permute.xlu2 %2706  ;;  %v3060_v5 = vpop.permute.xlu1 %3059 }
 0x504   :  { %v4477_v9 = vmax.f32 %v4475_v39, %v4476_v56  ;;  %v4497_v62 = vrot.slane %v4496_v6, 4  ;;  %v12719_v14 = vsel %vm5959_vm12, %v4964_v17, -inf  ;;  %v4484_v45 = vmax.f32 %v4482_v54, %v4483_v11  ;;  %2846 = vst.msk [vmem:[#allocation2 + $0x198] sm:$0xff] %vm2794_vm8, %v12607_v0  ;;  %9330 = vmatmul.msk.f32.gmra.mxu0 %vm3312_vm10, %v3261_v49 }
 0x505   :  { %v4491_v48 = vmax.f32 %v4489_v60, %v4490_v27  ;;  %v12723_v21 = vadd.f32 %v12483_v34, %v6019_v35  ;;  %v6493_v55 = vmax.f32 %v6365_v1, 0.0  ;;  %v6492_v43 = vmax.f32 %v12704_v10, 0.0  ;;  %3231 = vst.msk [vmem:[#allocation2 + $0x198] sm:$0xff] %vm3179_vm9, %v12633_v3  ;;  %v9288_v3 = vld [vmem:[%s15082_s0 + $0x242] sm:$0xff] }
 0x506   :  { %v4478_v7 = vrot.slane %v4477_v9, 2  ;;  %v4498_v46 = vmax.f32 %v4496_v6, %v4497_v62  ;;  %v4485_v2 = vrot.slane %v4484_v45, 2  ;;  %v3869_v41 = vrot.slane %v12712_v36, 2  ;;  %2299 = vrot.lane.b32.xlu2 %v9161_v57, %s9468_s20  ;;  %3097 = vrot.lane.b32.xlu1 %v9303_v8, %s9469_s25  ;;  %2847 = vst.msk [vmem:[#allocation2 + $0x1a0] sm:$0xff] %vm2794_vm8, %v2707_v47 }
 0x507   :  { %v4492_v19 = vrot.slane %v4491_v48, 2  ;;  %v4977_v42 = vrot.slane %v12708_v12, 1  ;;  %v3870_v20 = vrot.slane %v12712_v36, 4  ;;  %v6494_v63 = vmax.f32 %v6366_v25, 0.0  ;;  %3067 = vrot.lane.b32.xlu0 %v9288_v3, %s9469_s25  ;;  %3216 = vst.msk [vmem:[#allocation2 + $0x120] sm:$0xff] %vm3179_vm9, %v3060_v5 }
 0x508   :  { %v4479_v52 = vmax.f32 %v4477_v9, %v4478_v7  ;;  %v4499_v37 = vrot.slane %v4498_v46, 2  ;;  %v12741_v0 = vsel %vm5959_vm12, %v4971_v61, -inf  ;;  %v4486_v53 = vmax.f32 %v4484_v45, %v4485_v2 }
 0x509   :  { %v4493_v50 = vmax.f32 %v4491_v48, %v4492_v19  ;;  %v6817_v28 = vrot.slane %v6493_v55, 7  ;;  %v4979_v32 = vsel %vm4166_vm11, %v12712_v36, -inf  ;;  %v6495_v31 = vmax.f32 %v12723_v21, 0.0 }
 0x50a   :  { %v4480_v23 = vrot.slane %v4479_v52, 1  ;;  %v4500_v29 = vmax.f32 %v4498_v46, %v4499_v37  ;;  %v4487_v38 = vrot.slane %v4486_v53, 1  ;;  %v4986_v40 = vsel %vm4166_vm11, %v3869_v41, -inf  ;;  %v2254_v4 = vpop.permute.xlu0 %2253 }
 0x50b   :  { %v4494_v26 = vrot.slane %v4493_v50, 1  ;;  %v3871_v51 = vrot.slane %v12712_v36, 6  ;;  %v4993_v13 = vsel %vm4166_vm11, %v3870_v20, -inf  ;;  %v6819_v17 = vrot.slane %v6494_v63, 6  ;;  %2428 = vst.msk [vmem:[#allocation2 + $0x90] sm:$0xff] %vm2409_vm6, %v2254_v4 }
 0x50c   :  { %v4481_v30 = vmax.f32 %v4479_v52, %v4480_v23  ;;  %v4501_v58 = vrot.slane %v4500_v29, 1  ;;  %v4488_v39 = vmax.f32 %v4486_v53, %v4487_v38  ;;  %v4980_v60 = vrot.slane %v4979_v32, 4  ;;  %v3295_v24 = vld [vmem:[#allocation2 + $0x198] sm:$0xff] }
 0x50d   :  { %v4495_v54 = vmax.f32 %v4493_v50, %v4494_v26  ;;  %v6818_v35 = vsel %vm15097_vm13, %v6817_v28, %v6492_v43  ;;  %v4987_v56 = vrot.slane %v4986_v40, 4  ;;  %v4994_v59 = vrot.slane %v4993_v13, 4  ;;  %9364 = vmatmul.msk.f32.gmra.mxu3 %vm3312_vm10, %v3295_v24 }
 0x50e   :  { %v4502_v10 = vmax.f32 %v4500_v29, %v4501_v58  ;;  %v6021_v1 = vsel %vm5959_vm12, %v4481_v30, -inf  ;;  %v6024_v27 = vsel %vm5959_vm12, %v4488_v39, -inf  ;;  %v5000_v62 = vsel %vm4166_vm11, %v3871_v51, -inf }
 0x50f   :  { %v6022_v11 = vmax.f32 %v12673_v33, %v6021_v1  ;;  %v6027_v6 = vsel %vm5959_vm12, %v4495_v54, -inf  ;;  %v6025_v25 = vmax.f32 %v12676_v44, %v6024_v27  ;;  %v6820_v36 = vsel %vm15096_vm14, %v6819_v17, %v6818_v35  ;;  %v3092_v54 = vpop.permute.xlu2 %3091 }
 0x510   :  { %v6028_v61 = vmax.f32 %v12682_v16, %v6027_v6  ;;  %v6030_v9 = vsel %vm5959_vm12, %v4502_v10, -inf  ;;  %v4981_v45 = vmax.f32 %v4979_v32, %v4980_v60  ;;  %v6821_v48 = vrot.slane %v6495_v31, 5  ;;  %v3658_v16 = vpop.f32.mrf.mxu3  ;;  %v3616_v32 = vpop.f32.mrf.mxu2  ;;  %v9176_v31 = vld [vmem:[%s15082_s0 + $0x300] sm:$0xff]  ;;  %3232 = vst.msk [vmem:[#allocation2 + $0x1a0] sm:$0xff] %vm3179_vm9, %v3092_v54 }
 0x511   :  { %v6031_v33 = vmax.f32 %v12685_v18, %v6030_v9  ;;  %v6368_v15 = vadd.f32 %v12483_v34, %v6022_v11  ;;  %v6369_v21 = vadd.f32 %v12483_v34, %v6025_v25  ;;  %v4988_v55 = vmax.f32 %v4986_v40, %v4987_v56  ;;  %2329 = vrot.lane.b32.xlu0 %v9176_v31, %s9468_s20  ;;  %v3024_v60 = vpop.permute.xlu1 %3023 }
 0x512   :  { %v6370_v44 = vadd.f32 %v12483_v34, %v6028_v61  ;;  %v4995_v43 = vmax.f32 %v4993_v13, %v4994_v59  ;;  %v5001_v2 = vrot.slane %v5000_v62, 4  ;;  %v6822_v19 = vsel %vm15095_vm15, %v6821_v48, %v6820_v36  ;;  %v2639_v11 = vpop.permute.xlu0 %2638 }
 0x513   :  { %v6371_v7 = vadd.f32 %v12483_v34, %v6031_v33  ;;  %v6496_v46 = vmax.f32 %v6368_v15, 0.0  ;;  %v4978_v18 = vmax.f32 %v12708_v12, %v4977_v42  ;;  %v6497_v41 = vmax.f32 %v6369_v21, 0.0  ;;  %v9240_v12 = vld [vmem:[%s15082_s0 + $0x301] sm:$0xff]  ;;  %v9225_v42 = vld [vmem:[%s15082_s0 + $0x249] sm:$0xff]  ;;  %2813 = vst.msk [vmem:[#allocation2 + $0x90] sm:$0xff] %vm2794_vm8, %v2639_v11 }
 0x514   :  { %v6498_v52 = vmax.f32 %v6370_v44, 0.0  ;;  %v4982_v57 = vrot.slane %v4981_v45, 2  ;;  %v3914_v8 = vrot.slane %v3658_v16, 2  ;;  %v4989_v50 = vrot.slane %v4988_v55, 2  ;;  %2714 = vrot.lane.b32.xlu2 %v9240_v12, %s9470_s13  ;;  %2684 = vrot.lane.b32.xlu1 %v9225_v42, %s9470_s13  ;;  %3198 = vst.msk [vmem:[#allocation2 + $0x90] sm:$0xff] %vm3179_vm9, %v3024_v60 }
 0x515   :  { %v6499_v37 = vmax.f32 %v6371_v7, 0.0  ;;  %v6823_v20 = vrot.slane %v6496_v46, 4  ;;  %v6825_v63 = vrot.slane %v6497_v41, 3  ;;  %v3915_v3 = vrot.slane %v3658_v16, 4  ;;  %v9304_v7 = vld [vmem:[%s15082_s0 + $0x302] sm:$0xff]  ;;  %v9289_v46 = vld [vmem:[%s15082_s0 + $0x24a] sm:$0xff] }
 0x516   :  { %v6827_v53 = vrot.slane %v6498_v52, 2  ;;  %v4996_v28 = vrot.slane %v4995_v43, 2  ;;  %v5002_v23 = vmax.f32 %v5000_v62, %v5001_v2  ;;  %v3916_v29 = vrot.slane %v3658_v16, 6  ;;  %v3280_v41 = vld [vmem:[#allocation2 + $0x120] sm:$0xff] }
 0x517   :  { %v6824_v49 = vsel %vm6792_vm0, %v6823_v20, %v6822_v19  ;;  %v6829_v26 = vrot.slane %v6499_v37, 1  ;;  %v5399_v40 = vsel %vm4166_vm11, %v3658_v16, -inf  ;;  %v5406_v47 = vsel %vm4166_vm11, %v3914_v8, -inf  ;;  %v9162_v16 = vld [vmem:[%s15082_s0 + $0x258] sm:$0xff]  ;;  %9349 = vmatmul.msk.f32.gmra.mxu2 %vm3312_vm10, %v3280_v41 }
 0x518   :  { %v6826_v38 = vsel %vm6795_vm1, %v6825_v63, %v6824_v49  ;;  %v5400_v58 = vrot.slane %v5399_v40, 4  ;;  %v5407_v51 = vrot.slane %v5406_v47, 4  ;;  %v5413_v13 = vsel %vm4166_vm11, %v3915_v3, -inf  ;;  %v2262_v3 = vpop.permute.xlu2 %2261 }
 0x519   :  { %v6828_v30 = vsel %vm6798_vm2, %v6827_v53, %v6826_v38  ;;  %v12798_v5 = vsel %vm5959_vm12, %v4978_v18, -inf  ;;  %v4983_v17 = vmax.f32 %v4981_v45, %v4982_v57  ;;  %v3872_v39 = vrot.slane %v3616_v32, 2  ;;  %3069 = vrot.lane.b32.xlu0 %v9289_v46, %s9469_s25  ;;  %2432 = vst.msk [vmem:[#allocation2 + $0xb0] sm:$0xff] %vm2409_vm6, %v2262_v3  ;;  %v9241_v46 = vld [vmem:[%s15082_s0 + $0x309] sm:$0xff] }
 0x51a   :  { %v6830_v4 = vsel %vm15100_vm3, %v6829_v26, %v6828_v30  ;;  %v4990_v35 = vmax.f32 %v4988_v55, %v4989_v50  ;;  %v5414_v10 = vrot.slane %v5413_v13, 4  ;;  %v5420_v1 = vsel %vm4166_vm11, %v3916_v29, -inf  ;;  %v2645_v12 = vpop.permute.xlu0 %2644 }
 0x51b   :  { %7032 = vst.msk [vmem:[#allocation3 + $0x31] sm:$0xff] %vm5959_vm12, %v6830_v4  ;;  %v3873_v56 = vrot.slane %v3616_v32, 4  ;;  %v5003_v27 = vrot.slane %v5002_v23, 2  ;;  %v3874_v6 = vrot.slane %v3616_v32, 6  ;;  %v5007_v59 = vsel %vm4166_vm11, %v3616_v32, -inf  ;;  %v2292_v32 = vpop.permute.xlu1 %2291 }
 0x51c   :  { %v5014_v24 = vsel %vm4166_vm11, %v3872_v39, -inf  ;;  %v4997_v25 = vmax.f32 %v4995_v43, %v4996_v28  ;;  %v5401_v61 = vmax.f32 %v5399_v40, %v5400_v58  ;;  %v5408_v9 = vmax.f32 %v5406_v47, %v5407_v51  ;;  %2301 = vrot.lane.b32.xlu2 %v9162_v16, %s9468_s20  ;;  %3099 = vrot.lane.b32.xlu1 %v9304_v7, %s9469_s25  ;;  %v3562_v40 = vpop.f32.mrf.mxu0 }
 0x51d   :  { %v5008_v62 = vrot.slane %v5007_v59, 4  ;;  %v5421_v36 = vrot.slane %v5420_v1, 4  ;;  %v5015_v33 = vrot.slane %v5014_v24, 4  ;;  %v5021_v15 = vsel %vm4166_vm11, %v3873_v56, -inf  ;;  %2447 = vst.msk [vmem:[#allocation2 + $0x128] sm:$0xff] %vm2409_vm6, %v2292_v32 }
 0x51e   :  { %v5028_v45 = vsel %vm4166_vm11, %v3874_v6, -inf  ;;  %v4984_v48 = vrot.slane %v4983_v17, 1  ;;  %v4991_v21 = vrot.slane %v4990_v35, 1  ;;  %v5415_v44 = vmax.f32 %v5413_v13, %v5414_v10  ;;  %2816 = vst.msk [vmem:[#allocation2 + $0xa8] sm:$0xff] %vm2794_vm8, %v2645_v12  ;;  %v3262_v13 = vld [vmem:[#allocation2 + $0x90] sm:$0xff] }
 0x51f   :  { %v5009_v55 = vmax.f32 %v5007_v59, %v5008_v62  ;;  %v12819_v43 = vmax.f32 %v5002_v23, %v5003_v27  ;;  %v5016_v2 = vmax.f32 %v5014_v24, %v5015_v33  ;;  %v5022_v19 = vrot.slane %v5021_v15, 4  ;;  %9331 = vmatmul.msk.f32.gmra.mxu0 %vm3312_vm10, %v3262_v13 }
 0x520   :  { %v5029_v18 = vrot.slane %v5028_v45, 4  ;;  %v4998_v52 = vrot.slane %v4997_v25, 1  ;;  %v5402_v37 = vrot.slane %v5401_v61, 2  ;;  %v5409_v20 = vrot.slane %v5408_v9, 2 }
 0x521   :  { %v5010_v57 = vrot.slane %v5009_v55, 2  ;;  %v5422_v8 = vmax.f32 %v5420_v1, %v5421_v36  ;;  %v5017_v63 = vrot.slane %v5016_v2, 2  ;;  %v5023_v53 = vmax.f32 %v5021_v15, %v5022_v19 }
 0x522   :  { %v5030_v50 = vmax.f32 %v5028_v45, %v5029_v18  ;;  %v12825_v49 = vmax.f32 %v4983_v17, %v4984_v48  ;;  %v12827_v28 = vmax.f32 %v4990_v35, %v4991_v21  ;;  %v5416_v23 = vrot.slane %v5415_v44, 2  ;;  %v3030_v12 = vpop.permute.xlu0 %3029 }
 0x523   :  { %v5011_v29 = vmax.f32 %v5009_v55, %v5010_v57  ;;  %v5005_v42 = vrot.slane %v12819_v43, 1  ;;  %v5018_v31 = vmax.f32 %v5016_v2, %v5017_v63  ;;  %v5024_v38 = vrot.slane %v5023_v53, 2  ;;  %v9226_v2 = vld [vmem:[%s15082_s0 + $0x259] sm:$0xff]  ;;  %v12864_v63 = vpop.f32.mrf.mxu3  ;;  %3201 = vst.msk [vmem:[#allocation2 + $0xa8] sm:$0xff] %vm3179_vm9, %v3030_v12 }
 0x524   :  { %v5031_v26 = vrot.slane %v5030_v50, 2  ;;  %v12832_v47 = vmax.f32 %v4997_v25, %v4998_v52  ;;  %v5403_v30 = vmax.f32 %v5401_v61, %v5402_v37  ;;  %v12834_v58 = vmax.f32 %v5408_v9, %v5409_v20  ;;  %2716 = vrot.lane.b32.xlu2 %v9241_v46, %s9470_s13  ;;  %2686 = vrot.lane.b32.xlu1 %v9226_v2, %s9470_s13 }
 0x525   :  { %v5012_v51 = vrot.slane %v5011_v29, 1  ;;  %v5423_v4 = vrot.slane %v5422_v8, 2  ;;  %v5019_v17 = vrot.slane %v5018_v31, 1  ;;  %v5025_v39 = vmax.f32 %v5023_v53, %v5024_v38 }
 0x526   :  { %v5032_v54 = vmax.f32 %v5030_v50, %v5031_v26  ;;  %v12838_v60 = vmax.f32 %v5415_v44, %v5416_v23  ;;  %v3818_v10 = vrot.slane %v3562_v40, 2  ;;  %v3819_v1 = vrot.slane %v3562_v40, 4  ;;  %v2324_v50 = vpop.permute.xlu2 %2323 }
 0x527   :  { %v5013_v35 = vmax.f32 %v5011_v29, %v5012_v51  ;;  %v5020_v56 = vmax.f32 %v5018_v31, %v5019_v17  ;;  %v5026_v11 = vrot.slane %v5025_v39, 1  ;;  %v3820_v6 = vrot.slane %v3562_v40, 6  ;;  %2463 = vst.msk [vmem:[#allocation2 + $0x1a8] sm:$0xff] %vm2409_vm6, %v2324_v50 }
 0x528   :  { %v5033_v27 = vrot.slane %v5032_v54, 1  ;;  %v5404_v59 = vrot.slane %v5403_v30, 1  ;;  %v4503_v24 = vsel %vm4166_vm11, %v3562_v40, -inf  ;;  %v4510_v25 = vsel %vm4166_vm11, %v3818_v10, -inf }
 0x529   :  { %v4517_v61 = vsel %vm4166_vm11, %v3819_v1, -inf  ;;  %v5027_v9 = vmax.f32 %v5025_v39, %v5026_v11  ;;  %v6129_v36 = vsel %vm5959_vm12, %v5013_v35, -inf  ;;  %v6132_v33 = vsel %vm5959_vm12, %v5020_v56, -inf }
 0x52a   :  { %v5034_v62 = vmax.f32 %v5032_v54, %v5033_v27  ;;  %v6133_v15 = vmax.f32 %v12719_v14, %v6132_v33  ;;  %v4504_v45 = vrot.slane %v4503_v24, 4  ;;  %v4511_v48 = vrot.slane %v4510_v25, 4  ;;  %v9177_v14 = vld [vmem:[%s15082_s0 + $0x308] sm:$0xff]  ;;  %v2256_v50 = vpop.permute.xlu0 %2255 }
 0x52b   :  { %v4518_v21 = vrot.slane %v4517_v61, 4  ;;  %v5424_v44 = vmax.f32 %v5422_v8, %v5423_v4  ;;  %v6135_v55 = vsel %vm5959_vm12, %v5027_v9, -inf  ;;  %v4524_v7 = vsel %vm4166_vm11, %v3820_v6, -inf  ;;  %2331 = vrot.lane.b32.xlu0 %v9177_v14, %s9468_s20  ;;  %2429 = vst.msk [vmem:[#allocation2 + $0x98] sm:$0xff] %vm2409_vm6, %v2256_v50 }
 0x52c   :  { %v6138_v16 = vsel %vm5959_vm12, %v5034_v62, -inf  ;;  %v6136_v19 = vmax.f32 %v12741_v0, %v6135_v55  ;;  %v6405_v41 = vadd.f32 %v12483_v34, %v6133_v15  ;;  %v4505_v52 = vmax.f32 %v4503_v24, %v4504_v45  ;;  %v9163_v45 = vld [vmem:[%s15082_s0 + $0x260] sm:$0xff] }
 0x52d   :  { %v6139_v18 = vmax.f32 %v12798_v5, %v6138_v16  ;;  %v5411_v37 = vrot.slane %v12834_v58, 1  ;;  %v6130_v20 = vmax.f32 %v12716_v22, %v6129_v36  ;;  %v4512_v57 = vmax.f32 %v4510_v25, %v4511_v48  ;;  %v12877_v22 = vld [vmem:[%s15084_s2] ss:$0 sm:$0xff]  ;;  %v9305_v48 = vld [vmem:[%s15082_s0 + $0x30a] sm:$0xff]  ;;  %2303 = vrot.lane.b32.xlu2 %v9163_v45, %s9468_s20 }
 0x52e   :  { %v4519_v8 = vmax.f32 %v4517_v61, %v4518_v21  ;;  %v5006_v0 = vmax.f32 %v12819_v43, %v5005_v42  ;;  %v12871_v34 = vsel %vm5959_vm12, %v12825_v49, -inf  ;;  %v5418_v5 = vrot.slane %v12838_v60, 1  ;;  %v2677_v43 = vpop.permute.xlu1 %2676  ;;  %v9290_v21 = vld [vmem:[%s15082_s0 + $0x25a] sm:$0xff]  ;;  %3101 = vrot.lane.b32.xlu1 %v9305_v48, %s9469_s25 }
 0x52f   :  { %v6406_v53 = vadd.f32 %v12877_v22, %v6136_v19  ;;  %v5405_v3 = vmax.f32 %v5403_v30, %v5404_v59  ;;  %v5425_v23 = vrot.slane %v5424_v44, 1  ;;  %v6533_v29 = vmax.f32 %v6405_v41, 0.0  ;;  %2832 = vst.msk [vmem:[#allocation2 + $0x128] sm:$0xff] %vm2794_vm8, %v2677_v43  ;;  %v3664_v59 = vpop.f32.mrf.mxu3 }
 0x530   :  { %v4525_v32 = vrot.slane %v4524_v7, 4  ;;  %v12883_v49 = vsel %vm5959_vm12, %v12827_v28, -inf  ;;  %v12887_v42 = vsel %vm5959_vm12, %v12832_v47, -inf  ;;  %v6407_v31 = vadd.f32 %v12877_v22, %v6139_v18 }
 0x531   :  { %v4506_v38 = vrot.slane %v4505_v52, 2  ;;  %v5412_v26 = vmax.f32 %v12834_v58, %v5411_v37  ;;  %v6404_v40 = vadd.f32 %v12877_v22, %v6130_v20  ;;  %v4513_v30 = vrot.slane %v4512_v57, 2  ;;  %v2709_v20 = vpop.permute.xlu2 %2708 }
 0x532   :  { %v4520_v51 = vrot.slane %v4519_v8, 2  ;;  %v12895_v28 = vsel %vm5959_vm12, %v5006_v0, -inf  ;;  %v5419_v13 = vmax.f32 %v12838_v60, %v5418_v5  ;;  %v6534_v47 = vmax.f32 %v6406_v53, 0.0  ;;  %2848 = vst.msk [vmem:[#allocation2 + $0x1a8] sm:$0xff] %vm2794_vm8, %v2709_v20 }
 0x533   :  { %v3917_v4 = vrot.slane %v12864_v63, 2  ;;  %v5426_v17 = vmax.f32 %v5424_v44, %v5425_v23  ;;  %v12900_v39 = vsel %vm5959_vm12, %v5405_v3, -inf  ;;  %v6887_v54 = vrot.slane %v6533_v29, 7  ;;  %3071 = vrot.lane.b32.xlu0 %v9290_v21, %s9469_s25 }
 0x534   :  { %v4526_v58 = vmax.f32 %v4524_v7, %v4525_v32  ;;  %v6535_v35 = vmax.f32 %v6407_v31, 0.0  ;;  %v4507_v10 = vmax.f32 %v4505_v52, %v4506_v38  ;;  %v3918_v1 = vrot.slane %v12864_v63, 4 }
 0x535   :  { %v5427_v56 = vsel %vm4166_vm11, %v12864_v63, -inf  ;;  %v12906_v11 = vsel %vm5959_vm12, %v5412_v26, -inf  ;;  %v6532_v60 = vmax.f32 %v6404_v40, 0.0  ;;  %v4514_v27 = vmax.f32 %v4512_v57, %v4513_v30 }
 0x536   :  { %v4521_v6 = vmax.f32 %v4519_v8, %v4520_v51  ;;  %v12909_v24 = vsel %vm5959_vm12, %v5419_v13, -inf  ;;  %v6889_v25 = vrot.slane %v6534_v47, 6  ;;  %v3919_v61 = vrot.slane %v12864_v63, 6  ;;  %v3062_v57 = vpop.permute.xlu1 %3061  ;;  %v3265_v8 = vld [vmem:[#allocation2 + $0xa8] sm:$0xff] }
 0x537   :  { %v5434_v9 = vsel %vm4166_vm11, %v3917_v4, -inf  ;;  %v12914_v62 = vsel %vm5959_vm12, %v5426_v17, -inf  ;;  %v6888_v36 = vsel %vm15097_vm13, %v6887_v54, %v6532_v60  ;;  %v4527_v33 = vrot.slane %v4526_v58, 2  ;;  %9334 = vmatmul.msk.f32.vlgmr.msra.gmra.mxu1 %vm3312_vm10, %v3265_v8  ;;  %3217 = vst.msk [vmem:[#allocation2 + $0x128] sm:$0xff] %vm3179_vm9, %v3062_v57  ;;  %v9242_v54 = vld [vmem:[%s15082_s0 + $0x319] sm:$0xff] }
 0x538   :  { %v5428_v15 = vrot.slane %v5427_v56, 4  ;;  %v6891_v44 = vrot.slane %v6535_v35, 5  ;;  %v4508_v55 = vrot.slane %v4507_v10, 1  ;;  %v5441_v16 = vsel %vm4166_vm11, %v3918_v1, -inf  ;;  %v9178_v35 = vld [vmem:[%s15082_s0 + $0x318] sm:$0xff]  ;;  %2718 = vrot.lane.b32.xlu2 %v9242_v54, %s9470_s13 }
 0x539   :  { %v3920_v7 = vrot.slane %v3664_v59, 2  ;;  %v4515_v46 = vrot.slane %v4514_v27, 1  ;;  %v4522_v2 = vrot.slane %v4521_v6, 1  ;;  %v5435_v14 = vrot.slane %v5434_v9, 4 }
 0x53a   :  { %v3921_v19 = vrot.slane %v3664_v59, 4  ;;  %v6890_v18 = vsel %vm15096_vm14, %v6889_v25, %v6888_v36  ;;  %v5448_v41 = vsel %vm4166_vm11, %v3919_v61, -inf  ;;  %v3922_v52 = vrot.slane %v3664_v59, 6 }
 0x53b   :  { %v5455_v37 = vsel %vm4166_vm11, %v3664_v59, -inf  ;;  %v5429_v63 = vmax.f32 %v5427_v56, %v5428_v15  ;;  %v5442_v0 = vrot.slane %v5441_v16, 4  ;;  %v5462_v53 = vsel %vm4166_vm11, %v3920_v7, -inf  ;;  %2333 = vrot.lane.b32.xlu0 %v9178_v35, %s9468_s20 }
 0x53c   :  { %v5456_v5 = vrot.slane %v5455_v37, 4  ;;  %v4509_v3 = vmax.f32 %v4507_v10, %v4508_v55  ;;  %v12936_v23 = vmax.f32 %v4526_v58, %v4527_v33  ;;  %v5463_v29 = vrot.slane %v5462_v53, 4  ;;  %v9227_v58 = vld [vmem:[%s15082_s0 + $0x261] sm:$0xff]  ;;  %v3094_v55 = vpop.permute.xlu2 %3093 }
 0x53d   :  { %v5469_v32 = vsel %vm4166_vm11, %v3921_v19, -inf  ;;  %v5436_v43 = vmax.f32 %v5434_v9, %v5435_v14  ;;  %v5449_v12 = vrot.slane %v5448_v41, 4  ;;  %v12942_v26 = vsel %vm15095_vm15, %v6891_v44, %v6890_v18  ;;  %2688 = vrot.lane.b32.xlu1 %v9227_v58, %s9470_s13  ;;  %v3619_v9 = vpop.f32.mrf.mxu2  ;;  %3233 = vst.msk [vmem:[#allocation2 + $0x1a8] sm:$0xff] %vm3179_vm9, %v3094_v55  ;;  %v2641_v19 = vpop.permute.xlu0 %2640 }
 0x53e   :  { %v5457_v31 = vmax.f32 %v5455_v37, %v5456_v5  ;;  %v5470_v38 = vrot.slane %v5469_v32, 4  ;;  %v4516_v40 = vmax.f32 %v4514_v27, %v4515_v46  ;;  %v5464_v30 = vmax.f32 %v5462_v53, %v5463_v29  ;;  %2814 = vst.msk [vmem:[#allocation2 + $0x98] sm:$0xff] %vm2794_vm8, %v2641_v19  ;;  %v3281_v58 = vld [vmem:[#allocation2 + $0x128] sm:$0xff] }
 0x53f   :  { %v5476_v51 = vsel %vm4166_vm11, %v3922_v52, -inf  ;;  %v5430_v13 = vrot.slane %v5429_v63, 2  ;;  %v5443_v47 = vmax.f32 %v5441_v16, %v5442_v0  ;;  %v12954_v10 = vmax.f32 %v4521_v6, %v4522_v2  ;;  %v3026_v16 = vpop.permute.xlu1 %3025  ;;  %9350 = vmatmul.msk.f32.gmra.mxu2 %vm3312_vm10, %v3281_v58 }
 0x540   :  { %v5458_v4 = vrot.slane %v5457_v31, 2  ;;  %v5471_v17 = vmax.f32 %v5469_v32, %v5470_v38  ;;  %v4529_v1 = vrot.slane %v12936_v23, 1  ;;  %v5465_v56 = vrot.slane %v5464_v30, 2  ;;  %3199 = vst.msk [vmem:[#allocation2 + $0x98] sm:$0xff] %vm3179_vm9, %v3026_v16  ;;  %v9291_v38 = vld [vmem:[%s15082_s0 + $0x262] sm:$0xff] }
 0x541   :  { %v5477_v60 = vrot.slane %v5476_v51, 4  ;;  %v5437_v27 = vrot.slane %v5436_v43, 2  ;;  %v5450_v59 = vmax.f32 %v5448_v41, %v5449_v12  ;;  %v12961_v36 = vsel %vm5959_vm12, %v4509_v3, -inf  ;;  %v9179_v12 = vld [vmem:[%s15082_s0 + $0x320] sm:$0xff] }
 0x542   :  { %v5459_v25 = vmax.f32 %v5457_v31, %v5458_v4  ;;  %v5472_v61 = vrot.slane %v5471_v17, 2  ;;  %v12964_v6 = vsel %vm5959_vm12, %v4516_v40, -inf  ;;  %v5466_v33 = vmax.f32 %v5464_v30, %v5465_v56  ;;  %v9306_v31 = vld [vmem:[%s15082_s0 + $0x31a] sm:$0xff]  ;;  %2335 = vrot.lane.b32.xlu2 %v9179_v12, %s9468_s20 }
 0x543   :  { %v5478_v15 = vmax.f32 %v5476_v51, %v5477_v60  ;;  %v12966_v45 = vmax.f32 %v5429_v63, %v5430_v13  ;;  %v5444_v48 = vrot.slane %v5443_v47, 2  ;;  %v3875_v2 = vrot.slane %v3619_v9, 2  ;;  %3073 = vrot.lane.b32.xlu0 %v9291_v38, %s9469_s25 }
 0x544   :  { %v5460_v21 = vrot.slane %v5459_v25, 1  ;;  %v5473_v44 = vmax.f32 %v5471_v17, %v5472_v61  ;;  %v5467_v7 = vrot.slane %v5466_v33, 1  ;;  %v3876_v14 = vrot.slane %v3619_v9, 4 }
 0x545   :  { %v5479_v46 = vrot.slane %v5478_v15, 2  ;;  %v12969_v18 = vmax.f32 %v5436_v43, %v5437_v27  ;;  %v5451_v41 = vrot.slane %v5450_v59, 2  ;;  %v5035_v8 = vsel %vm4166_vm11, %v3619_v9, -inf  ;;  %3103 = vrot.lane.b32.xlu1 %v9306_v31, %s9469_s25  ;;  %v2647_v16 = vpop.permute.xlu0 %2646 }
 0x546   :  { %v5461_v52 = vmax.f32 %v5459_v25, %v5460_v21  ;;  %v5474_v37 = vrot.slane %v5473_v44, 1  ;;  %v5468_v20 = vmax.f32 %v5466_v33, %v5467_v7  ;;  %v5042_v63 = vsel %vm4166_vm11, %v3875_v2, -inf  ;;  %2817 = vst.msk [vmem:[#allocation2 + $0xb0] sm:$0xff] %vm2794_vm8, %v2647_v16 }
 0x547   :  { %v5480_v57 = vmax.f32 %v5478_v15, %v5479_v46  ;;  %v3877_v5 = vrot.slane %v3619_v9, 6  ;;  %v5036_v53 = vrot.slane %v5035_v8, 4  ;;  %v5043_v50 = vrot.slane %v5042_v63, 4  ;;  %v2264_v15 = vpop.permute.xlu2 %2263  ;;  %v2294_v55 = vpop.permute.xlu1 %2293  ;;  %v3263_v7 = vld [vmem:[#allocation2 + $0x98] sm:$0xff] }
 0x548   :  { %v5475_v0 = vmax.f32 %v5473_v44, %v5474_v37  ;;  %v5445_v3 = vmax.f32 %v5443_v47, %v5444_v48  ;;  %v6228_v32 = vsel %vm5959_vm12, %v5468_v20, -inf  ;;  %v5049_v43 = vsel %vm4166_vm11, %v3876_v14, -inf  ;;  %2433 = vst.msk [vmem:[#allocation2 + $0xb8] sm:$0xff] %vm2409_vm6, %v2264_v15  ;;  %9332 = vmatmul.msk.f32.gmra.mxu0 %vm3312_vm10, %v3263_v7  ;;  %v3667_v7 = vpop.f32.mrf.mxu3 }
 0x549   :  { %v5481_v29 = vrot.slane %v5480_v57, 1  ;;  %v5432_v40 = vrot.slane %v12966_v45, 1  ;;  %v5037_v51 = vmax.f32 %v5035_v8, %v5036_v53  ;;  %v5044_v13 = vmax.f32 %v5042_v63, %v5043_v50  ;;  %2448 = vst.msk [vmem:[#allocation2 + $0x130] sm:$0xff] %vm2409_vm6, %v2294_v55  ;;  %v3565_v8 = vpop.f32.mrf.mxu0 }
 0x54a   :  { %v6231_v30 = vsel %vm5959_vm12, %v5475_v0, -inf  ;;  %v6225_v4 = vsel %vm5959_vm12, %v5461_v52, -inf  ;;  %v6229_v17 = vmax.f32 %v12906_v11, %v6228_v32  ;;  %v5050_v54 = vrot.slane %v5049_v43, 4  ;;  %v3296_v11 = vld [vmem:[#allocation2 + $0x1a0] sm:$0xff] }
 0x54b   :  { %v5482_v47 = vmax.f32 %v5480_v57, %v5481_v29  ;;  %v6232_v35 = vmax.f32 %v12909_v24, %v6231_v30  ;;  %v5038_v56 = vrot.slane %v5037_v51, 2  ;;  %v5045_v60 = vrot.slane %v5044_v13, 2  ;;  %9365 = vmatmul.msk.f32.gmra.mxu3 %vm3312_vm10, %v3296_v11 }
 0x54c   :  { %v5056_v27 = vsel %vm4166_vm11, %v3877_v5, -inf  ;;  %v5439_v25 = vrot.slane %v12969_v18, 1  ;;  %v5446_v61 = vrot.slane %v5445_v3, 1  ;;  %v12997_v9 = vmax.f32 %v5450_v59, %v5451_v41 }
 0x54d   :  { %v5051_v33 = vmax.f32 %v5049_v43, %v5050_v54  ;;  %v13001_v48 = vsel %vm5959_vm12, %v12954_v10, -inf  ;;  %v6226_v24 = vmax.f32 %v12900_v39, %v6225_v4  ;;  %v5039_v21 = vmax.f32 %v5037_v51, %v5038_v56 }
 0x54e   :  { %v5046_v44 = vmax.f32 %v5044_v13, %v5045_v60  ;;  %v6234_v59 = vsel %vm5959_vm12, %v5482_v47, -inf  ;;  %v6437_v46 = vadd.f32 %v12877_v22, %v6229_v17  ;;  %v5057_v14 = vrot.slane %v5056_v27, 4 }
 0x54f   :  { %v5052_v2 = vrot.slane %v5051_v33, 2  ;;  %v5433_v39 = vmax.f32 %v12966_v45, %v5432_v40  ;;  %v6438_v10 = vadd.f32 %v12877_v22, %v6232_v35  ;;  %v5040_v19 = vrot.slane %v5039_v21, 1 }
 0x550   :  { %v5047_v41 = vrot.slane %v5046_v44, 1  ;;  %v5440_v52 = vmax.f32 %v12969_v18, %v5439_v25  ;;  %v13014_v37 = vmax.f32 %v5445_v3, %v5446_v61  ;;  %v5058_v57 = vmax.f32 %v5056_v27, %v5057_v14 }
 0x551   :  { %v5053_v20 = vmax.f32 %v5051_v33, %v5052_v2  ;;  %v5453_v63 = vrot.slane %v12997_v9, 1  ;;  %v6235_v0 = vmax.f32 %v12914_v62, %v6234_v59  ;;  %v5041_v5 = vmax.f32 %v5039_v21, %v5040_v19 }
 0x552   :  { %v5048_v53 = vmax.f32 %v5046_v44, %v5047_v41  ;;  %v6436_v45 = vadd.f32 %v12877_v22, %v6226_v24  ;;  %v6565_v50 = vmax.f32 %v6437_v46, 0.0  ;;  %v5059_v32 = vrot.slane %v5058_v57, 2 }
 0x553   :  { %v5054_v29 = vrot.slane %v5053_v20, 1  ;;  %v6566_v43 = vmax.f32 %v6438_v10, 0.0  ;;  %v6141_v12 = vsel %vm5959_vm12, %v5041_v5, -inf  ;;  %v4531_v3 = vsel %vm4166_vm11, %v3565_v8, -inf }
 0x554   :  { %v6144_v18 = vsel %vm5959_vm12, %v5048_v53, -inf  ;;  %v5060_v38 = vmax.f32 %v5058_v57, %v5059_v32  ;;  %v6142_v40 = vmax.f32 %v12871_v34, %v6141_v12  ;;  %v13025_v30 = vsel %vm5959_vm12, %v5433_v39, -inf }
 0x555   :  { %v5055_v31 = vmax.f32 %v5053_v20, %v5054_v29  ;;  %v6145_v62 = vmax.f32 %v12883_v49, %v6144_v18  ;;  %v6439_v51 = vadd.f32 %v12877_v22, %v6235_v0  ;;  %v3821_v13 = vrot.slane %v3565_v8, 2 }
 0x556   :  { %v3822_v47 = vrot.slane %v3565_v8, 4  ;;  %v5061_v4 = vrot.slane %v5060_v38, 1  ;;  %v6408_v54 = vadd.f32 %v12877_v22, %v6142_v40  ;;  %v6564_v35 = vmax.f32 %v6436_v45, 0.0  ;;  %v9243_v45 = vld [vmem:[%s15082_s0 + $0x321] sm:$0xff] }
 0x557   :  { %v6147_v17 = vsel %vm5959_vm12, %v5055_v31, -inf  ;;  %v6409_v58 = vadd.f32 %v12877_v22, %v6145_v62  ;;  %v6943_v56 = vrot.slane %v6565_v50, 7  ;;  %v4532_v60 = vrot.slane %v4531_v3, 4  ;;  %2720 = vrot.lane.b32.xlu0 %v9243_v45, %s9470_s13  ;;  %v2326_v62 = vpop.permute.xlu2 %2325 }
 0x558   :  { %v6148_v34 = vmax.f32 %v12887_v42, %v6147_v17  ;;  %v6945_v49 = vrot.slane %v6566_v43, 6  ;;  %v5062_v27 = vmax.f32 %v5060_v38, %v5061_v4  ;;  %v6536_v25 = vmax.f32 %v6408_v54, 0.0  ;;  %v3568_v54 = vpop.f32.mrf.mxu0  ;;  %2464 = vst.msk [vmem:[#allocation2 + $0x1b0] sm:$0xff] %vm2409_vm6, %v2326_v62 }
 0x559   :  { %v6537_v61 = vmax.f32 %v6409_v58, 0.0  ;;  %v6567_v33 = vmax.f32 %v6439_v51, 0.0  ;;  %v4538_v11 = vsel %vm4166_vm11, %v3821_v13, -inf  ;;  %v4545_v24 = vsel %vm4166_vm11, %v3822_v47, -inf  ;;  %v2679_v51 = vpop.permute.xlu1 %2678  ;;  %v3032_v58 = vpop.permute.xlu0 %3031 }
 0x55a   :  { %v6410_v15 = vadd.f32 %v12877_v22, %v6148_v34  ;;  %v6150_v21 = vsel %vm5959_vm12, %v5062_v27, -inf  ;;  %v6893_v44 = vrot.slane %v6536_v25, 4  ;;  %v3823_v16 = vrot.slane %v3565_v8, 6  ;;  %2833 = vst.msk [vmem:[#allocation2 + $0x130] sm:$0xff] %vm2794_vm8, %v2679_v51 }
 0x55b   :  { %v6895_v55 = vrot.slane %v6537_v61, 3  ;;  %v6944_v42 = vsel %vm15097_vm13, %v6943_v56, %v6564_v35  ;;  %v6151_v59 = vmax.f32 %v12895_v28, %v6150_v21  ;;  %v4533_v2 = vmax.f32 %v4531_v3, %v4532_v60  ;;  %3202 = vst.msk [vmem:[#allocation2 + $0xb0] sm:$0xff] %vm3179_vm9, %v3032_v58 }
 0x55c   :  { %v6538_v46 = vmax.f32 %v6410_v15, 0.0  ;;  %v13039_v14 = vsel %vm5959_vm12, %v5440_v52, -inf  ;;  %v6894_v39 = vsel %vm6792_vm0, %v6893_v44, %v12942_v26  ;;  %v4539_v10 = vrot.slane %v4538_v11, 4  ;;  %v9180_v52 = vld [vmem:[%s15082_s0 + $0x330] sm:$0xff]  ;;  %v9307_v26 = vld [vmem:[%s15082_s0 + $0x322] sm:$0xff] }
 0x55d   :  { %v4546_v19 = vrot.slane %v4545_v24, 4  ;;  %v6411_v41 = vadd.f32 %v12877_v22, %v6151_v59  ;;  %v6896_v20 = vsel %vm6795_vm1, %v6895_v55, %v6894_v39  ;;  %v3923_v8 = vrot.slane %v3667_v7, 2  ;;  %2337 = vrot.lane.b32.xlu2 %v9180_v52, %s9468_s20  ;;  %3105 = vrot.lane.b32.xlu1 %v9307_v26, %s9469_s25  ;;  %v9244_v39 = vld [vmem:[%s15082_s0 + $0x331] sm:$0xff] }
 0x55e   :  { %v6897_v57 = vrot.slane %v6538_v46, 2  ;;  %v5454_v0 = vmax.f32 %v12997_v9, %v5453_v63  ;;  %v6946_v28 = vsel %vm15096_vm14, %v6945_v49, %v6944_v42  ;;  %v6947_v5 = vrot.slane %v6567_v33, 5 }
 0x55f   :  { %v4552_v53 = vsel %vm4166_vm11, %v3823_v16, -inf  ;;  %v6539_v50 = vmax.f32 %v6411_v41, 0.0  ;;  %v4534_v29 = vrot.slane %v4533_v2, 2  ;;  %v3924_v9 = vrot.slane %v3667_v7, 4  ;;  %v9181_v16 = vld [vmem:[%s15082_s0 + $0x338] sm:$0xff]  ;;  %2722 = vrot.lane.b32.xlu0 %v9244_v39, %s9470_s13 }
 0x560   :  { %v3925_v63 = vrot.slane %v3667_v7, 6  ;;  %v6898_v32 = vsel %vm6798_vm2, %v6897_v57, %v6896_v20  ;;  %v13060_v43 = vmax.f32 %v4538_v11, %v4539_v10  ;;  %v13062_v12 = vmax.f32 %v4545_v24, %v4546_v19 }
 0x561   :  { %v5483_v18 = vsel %vm4166_vm11, %v3667_v7, -inf  ;;  %v13068_v3 = vsel %vm5959_vm12, %v13014_v37, -inf  ;;  %v6899_v31 = vrot.slane %v6539_v50, 1  ;;  %v5490_v40 = vsel %vm4166_vm11, %v3923_v8, -inf  ;;  %v9308_v7 = vld [vmem:[%s15082_s0 + $0x332] sm:$0xff] }
 0x562   :  { %v5484_v38 = vrot.slane %v5483_v18, 4  ;;  %v13072_v13 = vsel %vm5959_vm12, %v5454_v0, -inf  ;;  %v13075_v47 = vsel %vm15095_vm15, %v6947_v5, %v6946_v28  ;;  %v4553_v4 = vrot.slane %v4552_v53, 4  ;;  %v2711_v5 = vpop.permute.xlu2 %2710  ;;  %v3266_v51 = vld [vmem:[#allocation2 + $0xb0] sm:$0xff] }
 0x563   :  { %v5491_v17 = vrot.slane %v5490_v40, 4  ;;  %v6900_v37 = vsel %vm15100_vm3, %v6899_v31, %v6898_v32  ;;  %v5497_v56 = vsel %vm4166_vm11, %v3924_v9, -inf  ;;  %v5504_v34 = vsel %vm4166_vm11, %v3925_v63, -inf  ;;  %2849 = vst.msk [vmem:[#allocation2 + $0x1b0] sm:$0xff] %vm2794_vm8, %v2711_v5  ;;  %9335 = vmatmul.msk.f32.gmra.mxu1 %vm3312_vm10, %v3266_v51 }
 0x564   :  { %v5485_v35 = vmax.f32 %v5483_v18, %v5484_v38  ;;  %7037 = vst.msk [vmem:[#allocation3 + $0x81] sm:$0xff] %vm5959_vm12, %v6900_v37  ;;  %v13083_v60 = vmax.f32 %v4533_v2, %v4534_v29  ;;  %v4541_v49 = vrot.slane %v13060_v43, 2  ;;  %v4548_v27 = vrot.slane %v13062_v12, 2  ;;  %v2258_v29 = vpop.permute.xlu0 %2257 }
 0x565   :  { %v5492_v25 = vmax.f32 %v5490_v40, %v5491_v17  ;;  %v5498_v33 = vrot.slane %v5497_v56, 4  ;;  %v5505_v15 = vrot.slane %v5504_v34, 4  ;;  %v3824_v11 = vrot.slane %v3568_v54, 2  ;;  %2339 = vrot.lane.b32.xlu2 %v9181_v16, %s9468_s20  ;;  %3107 = vrot.lane.b32.xlu1 %v9308_v7, %s9469_s25  ;;  %2430 = vst.msk [vmem:[#allocation2 + $0xa0] sm:$0xff] %vm2409_vm6, %v2258_v29 }
 0x566   :  { %v5486_v61 = vrot.slane %v5485_v35, 2  ;;  %v13088_v24 = vmax.f32 %v4552_v53, %v4553_v4  ;;  %v3825_v44 = vrot.slane %v3568_v54, 4  ;;  %v3826_v55 = vrot.slane %v3568_v54, 6  ;;  %v3064_v53 = vpop.permute.xlu1 %3063  ;;  %v9182_v4 = vld [vmem:[%s15082_s0 + $0x348] sm:$0xff] }
 0x567   :  { %v5493_v21 = vrot.slane %v5492_v25, 2  ;;  %v5499_v59 = vmax.f32 %v5497_v56, %v5498_v33  ;;  %v5506_v46 = vmax.f32 %v5504_v34, %v5505_v15  ;;  %v4559_v2 = vsel %vm4166_vm11, %v3568_v54, -inf  ;;  %3218 = vst.msk [vmem:[#allocation2 + $0x130] sm:$0xff] %vm3179_vm9, %v3064_v53  ;;  %v9245_v56 = vld [vmem:[%s15082_s0 + $0x339] sm:$0xff] }
 0x568   :  { %v5487_v42 = vmax.f32 %v5485_v35, %v5486_v61  ;;  %v4560_v19 = vrot.slane %v4559_v2, 4  ;;  %v4566_v41 = vsel %vm4166_vm11, %v3824_v11, -inf  ;;  %v4573_v20 = vsel %vm4166_vm11, %v3825_v44, -inf  ;;  %v9309_v35 = vld [vmem:[%s15082_s0 + $0x33a] sm:$0xff]  ;;  %2724 = vrot.lane.b32.xlu0 %v9245_v56, %s9470_s13 }
 0x569   :  { %v5494_v10 = vmax.f32 %v5492_v25, %v5493_v21  ;;  %v5500_v8 = vrot.slane %v5499_v59, 2  ;;  %v5507_v0 = vrot.slane %v5506_v46, 2  ;;  %v4567_v28 = vrot.slane %v4566_v41, 4 }
 0x56a   :  { %v5488_v57 = vrot.slane %v5487_v42, 1  ;;  %v4561_v26 = vmax.f32 %v4559_v2, %v4560_v19  ;;  %v4574_v45 = vrot.slane %v4573_v20, 4  ;;  %v4580_v50 = vsel %vm4166_vm11, %v3826_v55, -inf }
 0x56b   :  { %v5495_v52 = vrot.slane %v5494_v10, 1  ;;  %v5501_v63 = vmax.f32 %v5499_v59, %v5500_v8  ;;  %v5508_v32 = vmax.f32 %v5506_v46, %v5507_v0  ;;  %v4568_v18 = vmax.f32 %v4566_v41, %v4567_v28 }
 0x56c   :  { %v5489_v9 = vmax.f32 %v5487_v42, %v5488_v57  ;;  %v4562_v38 = vrot.slane %v4561_v26, 2  ;;  %v4575_v40 = vmax.f32 %v4573_v20, %v4574_v45  ;;  %v4581_v62 = vrot.slane %v4580_v50, 4  ;;  %v2643_v57 = vpop.permute.xlu0 %2642 }
 0x56d   :  { %v5496_v31 = vmax.f32 %v5494_v10, %v5495_v52  ;;  %v5502_v17 = vrot.slane %v5501_v63, 1  ;;  %v5509_v54 = vrot.slane %v5508_v32, 1  ;;  %v4569_v37 = vrot.slane %v4568_v18, 2  ;;  %2341 = vrot.lane.b32.xlu2 %v9182_v4, %s9468_s20  ;;  %3109 = vrot.lane.b32.xlu1 %v9309_v35, %s9469_s25  ;;  %2815 = vst.msk [vmem:[#allocation2 + $0xa0] sm:$0xff] %vm2794_vm8, %v2643_v57 }
 0x56e   :  { %v6237_v58 = vsel %vm5959_vm12, %v5489_v9, -inf  ;;  %v4563_v61 = vmax.f32 %v4561_v26, %v4562_v38  ;;  %v4576_v33 = vrot.slane %v4575_v40, 2  ;;  %v4582_v42 = vmax.f32 %v4580_v50, %v4581_v62  ;;  %v3028_v39 = vpop.permute.xlu1 %3027  ;;  %v3282_v8 = vld [vmem:[#allocation2 + $0x130] sm:$0xff]  ;;  %v3622_v38 = vpop.f32.mrf.mxu2 }
 0x56f   :  { %v6238_v34 = vmax.f32 %v13025_v30, %v6237_v58  ;;  %v6240_v25 = vsel %vm5959_vm12, %v5496_v31, -inf  ;;  %v5503_v15 = vmax.f32 %v5501_v63, %v5502_v17  ;;  %v5510_v11 = vmax.f32 %v5508_v32, %v5509_v54  ;;  %9351 = vmatmul.msk.f32.gmra.mxu2 %vm3312_vm10, %v3282_v8  ;;  %3200 = vst.msk [vmem:[#allocation2 + $0xa0] sm:$0xff] %vm3179_vm9, %v3028_v39 }
 0x570   :  { %v6241_v21 = vmax.f32 %v13039_v14, %v6240_v25  ;;  %v4570_v44 = vmax.f32 %v4568_v18, %v4569_v37  ;;  %v4564_v16 = vrot.slane %v4563_v61, 1  ;;  %v4577_v7 = vmax.f32 %v4575_v40, %v4576_v33  ;;  %v2298_v14 = vpop.permute.xlu2 %2297 }
 0x571   :  { %v6440_v55 = vadd.f32 %v12877_v22, %v6238_v34  ;;  %v6243_v30 = vsel %vm5959_vm12, %v5503_v15, -inf  ;;  %v6246_v59 = vsel %vm5959_vm12, %v5510_v11, -inf  ;;  %v4536_v10 = vrot.slane %v13083_v60, 1  ;;  %2450 = vst.msk [vmem:[#allocation2 + $0x140] sm:$0xff] %vm2409_vm6, %v2298_v14 }
 0x572   :  { %v6441_v46 = vadd.f32 %v12877_v22, %v6241_v21  ;;  %v4571_v2 = vrot.slane %v4570_v44, 1  ;;  %v6244_v19 = vmax.f32 %v13068_v3, %v6243_v30  ;;  %v6247_v41 = vmax.f32 %v13072_v13, %v6246_v59  ;;  %v9183_v21 = vld [vmem:[%s15082_s0 + $0x350] sm:$0xff] }
 0x573   :  { %v6568_v20 = vmax.f32 %v6440_v55, 0.0  ;;  %v4578_v5 = vrot.slane %v4577_v7, 1  ;;  %v4583_v53 = vrot.slane %v4582_v42, 2  ;;  %v4565_v45 = vmax.f32 %v4563_v61, %v4564_v16 }
 0x574   :  { %v6569_v0 = vmax.f32 %v6441_v46, 0.0  ;;  %v4572_v28 = vmax.f32 %v4570_v44, %v4571_v2  ;;  %v6442_v52 = vadd.f32 %v12877_v22, %v6244_v19  ;;  %v6443_v26 = vadd.f32 %v12877_v22, %v6247_v41  ;;  %v3297_v19 = vld [vmem:[#allocation2 + $0x1a8] sm:$0xff] }
 0x575   :  { %v6949_v3 = vrot.slane %v6568_v20, 4  ;;  %v4542_v13 = vmax.f32 %v13060_v43, %v4541_v49  ;;  %v4579_v29 = vmax.f32 %v4577_v7, %v4578_v5  ;;  %v4584_v9 = vmax.f32 %v4582_v42, %v4583_v53  ;;  %2343 = vrot.lane.b32.xlu2 %v9183_v21, %s9468_s20  ;;  %9366 = vmatmul.msk.f32.gmra.mxu3 %vm3312_vm10, %v3297_v19 }
 0x576   :  { %v6951_v50 = vrot.slane %v6569_v0, 3  ;;  %v6570_v63 = vmax.f32 %v6442_v52, 0.0  ;;  %v6571_v32 = vmax.f32 %v6443_v26, 0.0  ;;  %v6036_v31 = vsel %vm5959_vm12, %v4572_v28, -inf  ;;  %v2649_v0 = vpop.permute.xlu0 %2648  ;;  %v3264_v28 = vld [vmem:[#allocation2 + $0xa0] sm:$0xff] }
 0x577   :  { %v6950_v18 = vsel %vm6792_vm0, %v6949_v3, %v13075_v47  ;;  %v4585_v62 = vrot.slane %v4584_v9, 1  ;;  %v6037_v51 = vmax.f32 %v12964_v6, %v6036_v31  ;;  %v6039_v4 = vsel %vm5959_vm12, %v4579_v29, -inf  ;;  %2818 = vst.msk [vmem:[#allocation2 + $0xb8] sm:$0xff] %vm2794_vm8, %v2649_v0  ;;  %9333 = vmatmul.msk.f32.gmra.mxu0 %vm3312_vm10, %v3264_v28 }
 0x578   :  { %v6952_v40 = vsel %vm6795_vm1, %v6951_v50, %v6950_v18  ;;  %v4549_v43 = vmax.f32 %v13062_v12, %v4548_v27  ;;  %v6953_v49 = vrot.slane %v6570_v63, 2  ;;  %v6955_v17 = vrot.slane %v6571_v32, 1  ;;  %v13189_v26 = vpop.permute.xlu2 %2712 }
 0x579   :  { %v6033_v54 = vsel %vm5959_vm12, %v4565_v45, -inf  ;;  %v4586_v58 = vmax.f32 %v4584_v9, %v4585_v62  ;;  %v6040_v47 = vmax.f32 %v13001_v48, %v6039_v4  ;;  %v3878_v37 = vrot.slane %v3622_v38, 2 }
 0x57a   :  { %v3879_v35 = vrot.slane %v3622_v38, 4  ;;  %v4530_v56 = vmax.f32 %v12936_v23, %v4529_v1  ;;  %v4555_v6 = vrot.slane %v13088_v24, 2  ;;  %v6954_v34 = vsel %vm6798_vm2, %v6953_v49, %v6952_v40  ;;  %v3571_v1 = vpop.f32.mrf.mxu0 }
 0x57b   :  { %v6373_v25 = vadd.f32 %v12877_v22, %v6037_v51  ;;  %v4537_v12 = vmax.f32 %v13083_v60, %v4536_v10  ;;  %v6956_v27 = vsel %vm15100_vm3, %v6955_v17, %v6954_v34  ;;  %v3880_v61 = vrot.slane %v3622_v38, 6  ;;  %v9310_v60 = vld [vmem:[%s15082_s0 + $0x34a] sm:$0xff]  ;;  %v2296_v10 = vpop.permute.xlu1 %2295 }
 0x57c   :  { %v5063_v33 = vsel %vm4166_vm11, %v3622_v38, -inf  ;;  %v4543_v48 = vrot.slane %v4542_v13, 1  ;;  %v4550_v15 = vrot.slane %v4549_v43, 1  ;;  %7041 = vst.msk [vmem:[#allocation3 + $0xe1] sm:$0xff] %vm5959_vm12, %v6956_v27  ;;  %v6034_v11 = vmax.f32 %v12961_v36, %v6033_v54  ;;  %3111 = vrot.lane.b32.xlu1 %v9310_v60, %s9469_s25  ;;  %v9246_v36 = vld [vmem:[%s15082_s0 + $0x349] sm:$0xff] }
 0x57d   :  { %v5070_v23 = vsel %vm4166_vm11, %v3878_v37, -inf  ;;  %v6042_v44 = vsel %vm5959_vm12, %v4586_v58, -inf  ;;  %v6374_v55 = vadd.f32 %v12877_v22, %v6040_v47  ;;  %v5064_v16 = vrot.slane %v5063_v33, 4  ;;  %2726 = vrot.lane.b32.xlu0 %v9246_v36, %s9470_s13  ;;  %2449 = vst.msk [vmem:[#allocation2 + $0x138] sm:$0xff] %vm2409_vm6, %v2296_v10 }
 0x57e   :  { %v5077_v7 = vsel %vm4166_vm11, %v3879_v35, -inf  ;;  %v6041_v42 = vsel %vm5959_vm12, %v4530_v56, -inf  ;;  %v6501_v30 = vmax.f32 %v6373_v25, 0.0  ;;  %v5071_v59 = vrot.slane %v5070_v23, 4 }
 0x57f   :  { %v4556_v46 = vmax.f32 %v13088_v24, %v4555_v6  ;;  %v5078_v2 = vrot.slane %v5077_v7, 4  ;;  %v5084_v14 = vsel %vm4166_vm11, %v3880_v61, -inf  ;;  %v3827_v39 = vrot.slane %v3571_v1, 2 }
 0x580   :  { %v4544_v41 = vmax.f32 %v4542_v13, %v4543_v48  ;;  %v13184_v20 = vsel %vm5959_vm12, %v4537_v12, -inf  ;;  %v6043_v57 = vmax.f32 %v6041_v42, %v6042_v44  ;;  %v6372_v8 = vadd.f32 %v12877_v22, %v6034_v11 }
 0x581   :  { %v4551_v24 = vmax.f32 %v4549_v43, %v4550_v15  ;;  %v6502_v5 = vmax.f32 %v6374_v55, 0.0  ;;  %v5065_v53 = vmax.f32 %v5063_v33, %v5064_v16  ;;  %v3828_v52 = vrot.slane %v3571_v1, 4  ;;  %v9311_v55 = vld [vmem:[%s15082_s0 + $0x352] sm:$0xff] }
 0x582   :  { %v6831_v3 = vrot.slane %v6501_v30, 7  ;;  %v5072_v45 = vmax.f32 %v5070_v23, %v5071_v59  ;;  %v5085_v13 = vrot.slane %v5084_v14, 4  ;;  %v4587_v50 = vsel %vm4166_vm11, %v3571_v1, -inf  ;;  %v9247_v16 = vld [vmem:[%s15082_s0 + $0x351] sm:$0xff] }
 0x583   :  { %v5079_v29 = vmax.f32 %v5077_v7, %v5078_v2  ;;  %v3829_v9 = vrot.slane %v3571_v1, 6  ;;  %v4588_v63 = vrot.slane %v4587_v50, 4  ;;  %v4594_v32 = vsel %vm4166_vm11, %v3827_v39, -inf  ;;  %v2300_v7 = vpop.permute.xlu2 %2299  ;;  %v3034_v2 = vpop.permute.xlu0 %3033 }
 0x584   :  { %v4557_v18 = vrot.slane %v4556_v46, 1  ;;  %v6375_v31 = vadd.f32 %v12877_v22, %v6043_v57  ;;  %v6500_v38 = vmax.f32 %v6372_v8, 0.0  ;;  %v4595_v40 = vrot.slane %v4594_v32, 4  ;;  %3113 = vrot.lane.b32.xlu1 %v9311_v55, %s9469_s25  ;;  %2451 = vst.msk [vmem:[#allocation2 + $0x148] sm:$0xff] %vm2409_vm6, %v2300_v7 }
 0x585   :  { %v6833_v62 = vrot.slane %v6502_v5, 6  ;;  %v5066_v51 = vrot.slane %v5065_v53, 2  ;;  %v4589_v4 = vmax.f32 %v4587_v50, %v4588_v63  ;;  %v4601_v43 = vsel %vm4166_vm11, %v3828_v52, -inf  ;;  %2728 = vrot.lane.b32.xlu0 %v9247_v16, %s9470_s13  ;;  %3203 = vst.msk [vmem:[#allocation2 + $0xb8] sm:$0xff] %vm3179_vm9, %v3034_v2 }
 0x586   :  { %v6832_v49 = vsel %vm15097_vm13, %v6831_v3, %v6500_v38  ;;  %v5073_v17 = vrot.slane %v5072_v45, 2  ;;  %v4596_v54 = vmax.f32 %v4594_v32, %v4595_v40  ;;  %v4602_v58 = vrot.slane %v4601_v43, 4  ;;  %v13222_v38 = vld [vmem:[%s15084_s2] ss:$0 sm:$0xff] }
 0x587   :  { %v5080_v47 = vrot.slane %v5079_v29, 2  ;;  %v5086_v37 = vmax.f32 %v5084_v14, %v5085_v13  ;;  %v4590_v35 = vrot.slane %v4589_v4, 2  ;;  %v4608_v56 = vsel %vm4166_vm11, %v3829_v9, -inf }
 0x588   :  { %v4558_v6 = vmax.f32 %v4556_v46, %v4557_v18  ;;  %v6503_v34 = vmax.f32 %v6375_v31, 0.0  ;;  %v4597_v22 = vrot.slane %v4596_v54, 2  ;;  %v4603_v25 = vmax.f32 %v4601_v43, %v4602_v58  ;;  %v2681_v46 = vpop.permute.xlu1 %2680 }
 0x589   :  { %v6047_v12 = vsel %vm5959_vm12, %v4544_v41, -inf  ;;  %v5067_v27 = vmax.f32 %v5065_v53, %v5066_v51  ;;  %v4591_v61 = vmax.f32 %v4589_v4, %v4590_v35  ;;  %v4609_v33 = vrot.slane %v4608_v56, 4  ;;  %v3625_v41 = vpop.f32.mrf.mxu2  ;;  %2834 = vst.msk [vmem:[#allocation2 + $0x138] sm:$0xff] %vm2794_vm8, %v2681_v46 }
 0x58a   :  { %v6834_v48 = vsel %vm15096_vm14, %v6833_v62, %v6832_v49  ;;  %v5074_v15 = vmax.f32 %v5072_v45, %v5073_v17  ;;  %v4598_v11 = vmax.f32 %v4596_v54, %v4597_v22  ;;  %v4604_v23 = vrot.slane %v4603_v25, 2 }
 0x58b   :  { %v5081_v1 = vmax.f32 %v5079_v29, %v5080_v47  ;;  %v5087_v21 = vrot.slane %v5086_v37, 2  ;;  %v4592_v60 = vrot.slane %v4591_v61, 1  ;;  %v4610_v44 = vmax.f32 %v4608_v56, %v4609_v33 }
 0x58c   :  { %v6050_v36 = vsel %vm5959_vm12, %v4551_v24, -inf  ;;  %v6835_v42 = vrot.slane %v6503_v34, 5  ;;  %v4599_v30 = vrot.slane %v4598_v11, 1  ;;  %v4605_v59 = vmax.f32 %v4603_v25, %v4604_v23 }
 0x58d   :  { %v6053_v14 = vsel %vm5959_vm12, %v4558_v6, -inf  ;;  %v5068_v39 = vrot.slane %v5067_v27, 1  ;;  %v4593_v10 = vmax.f32 %v4591_v61, %v4592_v60  ;;  %v4611_v19 = vrot.slane %v4610_v44, 2 }
 0x58e   :  { %v6836_v57 = vsel %vm15095_vm15, %v6835_v42, %v6834_v48  ;;  %v5075_v8 = vrot.slane %v5074_v15, 1  ;;  %v4600_v0 = vmax.f32 %v4598_v11, %v4599_v30  ;;  %v4606_v28 = vrot.slane %v4605_v59, 1  ;;  %v3670_v48 = vpop.f32.mrf.mxu3 }
 0x58f   :  { %v5082_v24 = vrot.slane %v5081_v1, 1  ;;  %v5088_v5 = vmax.f32 %v5086_v37, %v5087_v21  ;;  %v4612_v53 = vmax.f32 %v4610_v44, %v4611_v19  ;;  %v6045_v52 = vsel %vm5959_vm12, %v4593_v10, -inf }
 0x590   :  { %v4607_v3 = vmax.f32 %v4605_v59, %v4606_v28  ;;  %v6046_v45 = vmax.f32 %v13184_v20, %v6045_v52  ;;  %v6048_v13 = vsel %vm5959_vm12, %v4600_v0, -inf  ;;  %v3881_v50 = vrot.slane %v3625_v41, 2 }
 0x591   :  { %v5069_v29 = vmax.f32 %v5067_v27, %v5068_v39  ;;  %v4613_v9 = vrot.slane %v4612_v53, 1  ;;  %v6049_v63 = vmax.f32 %v6047_v12, %v6048_v13  ;;  %v3882_v32 = vrot.slane %v3625_v41, 4  ;;  %v3628_v28 = vpop.f32.mrf.mxu2 }
 0x592   :  { %v5076_v18 = vmax.f32 %v5074_v15, %v5075_v8  ;;  %v6051_v31 = vsel %vm5959_vm12, %v4607_v3, -inf  ;;  %v6376_v40 = vadd.f32 %v13222_v38, %v6046_v45  ;;  %v3883_v62 = vrot.slane %v3625_v41, 6 }
 0x593   :  { %v4614_v51 = vmax.f32 %v4612_v53, %v4613_v9  ;;  %v6052_v20 = vmax.f32 %v6050_v36, %v6051_v31  ;;  %v6377_v4 = vadd.f32 %v13222_v38, %v6049_v63  ;;  %v5091_v43 = vsel %vm4166_vm11, %v3625_v41, -inf }
 0x594   :  { %v5083_v49 = vmax.f32 %v5081_v1, %v5082_v24  ;;  %v5089_v17 = vrot.slane %v5088_v5, 1  ;;  %v6504_v54 = vmax.f32 %v6376_v40, 0.0  ;;  %v5098_v58 = vsel %vm4166_vm11, %v3881_v50, -inf }
 0x595   :  { %v6054_v47 = vsel %vm5959_vm12, %v4614_v51, -inf  ;;  %v6378_v37 = vadd.f32 %v13222_v38, %v6052_v20  ;;  %v6505_v35 = vmax.f32 %v6377_v4, 0.0  ;;  %v5105_v56 = vsel %vm4166_vm11, %v3882_v32, -inf }
 0x596   :  { %v6055_v6 = vmax.f32 %v6053_v14, %v6054_v47  ;;  %v6837_v34 = vrot.slane %v6504_v54, 4  ;;  %v5092_v22 = vrot.slane %v5091_v43, 4  ;;  %v5112_v25 = vsel %vm4166_vm11, %v3883_v62, -inf }
 0x597   :  { %v13233_v12 = vsel %vm5959_vm12, %v5069_v29, -inf  ;;  %v6506_v27 = vmax.f32 %v6378_v37, 0.0  ;;  %v6839_v61 = vrot.slane %v6505_v35, 3  ;;  %v5099_v33 = vrot.slane %v5098_v58, 4 }
 0x598   :  { %v5090_v15 = vmax.f32 %v5088_v5, %v5089_v17  ;;  %v6379_v11 = vadd.f32 %v13222_v38, %v6055_v6  ;;  %v6838_v23 = vsel %vm6792_vm0, %v6837_v34, %v6836_v57  ;;  %v5106_v1 = vrot.slane %v5105_v56, 4 }
 0x599   :  { %v13238_v21 = vsel %vm5959_vm12, %v5076_v18, -inf  ;;  %v6840_v60 = vsel %vm6795_vm1, %v6839_v61, %v6838_v23  ;;  %v6841_v44 = vrot.slane %v6506_v27, 2  ;;  %v5113_v55 = vrot.slane %v5112_v25, 4 }
 0x59a   :  { %v13242_v16 = vsel %vm5959_vm12, %v5083_v49, -inf  ;;  %v6507_v7 = vmax.f32 %v6379_v11, 0.0  ;;  %v5093_v36 = vmax.f32 %v5091_v43, %v5092_v22  ;;  %v3926_v42 = vrot.slane %v3670_v48, 2 }
 0x59b   :  { %v6842_v30 = vsel %vm6798_vm2, %v6841_v44, %v6840_v60  ;;  %v5100_v59 = vmax.f32 %v5098_v58, %v5099_v33  ;;  %v3927_v46 = vrot.slane %v3670_v48, 4  ;;  %v3928_v2 = vrot.slane %v3670_v48, 6 }
 0x59c   :  { %v6843_v14 = vrot.slane %v6507_v7, 1  ;;  %v5107_v39 = vmax.f32 %v5105_v56, %v5106_v1  ;;  %v5511_v10 = vsel %vm4166_vm11, %v3670_v48, -inf  ;;  %v5518_v19 = vsel %vm4166_vm11, %v3926_v42, -inf }
 0x59d   :  { %v5114_v41 = vmax.f32 %v5112_v25, %v5113_v55  ;;  %v5512_v57 = vrot.slane %v5511_v10, 4  ;;  %v5519_v8 = vrot.slane %v5518_v19, 4  ;;  %v5525_v0 = vsel %vm4166_vm11, %v3927_v46, -inf }
 0x59e   :  { %v6844_v24 = vsel %vm15100_vm3, %v6843_v14, %v6842_v30  ;;  %v5094_v5 = vrot.slane %v5093_v36, 2  ;;  %v5526_v53 = vrot.slane %v5525_v0, 4  ;;  %v5532_v52 = vsel %vm4166_vm11, %v3928_v2, -inf }
 0x59f   :  { %7033 = vst.msk [vmem:[#allocation3 + $0x41] sm:$0xff] %vm5959_vm12, %v6844_v24  ;;  %v5101_v3 = vrot.slane %v5100_v59, 2  ;;  %v5513_v45 = vmax.f32 %v5511_v10, %v5512_v57  ;;  %v5520_v13 = vmax.f32 %v5518_v19, %v5519_v8  ;;  %v9471_v29 = vmov 0.0  }
 0x5a0   :  { %v5527_v50 = vmax.f32 %v5525_v0, %v5526_v53  ;;  %6604 = vst.msk [vmem:[#allocation3] sm:$0xff] %vm5959_vm12, %v9471_v29  ;;  %v3884_v9 = vrot.slane %v3628_v28, 2  ;;  %v3885_v63 = vrot.slane %v3628_v28, 4  ;;  %v3886_v32 = vrot.slane %v3628_v28, 6 }
 0x5a1   :  { %v13254_v18 = vsel %vm5959_vm12, %v5090_v15, -inf  ;;  %v5108_v31 = vrot.slane %v5107_v39, 2  ;;  %v5115_v40 = vrot.slane %v5114_v41, 2  ;;  %v5533_v62 = vrot.slane %v5532_v52, 4  ;;  %6605 = vst.msk [vmem:[#allocation3 + $0x8] sm:$0x3] %vm4166_vm11, %v9471_v29 }
 0x5a2   :  { %v5514_v51 = vrot.slane %v5513_v45, 2  ;;  %6606 = vst.msk [vmem:[#allocation3 + $0xa0] sm:$0xff] %vm5959_vm12, %v9471_v29  ;;  %v5119_v20 = vsel %vm4166_vm11, %v3628_v28, -inf  ;;  %v5126_v4 = vsel %vm4166_vm11, %v3884_v9, -inf  ;;  %v5133_v43 = vsel %vm4166_vm11, %v3885_v63, -inf }
 0x5a3   :  { %v5095_v49 = vmax.f32 %v5093_v36, %v5094_v5  ;;  %v5521_v17 = vrot.slane %v5520_v13, 2  ;;  %v5528_v54 = vrot.slane %v5527_v50, 2  ;;  %6607 = vst.msk [vmem:[#allocation3 + $0xa8] sm:$0x3] %vm4166_vm11, %v9471_v29  ;;  %v5120_v58 = vrot.slane %v5119_v20, 4 }
 0x5a4   :  { %v5102_v47 = vmax.f32 %v5100_v59, %v5101_v3  ;;  %6609 = vst.msk [vmem:[#allocation3 + $0x90] sm:$0xff] %vm5959_vm12, %v9471_v29  ;;  %v5127_v37 = vrot.slane %v5126_v4, 4  ;;  %v5134_v35 = vrot.slane %v5133_v43, 4  ;;  %v5140_v56 = vsel %vm4166_vm11, %v3886_v32, -inf }
 0x5a5   :  { %v5109_v6 = vmax.f32 %v5107_v39, %v5108_v31  ;;  %v5116_v34 = vmax.f32 %v5114_v41, %v5115_v40  ;;  %v5534_v22 = vmax.f32 %v5532_v52, %v5533_v62  ;;  %6610 = vst.msk [vmem:[#allocation3 + $0x98] sm:$0x3] %vm4166_vm11, %v9471_v29  ;;  %v5121_v25 = vmax.f32 %v5119_v20, %v5120_v58 }
 0x5a6   :  { %v5515_v27 = vmax.f32 %v5513_v45, %v5514_v51  ;;  %6611 = vst.msk [vmem:[#allocation3 + $0x130] sm:$0xff] %vm5959_vm12, %v9471_v29  ;;  %v5128_v61 = vmax.f32 %v5126_v4, %v5127_v37  ;;  %v5135_v33 = vmax.f32 %v5133_v43, %v5134_v35  ;;  %v5141_v48 = vrot.slane %v5140_v56, 4  ;;  %v13289_v43 = vld [vmem:[#allocation3 + $0x11] sm:$0xff] }
 0x5a7   :  { %v5096_v15 = vrot.slane %v5095_v49, 1  ;;  %v5522_v11 = vmax.f32 %v5520_v13, %v5521_v17  ;;  %v5529_v23 = vmax.f32 %v5527_v50, %v5528_v54  ;;  %6612 = vst.msk [vmem:[#allocation3 + $0x138] sm:$0x3] %vm4166_vm11, %v9471_v29  ;;  %v5122_v1 = vrot.slane %v5121_v25, 2 }
 0x5a8   :  { %v5103_v60 = vrot.slane %v5102_v47, 1  ;;  %v7078_v44 = vld [vmem:[#allocation3 + $0x1] sm:$0xff]  ;;  %v5129_v55 = vrot.slane %v5128_v61, 2  ;;  %v5136_v7 = vrot.slane %v5135_v33, 2  ;;  %v5142_v36 = vmax.f32 %v5140_v56, %v5141_v48  ;;  %6634 = vst.msk [vmem:[#allocation3 + $0x9] sm:$0x1] %vm6613_vm4, %v9471_v29  ;;  %v13334_v48 = vpop.permute.xlu0 %3065 }
 0x5a9   :  { %v5110_v42 = vrot.slane %v5109_v6, 1  ;;  %v5117_v30 = vrot.slane %v5116_v34, 1  ;;  %v5535_v59 = vrot.slane %v5534_v22, 2  ;;  %7110 = vrot.lane.b32.xlu2 %v7078_v44, %s9472_s21  ;;  %v5123_v46 = vmax.f32 %v5121_v25, %v5122_v1  ;;  %6614 = vst.msk [vmem:[#allocation3] sm:$0x1] %vm6613_vm4, %v9471_v29  ;;  %v13320_v25 = vpop.permute.xlu1 %3095  ;;  %v3267_v44 = vld [vmem:[#allocation2 + $0xb8] sm:$0xff] }
 0x5aa   :  { %v5516_v2 = vrot.slane %v5515_v27, 1  ;;  %v5130_v14 = vmax.f32 %v5128_v61, %v5129_v55  ;;  %v5137_v39 = vmax.f32 %v5135_v33, %v5136_v7  ;;  %v5143_v10 = vrot.slane %v5142_v36, 2  ;;  %6615 = vst.msk [vmem:[#allocation3 + $0x10] sm:$0x1] %vm6613_vm4, %v9471_v29  ;;  %v3574_v55 = vpop.f32.mrf.mxu0  ;;  %v3673_v7 = vpop.f32.mrf.mxu3  ;;  %9336 = vmatmul.msk.f32.gmra.mxu1 %vm3312_vm10, %v3267_v44 }
 0x5ab   :  { %v5523_v19 = vrot.slane %v5522_v11, 1  ;;  %v5530_v41 = vrot.slane %v5529_v23, 1  ;;  %v5124_v57 = vrot.slane %v5123_v46, 1  ;;  %v5097_v8 = vmax.f32 %v5095_v49, %v5096_v15  ;;  %6616 = vst.msk [vmem:[#allocation3 + $0x20] sm:$0x1] %vm6613_vm4, %v9471_v29 }
 0x5ac   :  { %v5131_v0 = vrot.slane %v5130_v14, 1  ;;  %v5138_v28 = vrot.slane %v5137_v39, 1  ;;  %v5144_v24 = vmax.f32 %v5142_v36, %v5143_v10  ;;  %v5104_v5 = vmax.f32 %v5102_v47, %v5103_v60  ;;  %6617 = vst.msk [vmem:[#allocation3 + $0x30] sm:$0x1] %vm6613_vm4, %v9471_v29 }
 0x5ad   :  { %v5111_v53 = vmax.f32 %v5109_v6, %v5110_v42  ;;  %v5536_v52 = vmax.f32 %v5534_v22, %v5535_v59  ;;  %v5125_v3 = vmax.f32 %v5123_v46, %v5124_v57  ;;  %v5118_v45 = vmax.f32 %v5116_v34, %v5117_v30  ;;  %6618 = vst.msk [vmem:[#allocation3 + $0x40] sm:$0x1] %vm6613_vm4, %v9471_v29  ;;  %v13318_v22 = vpop.permute.xlu2 %2714 }
 0x5ae   :  { %v5132_v13 = vmax.f32 %v5130_v14, %v5131_v0  ;;  %v5139_v50 = vmax.f32 %v5137_v39, %v5138_v28  ;;  %v5145_v9 = vrot.slane %v5144_v24, 1  ;;  %v5517_v63 = vmax.f32 %v5515_v27, %v5516_v2  ;;  %6619 = vst.msk [vmem:[#allocation3 + $0x50] sm:$0x1] %vm6613_vm4, %v9471_v29 }
 0x5af   :  { %v5524_v32 = vmax.f32 %v5522_v11, %v5523_v19  ;;  %v5531_v31 = vmax.f32 %v5529_v23, %v5530_v41  ;;  %v6153_v40 = vsel %vm5959_vm12, %v5125_v3, -inf  ;;  %v13292_v49 = vsel %vm5959_vm12, %v5097_v8, -inf  ;;  %v7175_v34 = vld [vmem:[#allocation3 + $0x2] sm:$0xff]  ;;  %6620 = vst.msk [vmem:[#allocation3 + $0x60] sm:$0x1] %vm6613_vm4, %v9471_v29 }
 0x5b0   :  { %v5146_v62 = vmax.f32 %v5144_v24, %v5145_v9  ;;  %v6154_v51 = vmax.f32 %v13233_v12, %v6153_v40  ;;  %v6156_v20 = vsel %vm5959_vm12, %v5132_v13, -inf  ;;  %v6159_v4 = vsel %vm5959_vm12, %v5139_v50, -inf  ;;  %7207 = vrot.lane.b32.xlu0 %v7175_v34, %s9474_s1  ;;  %6621 = vst.msk [vmem:[#allocation3 + $0x70] sm:$0x1] %vm6613_vm4, %v9471_v29  ;;  %v13388_v34 = vpop.permute.xlu0 %2327 }
 0x5b1   :  { %v5537_v17 = vrot.slane %v5536_v52, 1  ;;  %v6157_v54 = vmax.f32 %v13238_v21, %v6156_v20  ;;  %v6160_v58 = vmax.f32 %v13242_v16, %v6159_v4  ;;  %7401 = vrot.lane.b32.xlu2 %v13289_v43, %s9473_s22  ;;  %v13301_v12 = vsel %vm5959_vm12, %v5104_v5, -inf  ;;  %6622 = vst.msk [vmem:[#allocation3 + $0x80] sm:$0x1] %vm6613_vm4, %v9471_v29  ;;  %v7272_v60 = vld [vmem:[#allocation3 + $0x10] sm:$0xff]  ;;  %v13357_v5 = vld [vmem:[#allocation3 + $0x21] sm:$0xff] }
 0x5b2   :  { %v13304_v47 = vsel %vm5959_vm12, %v5111_v53, -inf  ;;  %v6162_v37 = vsel %vm5959_vm12, %v5146_v62, -inf  ;;  %v6412_v35 = vadd.f32 %v13222_v38, %v6154_v51  ;;  %v13311_v21 = vsel %vm5959_vm12, %v5118_v45, -inf  ;;  %6623 = vst.msk [vmem:[#allocation3 + $0x90] sm:$0x1] %vm6613_vm4, %v9471_v29  ;;  %7304 = vrot.lane.b32.xlu1 %v7272_v60, %s9469_s25 }
 0x5b3   :  { %v6163_v16 = vmax.f32 %v13254_v18, %v6162_v37  ;;  %v6413_v56 = vadd.f32 %v13222_v38, %v6157_v54  ;;  %v6414_v6 = vadd.f32 %v13222_v38, %v6160_v58  ;;  %v13323_v27 = vsel %vm5959_vm12, %v5517_v63, -inf  ;;  %6624 = vst.msk [vmem:[#allocation3 + $0xa0] sm:$0x1] %vm6613_vm4, %v9471_v29  ;;  %v13376_v54 = vld [vmem:[#allocation3 + $0x20] sm:$0xff]  ;;  %v13380_v37 = vpop.permute.xlu1 %2682 }
 0x5b4   :  { %v13326_v61 = vsel %vm5959_vm12, %v5524_v32, -inf  ;;  %v13329_v18 = vsel %vm5959_vm12, %v5531_v31, -inf  ;;  %v6540_v33 = vmax.f32 %v6412_v35, 0.0  ;;  %v5538_v15 = vmax.f32 %v5536_v52, %v5537_v17  ;;  %6625 = vst.msk [vmem:[#allocation3 + $0xb0] sm:$0x1] %vm6613_vm4, %v9471_v29 }
 0x5b5   :  { %v6415_v11 = vadd.f32 %v13222_v38, %v6163_v16  ;;  %v6541_v23 = vmax.f32 %v6413_v56, 0.0  ;;  %v6542_v1 = vmax.f32 %v6414_v6, 0.0  ;;  %v3830_v36 = vrot.slane %v3574_v55, 2  ;;  %6626 = vst.msk [vmem:[#allocation3 + $0xc0] sm:$0x1] %vm6613_vm4, %v9471_v29  ;;  %v13378_v58 = vpop.permute.xlu2 %2301 }
 0x5b6   :  { %v3831_v42 = vrot.slane %v3574_v55, 4  ;;  %v3832_v30 = vrot.slane %v3574_v55, 6  ;;  %v4615_v59 = vsel %vm4166_vm11, %v3574_v55, -inf  ;;  %v3929_v57 = vrot.slane %v3673_v7, 2  ;;  %6627 = vst.msk [vmem:[#allocation3 + $0xd0] sm:$0x1] %vm6613_vm4, %v9471_v29 }
 0x5b7   :  { %v6543_v46 = vmax.f32 %v6415_v11, 0.0  ;;  %v6901_v2 = vrot.slane %v6541_v23, 7  ;;  %v6903_v14 = vrot.slane %v6542_v1, 6  ;;  %v4616_v39 = vrot.slane %v4615_v59, 4  ;;  %6628 = vst.msk [vmem:[#allocation3 + $0xe0] sm:$0x1] %vm6613_vm4, %v9471_v29 }
 0x5b8   :  { %v4622_v10 = vsel %vm4166_vm11, %v3830_v36, -inf  ;;  %v4629_v19 = vsel %vm4166_vm11, %v3831_v42, -inf  ;;  %v4636_v41 = vsel %vm4166_vm11, %v3832_v30, -inf  ;;  %v13352_v8 = vsel %vm5959_vm12, %v5538_v15, -inf  ;;  %6629 = vst.msk [vmem:[#allocation3 + $0xf0] sm:$0x1] %vm6613_vm4, %v9471_v29 }
 0x5b9   :  { %v6902_v0 = vsel %vm15097_vm13, %v6901_v2, %v6540_v33  ;;  %v4617_v28 = vmax.f32 %v4615_v59, %v4616_v39  ;;  %v4623_v24 = vrot.slane %v4622_v10, 4  ;;  %v13359_v53 = vrot.slane %v6543_v46, 5  ;;  %7693 = vrot.lane.b32.xlu2 %v13357_v5, %s9475_s23  ;;  %6630 = vst.msk [vmem:[#allocation3 + $0x100] sm:$0x1] %vm6613_vm4, %v9471_v29  ;;  %v3676_v39 = vpop.f32.mrf.mxu3 }
 0x5ba   :  { %v4630_v52 = vrot.slane %v4629_v19, 4  ;;  %v4637_v3 = vrot.slane %v4636_v41, 4  ;;  %v3930_v45 = vrot.slane %v3673_v7, 4  ;;  %v13366_v13 = vsel %vm15096_vm14, %v6903_v14, %v6902_v0  ;;  %6631 = vst.msk [vmem:[#allocation3 + $0x110] sm:$0x1] %vm6613_vm4, %v9471_v29  ;;  %7596 = vrot.lane.b32.xlu1 %v13376_v54, %s9476_s24 }
 0x5bb   :  { %v4618_v50 = vrot.slane %v4617_v28, 2  ;;  %v4624_v9 = vmax.f32 %v4622_v10, %v4623_v24  ;;  %v3931_v63 = vrot.slane %v3673_v7, 6  ;;  %v5539_v40 = vsel %vm4166_vm11, %v3673_v7, -inf  ;;  %6632 = vst.msk [vmem:[#allocation3 + $0x120] sm:$0x1] %vm6613_vm4, %v9471_v29 }
 0x5bc   :  { %v4631_v32 = vmax.f32 %v4629_v19, %v4630_v52  ;;  %v4638_v31 = vmax.f32 %v4636_v41, %v4637_v3  ;;  %v5546_v62 = vsel %vm4166_vm11, %v3929_v57, -inf  ;;  %v5540_v4 = vrot.slane %v5539_v40, 4  ;;  %6633 = vst.msk [vmem:[#allocation3 + $0x130] sm:$0x1] %vm6613_vm4, %v9471_v29 }
 0x5bd   :  { %v4619_v51 = vmax.f32 %v4617_v28, %v4618_v50  ;;  %v4625_v20 = vrot.slane %v4624_v9, 2  ;;  %v5547_v17 = vrot.slane %v5546_v62, 4  ;;  %v5553_v56 = vsel %vm4166_vm11, %v3930_v45, -inf  ;;  %6635 = vst.msk [vmem:[#allocation3 + $0x19] sm:$0x1] %vm6613_vm4, %v9471_v29 }
 0x5be   :  { %v4632_v35 = vrot.slane %v4631_v32, 2  ;;  %v4639_v16 = vrot.slane %v4638_v31, 2  ;;  %v5560_v6 = vsel %vm4166_vm11, %v3931_v63, -inf  ;;  %v5541_v11 = vmax.f32 %v5539_v40, %v5540_v4  ;;  %6636 = vst.msk [vmem:[#allocation3 + $0x29] sm:$0x1] %vm6613_vm4, %v9471_v29 }
 0x5bf   :  { %v4620_v33 = vrot.slane %v4619_v51, 1  ;;  %v4626_v15 = vmax.f32 %v4624_v9, %v4625_v20  ;;  %v5548_v23 = vmax.f32 %v5546_v62, %v5547_v17  ;;  %v5554_v44 = vrot.slane %v5553_v56, 4  ;;  %6637 = vst.msk [vmem:[#allocation3 + $0x39] sm:$0x1] %vm6613_vm4, %v9471_v29  ;;  %v13422_v17 = vpop.permute.xlu2 %2716 }
 0x5c0   :  { %v4633_v1 = vmax.f32 %v4631_v32, %v4632_v35  ;;  %v4640_v60 = vmax.f32 %v4638_v31, %v4639_v16  ;;  %v5561_v55 = vrot.slane %v5560_v6, 4  ;;  %v5542_v42 = vrot.slane %v5541_v11, 2  ;;  %6638 = vst.msk [vmem:[#allocation3 + $0x49] sm:$0x1] %vm6613_vm4, %v9471_v29  ;;  %v13424_v35 = vpop.permute.xlu1 %3097 }
 0x5c1   :  { %v4621_v7 = vmax.f32 %v4619_v51, %v4620_v33  ;;  %v4627_v36 = vrot.slane %v4626_v15, 1  ;;  %v5549_v30 = vrot.slane %v5548_v23, 2  ;;  %v5555_v2 = vmax.f32 %v5553_v56, %v5554_v44  ;;  %6639 = vst.msk [vmem:[#allocation3 + $0x59] sm:$0x1] %vm6613_vm4, %v9471_v29 }
 0x5c2   :  { %v4634_v59 = vrot.slane %v4633_v1, 1  ;;  %v4641_v46 = vrot.slane %v4640_v60, 1  ;;  %v5562_v14 = vmax.f32 %v5560_v6, %v5561_v55  ;;  %v5543_v41 = vmax.f32 %v5541_v11, %v5542_v42  ;;  %6640 = vst.msk [vmem:[#allocation3 + $0x69] sm:$0x1] %vm6613_vm4, %v9471_v29  ;;  %7112 = vrot.lane.b32.xlu1 %v13289_v43, %s9472_s21  ;;  %v3631_v11 = vpop.f32.mrf.mxu2 }
 0x5c3   :  { %v4628_v10 = vmax.f32 %v4626_v15, %v4627_v36  ;;  %v13401_v19 = vsel %vm5959_vm12, %v4621_v7, -inf  ;;  %v5550_v57 = vmax.f32 %v5548_v23, %v5549_v30  ;;  %v5556_v24 = vrot.slane %v5555_v2, 2  ;;  %6641 = vst.msk [vmem:[#allocation3 + $0x79] sm:$0x1] %vm6613_vm4, %v9471_v29  ;;  %v13434_v15 = vpop.permute.xlu0 %3067 }
 0x5c4   :  { %v4635_v0 = vmax.f32 %v4633_v1, %v4634_v59  ;;  %v4642_v28 = vmax.f32 %v4640_v60, %v4641_v46  ;;  %v5563_v52 = vrot.slane %v5562_v14, 2  ;;  %v5544_v45 = vrot.slane %v5543_v41, 1  ;;  %6642 = vst.msk [vmem:[#allocation3 + $0x89] sm:$0x1] %vm6613_vm4, %v9471_v29  ;;  %v7466_v6 = vld [vmem:[#allocation3 + $0x12] sm:$0xff] }
 0x5c5   :  { %v13408_v3 = vsel %vm5959_vm12, %v4628_v10, -inf  ;;  %v5551_v50 = vrot.slane %v5550_v57, 1  ;;  %v3932_v9 = vrot.slane %v3676_v39, 2  ;;  %v5557_v31 = vmax.f32 %v5555_v2, %v5556_v24  ;;  %6643 = vst.msk [vmem:[#allocation3 + $0x99] sm:$0x1] %vm6613_vm4, %v9471_v29  ;;  %7498 = vrot.lane.b32.xlu0 %v7466_v6, %s9477_s26  ;;  %7209 = vrot.lane.b32.xlu2 %v7466_v6, %s9474_s1 }
 0x5c6   :  { %v13413_v63 = vsel %vm5959_vm12, %v4635_v0, -inf  ;;  %v13416_v32 = vsel %vm5959_vm12, %v4642_v28, -inf  ;;  %v5564_v40 = vmax.f32 %v5562_v14, %v5563_v52  ;;  %v5545_v62 = vmax.f32 %v5543_v41, %v5544_v45  ;;  %6644 = vst.msk [vmem:[#allocation3 + $0xa9] sm:$0x1] %vm6613_vm4, %v9471_v29 }
 0x5c7   :  { %v5552_v51 = vmax.f32 %v5550_v57, %v5551_v50  ;;  %v3933_v20 = vrot.slane %v3676_v39, 4  ;;  %v3934_v4 = vrot.slane %v3676_v39, 6  ;;  %v13429_v16 = vsel %vm15095_vm15, %v13359_v53, %v13366_v13  ;;  %6645 = vst.msk [vmem:[#allocation3 + $0xb9] sm:$0x1] %vm6613_vm4, %v9471_v29 }
 0x5c8   :  { %v5558_v43 = vrot.slane %v5557_v31, 1  ;;  %v5565_v56 = vrot.slane %v5564_v40, 1  ;;  %v5567_v33 = vsel %vm4166_vm11, %v3676_v39, -inf  ;;  %v13439_v23 = vsel %vm5959_vm12, %v5545_v62, -inf  ;;  %6646 = vst.msk [vmem:[#allocation3 + $0xc9] sm:$0x1] %vm6613_vm4, %v9471_v29 }
 0x5c9   :  { %v13442_v53 = vsel %vm5959_vm12, %v5552_v51, -inf  ;;  %v5568_v13 = vrot.slane %v5567_v33, 4  ;;  %v5574_v1 = vsel %vm4166_vm11, %v3932_v9, -inf  ;;  %v5581_v7 = vsel %vm4166_vm11, %v3933_v20, -inf  ;;  %6647 = vst.msk [vmem:[#allocation3 + $0xd9] sm:$0x1] %vm6613_vm4, %v9471_v29 }
 0x5ca   :  { %v5559_v60 = vmax.f32 %v5557_v31, %v5558_v43  ;;  %v5566_v44 = vmax.f32 %v5564_v40, %v5565_v56  ;;  %v5575_v55 = vrot.slane %v5574_v1, 4  ;;  %v5582_v42 = vrot.slane %v5581_v7, 4  ;;  %6648 = vst.msk [vmem:[#allocation3 + $0xe9] sm:$0x1] %vm6613_vm4, %v9471_v29  ;;  %7403 = vrot.lane.b32.xlu1 %v13357_v5, %s9473_s22  ;;  %v13473_v20 = vld [vmem:[#allocation3 + $0x22] sm:$0xff] }
 0x5cb   :  { %v5569_v36 = vmax.f32 %v5567_v33, %v5568_v13  ;;  %v5588_v30 = vsel %vm4166_vm11, %v3934_v4, -inf  ;;  %v3887_v59 = vrot.slane %v3631_v11, 2  ;;  %v3888_v57 = vrot.slane %v3631_v11, 4  ;;  %6649 = vst.msk [vmem:[#allocation3 + $0xf9] sm:$0x1] %vm6613_vm4, %v9471_v29  ;;  %v13481_v13 = vpop.permute.xlu2 %2303 }
 0x5cc   :  { %v13456_v46 = vsel %vm5959_vm12, %v5559_v60, -inf  ;;  %v13459_v2 = vsel %vm5959_vm12, %v5566_v44, -inf  ;;  %v5576_v14 = vmax.f32 %v5574_v1, %v5575_v55  ;;  %v5589_v39 = vrot.slane %v5588_v30, 4  ;;  %6650 = vst.msk [vmem:[#allocation3 + $0x109] sm:$0x1] %vm6613_vm4, %v9471_v29  ;;  %v13483_v1 = vpop.permute.xlu1 %2684 }
 0x5cd   :  { %v5570_v10 = vrot.slane %v5569_v36, 2  ;;  %v5583_v41 = vmax.f32 %v5581_v7, %v5582_v42  ;;  %v3889_v0 = vrot.slane %v3631_v11, 6  ;;  %v5147_v52 = vsel %vm4166_vm11, %v3631_v11, -inf  ;;  %6651 = vst.msk [vmem:[#allocation3 + $0x119] sm:$0x1] %vm6613_vm4, %v9471_v29  ;;  %7790 = vrot.lane.b32.xlu0 %v13473_v20, %s9478_s27  ;;  %7500 = vrot.lane.b32.xlu2 %v13473_v20, %s9477_s26 }
 0x5ce   :  { %v5577_v28 = vrot.slane %v5576_v14, 2  ;;  %v5590_v24 = vmax.f32 %v5588_v30, %v5589_v39  ;;  %v5154_v45 = vsel %vm4166_vm11, %v3887_v59, -inf  ;;  %v5148_v31 = vrot.slane %v5147_v52, 4  ;;  %6652 = vst.msk [vmem:[#allocation3 + $0x129] sm:$0x1] %vm6613_vm4, %v9471_v29 }
 0x5cf   :  { %v5571_v50 = vmax.f32 %v5569_v36, %v5570_v10  ;;  %v5584_v9 = vrot.slane %v5583_v41, 2  ;;  %v5155_v40 = vrot.slane %v5154_v45, 4  ;;  %v5161_v4 = vsel %vm4166_vm11, %v3888_v57, -inf  ;;  %v13489_v36 = vpop.permute.xlu0 %2329  ;;  %6653 = vst.msk [vmem:[#allocation3 + $0x139] sm:$0x1] %vm6613_vm4, %v9471_v29  ;;  %v13498_v29 = vld [vmem:[#allocation3 + $0x31] sm:$0xff] }
 0x5d0   :  { %v5578_v62 = vmax.f32 %v5576_v14, %v5577_v28  ;;  %v5591_v51 = vrot.slane %v5590_v24, 2  ;;  %v5168_v43 = vsel %vm4166_vm11, %v3889_v0, -inf  ;;  %v5149_v33 = vmax.f32 %v5147_v52, %v5148_v31  ;;  %3234 = vst.msk [vmem:[#allocation2 + $0x1b0] sm:$0xff] %vm3179_vm9, %v13320_v25 }
 0x5d1   :  { %v5572_v56 = vrot.slane %v5571_v50, 1  ;;  %v5585_v6 = vmax.f32 %v5583_v41, %v5584_v9  ;;  %v5156_v11 = vmax.f32 %v5154_v45, %v5155_v40  ;;  %v5162_v55 = vrot.slane %v5161_v4, 4  ;;  %3219 = vst.msk [vmem:[#allocation2 + $0x138] sm:$0xff] %vm3179_vm9, %v13334_v48 }
 0x5d2   :  { %v5579_v60 = vrot.slane %v5578_v62, 1  ;;  %v5592_v44 = vmax.f32 %v5590_v24, %v5591_v51  ;;  %v5169_v7 = vrot.slane %v5168_v43, 4  ;;  %v5150_v59 = vrot.slane %v5149_v33, 2  ;;  %2452 = vst.msk [vmem:[#allocation2 + $0x150] sm:$0xff] %vm2409_vm6, %v13378_v58  ;;  %7695 = vrot.lane.b32.xlu1 %v13498_v29, %s9475_s23 }
 0x5d3   :  { %v5573_v42 = vmax.f32 %v5571_v50, %v5572_v56  ;;  %v5586_v30 = vrot.slane %v5585_v6, 1  ;;  %v5157_v14 = vrot.slane %v5156_v11, 2  ;;  %v5163_v41 = vmax.f32 %v5161_v4, %v5162_v55  ;;  %2835 = vst.msk [vmem:[#allocation2 + $0x140] sm:$0xff] %vm2794_vm8, %v13380_v37 }
 0x5d4   :  { %v5580_v39 = vmax.f32 %v5578_v62, %v5579_v60  ;;  %v5593_v10 = vrot.slane %v5592_v44, 1  ;;  %v5170_v57 = vmax.f32 %v5168_v43, %v5169_v7  ;;  %v5151_v24 = vmax.f32 %v5149_v33, %v5150_v59  ;;  %2465 = vst.msk [vmem:[#allocation2 + $0x1b8] sm:$0xff] %vm2409_vm6, %v13388_v34  ;;  %v13535_v7 = vpop.permute.xlu2 %2718 }
 0x5d5   :  { %v5587_v0 = vmax.f32 %v5585_v6, %v5586_v30  ;;  %v6249_v28 = vsel %vm5959_vm12, %v5573_v42, -inf  ;;  %v5158_v52 = vmax.f32 %v5156_v11, %v5157_v14  ;;  %v5164_v9 = vrot.slane %v5163_v41, 2  ;;  %2850 = vst.msk [vmem:[#allocation2 + $0x1b8] sm:$0xff] %vm2794_vm8, %v13189_v26  ;;  %v13519_v6 = vld [vmem:[#allocation3 + $0x32] sm:$0xff]  ;;  %7306 = vrot.lane.b32.xlu0 %v13376_v54, %s9469_s25  ;;  %v13526_v26 = vpop.f32.mrf.mxu0  ;;  %v3100_v42 = vpop.permute.xlu1 %3099 }
 0x5d6   :  { %v5594_v45 = vmax.f32 %v5592_v44, %v5593_v10  ;;  %v6250_v25 = vmax.f32 %v13323_v27, %v6249_v28  ;;  %v6252_v50 = vsel %vm5959_vm12, %v5580_v39, -inf  ;;  %v5152_v40 = vrot.slane %v5151_v24, 1  ;;  %3235 = vst.msk [vmem:[#allocation2 + $0x1b8] sm:$0xff] %vm3179_vm9, %v13424_v35  ;;  %7792 = vrot.lane.b32.xlu2 %v13519_v6, %s9478_s27 }
 0x5d7   :  { %v6253_v48 = vmax.f32 %v13326_v61, %v6252_v50  ;;  %v6255_v31 = vsel %vm5959_vm12, %v5587_v0, -inf  ;;  %v5159_v62 = vrot.slane %v5158_v52, 1  ;;  %v5165_v4 = vmax.f32 %v5163_v41, %v5164_v9  ;;  %3220 = vst.msk [vmem:[#allocation2 + $0x140] sm:$0xff] %vm3179_vm9, %v13434_v15  ;;  %v3070_v10 = vpop.permute.xlu0 %3069 }
 0x5d8   :  { %v6256_v27 = vmax.f32 %v13329_v18, %v6255_v31  ;;  %v6258_v58 = vsel %vm5959_vm12, %v5594_v45, -inf  ;;  %v6444_v51 = vadd.f32 %v13222_v38, %v6250_v25  ;;  %v5153_v43 = vmax.f32 %v5151_v24, %v5152_v40  ;;  %v3283_v54 = vld [vmem:[#allocation2 + $0x138] sm:$0xff]  ;;  %2453 = vst.msk [vmem:[#allocation2 + $0x158] sm:$0xff] %vm2409_vm6, %v13481_v13  ;;  %v7047_v25 = vld [vmem:[#allocation3 + $0x10] sm:$0xff] }
 0x5d9   :  { %v6259_v37 = vmax.f32 %v13352_v8, %v6258_v58  ;;  %v6445_v61 = vadd.f32 %v13222_v38, %v6253_v48  ;;  %v5160_v56 = vmax.f32 %v5158_v52, %v5159_v62  ;;  %v5166_v18 = vrot.slane %v5165_v4, 1  ;;  %v3298_v8 = vld [vmem:[#allocation2 + $0x1b0] sm:$0xff]  ;;  %9352 = vmatmul.msk.f32.gmra.mxu2 %vm3312_vm10, %v3283_v54  ;;  %2836 = vst.msk [vmem:[#allocation2 + $0x148] sm:$0xff] %vm2794_vm8, %v13483_v1 }
 0x5da   :  { %v6446_v34 = vadd.f32 %v13222_v38, %v6256_v27  ;;  %v6572_v33 = vmax.f32 %v6444_v51, 0.0  ;;  %v5171_v11 = vrot.slane %v5170_v57, 2  ;;  %v6165_v55 = vsel %vm5959_vm12, %v5153_v43, -inf  ;;  %9367 = vmatmul.msk.f32.gmra.mxu3 %vm3312_vm10, %v3298_v8  ;;  %2466 = vst.msk [vmem:[#allocation2 + $0x1c0] sm:$0xff] %vm2409_vm6, %v13489_v36  ;;  %7211 = vrot.lane.b32.xlu1 %v13473_v20, %s9474_s1  ;;  %v7565_v27 = vld [vmem:[#allocation3 + $0x30] sm:$0xff] }
 0x5db   :  { %v6447_v60 = vadd.f32 %v13222_v38, %v6259_v37  ;;  %v6573_v44 = vmax.f32 %v6445_v61, 0.0  ;;  %v6168_v35 = vsel %vm5959_vm12, %v5160_v56, -inf  ;;  %v5167_v59 = vmax.f32 %v5165_v4, %v5166_v18  ;;  %2851 = vst.msk [vmem:[#allocation2 + $0x1c0] sm:$0xff] %vm2794_vm8, %v13318_v22 }
 0x5dc   :  { %v6574_v30 = vmax.f32 %v6446_v34, 0.0  ;;  %v5172_v14 = vmax.f32 %v5170_v57, %v5171_v11  ;;  %v6166_v39 = vmax.f32 %v13292_v49, %v6165_v55  ;;  %v6169_v0 = vmax.f32 %v13301_v12, %v6168_v35  ;;  %3236 = vst.msk [vmem:[#allocation2 + $0x1c0] sm:$0xff] %vm3179_vm9, %v3100_v42  ;;  %v3679_v34 = vpop.f32.mrf.mxu3  ;;  %v2336_v55 = vpop.permute.xlu2 %2335 }
 0x5dd   :  { %v6575_v15 = vmax.f32 %v6447_v60, 0.0  ;;  %v6957_v41 = vrot.slane %v6573_v44, 7  ;;  %v3833_v28 = vrot.slane %v13526_v26, 2  ;;  %v6171_v57 = vsel %vm5959_vm12, %v5167_v59, -inf  ;;  %v3299_v40 = vld [vmem:[#allocation2 + $0x1b8] sm:$0xff]  ;;  %3221 = vst.msk [vmem:[#allocation2 + $0x148] sm:$0xff] %vm3179_vm9, %v3070_v10  ;;  %7598 = vrot.lane.b32.xlu0 %v7565_v27, %s9476_s24  ;;  %v2687_v35 = vpop.permute.xlu1 %2686 }
 0x5de   :  { %v6959_v24 = vrot.slane %v6574_v30, 6  ;;  %v5173_v52 = vrot.slane %v5172_v14, 1  ;;  %v6416_v49 = vadd.f32 %v13222_v38, %v6166_v39  ;;  %v6172_v45 = vmax.f32 %v13304_v47, %v6171_v57  ;;  %7308 = vrot.lane.b32.xlu2 %v7565_v27, %s9469_s25  ;;  %7063 = vst.msk [vmem:[#allocation4 + $0x8] sm:$0xff] %vm5959_vm12, %v7047_v25  ;;  %v3284_v42 = vld [vmem:[#allocation2 + $0x140] sm:$0xff] }
 0x5df   :  { %v6958_v13 = vsel %vm15097_vm13, %v6957_v41, %v6572_v33  ;;  %v6961_v12 = vrot.slane %v6575_v15, 5  ;;  %v6417_v1 = vadd.f32 %v13222_v38, %v6169_v0  ;;  %v3834_v36 = vrot.slane %v13526_v26, 4  ;;  %2469 = vst.msk [vmem:[#allocation2 + $0x1d8] sm:$0xff] %vm2409_vm6, %v2336_v55 }
 0x5e0   :  { %v6960_v50 = vsel %vm15096_vm14, %v6959_v24, %v6958_v13  ;;  %v5174_v9 = vmax.f32 %v5172_v14, %v5173_v52  ;;  %v6544_v48 = vmax.f32 %v6416_v49, 0.0  ;;  %v6418_v31 = vadd.f32 %v13222_v38, %v6172_v45  ;;  %v2332_v14 = vpop.permute.xlu0 %2331  ;;  %2837 = vst.msk [vmem:[#allocation2 + $0x150] sm:$0xff] %vm2794_vm8, %v2687_v35 }
 0x5e1   :  { %v13561_v20 = vsel %vm15095_vm15, %v6961_v12, %v6960_v50  ;;  %v6545_v47 = vmax.f32 %v6417_v1, 0.0  ;;  %v3835_v62 = vrot.slane %v13526_v26, 6  ;;  %v4643_v51 = vsel %vm4166_vm11, %v13526_v26, -inf  ;;  %9353 = vmatmul.msk.f32.gmra.mxu2 %vm3312_vm10, %v3284_v42  ;;  %2467 = vst.msk [vmem:[#allocation2 + $0x1c8] sm:$0xff] %vm2409_vm6, %v2332_v14  ;;  %v13592_v12 = vld [vmem:[#allocation3 + $0x40] sm:$0xff] }
 0x5e2   :  { %v6174_v22 = vsel %vm5959_vm12, %v5174_v9, -inf  ;;  %v6907_v58 = vrot.slane %v6544_v48, 4  ;;  %v4650_v4 = vsel %vm4166_vm11, %v3833_v28, -inf  ;;  %v6546_v61 = vmax.f32 %v6418_v31, 0.0  ;;  %9368 = vmatmul.msk.f32.gmra.mxu3 %vm3312_vm10, %v3299_v40  ;;  %7502 = vrot.lane.b32.xlu1 %v13519_v6, %s9477_s26  ;;  %2852 = vst.msk [vmem:[#allocation2 + $0x1c8] sm:$0xff] %vm2794_vm8, %v13422_v17 }
 0x5e3   :  { %v6175_v37 = vmax.f32 %v13311_v21, %v6174_v22  ;;  %v6909_v43 = vrot.slane %v6545_v47, 3  ;;  %v4644_v56 = vrot.slane %v4643_v51, 4  ;;  %v4651_v18 = vrot.slane %v4650_v4, 4 }
 0x5e4   :  { %v6908_v33 = vsel %vm6792_vm0, %v6907_v58, %v13429_v16  ;;  %v4657_v11 = vsel %vm4166_vm11, %v3834_v36, -inf  ;;  %v4664_v26 = vsel %vm4166_vm11, %v3835_v62, -inf  ;;  %v6911_v44 = vrot.slane %v6546_v61, 2 }
 0x5e5   :  { %v6419_v8 = vadd.f32 %v13222_v38, %v6175_v37  ;;  %v6910_v60 = vsel %vm6795_vm1, %v6909_v43, %v6908_v33  ;;  %v4645_v21 = vmax.f32 %v4643_v51, %v4644_v56  ;;  %v4652_v54 = vmax.f32 %v4650_v4, %v4651_v18  ;;  %7114 = vrot.lane.b32.xlu0 %v13357_v5, %s9472_s21  ;;  %v3580_v51 = vpop.f32.mrf.mxu0  ;;  %v2338_v56 = vpop.permute.xlu2 %2337  ;;  %v3285_v33 = vld [vmem:[#allocation2 + $0x148] sm:$0xff] }
 0x5e6   :  { %v4658_v30 = vrot.slane %v4657_v11, 4  ;;  %v4665_v59 = vrot.slane %v4664_v26, 4  ;;  %v3935_v16 = vrot.slane %v3679_v34, 2  ;;  %v6912_v39 = vsel %vm6798_vm2, %v6911_v44, %v6910_v60  ;;  %7600 = vrot.lane.b32.xlu2 %v13592_v12, %s9476_s24  ;;  %2470 = vst.msk [vmem:[#allocation2 + $0x1e0] sm:$0xff] %vm2409_vm6, %v2338_v56 }
 0x5e7   :  { %v6547_v38 = vmax.f32 %v6419_v8, 0.0  ;;  %v4646_v10 = vrot.slane %v4645_v21, 2  ;;  %v3936_v15 = vrot.slane %v3679_v34, 4  ;;  %v4653_v41 = vrot.slane %v4652_v54, 2 }
 0x5e8   :  { %v4659_v0 = vmax.f32 %v4657_v11, %v4658_v30  ;;  %v4666_v28 = vmax.f32 %v4664_v26, %v4665_v59  ;;  %v3937_v24 = vrot.slane %v3679_v34, 6  ;;  %v5595_v49 = vsel %vm4166_vm11, %v3679_v34, -inf  ;;  %v3102_v34 = vpop.permute.xlu1 %3101  ;;  %v3072_v60 = vpop.permute.xlu0 %3071 }
 0x5e9   :  { %v6913_v52 = vrot.slane %v6547_v38, 1  ;;  %v4647_v57 = vmax.f32 %v4645_v21, %v4646_v10  ;;  %v5602_v13 = vsel %vm4166_vm11, %v3935_v16, -inf  ;;  %v4654_v45 = vmax.f32 %v4652_v54, %v4653_v41  ;;  %9354 = vmatmul.msk.f32.gmra.mxu2 %vm3312_vm10, %v3285_v33  ;;  %3237 = vst.msk [vmem:[#allocation2 + $0x1c8] sm:$0xff] %vm3179_vm9, %v3102_v34  ;;  %v7048_v16 = vld [vmem:[#allocation3 + $0x20] sm:$0xff] }
 0x5ea   :  { %v4660_v1 = vrot.slane %v4659_v0, 2  ;;  %v4667_v25 = vrot.slane %v4666_v28, 2  ;;  %v5596_v50 = vrot.slane %v5595_v49, 4  ;;  %v5603_v36 = vrot.slane %v5602_v13, 4  ;;  %3222 = vst.msk [vmem:[#allocation2 + $0x150] sm:$0xff] %vm3179_vm9, %v3072_v60 }
 0x5eb   :  { %v6914_v9 = vsel %vm15100_vm3, %v6913_v52, %v6912_v39  ;;  %v4648_v48 = vrot.slane %v4647_v57, 1  ;;  %v5609_v31 = vsel %vm4166_vm11, %v3936_v15, -inf  ;;  %v4655_v17 = vrot.slane %v4654_v45, 1  ;;  %7064 = vst.msk [vmem:[#allocation4 + $0x10] sm:$0xff] %vm5959_vm12, %v7048_v16 }
 0x5ec   :  { %7038 = vst.msk [vmem:[#allocation3 + $0xb1] sm:$0xff] %vm5959_vm12, %v6914_v9  ;;  %v4661_v47 = vmax.f32 %v4659_v0, %v4660_v1  ;;  %v4668_v40 = vmax.f32 %v4666_v28, %v4667_v25  ;;  %v5597_v62 = vmax.f32 %v5595_v49, %v5596_v50  ;;  %v5604_v22 = vmax.f32 %v5602_v13, %v5603_v36  ;;  %v13626_v50 = vld [vmem:[#allocation3 + $0x42] sm:$0xff] }
 0x5ed   :  { %v4649_v27 = vmax.f32 %v4647_v57, %v4648_v48  ;;  %v5610_v58 = vrot.slane %v5609_v31, 4  ;;  %v5616_v5 = vsel %vm4166_vm11, %v3937_v24, -inf  ;;  %v4656_v4 = vmax.f32 %v4654_v45, %v4655_v17  ;;  %7405 = vrot.lane.b32.xlu0 %v13498_v29, %s9473_s22  ;;  %7794 = vrot.lane.b32.xlu1 %v13626_v50, %s9478_s27  ;;  %v2340_v17 = vpop.permute.xlu2 %2339 }
 0x5ee   :  { %v4662_v37 = vrot.slane %v4661_v47, 1  ;;  %v4669_v61 = vrot.slane %v4668_v40, 1  ;;  %v5598_v43 = vrot.slane %v5597_v62, 2  ;;  %v5605_v11 = vrot.slane %v5604_v22, 2  ;;  %7116 = vrot.lane.b32.xlu2 %v13498_v29, %s9472_s21  ;;  %v3300_v29 = vld [vmem:[#allocation2 + $0x1c0] sm:$0xff]  ;;  %2471 = vst.msk [vmem:[#allocation2 + $0x1e8] sm:$0xff] %vm2409_vm6, %v2340_v17 }
 0x5ef   :  { %v13603_v18 = vsel %vm5959_vm12, %v4649_v27, -inf  ;;  %v5611_v26 = vmax.f32 %v5609_v31, %v5610_v58  ;;  %v5617_v8 = vrot.slane %v5616_v5, 4  ;;  %v13608_v55 = vsel %vm5959_vm12, %v4656_v4, -inf  ;;  %9369 = vmatmul.msk.f32.gmra.mxu3 %vm3312_vm10, %v3300_v29 }
 0x5f0   :  { %v4663_v44 = vmax.f32 %v4661_v47, %v4662_v37  ;;  %v4670_v21 = vmax.f32 %v4668_v40, %v4669_v61  ;;  %v5599_v35 = vmax.f32 %v5597_v62, %v5598_v43  ;;  %v5606_v42 = vmax.f32 %v5604_v22, %v5605_v11  ;;  %v2689_v47 = vpop.permute.xlu1 %2688  ;;  %v2334_v58 = vpop.permute.xlu0 %2333  ;;  %v13645_v11 = vld [vmem:[#allocation3 + $0x41] sm:$0xff] }
 0x5f1   :  { %v5612_v54 = vrot.slane %v5611_v26, 2  ;;  %v5618_v30 = vmax.f32 %v5616_v5, %v5617_v8  ;;  %v3836_v59 = vrot.slane %v3580_v51, 2  ;;  %v3837_v10 = vrot.slane %v3580_v51, 4  ;;  %2838 = vst.msk [vmem:[#allocation2 + $0x158] sm:$0xff] %vm2794_vm8, %v2689_v47  ;;  %v3286_v61 = vld [vmem:[#allocation2 + $0x150] sm:$0xff] }
 0x5f2   :  { %v13613_v14 = vsel %vm5959_vm12, %v4663_v44, -inf  ;;  %v13616_v38 = vsel %vm5959_vm12, %v4670_v21, -inf  ;;  %v5600_v39 = vrot.slane %v5599_v35, 1  ;;  %v5607_v15 = vrot.slane %v5606_v42, 1  ;;  %2468 = vst.msk [vmem:[#allocation2 + $0x1d0] sm:$0xff] %vm2409_vm6, %v2334_v58  ;;  %9355 = vmatmul.msk.f32.gmra.mxu2 %vm3312_vm10, %v3286_v61 }
 0x5f3   :  { %v5613_v41 = vmax.f32 %v5611_v26, %v5612_v54  ;;  %v5619_v0 = vrot.slane %v5618_v30, 2  ;;  %v3838_v28 = vrot.slane %v3580_v51, 6  ;;  %v4671_v52 = vsel %vm4166_vm11, %v3580_v51, -inf  ;;  %2853 = vst.msk [vmem:[#allocation2 + $0x1d0] sm:$0xff] %vm2794_vm8, %v13535_v7 }
 0x5f4   :  { %v5601_v24 = vmax.f32 %v5599_v35, %v5600_v39  ;;  %v4678_v57 = vsel %vm4166_vm11, %v3836_v59, -inf  ;;  %v4685_v49 = vsel %vm4166_vm11, %v3837_v10, -inf  ;;  %v5608_v13 = vmax.f32 %v5606_v42, %v5607_v15 }
 0x5f5   :  { %v5614_v45 = vrot.slane %v5613_v41, 1  ;;  %v5620_v1 = vmax.f32 %v5618_v30, %v5619_v0  ;;  %v4672_v25 = vrot.slane %v4671_v52, 4  ;;  %v4679_v48 = vrot.slane %v4678_v57, 4  ;;  %7697 = vrot.lane.b32.xlu0 %v13645_v11, %s9475_s23  ;;  %7310 = vrot.lane.b32.xlu1 %v13592_v12, %s9469_s25 }
 0x5f6   :  { %v6261_v9 = vsel %vm5959_vm12, %v5601_v24, -inf  ;;  %v4686_v36 = vrot.slane %v4685_v49, 4  ;;  %v4692_v31 = vsel %vm4166_vm11, %v3838_v28, -inf  ;;  %v6264_v22 = vsel %vm5959_vm12, %v5608_v13, -inf  ;;  %7407 = vrot.lane.b32.xlu2 %v13645_v11, %s9473_s22 }
 0x5f7   :  { %v5615_v40 = vmax.f32 %v5613_v41, %v5614_v45  ;;  %v5621_v62 = vrot.slane %v5620_v1, 1  ;;  %v6262_v27 = vmax.f32 %v13439_v23, %v6261_v9  ;;  %v6265_v5 = vmax.f32 %v13442_v53, %v6264_v22  ;;  %v13642_v23 = vld [vmem:[%s15084_s2] ss:$0 sm:$0xff]  ;;  %v3634_v41 = vpop.f32.mrf.mxu2 }
 0x5f8   :  { %v4673_v51 = vmax.f32 %v4671_v52, %v4672_v25  ;;  %v4680_v4 = vmax.f32 %v4678_v57, %v4679_v48  ;;  %v4687_v37 = vmax.f32 %v4685_v49, %v4686_v36  ;;  %v4693_v33 = vrot.slane %v4692_v31, 4  ;;  %v2342_v52 = vpop.permute.xlu2 %2341  ;;  %v3104_v57 = vpop.permute.xlu1 %3103 }
 0x5f9   :  { %v5622_v43 = vmax.f32 %v5620_v1, %v5621_v62  ;;  %v6267_v56 = vsel %vm5959_vm12, %v5615_v40, -inf  ;;  %v6448_v34 = vadd.f32 %v13642_v23, %v6262_v27  ;;  %v6449_v26 = vadd.f32 %v13642_v23, %v6265_v5  ;;  %2472 = vst.msk [vmem:[#allocation2 + $0x1f0] sm:$0xff] %vm2409_vm6, %v2342_v52  ;;  %v3074_v25 = vpop.permute.xlu0 %3073 }
 0x5fa   :  { %v6268_v53 = vmax.f32 %v13456_v46, %v6267_v56  ;;  %v4674_v8 = vrot.slane %v4673_v51, 2  ;;  %v4681_v60 = vrot.slane %v4680_v4, 2  ;;  %v4688_v35 = vrot.slane %v4687_v37, 2  ;;  %3238 = vst.msk [vmem:[#allocation2 + $0x1d0] sm:$0xff] %vm3179_vm9, %v3104_v57 }
 0x5fb   :  { %v6270_v44 = vsel %vm5959_vm12, %v5622_v43, -inf  ;;  %v6576_v21 = vmax.f32 %v6448_v34, 0.0  ;;  %v4694_v42 = vmax.f32 %v4692_v31, %v4693_v33  ;;  %v6577_v30 = vmax.f32 %v6449_v26, 0.0  ;;  %3223 = vst.msk [vmem:[#allocation2 + $0x158] sm:$0xff] %vm3179_vm9, %v3074_v25  ;;  %v3589_v33 = vpop.f32.mrf.mxu1 }
 0x5fc   :  { %v6271_v46 = vmax.f32 %v13459_v2, %v6270_v44  ;;  %v6450_v54 = vadd.f32 %v13642_v23, %v6268_v53  ;;  %v4675_v59 = vmax.f32 %v4673_v51, %v4674_v8  ;;  %v4682_v39 = vmax.f32 %v4680_v4, %v4681_v60  ;;  %v3301_v2 = vld [vmem:[#allocation2 + $0x1c8] sm:$0xff] }
 0x5fd   :  { %v6963_v16 = vrot.slane %v6576_v21, 4  ;;  %v4689_v10 = vmax.f32 %v4687_v37, %v4688_v35  ;;  %v4695_v15 = vrot.slane %v4694_v42, 2  ;;  %v6965_v28 = vrot.slane %v6577_v30, 3  ;;  %9370 = vmatmul.msk.f32.gmra.mxu3 %vm3312_vm10, %v3301_v2  ;;  %7213 = vrot.lane.b32.xlu0 %v13519_v6, %s9474_s1 }
 0x5fe   :  { %v6451_v7 = vadd.f32 %v13642_v23, %v6271_v46  ;;  %v6578_v0 = vmax.f32 %v6450_v54, 0.0  ;;  %v4676_v24 = vrot.slane %v4675_v59, 1  ;;  %v4683_v13 = vrot.slane %v4682_v39, 1 }
 0x5ff   :  { %v6964_v49 = vsel %vm6792_vm0, %v6963_v16, %v13561_v20  ;;  %v4690_v45 = vrot.slane %v4689_v10, 1  ;;  %v4696_v1 = vmax.f32 %v4694_v42, %v4695_v15  ;;  %v3890_v47 = vrot.slane %v3634_v41, 2 }
 0x600   :  { %v6579_v29 = vmax.f32 %v6451_v7, 0.0  ;;  %v6966_v9 = vsel %vm6795_vm1, %v6965_v28, %v6964_v49  ;;  %v6967_v48 = vrot.slane %v6578_v0, 2  ;;  %v4677_v36 = vmax.f32 %v4675_v59, %v4676_v24  ;;  %v3106_v60 = vpop.permute.xlu1 %3105 }
 0x601   :  { %v4684_v12 = vmax.f32 %v4682_v39, %v4683_v13  ;;  %v4691_v31 = vmax.f32 %v4689_v10, %v4690_v45  ;;  %v4697_v17 = vrot.slane %v4696_v1, 1  ;;  %v3891_v27 = vrot.slane %v3634_v41, 4  ;;  %v2721_v46 = vpop.permute.xlu0 %2720  ;;  %v3302_v54 = vld [vmem:[#allocation2 + $0x1d0] sm:$0xff] }
 0x602   :  { %v6968_v20 = vsel %vm6798_vm2, %v6967_v48, %v6966_v9  ;;  %v6969_v40 = vrot.slane %v6579_v29, 1  ;;  %v6057_v62 = vsel %vm5959_vm12, %v4677_v36, -inf  ;;  %v3892_v43 = vrot.slane %v3634_v41, 6  ;;  %2854 = vst.msk [vmem:[#allocation2 + $0x1d8] sm:$0xff] %vm2794_vm8, %v2721_v46  ;;  %v3287_v39 = vld [vmem:[#allocation2 + $0x158] sm:$0xff] }
 0x603   :  { %v4698_v22 = vmax.f32 %v4696_v1, %v4697_v17  ;;  %v6058_v58 = vmax.f32 %v13401_v19, %v6057_v62  ;;  %v6060_v5 = vsel %vm5959_vm12, %v4684_v12, -inf  ;;  %v6063_v51 = vsel %vm5959_vm12, %v4691_v31, -inf  ;;  %3239 = vst.msk [vmem:[#allocation2 + $0x1d8] sm:$0xff] %vm3179_vm9, %v3106_v60  ;;  %9356 = vmatmul.msk.f32.gmra.mxu2 %vm3312_vm10, %v3287_v39 }
 0x604   :  { %v6970_v4 = vsel %vm15100_vm3, %v6969_v40, %v6968_v20  ;;  %v6061_v37 = vmax.f32 %v13408_v3, %v6060_v5  ;;  %v6064_v61 = vmax.f32 %v13413_v63, %v6063_v51  ;;  %v5175_v34 = vsel %vm4166_vm11, %v3634_v41, -inf  ;;  %v2344_v63 = vpop.permute.xlu2 %2343 }
 0x605   :  { %7042 = vst.msk [vmem:[#allocation3 + $0xf1] sm:$0xff] %vm5959_vm12, %v6970_v4  ;;  %v6066_v56 = vsel %vm5959_vm12, %v4698_v22, -inf  ;;  %v6380_v6 = vadd.f32 %v13642_v23, %v6058_v58  ;;  %v5182_v19 = vsel %vm4166_vm11, %v3890_v47, -inf  ;;  %v5176_v8 = vrot.slane %v5175_v34, 4  ;;  %9371 = vmatmul.msk.f32.gmra.mxu3 %vm3312_vm10, %v3302_v54  ;;  %7504 = vrot.lane.b32.xlu0 %v13626_v50, %s9477_s26 }
 0x606   :  { %v6067_v53 = vmax.f32 %v13416_v32, %v6066_v56  ;;  %v6381_v26 = vadd.f32 %v13642_v23, %v6061_v37  ;;  %v6382_v3 = vadd.f32 %v13642_v23, %v6064_v61  ;;  %v5183_v21 = vrot.slane %v5182_v19, 4  ;;  %2473 = vst.msk [vmem:[#allocation2 + $0x1f8] sm:$0xff] %vm2409_vm6, %v2344_v63  ;;  %v7053_v37 = vld [vmem:[#allocation3 + $0x70] sm:$0xff] }
 0x607   :  { %v6508_v44 = vmax.f32 %v6380_v6, 0.0  ;;  %v5189_v35 = vsel %vm4166_vm11, %v3891_v27, -inf  ;;  %v5196_v42 = vsel %vm4166_vm11, %v3892_v43, -inf  ;;  %v5177_v16 = vmax.f32 %v5175_v34, %v5176_v8  ;;  %v3583_v34 = vpop.f32.mrf.mxu0  ;;  %7069 = vst.msk [vmem:[#allocation4 + $0x38] sm:$0xff] %vm5959_vm12, %v7053_v37 }
 0x608   :  { %v6383_v30 = vadd.f32 %v13642_v23, %v6067_v53  ;;  %v6509_v32 = vmax.f32 %v6381_v26, 0.0  ;;  %v6510_v59 = vmax.f32 %v6382_v3, 0.0  ;;  %v5184_v10 = vmax.f32 %v5182_v19, %v5183_v21  ;;  %v7046_v19 = vld [vmem:[#allocation3] sm:$0xff] }
 0x609   :  { %v5190_v15 = vrot.slane %v5189_v35, 4  ;;  %v5197_v41 = vrot.slane %v5196_v42, 4  ;;  %v3845_v7 = vrot.slane %v3589_v33, 2  ;;  %v5178_v52 = vrot.slane %v5177_v16, 2  ;;  %7062 = vst.msk [vmem:[#allocation4] sm:$0xff] %vm5959_vm12, %v7046_v19  ;;  %v2723_v63 = vpop.permute.xlu0 %2722 }
 0x60a   :  { %v6511_v0 = vmax.f32 %v6383_v30, 0.0  ;;  %v6845_v28 = vrot.slane %v6509_v32, 7  ;;  %v6847_v24 = vrot.slane %v6510_v59, 6  ;;  %v5185_v57 = vrot.slane %v5184_v10, 2  ;;  %2855 = vst.msk [vmem:[#allocation2 + $0x1e0] sm:$0xff] %vm2794_vm8, %v2723_v63 }
 0x60b   :  { %v5191_v2 = vmax.f32 %v5189_v35, %v5190_v15  ;;  %v5198_v49 = vmax.f32 %v5196_v42, %v5197_v41  ;;  %v3846_v13 = vrot.slane %v3589_v33, 4  ;;  %v5179_v25 = vmax.f32 %v5177_v16, %v5178_v52  ;;  %v3108_v42 = vpop.permute.xlu1 %3107 }
 0x60c   :  { %v6846_v45 = vsel %vm15097_vm13, %v6845_v28, %v6508_v44  ;;  %v6849_v1 = vrot.slane %v6511_v0, 5  ;;  %v3847_v29 = vrot.slane %v3589_v33, 6  ;;  %v5186_v48 = vmax.f32 %v5184_v10, %v5185_v57  ;;  %3240 = vst.msk [vmem:[#allocation2 + $0x1e0] sm:$0xff] %vm3179_vm9, %v3108_v42 }
 0x60d   :  { %v6848_v9 = vsel %vm15096_vm14, %v6847_v24, %v6846_v45  ;;  %v5192_v36 = vrot.slane %v5191_v2, 2  ;;  %v5199_v12 = vrot.slane %v5198_v49, 2  ;;  %v5180_v17 = vrot.slane %v5179_v25, 1 }
 0x60e   :  { %v13701_v31 = vsel %vm15095_vm15, %v6849_v1, %v6848_v9  ;;  %v4755_v47 = vsel %vm4166_vm11, %v3589_v33, -inf  ;;  %v4762_v20 = vsel %vm4166_vm11, %v3845_v7, -inf  ;;  %v5187_v40 = vrot.slane %v5186_v48, 1  ;;  %v3303_v33 = vld [vmem:[#allocation2 + $0x1d8] sm:$0xff] }
 0x60f   :  { %v5193_v62 = vmax.f32 %v5191_v2, %v5192_v36  ;;  %v5200_v27 = vmax.f32 %v5198_v49, %v5199_v12  ;;  %v4756_v22 = vrot.slane %v4755_v47, 4  ;;  %v5181_v58 = vmax.f32 %v5179_v25, %v5180_v17  ;;  %9372 = vmatmul.msk.f32.gmra.mxu3 %vm3312_vm10, %v3303_v33 }
 0x610   :  { %v4763_v5 = vrot.slane %v4762_v20, 4  ;;  %v4769_v51 = vsel %vm4166_vm11, %v3846_v13, -inf  ;;  %v4776_v4 = vsel %vm4166_vm11, %v3847_v29, -inf  ;;  %v5188_v61 = vmax.f32 %v5186_v48, %v5187_v40 }
 0x611   :  { %v5194_v43 = vrot.slane %v5193_v62, 1  ;;  %v5201_v56 = vrot.slane %v5200_v27, 1  ;;  %v4757_v6 = vmax.f32 %v4755_v47, %v4756_v22  ;;  %v13709_v53 = vsel %vm5959_vm12, %v5181_v58, -inf }
 0x612   :  { %v4764_v26 = vmax.f32 %v4762_v20, %v4763_v5  ;;  %v4770_v3 = vrot.slane %v4769_v51, 4  ;;  %v4777_v8 = vrot.slane %v4776_v4, 4  ;;  %v13714_v21 = vsel %vm5959_vm12, %v5188_v61, -inf }
 0x613   :  { %v5195_v60 = vmax.f32 %v5193_v62, %v5194_v43  ;;  %v5202_v44 = vmax.f32 %v5200_v27, %v5201_v56  ;;  %v4758_v35 = vrot.slane %v4757_v6, 2  ;;  %v3839_v32 = vrot.slane %v3583_v34, 2  ;;  %v3637_v27 = vpop.f32.mrf.mxu2  ;;  %v7111_v43 = vpop.permute.xlu2 %7110 }
 0x614   :  { %v4765_v46 = vrot.slane %v4764_v26, 2  ;;  %v4771_v54 = vmax.f32 %v4769_v51, %v4770_v3  ;;  %v4778_v30 = vmax.f32 %v4776_v4, %v4777_v8  ;;  %v3840_v10 = vrot.slane %v3583_v34, 4  ;;  %7159 = vst.msk [vmem:[#allocation4] sm:$0xff] %vm15098_vm5, %v7111_v43  ;;  %v3110_v63 = vpop.permute.xlu1 %3109 }
 0x615   :  { %v13719_v59 = vsel %vm5959_vm12, %v5195_v60, -inf  ;;  %v13722_v16 = vsel %vm5959_vm12, %v5202_v44, -inf  ;;  %v4759_v39 = vmax.f32 %v4757_v6, %v4758_v35  ;;  %v3841_v0 = vrot.slane %v3583_v34, 6  ;;  %v2725_v60 = vpop.permute.xlu0 %2724 }
 0x616   :  { %v4766_v15 = vmax.f32 %v4764_v26, %v4765_v46  ;;  %v4772_v41 = vrot.slane %v4771_v54, 2  ;;  %v4779_v7 = vrot.slane %v4778_v30, 2  ;;  %v4699_v24 = vsel %vm4166_vm11, %v3583_v34, -inf  ;;  %2856 = vst.msk [vmem:[#allocation2 + $0x1e8] sm:$0xff] %vm2794_vm8, %v2725_v60 }
 0x617   :  { %v4760_v28 = vrot.slane %v4759_v39, 1  ;;  %v4706_v52 = vsel %vm4166_vm11, %v3839_v32, -inf  ;;  %v4713_v57 = vsel %vm4166_vm11, %v3840_v10, -inf  ;;  %v4700_v45 = vrot.slane %v4699_v24, 4  ;;  %3241 = vst.msk [vmem:[#allocation2 + $0x1e8] sm:$0xff] %vm3179_vm9, %v3110_v63  ;;  %v3682_v63 = vpop.f32.mrf.mxu3 }
 0x618   :  { %v4767_v2 = vrot.slane %v4766_v15, 1  ;;  %v4773_v49 = vmax.f32 %v4771_v54, %v4772_v41  ;;  %v4780_v13 = vmax.f32 %v4778_v30, %v4779_v7  ;;  %v4707_v25 = vrot.slane %v4706_v52, 4 }
 0x619   :  { %v4761_v1 = vmax.f32 %v4759_v39, %v4760_v28  ;;  %v4714_v29 = vrot.slane %v4713_v57, 4  ;;  %v4720_v9 = vsel %vm4166_vm11, %v3841_v0, -inf  ;;  %v4701_v17 = vmax.f32 %v4699_v24, %v4700_v45 }
 0x61a   :  { %v4768_v48 = vmax.f32 %v4766_v15, %v4767_v2  ;;  %v4774_v36 = vrot.slane %v4773_v49, 1  ;;  %v4781_v12 = vrot.slane %v4780_v13, 1  ;;  %v4708_v20 = vmax.f32 %v4706_v52, %v4707_v25 }
 0x61b   :  { %v13729_v47 = vsel %vm5959_vm12, %v4761_v1, -inf  ;;  %v4715_v40 = vmax.f32 %v4713_v57, %v4714_v29  ;;  %v4721_v62 = vrot.slane %v4720_v9, 4  ;;  %v4702_v51 = vrot.slane %v4701_v17, 2 }
 0x61c   :  { %v4775_v22 = vmax.f32 %v4773_v49, %v4774_v36  ;;  %v4782_v58 = vmax.f32 %v4780_v13, %v4781_v12  ;;  %v13732_v5 = vsel %vm5959_vm12, %v4768_v48, -inf  ;;  %v4709_v4 = vrot.slane %v4708_v20, 2 }
 0x61d   :  { %v4716_v37 = vrot.slane %v4715_v40, 2  ;;  %v4722_v61 = vmax.f32 %v4720_v9, %v4721_v62  ;;  %v4703_v34 = vmax.f32 %v4701_v17, %v4702_v51  ;;  %v3893_v19 = vrot.slane %v3637_v27, 2 }
 0x61e   :  { %v13735_v56 = vsel %vm5959_vm12, %v4775_v22, -inf  ;;  %v13738_v6 = vsel %vm5959_vm12, %v4782_v58, -inf  ;;  %v4710_v33 = vmax.f32 %v4708_v20, %v4709_v4  ;;  %v3894_v8 = vrot.slane %v3637_v27, 4  ;;  %v2727_v22 = vpop.permute.xlu0 %2726 }
 0x61f   :  { %v4717_v26 = vmax.f32 %v4715_v40, %v4716_v37  ;;  %v4723_v3 = vrot.slane %v4722_v61, 2  ;;  %v4704_v44 = vrot.slane %v4703_v34, 1  ;;  %v3895_v35 = vrot.slane %v3637_v27, 6  ;;  %2857 = vst.msk [vmem:[#allocation2 + $0x1f0] sm:$0xff] %vm2794_vm8, %v2727_v22 }
 0x620   :  { %v5203_v42 = vsel %vm4166_vm11, %v3637_v27, -inf  ;;  %v5210_v46 = vsel %vm4166_vm11, %v3893_v19, -inf  ;;  %v4711_v54 = vrot.slane %v4710_v33, 1  ;;  %v5217_v41 = vsel %vm4166_vm11, %v3894_v8, -inf  ;;  %v3112_v27 = vpop.permute.xlu1 %3111 }
 0x621   :  { %v4718_v30 = vrot.slane %v4717_v26, 1  ;;  %v4724_v32 = vmax.f32 %v4722_v61, %v4723_v3  ;;  %v5204_v39 = vrot.slane %v5203_v42, 4  ;;  %v4705_v10 = vmax.f32 %v4703_v34, %v4704_v44  ;;  %3242 = vst.msk [vmem:[#allocation2 + $0x1f0] sm:$0xff] %vm3179_vm9, %v3112_v27  ;;  %v13785_v27 = vpop.permute.xlu2 %7401 }
 0x622   :  { %v5211_v15 = vrot.slane %v5210_v46, 4  ;;  %v5224_v7 = vsel %vm4166_vm11, %v3895_v35, -inf  ;;  %v4712_v0 = vmax.f32 %v4710_v33, %v4711_v54  ;;  %v5218_v49 = vrot.slane %v5217_v41, 4 }
 0x623   :  { %v4719_v28 = vmax.f32 %v4717_v26, %v4718_v30  ;;  %v4725_v24 = vrot.slane %v4724_v32, 1  ;;  %v5205_v52 = vmax.f32 %v5203_v42, %v5204_v39  ;;  %v6069_v57 = vsel %vm5959_vm12, %v4705_v10, -inf }
 0x624   :  { %v5212_v2 = vmax.f32 %v5210_v46, %v5211_v15  ;;  %v5225_v13 = vrot.slane %v5224_v7, 4  ;;  %v6070_v1 = vmax.f32 %v13603_v18, %v6069_v57  ;;  %v6072_v25 = vsel %vm5959_vm12, %v4712_v0, -inf }
 0x625   :  { %v4726_v45 = vmax.f32 %v4724_v32, %v4725_v24  ;;  %v6075_v29 = vsel %vm5959_vm12, %v4719_v28, -inf  ;;  %v6073_v9 = vmax.f32 %v13608_v55, %v6072_v25  ;;  %v5206_v36 = vrot.slane %v5205_v52, 2 }
 0x626   :  { %v6076_v48 = vmax.f32 %v13613_v14, %v6075_v29  ;;  %v5213_v12 = vrot.slane %v5212_v2, 2  ;;  %v6384_v20 = vadd.f32 %v13642_v23, %v6070_v1  ;;  %v5219_v40 = vmax.f32 %v5217_v41, %v5218_v49  ;;  %v2729_v57 = vpop.permute.xlu0 %2728 }
 0x627   :  { %v6078_v17 = vsel %vm5959_vm12, %v4726_v45, -inf  ;;  %v5226_v62 = vmax.f32 %v5224_v7, %v5225_v13  ;;  %v6385_v58 = vadd.f32 %v13642_v23, %v6073_v9  ;;  %v5207_v4 = vmax.f32 %v5205_v52, %v5206_v36  ;;  %v3592_v52 = vpop.f32.mrf.mxu1  ;;  %2858 = vst.msk [vmem:[#allocation2 + $0x1f8] sm:$0xff] %vm2794_vm8, %v2729_v57 }
 0x628   :  { %v6079_v18 = vmax.f32 %v13616_v38, %v6078_v17  ;;  %v6386_v51 = vadd.f32 %v13642_v23, %v6076_v48  ;;  %v6512_v55 = vmax.f32 %v6384_v20, 0.0  ;;  %v5214_v14 = vmax.f32 %v5212_v2, %v5213_v12  ;;  %v3114_v9 = vpop.permute.xlu1 %3113 }
 0x629   :  { %v5220_v37 = vrot.slane %v5219_v40, 2  ;;  %v5227_v61 = vrot.slane %v5226_v62, 2  ;;  %v6513_v34 = vmax.f32 %v6385_v58, 0.0  ;;  %v5208_v33 = vrot.slane %v5207_v4, 1  ;;  %3243 = vst.msk [vmem:[#allocation2 + $0x1f8] sm:$0xff] %vm3179_vm9, %v3114_v9 }
 0x62a   :  { %v6387_v43 = vadd.f32 %v13642_v23, %v6079_v18  ;;  %v6514_v19 = vmax.f32 %v6386_v51, 0.0  ;;  %v6851_v26 = vrot.slane %v6512_v55, 4  ;;  %v5215_v38 = vrot.slane %v5214_v14, 1 }
 0x62b   :  { %v5221_v3 = vmax.f32 %v5219_v40, %v5220_v37  ;;  %v5228_v8 = vmax.f32 %v5226_v62, %v5227_v61  ;;  %v6853_v44 = vrot.slane %v6513_v34, 3  ;;  %v5209_v42 = vmax.f32 %v5207_v4, %v5208_v33 }
 0x62c   :  { %v6515_v60 = vmax.f32 %v6387_v43, 0.0  ;;  %v6855_v35 = vrot.slane %v6514_v19, 2  ;;  %v6852_v46 = vsel %vm6792_vm0, %v6851_v26, %v13701_v31  ;;  %v5216_v54 = vmax.f32 %v5214_v14, %v5215_v38 }
 0x62d   :  { %v5222_v30 = vrot.slane %v5221_v3, 1  ;;  %v5229_v32 = vrot.slane %v5228_v8, 1  ;;  %v6854_v39 = vsel %vm6795_vm1, %v6853_v44, %v6852_v46  ;;  %v13765_v15 = vsel %vm5959_vm12, %v5209_v42, -inf }
 0x62e   :  { %v6857_v10 = vrot.slane %v6515_v60, 1  ;;  %v3938_v41 = vrot.slane %v3682_v63, 2  ;;  %v6856_v7 = vsel %vm6798_vm2, %v6855_v35, %v6854_v39  ;;  %v13769_v24 = vsel %vm5959_vm12, %v5216_v54, -inf }
 0x62f   :  { %v5223_v0 = vmax.f32 %v5221_v3, %v5222_v30  ;;  %v5230_v28 = vmax.f32 %v5228_v8, %v5229_v32  ;;  %v3939_v2 = vrot.slane %v3682_v63, 4  ;;  %v3940_v49 = vrot.slane %v3682_v63, 6  ;;  %v7049_v32 = vld [vmem:[#allocation3 + $0x30] sm:$0xff] }
 0x630   :  { %v6858_v31 = vsel %vm15100_vm3, %v6857_v10, %v6856_v7  ;;  %v5623_v13 = vsel %vm4166_vm11, %v3682_v63, -inf  ;;  %v5630_v29 = vsel %vm4166_vm11, %v3938_v41, -inf  ;;  %v3848_v17 = vrot.slane %v3592_v52, 2  ;;  %7065 = vst.msk [vmem:[#allocation4 + $0x18] sm:$0xff] %vm5959_vm12, %v7049_v32 }
 0x631   :  { %7034 = vst.msk [vmem:[#allocation3 + $0x51] sm:$0xff] %vm5959_vm12, %v6858_v31  ;;  %v13776_v45 = vsel %vm5959_vm12, %v5223_v0, -inf  ;;  %v13779_v1 = vsel %vm5959_vm12, %v5230_v28, -inf  ;;  %v5624_v25 = vrot.slane %v5623_v13, 4  ;;  %v5631_v48 = vrot.slane %v5630_v29, 4 }
 0x632   :  { %v5637_v36 = vsel %vm4166_vm11, %v3939_v2, -inf  ;;  %v5644_v12 = vsel %vm4166_vm11, %v3940_v49, -inf  ;;  %v3849_v22 = vrot.slane %v3592_v52, 4  ;;  %v3850_v58 = vrot.slane %v3592_v52, 6 }
 0x633   :  { %v5625_v20 = vmax.f32 %v5623_v13, %v5624_v25  ;;  %v5638_v40 = vrot.slane %v5637_v36, 4  ;;  %v5645_v62 = vrot.slane %v5644_v12, 4  ;;  %v5632_v18 = vmax.f32 %v5630_v29, %v5631_v48  ;;  %v3640_v25 = vpop.f32.mrf.mxu2 }
 0x634   :  { %v4783_v51 = vsel %vm4166_vm11, %v3592_v52, -inf  ;;  %v4790_v4 = vsel %vm4166_vm11, %v3848_v17, -inf  ;;  %v4797_v19 = vsel %vm4166_vm11, %v3849_v22, -inf  ;;  %v4804_v33 = vsel %vm4166_vm11, %v3850_v58, -inf  ;;  %v3586_v22 = vpop.f32.mrf.mxu0 }
 0x635   :  { %v5626_v55 = vrot.slane %v5625_v20, 2  ;;  %v5639_v14 = vmax.f32 %v5637_v36, %v5638_v40  ;;  %v5646_v37 = vmax.f32 %v5644_v12, %v5645_v62  ;;  %v4784_v61 = vrot.slane %v4783_v51, 4  ;;  %v13795_v12 = vpop.permute.xlu2 %7693 }
 0x636   :  { %v5633_v43 = vrot.slane %v5632_v18, 2  ;;  %v4791_v34 = vrot.slane %v4790_v4, 4  ;;  %v4798_v44 = vrot.slane %v4797_v19, 4  ;;  %v4805_v35 = vrot.slane %v4804_v33, 4 }
 0x637   :  { %v5627_v26 = vmax.f32 %v5625_v20, %v5626_v55  ;;  %v5640_v38 = vrot.slane %v5639_v14, 2  ;;  %v5647_v3 = vrot.slane %v5646_v37, 2  ;;  %v4785_v8 = vmax.f32 %v4783_v51, %v4784_v61 }
 0x638   :  { %v5634_v63 = vmax.f32 %v5632_v18, %v5633_v43  ;;  %v4792_v60 = vmax.f32 %v4790_v4, %v4791_v34  ;;  %v4799_v41 = vmax.f32 %v4797_v19, %v4798_v44  ;;  %v4806_v7 = vmax.f32 %v4804_v33, %v4805_v35  ;;  %v7567_v44 = vld [vmem:[#allocation3 + $0x50] sm:$0xff] }
 0x639   :  { %v5628_v42 = vrot.slane %v5627_v26, 1  ;;  %v5641_v46 = vmax.f32 %v5639_v14, %v5640_v38  ;;  %v5648_v54 = vmax.f32 %v5646_v37, %v5647_v3  ;;  %v4786_v30 = vrot.slane %v4785_v8, 2  ;;  %v13814_v38 = vld [vmem:[#allocation3 + $0x51] sm:$0xff]  ;;  %7602 = vrot.lane.b32.xlu1 %v7567_v44, %s9476_s24 }
 0x63a   :  { %v5635_v39 = vrot.slane %v5634_v63, 1  ;;  %v4793_v10 = vrot.slane %v4792_v60, 2  ;;  %v4800_v49 = vrot.slane %v4799_v41, 2  ;;  %v4807_v13 = vrot.slane %v4806_v7, 2  ;;  %7699 = vrot.lane.b32.xlu2 %v13814_v38, %s9475_s23 }
 0x63b   :  { %v5629_v0 = vmax.f32 %v5627_v26, %v5628_v42  ;;  %v5642_v28 = vrot.slane %v5641_v46, 1  ;;  %v5649_v52 = vrot.slane %v5648_v54, 1  ;;  %v4787_v57 = vmax.f32 %v4785_v8, %v4786_v30  ;;  %v13812_v26 = vld [vmem:[#allocation3 + $0x52] sm:$0xff] }
 0x63c   :  { %v5636_v31 = vmax.f32 %v5634_v63, %v5635_v39  ;;  %v4794_v2 = vmax.f32 %v4792_v60, %v4793_v10  ;;  %v4801_v40 = vmax.f32 %v4799_v41, %v4800_v49  ;;  %v4808_v62 = vmax.f32 %v4806_v7, %v4807_v13  ;;  %7796 = vrot.lane.b32.xlu0 %v13812_v26, %s9478_s27 }
 0x63d   :  { %v5643_v29 = vmax.f32 %v5641_v46, %v5642_v28  ;;  %v5650_v9 = vmax.f32 %v5648_v54, %v5649_v52  ;;  %v13793_v48 = vsel %vm5959_vm12, %v5629_v0, -inf  ;;  %v4788_v36 = vrot.slane %v4787_v57, 1  ;;  %v13831_v49 = vpop.permute.xlu2 %7209 }
 0x63e   :  { %v13798_v17 = vsel %vm5959_vm12, %v5636_v31, -inf  ;;  %v4795_v20 = vrot.slane %v4794_v2, 1  ;;  %v3896_v4 = vrot.slane %v3640_v25, 2  ;;  %v4802_v14 = vrot.slane %v4801_v40, 1 }
 0x63f   :  { %v13801_v18 = vsel %vm5959_vm12, %v5643_v29, -inf  ;;  %v13804_v58 = vsel %vm5959_vm12, %v5650_v9, -inf  ;;  %v13806_v51 = vmax.f32 %v4787_v57, %v4788_v36  ;;  %v4809_v37 = vrot.slane %v4808_v62, 1 }
 0x640   :  { %v13808_v55 = vmax.f32 %v4794_v2, %v4795_v20  ;;  %v3897_v61 = vrot.slane %v3640_v25, 4  ;;  %v3898_v43 = vrot.slane %v3640_v25, 6  ;;  %v5231_v34 = vsel %vm4166_vm11, %v3640_v25, -inf }
 0x641   :  { %v5238_v19 = vsel %vm4166_vm11, %v3896_v4, -inf  ;;  %v3842_v33 = vrot.slane %v3586_v22, 2  ;;  %v13816_v3 = vmax.f32 %v4801_v40, %v4802_v14  ;;  %v13818_v8 = vmax.f32 %v4808_v62, %v4809_v37  ;;  %7118 = vrot.lane.b32.xlu1 %v13645_v11, %s9472_s21 }
 0x642   :  { %v5232_v63 = vrot.slane %v5231_v34, 4  ;;  %v5239_v60 = vrot.slane %v5238_v19, 4  ;;  %v5245_v35 = vsel %vm4166_vm11, %v3897_v61, -inf  ;;  %v5252_v42 = vsel %vm4166_vm11, %v3898_v43, -inf  ;;  %7215 = vrot.lane.b32.xlu2 %v13626_v50, %s9474_s1  ;;  %v7878_v50 = vld [vmem:[%s15085_s3 + $0x38] sm:$0xff] }
 0x643   :  { %v3843_v46 = vrot.slane %v3586_v22, 4  ;;  %v3844_v54 = vrot.slane %v3586_v22, 6  ;;  %v5246_v39 = vrot.slane %v5245_v35, 4  ;;  %v5253_v10 = vrot.slane %v5252_v42, 4 }
 0x644   :  { %v5233_v30 = vmax.f32 %v5231_v34, %v5232_v63  ;;  %v5240_v32 = vmax.f32 %v5238_v19, %v5239_v60  ;;  %v4727_v41 = vsel %vm4166_vm11, %v3586_v22, -inf  ;;  %v4734_v7 = vsel %vm4166_vm11, %v3842_v33, -inf  ;;  %v13833_v33 = vpop.permute.xlu0 %7207  ;;  %v13835_v63 = vpop.permute.xlu1 %7304  ;;  %7312 = vrot.lane.b32.xlu0 %v7567_v44, %s9469_s25 }
 0x645   :  { %v4741_v0 = vsel %vm4166_vm11, %v3843_v46, -inf  ;;  %v4748_v28 = vsel %vm4166_vm11, %v3844_v54, -inf  ;;  %v5247_v31 = vmax.f32 %v5245_v35, %v5246_v39  ;;  %v5254_v2 = vmax.f32 %v5252_v42, %v5253_v10  ;;  %v7879_v10 = vld [vmem:[%s15085_s3 + $0x40] sm:$0xff] }
 0x646   :  { %v5234_v52 = vrot.slane %v5233_v30, 2  ;;  %v5241_v57 = vrot.slane %v5240_v32, 2  ;;  %v4728_v13 = vrot.slane %v4727_v41, 4  ;;  %v4735_v25 = vrot.slane %v4734_v7, 4  ;;  %7936 = vmatpush.msrb.mxu1 %v7879_v10 }
 0x647   :  { %v4742_v29 = vrot.slane %v4741_v0, 4  ;;  %v4749_v9 = vrot.slane %v4748_v28, 4  ;;  %v5248_v40 = vrot.slane %v5247_v31, 2  ;;  %v5255_v62 = vrot.slane %v5254_v2, 2 }
 0x648   :  { %v5235_v36 = vmax.f32 %v5233_v30, %v5234_v52  ;;  %v5242_v20 = vmax.f32 %v5240_v32, %v5241_v57  ;;  %v4729_v22 = vmax.f32 %v4727_v41, %v4728_v13  ;;  %v4736_v4 = vmax.f32 %v4734_v7, %v4735_v25  ;;  %7937 = vmatpush.msrb.mxu1 %v7878_v50 }
 0x649   :  { %v4743_v14 = vmax.f32 %v4741_v0, %v4742_v29  ;;  %v4750_v37 = vmax.f32 %v4748_v28, %v4749_v9  ;;  %v5249_v34 = vmax.f32 %v5247_v31, %v5248_v40  ;;  %v5256_v19 = vmax.f32 %v5254_v2, %v5255_v62  ;;  %v7877_v31 = vld [vmem:[%s15085_s3 + $0x30] sm:$0xff]  ;;  %7409 = vrot.lane.b32.xlu1 %v13814_v38, %s9473_s22 }
 0x64a   :  { %v5236_v61 = vrot.slane %v5235_v36, 1  ;;  %v5243_v43 = vrot.slane %v5242_v20, 1  ;;  %v4730_v60 = vrot.slane %v4729_v22, 2  ;;  %v4737_v35 = vrot.slane %v4736_v4, 2  ;;  %7938 = vmatpush.msrb.mxu1 %v7877_v31  ;;  %7506 = vrot.lane.b32.xlu2 %v13812_v26, %s9477_s26 }
 0x64b   :  { %v4744_v42 = vrot.slane %v4743_v14, 2  ;;  %v4751_v46 = vrot.slane %v4750_v37, 2  ;;  %v5250_v32 = vrot.slane %v5249_v34, 1  ;;  %v5257_v39 = vrot.slane %v5256_v19, 1 }
 0x64c   :  { %v5237_v54 = vmax.f32 %v5235_v36, %v5236_v61  ;;  %v5244_v30 = vmax.f32 %v5242_v20, %v5243_v43  ;;  %v4731_v44 = vmax.f32 %v4729_v22, %v4730_v60  ;;  %v4738_v41 = vmax.f32 %v4736_v4, %v4737_v35 }
 0x64d   :  { %v4745_v7 = vmax.f32 %v4743_v14, %v4744_v42  ;;  %v4752_v0 = vmax.f32 %v4750_v37, %v4751_v46  ;;  %v5251_v28 = vmax.f32 %v5249_v34, %v5250_v32  ;;  %v5258_v52 = vmax.f32 %v5256_v19, %v5257_v39 }
 0x64e   :  { %v6177_v11 = vsel %vm5959_vm12, %v5237_v54, -inf  ;;  %v6180_v57 = vsel %vm5959_vm12, %v5244_v30, -inf  ;;  %v4732_v25 = vrot.slane %v4731_v44, 1  ;;  %v4739_v29 = vrot.slane %v4738_v41, 1  ;;  %v7499_v54 = vpop.permute.xlu0 %7498  ;;  %v13875_v30 = vpop.permute.xlu1 %7596 }
 0x64f   :  { %v6178_v2 = vmax.f32 %v13709_v53, %v6177_v11  ;;  %v6181_v13 = vmax.f32 %v13714_v21, %v6180_v57  ;;  %v6183_v9 = vsel %vm5959_vm12, %v5251_v28, -inf  ;;  %v6186_v36 = vsel %vm5959_vm12, %v5258_v52, -inf  ;;  %v13861_v53 = vpop.permute.xlu2 %7500  ;;  %v3685_v11 = vpop.f32.mrf.mxu3 }
 0x650   :  { %v4746_v20 = vrot.slane %v4745_v7, 1  ;;  %v4753_v40 = vrot.slane %v4752_v0, 1  ;;  %v6184_v62 = vmax.f32 %v13719_v59, %v6183_v9  ;;  %v6187_v22 = vmax.f32 %v13722_v16, %v6186_v36 }
 0x651   :  { %v6420_v4 = vadd.f32 %v13642_v23, %v6178_v2  ;;  %v6421_v14 = vadd.f32 %v13642_v23, %v6181_v13  ;;  %v4733_v21 = vmax.f32 %v4731_v44, %v4732_v25  ;;  %v4740_v37 = vmax.f32 %v4738_v41, %v4739_v29 }
 0x652   :  { %v4747_v61 = vmax.f32 %v4745_v7, %v4746_v20  ;;  %v4754_v43 = vmax.f32 %v4752_v0, %v4753_v40  ;;  %v6422_v34 = vadd.f32 %v13642_v23, %v6184_v62  ;;  %v6423_v59 = vadd.f32 %v13642_v23, %v6187_v22 }
 0x653   :  { %v6548_v19 = vmax.f32 %v6420_v4, 0.0  ;;  %v6549_v16 = vmax.f32 %v6421_v14, 0.0  ;;  %v6080_v60 = vsel %vm5959_vm12, %v4733_v21, -inf  ;;  %v6081_v35 = vsel %vm5959_vm12, %v13806_v51, -inf }
 0x654   :  { %v6083_v42 = vsel %vm5959_vm12, %v4740_v37, -inf  ;;  %v6084_v46 = vsel %vm5959_vm12, %v13808_v55, -inf  ;;  %v6550_v32 = vmax.f32 %v6422_v34, 0.0  ;;  %v6551_v39 = vmax.f32 %v6423_v59, 0.0 }
 0x655   :  { %v6915_v10 = vrot.slane %v6549_v16, 7  ;;  %v6082_v50 = vmax.f32 %v6080_v60, %v6081_v35  ;;  %v6085_v44 = vmax.f32 %v6083_v42, %v6084_v46  ;;  %v6086_v41 = vsel %vm5959_vm12, %v4747_v61, -inf  ;;  %v7876_v16 = vld [vmem:[%s15085_s3 + $0x28] sm:$0xff]  ;;  %v7875_v60 = vld [vmem:[%s15085_s3 + $0x20] sm:$0xff] }
 0x656   :  { %v6087_v7 = vsel %vm5959_vm12, %v13816_v3, -inf  ;;  %v6089_v51 = vsel %vm5959_vm12, %v4754_v43, -inf  ;;  %v6917_v28 = vrot.slane %v6550_v32, 6  ;;  %v6919_v52 = vrot.slane %v6551_v39, 5  ;;  %v13911_v35 = vpop.permute.xlu0 %7790  ;;  %v7113_v42 = vpop.permute.xlu1 %7112  ;;  %7939 = vmatpush.msrb.mxu1 %v7876_v16 }
 0x657   :  { %v6916_v0 = vsel %vm15097_vm13, %v6915_v10, %v6548_v19  ;;  %v6088_v55 = vmax.f32 %v6086_v41, %v6087_v7  ;;  %v6090_v57 = vsel %vm5959_vm12, %v13818_v8, -inf  ;;  %v6388_v31 = vadd.f32 %v13642_v23, %v6082_v50  ;;  %v13896_v4 = vpop.permute.xlu2 %7792  ;;  %v3304_v10 = vld [vmem:[#allocation2 + $0x1e0] sm:$0xff]  ;;  %7160 = vst.msk [vmem:[#allocation4 + $0x8] sm:$0xff] %vm15098_vm5, %v7113_v42  ;;  %v7874_v7 = vld [vmem:[%s15085_s3 + $0x18] sm:$0xff] }
 0x658   :  { %v6389_v2 = vadd.f32 %v13642_v23, %v6085_v44  ;;  %vm7255_vm6 = vcmask 195712   ;;  %v6918_v13 = vsel %vm15096_vm14, %v6917_v28, %v6916_v0  ;;  %v6091_v25 = vmax.f32 %v6089_v51, %v6090_v57  ;;  %9373 = vmatmul.msk.f32.gmra.mxu3 %vm3312_vm10, %v3304_v10  ;;  %7940 = vmatpush.msrb.mxu1 %v7875_v60 }
 0x659   :  { %v6390_v3 = vadd.f32 %v13642_v23, %v6088_v55  ;;  %7256 = vst.msk [vmem:[#allocation4] sm:$0xff] %vm7255_vm6, %v13833_v33  ;;  %v13891_v29 = vsel %vm15095_vm15, %v6919_v52, %v6918_v13  ;;  %v6516_v9 = vmax.f32 %v6388_v31, 0.0  ;;  %v3941_v8 = vrot.slane %v3685_v11, 2  ;;  %v7873_v31 = vld [vmem:[%s15085_s3 + $0x10] sm:$0xff] }
 0x65a   :  { %v6517_v36 = vmax.f32 %v6389_v2, 0.0  ;;  %7353 = vst.msk [vmem:[#allocation4] sm:$0xff] %vm15099_vm7, %v13835_v63  ;;  %v6391_v20 = vadd.f32 %v13642_v23, %v6091_v25  ;;  %v3942_v62 = vrot.slane %v3685_v11, 4  ;;  %v3943_v22 = vrot.slane %v3685_v11, 6  ;;  %v3595_v63 = vpop.f32.mrf.mxu1  ;;  %7941 = vmatpush.msrb.mxu1 %v7874_v7 }
 0x65b   :  { %v6518_v40 = vmax.f32 %v6390_v3, 0.0  ;;  %v5651_v33 = vsel %vm4166_vm11, %v3685_v11, -inf  ;;  %v5658_v21 = vsel %vm4166_vm11, %v3941_v8, -inf  ;;  %vm7449_vm8 = vcmask 326912   ;;  %7257 = vst.msk [vmem:[#allocation4 + $0x8] sm:$0xff] %vm7255_vm6, %v13831_v49 }
 0x65c   :  { %v6859_v14 = vrot.slane %v6517_v36, 7  ;;  %v6519_v37 = vmax.f32 %v6391_v20, 0.0  ;;  %v5652_v43 = vrot.slane %v5651_v33, 4  ;;  %v5659_v34 = vrot.slane %v5658_v21, 4  ;;  %7450 = vst.msk [vmem:[#allocation4] sm:$0xff] %vm7449_vm8, %v13785_v27  ;;  %v7872_v20 = vld [vmem:[%s15085_s3 + $0x8] sm:$0xff]  ;;  %7942 = vmatpush.msrb.mxu1 %v7873_v31 }
 0x65d   :  { %v6861_v61 = vrot.slane %v6518_v40, 6  ;;  %v5665_v59 = vsel %vm4166_vm11, %v3942_v62, -inf  ;;  %v5672_v19 = vsel %vm4166_vm11, %v3943_v22, -inf  ;;  %vm7546_vm9 = vcmask 392512  }
 0x65e   :  { %v6860_v23 = vsel %vm15097_vm13, %v6859_v14, %v6516_v9  ;;  %v6863_v46 = vrot.slane %v6519_v37, 5  ;;  %v5653_v32 = vmax.f32 %v5651_v33, %v5652_v43  ;;  %v5660_v39 = vmax.f32 %v5658_v21, %v5659_v34  ;;  %7547 = vst.msk [vmem:[#allocation4] sm:$0xff] %vm7546_vm9, %v7499_v54  ;;  %v7871_v43 = vld [vmem:[%s15085_s3] sm:$0xff]  ;;  %v7404_v34 = vpop.permute.xlu1 %7403  ;;  %7943 = vmatpush.msrb.mxu1 %v7872_v20 }
 0x65f   :  { %v6862_v27 = vsel %vm15096_vm14, %v6861_v61, %v6860_v23  ;;  %v5666_v50 = vrot.slane %v5665_v59, 4  ;;  %v5673_v44 = vrot.slane %v5672_v19, 4  ;;  %vm7644_vm4 = vcmask 458112   ;;  %v13936_v14 = vpop.permute.xlu2 %7308 }
 0x660   :  { %v3851_v41 = vrot.slane %v3595_v63, 2  ;;  %v13921_v51 = vsel %vm15095_vm15, %v6863_v46, %v6862_v27  ;;  %v5654_v0 = vrot.slane %v5653_v32, 2  ;;  %v5661_v28 = vrot.slane %v5660_v39, 2  ;;  %7645 = vst.msk [vmem:[#allocation4] sm:$0xff] %vm7644_vm4, %v13875_v30  ;;  %7944 = vmatpush.msrb.mxu1 %v7871_v43 }
 0x661   :  { %v3852_v54 = vrot.slane %v3595_v63, 4  ;;  %v5667_v52 = vmax.f32 %v5665_v59, %v5666_v50  ;;  %v5674_v55 = vmax.f32 %v5672_v19, %v5673_v44  ;;  %v3853_v11 = vrot.slane %v3595_v63, 6 }
 0x662   :  { %v4811_v57 = vsel %vm4166_vm11, %v3595_v63, -inf  ;;  %v5655_v2 = vmax.f32 %v5653_v32, %v5654_v0  ;;  %v5662_v13 = vmax.f32 %v5660_v39, %v5661_v28  ;;  %v4818_v3 = vsel %vm4166_vm11, %v3851_v41, -inf  ;;  %v7307_v63 = vpop.permute.xlu0 %7306  ;;  %v3643_v28 = vpop.f32.mrf.mxu2 }
 0x663   :  { %v4812_v25 = vrot.slane %v4811_v57, 4  ;;  %v5668_v30 = vrot.slane %v5667_v52, 2  ;;  %v5675_v9 = vrot.slane %v5674_v55, 2  ;;  %v4819_v36 = vrot.slane %v4818_v3, 4  ;;  %7354 = vst.msk [vmem:[#allocation4 + $0x8] sm:$0xff] %vm15099_vm7, %v7307_v63 }
 0x664   :  { %v4825_v8 = vsel %vm4166_vm11, %v3852_v54, -inf  ;;  %v5656_v49 = vrot.slane %v5655_v2, 1  ;;  %v5663_v40 = vrot.slane %v5662_v13, 1  ;;  %v4832_v61 = vsel %vm4166_vm11, %v3853_v11, -inf  ;;  %7451 = vst.msk [vmem:[#allocation4 + $0x8] sm:$0xff] %vm7449_vm8, %v7404_v34 }
 0x665   :  { %v4813_v62 = vmax.f32 %v4811_v57, %v4812_v25  ;;  %v4826_v22 = vrot.slane %v4825_v8, 4  ;;  %v5669_v33 = vmax.f32 %v5667_v52, %v5668_v30  ;;  %v5676_v21 = vmax.f32 %v5674_v55, %v5675_v9  ;;  %7548 = vst.msk [vmem:[#allocation4 + $0x8] sm:$0xff] %vm7546_vm9, %v13861_v53  ;;  %v13976_v63 = vld [vmem:[%s15084_s2] ss:$0 sm:$0xff] }
 0x666   :  { %v4820_v37 = vmax.f32 %v4818_v3, %v4819_v36  ;;  %v5657_v23 = vmax.f32 %v5655_v2, %v5656_v49  ;;  %v5664_v59 = vmax.f32 %v5662_v13, %v5663_v40  ;;  %v4833_v46 = vrot.slane %v4832_v61, 4 }
 0x667   :  { %v4814_v19 = vrot.slane %v4813_v62, 2  ;;  %v4827_v16 = vmax.f32 %v4825_v8, %v4826_v22  ;;  %v5670_v60 = vrot.slane %v5669_v33, 1  ;;  %v5677_v42 = vrot.slane %v5676_v21, 1  ;;  %v13967_v22 = vpop.permute.xlu2 %7600 }
 0x668   :  { %v4821_v27 = vrot.slane %v4820_v37, 2  ;;  %v13945_v32 = vsel %vm5959_vm12, %v5657_v23, -inf  ;;  %v13948_v39 = vsel %vm5959_vm12, %v5664_v59, -inf  ;;  %v4834_v0 = vmax.f32 %v4832_v61, %v4833_v46 }
 0x669   :  { %v4815_v10 = vmax.f32 %v4813_v62, %v4814_v19  ;;  %v4828_v50 = vrot.slane %v4827_v16, 2  ;;  %v5671_v44 = vmax.f32 %v5669_v33, %v5670_v60  ;;  %v5678_v41 = vmax.f32 %v5676_v21, %v5677_v42 }
 0x66a   :  { %v4822_v7 = vmax.f32 %v4820_v37, %v4821_v27  ;;  %vm7741_vm15 = vcmask 523712   ;;  %vm7838_vm14 = vcmask 589312   ;;  %v4835_v31 = vrot.slane %v4834_v0, 2 }
 0x66b   :  { %v4816_v54 = vrot.slane %v4815_v10, 1  ;;  %v4829_v52 = vmax.f32 %v4827_v16, %v4828_v50  ;;  %v13953_v55 = vsel %vm5959_vm12, %v5671_v44, -inf  ;;  %v13956_v11 = vsel %vm5959_vm12, %v5678_v41, -inf  ;;  %7742 = vst.msk [vmem:[#allocation4] sm:$0xff] %vm7741_vm15, %v13795_v12 }
 0x66c   :  { %v4823_v57 = vrot.slane %v4822_v7, 1  ;;  %7839 = vst.msk [vmem:[#allocation4] sm:$0xff] %vm7838_vm14, %v13911_v35  ;;  %vm7880_vm13 = vcmask 588800   ;;  %v3899_v13 = vrot.slane %v3643_v28, 2  ;;  %v4836_v3 = vmax.f32 %v4834_v0, %v4835_v31 }
 0x66d   :  { %v4817_v53 = vmax.f32 %v4815_v10, %v4816_v54  ;;  %v4830_v2 = vrot.slane %v4829_v52, 1  ;;  %v3900_v30 = vrot.slane %v3643_v28, 4  ;;  %v3901_v9 = vrot.slane %v3643_v28, 6 }
 0x66e   :  { %v4824_v25 = vmax.f32 %v4822_v7, %v4823_v57  ;;  %v5259_v20 = vsel %vm4166_vm11, %v3643_v28, -inf  ;;  %v5266_v49 = vsel %vm4166_vm11, %v3899_v13, -inf  ;;  %v4837_v40 = vrot.slane %v4836_v3, 1 }
 0x66f   :  { %v4831_v36 = vmax.f32 %v4829_v52, %v4830_v2  ;;  %v6093_v8 = vsel %vm5959_vm12, %v4817_v53, -inf  ;;  %v5260_v35 = vrot.slane %v5259_v20, 4  ;;  %v5267_v37 = vrot.slane %v5266_v49, 4  ;;  %v3688_v2 = vpop.f32.mrf.mxu3 }
 0x670   :  { %v6094_v12 = vmax.f32 %v13729_v47, %v6093_v8  ;;  %v6096_v62 = vsel %vm5959_vm12, %v4824_v25, -inf  ;;  %v5273_v61 = vsel %vm4166_vm11, %v3900_v30, -inf  ;;  %v4838_v43 = vmax.f32 %v4836_v3, %v4837_v40  ;;  %v13988_v30 = vld [vmem:[#allocation3 + $0xe0] sm:$0xff]  ;;  %v7696_v40 = vpop.permute.xlu1 %7695 }
 0x671   :  { %v6097_v33 = vmax.f32 %v13732_v5, %v6096_v62  ;;  %v6099_v21 = vsel %vm5959_vm12, %v4831_v36, -inf  ;;  %v5261_v23 = vmax.f32 %v5259_v20, %v5260_v35  ;;  %v5268_v19 = vmax.f32 %v5266_v49, %v5267_v37  ;;  %v3305_v49 = vld [vmem:[#allocation2 + $0x1e8] sm:$0xff]  ;;  %7074 = vst.msk [vmem:[#allocation4 + $0x60] sm:$0xff] %vm5959_vm12, %v13988_v30 }
 0x672   :  { %v6100_v34 = vmax.f32 %v13735_v56, %v6099_v21  ;;  %v6392_v47 = vadd.f32 %v13976_v63, %v6094_v12  ;;  %v5274_v5 = vrot.slane %v5273_v61, 4  ;;  %v5280_v16 = vsel %vm4166_vm11, %v3901_v9, -inf  ;;  %v7599_v12 = vpop.permute.xlu0 %7598  ;;  %9374 = vmatmul.msk.f32.gmra.mxu3 %vm3312_vm10, %v3305_v49  ;;  %v7117_v21 = vpop.permute.xlu2 %7116 }
 0x673   :  { %v6393_v59 = vadd.f32 %v13976_v63, %v6097_v33  ;;  %v6102_v60 = vsel %vm5959_vm12, %v4838_v43, -inf  ;;  %v7855_v56 = vld [vmem:[#allocation4] sm:$0xff]  ;;  %v5262_v46 = vrot.slane %v5261_v23, 2  ;;  %v5269_v44 = vrot.slane %v5268_v19, 2  ;;  %7646 = vst.msk [vmem:[#allocation4 + $0x8] sm:$0xff] %vm7644_vm4, %v7599_v12 }
 0x674   :  { %v6394_v42 = vadd.f32 %v13976_v63, %v6100_v34  ;;  %v6520_v27 = vmax.f32 %v6392_v47, 0.0  ;;  %v6103_v10 = vmax.f32 %v13738_v6, %v6102_v60  ;;  %9377 = vmatmul.msk.f32.vlgmr.msrb.gmra.mxu1 %vm7880_vm13, %v7855_v56  ;;  %v5275_v41 = vmax.f32 %v5273_v61, %v5274_v5  ;;  %7743 = vst.msk [vmem:[#allocation4 + $0x8] sm:$0xff] %vm7741_vm15, %v7696_v40 }
 0x675   :  { %v6521_v50 = vmax.f32 %v6393_v59, 0.0  ;;  %v5263_v28 = vmax.f32 %v5261_v23, %v5262_v46  ;;  %v5281_v54 = vrot.slane %v5280_v16, 4  ;;  %v5270_v31 = vmax.f32 %v5268_v19, %v5269_v44  ;;  %7840 = vst.msk [vmem:[#allocation4 + $0x8] sm:$0xff] %vm7838_vm14, %v13896_v4 }
 0x676   :  { %v6522_v7 = vmax.f32 %v6394_v42, 0.0  ;;  %v6865_v0 = vrot.slane %v6520_v27, 4  ;;  %v6395_v52 = vadd.f32 %v13976_v63, %v6103_v10  ;;  %v5276_v53 = vrot.slane %v5275_v41, 2  ;;  %7162 = vst.msk [vmem:[#allocation4 + $0x18] sm:$0xff] %vm15098_vm5, %v7117_v21 }
 0x677   :  { %v6867_v57 = vrot.slane %v6521_v50, 3  ;;  %v5264_v6 = vrot.slane %v5263_v28, 1  ;;  %v5282_v3 = vmax.f32 %v5280_v16, %v5281_v54  ;;  %v5271_v8 = vrot.slane %v5270_v31, 1 }
 0x678   :  { %v6866_v13 = vsel %vm6792_vm0, %v6865_v0, %v13921_v51  ;;  %v6869_v25 = vrot.slane %v6522_v7, 2  ;;  %v6523_v9 = vmax.f32 %v6395_v52, 0.0  ;;  %v5277_v20 = vmax.f32 %v5275_v41, %v5276_v53  ;;  %v7212_v53 = vpop.permute.xlu1 %7211 }
 0x679   :  { %v6868_v36 = vsel %vm6795_vm1, %v6867_v57, %v6866_v13  ;;  %v5265_v35 = vmax.f32 %v5263_v28, %v5264_v6  ;;  %v5283_v51 = vrot.slane %v5282_v3, 2  ;;  %v3944_v33 = vrot.slane %v3688_v2, 2 }
 0x67a   :  { %v6870_v62 = vsel %vm6798_vm2, %v6869_v25, %v6868_v36  ;;  %v6871_v37 = vrot.slane %v6523_v9, 1  ;;  %v5272_v61 = vmax.f32 %v5270_v31, %v5271_v8  ;;  %v5278_v43 = vrot.slane %v5277_v20, 1 }
 0x67b   :  { %v3945_v34 = vrot.slane %v3688_v2, 4  ;;  %v5284_v47 = vmax.f32 %v5282_v3, %v5283_v51  ;;  %v6189_v23 = vsel %vm5959_vm12, %v5265_v35, -inf  ;;  %v3946_v59 = vrot.slane %v3688_v2, 6  ;;  %v3691_v35 = vpop.f32.mrf.mxu3 }
 0x67c   :  { %v5679_v19 = vsel %vm4166_vm11, %v3688_v2, -inf  ;;  %v6872_v5 = vsel %vm15100_vm3, %v6871_v37, %v6870_v62  ;;  %v5279_v16 = vmax.f32 %v5277_v20, %v5278_v43  ;;  %v6190_v60 = vmax.f32 %v13765_v15, %v6189_v23  ;;  %v3306_v15 = vld [vmem:[#allocation2 + $0x1f0] sm:$0xff]  ;;  %v7115_v2 = vpop.permute.xlu0 %7114  ;;  %v7856_v20 = vld [vmem:[#allocation4 + $0x8] sm:$0xff] }
 0x67d   :  { %v6192_v42 = vsel %vm5959_vm12, %v5272_v61, -inf  ;;  %7035 = vst.msk [vmem:[#allocation3 + $0x61] sm:$0xff] %vm5959_vm12, %v6872_v5  ;;  %v5285_v27 = vrot.slane %v5284_v47, 1  ;;  %v5680_v46 = vrot.slane %v5679_v19, 4  ;;  %v5686_v10 = vsel %vm4166_vm11, %v3944_v33, -inf  ;;  %9375 = vmatmul.msk.f32.gmra.mxu3 %vm3312_vm10, %v3306_v15  ;;  %9378 = vmatmul.msk.f32.gmra.mxu1 %vm7880_vm13, %v7856_v20 }
 0x67e   :  { %v6193_v56 = vmax.f32 %v13769_v24, %v6192_v42  ;;  %v6195_v50 = vsel %vm5959_vm12, %v5279_v16, -inf  ;;  %v6424_v4 = vadd.f32 %v13976_v63, %v6190_v60  ;;  %v5687_v44 = vrot.slane %v5686_v10, 4  ;;  %7161 = vst.msk [vmem:[#allocation4 + $0x10] sm:$0xff] %vm15098_vm5, %v7115_v2  ;;  %v3307_v16 = vld [vmem:[#allocation2 + $0x1f8] sm:$0xff] }
 0x67f   :  { %v5693_v41 = vsel %vm4166_vm11, %v3945_v34, -inf  ;;  %v5286_v7 = vmax.f32 %v5284_v47, %v5285_v27  ;;  %v6196_v0 = vmax.f32 %v13776_v45, %v6195_v50  ;;  %v5681_v54 = vmax.f32 %v5679_v19, %v5680_v46  ;;  %7258 = vst.msk [vmem:[#allocation4 + $0x10] sm:$0xff] %vm7255_vm6, %v7212_v53 }
 0x680   :  { %v6425_v28 = vadd.f32 %v13976_v63, %v6193_v56  ;;  %v6552_v52 = vmax.f32 %v6424_v4, 0.0  ;;  %v5688_v57 = vmax.f32 %v5686_v10, %v5687_v44  ;;  %v5694_v24 = vrot.slane %v5693_v41, 4  ;;  %7355 = vst.msk [vmem:[#allocation4 + $0x10] sm:$0xff] %vm15099_vm7, %v13936_v14  ;;  %v7503_v44 = vpop.permute.xlu1 %7502 }
 0x681   :  { %v5700_v31 = vsel %vm4166_vm11, %v3946_v59, -inf  ;;  %v6198_v13 = vsel %vm5959_vm12, %v5286_v7, -inf  ;;  %v6426_v25 = vadd.f32 %v13976_v63, %v6196_v0  ;;  %v5682_v3 = vrot.slane %v5681_v54, 2 }
 0x682   :  { %v6553_v6 = vmax.f32 %v6425_v28, 0.0  ;;  %v6199_v45 = vmax.f32 %v13779_v1, %v6198_v13  ;;  %v6921_v9 = vrot.slane %v6552_v52, 4  ;;  %v5689_v36 = vrot.slane %v5688_v57, 2 }
 0x683   :  { %v5695_v8 = vmax.f32 %v5693_v41, %v5694_v24  ;;  %v6554_v49 = vmax.f32 %v6426_v25, 0.0  ;;  %v5683_v12 = vmax.f32 %v5681_v54, %v5682_v3  ;;  %v5701_v62 = vrot.slane %v5700_v31, 4 }
 0x684   :  { %v6923_v40 = vrot.slane %v6553_v6, 3  ;;  %v6427_v51 = vadd.f32 %v13976_v63, %v6199_v45  ;;  %v6922_v1 = vsel %vm6792_vm0, %v6921_v9, %v13891_v29  ;;  %v5690_v33 = vmax.f32 %v5688_v57, %v5689_v36  ;;  %v14027_v47 = vld [vmem:[#allocation3 + $0x62] sm:$0xff]  ;;  %v7406_v41 = vpop.permute.xlu0 %7405 }
 0x685   :  { %v5696_v21 = vrot.slane %v5695_v8, 2  ;;  %v6925_v61 = vrot.slane %v6554_v49, 2  ;;  %v5684_v43 = vrot.slane %v5683_v12, 1  ;;  %v5702_v34 = vmax.f32 %v5700_v31, %v5701_v62  ;;  %v14029_v23 = vld [vmem:[#allocation3 + $0x61] sm:$0xff]  ;;  %7798 = vrot.lane.b32.xlu2 %v14027_v47, %s9478_s27  ;;  %9376 = vmatmul.msk.f32.gmra.mxu3 %vm3312_vm10, %v3307_v16  ;;  %7452 = vst.msk [vmem:[#allocation4 + $0x10] sm:$0xff] %vm7449_vm8, %v7406_v41  ;;  %v14076_v41 = vld [vmem:[#allocation3 + $0x70] sm:$0xff] }
 0x686   :  { %v6924_v37 = vsel %vm6795_vm1, %v6923_v40, %v6922_v1  ;;  %v6555_v14 = vmax.f32 %v6427_v51, 0.0  ;;  %v5691_v59 = vrot.slane %v5690_v33, 1  ;;  %v3947_v5 = vrot.slane %v3691_v35, 2  ;;  %7701 = vrot.lane.b32.xlu1 %v14029_v23, %s9475_s23  ;;  %v7568_v29 = vld [vmem:[#allocation3 + $0x60] sm:$0xff]  ;;  %7549 = vst.msk [vmem:[#allocation4 + $0x10] sm:$0xff] %vm7546_vm9, %v7503_v44 }
 0x687   :  { %v5697_v19 = vmax.f32 %v5695_v8, %v5696_v21  ;;  %v6926_v60 = vsel %vm6798_vm2, %v6925_v61, %v6924_v37  ;;  %v5685_v42 = vmax.f32 %v5683_v12, %v5684_v43  ;;  %v5703_v27 = vrot.slane %v5702_v34, 2  ;;  %7604 = vrot.lane.b32.xlu0 %v7568_v29, %s9476_s24  ;;  %7647 = vst.msk [vmem:[#allocation4 + $0x10] sm:$0xff] %vm7644_vm4, %v13967_v22 }
 0x688   :  { %v3948_v56 = vrot.slane %v3691_v35, 4  ;;  %v6927_v46 = vrot.slane %v6555_v14, 1  ;;  %v5692_v10 = vmax.f32 %v5690_v33, %v5691_v59  ;;  %v3949_v4 = vrot.slane %v3691_v35, 6  ;;  %v7795_v37 = vpop.permute.xlu1 %7794 }
 0x689   :  { %v5698_v50 = vrot.slane %v5697_v19, 1  ;;  %v5704_v15 = vmax.f32 %v5702_v34, %v5703_v27  ;;  %v6273_v7 = vsel %vm5959_vm12, %v5685_v42, -inf  ;;  %v5707_v0 = vsel %vm4166_vm11, %v3691_v35, -inf }
 0x68a   :  { %v5714_v28 = vsel %vm4166_vm11, %v3947_v5, -inf  ;;  %v6928_v54 = vsel %vm15100_vm3, %v6927_v46, %v6926_v60  ;;  %v6274_v57 = vmax.f32 %v13793_v48, %v6273_v7  ;;  %v6276_v24 = vsel %vm5959_vm12, %v5692_v10, -inf }
 0x68b   :  { %v5699_v52 = vmax.f32 %v5697_v19, %v5698_v50  ;;  %7039 = vst.msk [vmem:[#allocation3 + $0xc1] sm:$0xff] %vm5959_vm12, %v6928_v54  ;;  %v5705_v31 = vrot.slane %v5704_v15, 1  ;;  %v6277_v53 = vmax.f32 %v13798_v17, %v6276_v24  ;;  %v5708_v2 = vrot.slane %v5707_v0, 4 }
 0x68c   :  { %v5715_v13 = vrot.slane %v5714_v28, 4  ;;  %v6452_v6 = vadd.f32 %v13976_v63, %v6274_v57  ;;  %v5721_v3 = vsel %vm4166_vm11, %v3948_v56, -inf  ;;  %v5728_v45 = vsel %vm4166_vm11, %v3949_v4, -inf }
 0x68d   :  { %v6279_v25 = vsel %vm5959_vm12, %v5699_v52, -inf  ;;  %v5706_v48 = vmax.f32 %v5704_v15, %v5705_v31  ;;  %v6453_v36 = vadd.f32 %v13976_v63, %v6277_v53  ;;  %v5709_v8 = vmax.f32 %v5707_v0, %v5708_v2  ;;  %7314 = vrot.lane.b32.xlu2 %v7568_v29, %s9469_s25 }
 0x68e   :  { %v6280_v9 = vmax.f32 %v13801_v18, %v6279_v25  ;;  %v6580_v17 = vmax.f32 %v6452_v6, 0.0  ;;  %v5716_v20 = vmax.f32 %v5714_v28, %v5715_v13  ;;  %v5722_v49 = vrot.slane %v5721_v3, 4  ;;  %7217 = vrot.lane.b32.xlu1 %v13812_v26, %s9474_s1  ;;  %v14063_v18 = vpop.f32.mrf.mxu2  ;;  %v7698_v26 = vpop.permute.xlu0 %7697 }
 0x68f   :  { %v5729_v40 = vrot.slane %v5728_v45, 4  ;;  %v6282_v12 = vsel %vm5959_vm12, %v5706_v48, -inf  ;;  %v6581_v22 = vmax.f32 %v6453_v36, 0.0  ;;  %v5710_v35 = vrot.slane %v5709_v8, 2  ;;  %7120 = vrot.lane.b32.xlu0 %v13814_v38, %s9472_s21  ;;  %7744 = vst.msk [vmem:[#allocation4 + $0x10] sm:$0xff] %vm7741_vm15, %v7698_v26 }
 0x690   :  { %v6454_v62 = vadd.f32 %v13976_v63, %v6280_v9  ;;  %v6283_v51 = vmax.f32 %v13804_v58, %v6282_v12  ;;  %v5717_v1 = vrot.slane %v5716_v20, 2  ;;  %v5723_v33 = vmax.f32 %v5721_v3, %v5722_v49  ;;  %7841 = vst.msk [vmem:[#allocation4 + $0x10] sm:$0xff] %vm7838_vm14, %v7795_v37  ;;  %v7311_v6 = vpop.permute.xlu1 %7310 }
 0x691   :  { %v5730_v21 = vmax.f32 %v5728_v45, %v5729_v40  ;;  %v6971_v43 = vrot.slane %v6581_v22, 7  ;;  %v5711_v34 = vmax.f32 %v5709_v8, %v5710_v35  ;;  %v3902_v14 = vrot.slane %v14063_v18, 2  ;;  %v7050_v8 = vld [vmem:[#allocation3 + $0x40] sm:$0xff] }
 0x692   :  { %v6582_v61 = vmax.f32 %v6454_v62, 0.0  ;;  %v6455_v59 = vadd.f32 %v13976_v63, %v6283_v51  ;;  %v5718_v19 = vmax.f32 %v5716_v20, %v5717_v1  ;;  %v5724_v38 = vrot.slane %v5723_v33, 2  ;;  %7066 = vst.msk [vmem:[#allocation4 + $0x20] sm:$0xff] %vm5959_vm12, %v7050_v8 }
 0x693   :  { %v5731_v5 = vrot.slane %v5730_v21, 2  ;;  %vm15107_vm10 = vcmask 1041409   ;;  %v5712_v29 = vrot.slane %v5711_v34, 1  ;;  %v3903_v60 = vrot.slane %v14063_v18, 4 }
 0x694   :  { %v6972_v58 = vsel %vm15107_vm10, %v6971_v43, %v6580_v17  ;;  %v6973_v16 = vrot.slane %v6582_v61, 6  ;;  %v6583_v42 = vmax.f32 %v6455_v59, 0.0  ;;  %v5719_v27 = vrot.slane %v5718_v19, 1  ;;  %v7408_v17 = vpop.permute.xlu2 %7407  ;;  %v14105_v61 = vld [vmem:[#allocation3 + $0x72] sm:$0xff] }
 0x695   :  { %v5725_v56 = vmax.f32 %v5723_v33, %v5724_v38  ;;  %v5732_v46 = vmax.f32 %v5730_v21, %v5731_v5  ;;  %vm15108_vm5 = vcmask 1042434   ;;  %v5713_v50 = vmax.f32 %v5711_v34, %v5712_v29  ;;  %7606 = vrot.lane.b32.xlu2 %v14076_v41, %s9476_s24  ;;  %v14109_v59 = vld [vmem:[#allocation3 + $0x71] sm:$0xff] }
 0x696   :  { %v6974_v10 = vsel %vm15108_vm5, %v6973_v16, %v6972_v58  ;;  %v3904_v4 = vrot.slane %v14063_v18, 6  ;;  %v5287_v44 = vsel %vm4166_vm11, %v14063_v18, -inf  ;;  %v6975_v15 = vrot.slane %v6583_v42, 5  ;;  %7508 = vrot.lane.b32.xlu1 %v14027_v47, %s9477_s26  ;;  %v7214_v25 = vpop.permute.xlu0 %7213  ;;  %v3649_v12 = vpop.f32.mrf.mxu2 }
 0x697   :  { %v5720_v7 = vmax.f32 %v5718_v19, %v5719_v27  ;;  %v5726_v0 = vrot.slane %v5725_v56, 1  ;;  %v5733_v28 = vrot.slane %v5732_v46, 1  ;;  %v6285_v54 = vsel %vm5959_vm12, %v5713_v50, -inf  ;;  %7411 = vrot.lane.b32.xlu0 %v14029_v23, %s9473_s22  ;;  %7259 = vst.msk [vmem:[#allocation4 + $0x18] sm:$0xff] %vm7255_vm6, %v7214_v25  ;;  %v7857_v36 = vld [vmem:[#allocation4 + $0x10] sm:$0xff] }
 0x698   :  { %v5288_v52 = vrot.slane %v5287_v44, 4  ;;  %v5294_v57 = vsel %vm4166_vm11, %v3902_v14, -inf  ;;  %v5301_v24 = vsel %vm4166_vm11, %v3903_v60, -inf  ;;  %vm15109_vm5 = vcmask 1043459   ;;  %7356 = vst.msk [vmem:[#allocation4 + $0x18] sm:$0xff] %vm15099_vm7, %v7311_v6  ;;  %9379 = vmatmul.msk.f32.gmra.mxu1 %vm7880_vm13, %v7857_v36 }
 0x699   :  { %v6976_v31 = vsel %vm15109_vm5, %v6975_v15, %v6974_v10  ;;  %v5727_v53 = vmax.f32 %v5725_v56, %v5726_v0  ;;  %v5734_v2 = vmax.f32 %v5732_v46, %v5733_v28  ;;  %v6286_v13 = vmax.f32 %v13945_v32, %v6285_v54  ;;  %7453 = vst.msk [vmem:[#allocation4 + $0x18] sm:$0xff] %vm7449_vm8, %v7408_v17 }
 0x69a   :  { %v6288_v3 = vsel %vm5959_vm12, %v5720_v7, -inf  ;;  %v5289_v45 = vmax.f32 %v5287_v44, %v5288_v52  ;;  %v5295_v48 = vrot.slane %v5294_v57, 4  ;;  %v5302_v9 = vrot.slane %v5301_v24, 4 }
 0x69b   :  { %v6289_v20 = vmax.f32 %v13948_v39, %v6288_v3  ;;  %v6291_v49 = vsel %vm5959_vm12, %v5727_v53, -inf  ;;  %v6294_v40 = vsel %vm5959_vm12, %v5734_v2, -inf  ;;  %v6456_v32 = vadd.f32 %v13976_v63, %v6286_v13 }
 0x69c   :  { %v6292_v62 = vmax.f32 %v13953_v55, %v6291_v49  ;;  %v6295_v22 = vmax.f32 %v13956_v11, %v6294_v40  ;;  %v5290_v35 = vrot.slane %v5289_v45, 2  ;;  %v5296_v18 = vmax.f32 %v5294_v57, %v5295_v48 }
 0x69d   :  { %v6457_v39 = vadd.f32 %v13976_v63, %v6289_v20  ;;  %v6584_v51 = vmax.f32 %v6456_v32, 0.0  ;;  %v5303_v1 = vmax.f32 %v5301_v24, %v5302_v9  ;;  %v5308_v33 = vsel %vm4166_vm11, %v3904_v4, -inf  ;;  %7122 = vrot.lane.b32.xlu2 %v14029_v23, %s9472_s21 }
 0x69e   :  { %v6458_v21 = vadd.f32 %v13976_v63, %v6292_v62  ;;  %v6459_v37 = vadd.f32 %v13976_v63, %v6295_v22  ;;  %v5291_v26 = vmax.f32 %v5289_v45, %v5290_v35  ;;  %v5297_v55 = vrot.slane %v5296_v18, 2  ;;  %7800 = vrot.lane.b32.xlu1 %v14105_v61, %s9478_s27  ;;  %v7505_v27 = vpop.permute.xlu0 %7504  ;;  %v3652_v24 = vpop.f32.mrf.mxu2 }
 0x69f   :  { %v6585_v11 = vmax.f32 %v6457_v39, 0.0  ;;  %v6977_v43 = vrot.slane %v6584_v51, 4  ;;  %v5304_v34 = vrot.slane %v5303_v1, 2  ;;  %v5309_v14 = vrot.slane %v5308_v33, 4  ;;  %7703 = vrot.lane.b32.xlu0 %v14109_v59, %s9475_s23  ;;  %7550 = vst.msk [vmem:[#allocation4 + $0x18] sm:$0xff] %vm7546_vm9, %v7505_v27 }
 0x6a0   :  { %v6586_v19 = vmax.f32 %v6458_v21, 0.0  ;;  %v6587_v38 = vmax.f32 %v6459_v37, 0.0  ;;  %v5292_v5 = vrot.slane %v5291_v26, 1  ;;  %v5298_v58 = vmax.f32 %v5296_v18, %v5297_v55 }
 0x6a1   :  { %v6978_v16 = vsel %vm6792_vm0, %v6977_v43, %v6976_v31  ;;  %v6979_v29 = vrot.slane %v6585_v11, 3  ;;  %v5305_v60 = vmax.f32 %v5303_v1, %v5304_v34  ;;  %v5310_v42 = vmax.f32 %v5308_v33, %v5309_v14 }
 0x6a2   :  { %v6981_v56 = vrot.slane %v6586_v19, 2  ;;  %v6983_v46 = vrot.slane %v6587_v38, 1  ;;  %v5293_v10 = vmax.f32 %v5291_v26, %v5292_v5  ;;  %v5299_v50 = vrot.slane %v5298_v58, 1  ;;  %v14141_v19 = vld [vmem:[#allocation3 + $0x80] sm:$0xff] }
 0x6a3   :  { %v6980_v23 = vsel %vm6795_vm1, %v6979_v29, %v6978_v16  ;;  %v5306_v4 = vrot.slane %v5305_v60, 1  ;;  %v5311_v44 = vrot.slane %v5310_v42, 2  ;;  %v3905_v15 = vrot.slane %v3649_v12, 2  ;;  %v14143_v38 = vld [vmem:[#allocation3 + $0x81] sm:$0xff] }
 0x6a4   :  { %v6982_v7 = vsel %vm6798_vm2, %v6981_v56, %v6980_v23  ;;  %v3906_v0 = vrot.slane %v3649_v12, 4  ;;  %v5300_v54 = vmax.f32 %v5298_v58, %v5299_v50  ;;  %v3907_v57 = vrot.slane %v3649_v12, 6 }
 0x6a5   :  { %v6984_v28 = vsel %vm15100_vm3, %v6983_v46, %v6982_v7  ;;  %v5312_v52 = vmax.f32 %v5310_v42, %v5311_v44  ;;  %v14122_v31 = vsel %vm5959_vm12, %v5293_v10, -inf  ;;  %v5315_v53 = vsel %vm4166_vm11, %v3649_v12, -inf  ;;  %7413 = vrot.lane.b32.xlu2 %v14109_v59, %s9473_s22 }
 0x6a6   :  { %7043 = vst.msk [vmem:[#allocation3 + $0x101] sm:$0xff] %vm5959_vm12, %v6984_v28  ;;  %v5322_v2 = vsel %vm4166_vm11, %v3905_v15, -inf  ;;  %v5329_v13 = vsel %vm4166_vm11, %v3906_v0, -inf  ;;  %v5307_v25 = vmax.f32 %v5305_v60, %v5306_v4  ;;  %v5316_v3 = vrot.slane %v5315_v53, 4  ;;  %7316 = vrot.lane.b32.xlu1 %v14076_v41, %s9469_s25 }
 0x6a7   :  { %v5313_v6 = vrot.slane %v5312_v52, 1  ;;  %v5323_v45 = vrot.slane %v5322_v2, 4  ;;  %v5330_v48 = vrot.slane %v5329_v13, 4  ;;  %v5336_v9 = vsel %vm4166_vm11, %v3907_v57, -inf  ;;  %7219 = vrot.lane.b32.xlu0 %v14027_v47, %s9474_s1 }
 0x6a8   :  { %v3908_v36 = vrot.slane %v3652_v24, 2  ;;  %v3909_v8 = vrot.slane %v3652_v24, 4  ;;  %v14135_v17 = vsel %vm5959_vm12, %v5300_v54, -inf  ;;  %v5317_v20 = vmax.f32 %v5315_v53, %v5316_v3 }
 0x6a9   :  { %v5324_v49 = vmax.f32 %v5322_v2, %v5323_v45  ;;  %v5337_v40 = vrot.slane %v5336_v9, 4  ;;  %v5331_v32 = vmax.f32 %v5329_v13, %v5330_v48  ;;  %v3910_v12 = vrot.slane %v3652_v24, 6  ;;  %v3694_v13 = vpop.f32.mrf.mxu3 }
 0x6aa   :  { %v5343_v41 = vsel %vm4166_vm11, %v3652_v24, -inf  ;;  %v5350_v62 = vsel %vm4166_vm11, %v3908_v36, -inf  ;;  %v5314_v22 = vmax.f32 %v5312_v52, %v5313_v6  ;;  %v5318_v35 = vrot.slane %v5317_v20, 2 }
 0x6ab   :  { %v5325_v18 = vrot.slane %v5324_v49, 2  ;;  %v5338_v39 = vmax.f32 %v5336_v9, %v5337_v40  ;;  %v5332_v51 = vrot.slane %v5331_v32, 2  ;;  %v5344_v1 = vrot.slane %v5343_v41, 4 }
 0x6ac   :  { %v5351_v33 = vrot.slane %v5350_v62, 4  ;;  %v5357_v47 = vsel %vm4166_vm11, %v3909_v8, -inf  ;;  %v5319_v21 = vmax.f32 %v5317_v20, %v5318_v35  ;;  %v5364_v14 = vsel %vm4166_vm11, %v3910_v12, -inf  ;;  %v7764_v12 = vld [vmem:[#allocation3 + $0x82] sm:$0xff] }
 0x6ad   :  { %v5326_v37 = vmax.f32 %v5324_v49, %v5325_v18  ;;  %v5339_v26 = vrot.slane %v5338_v39, 2  ;;  %v5358_v55 = vrot.slane %v5357_v47, 4  ;;  %v5333_v11 = vmax.f32 %v5331_v32, %v5332_v51  ;;  %7705 = vrot.lane.b32.xlu2 %v14143_v38, %s9475_s23 }
 0x6ae   :  { %v5345_v43 = vmax.f32 %v5343_v41, %v5344_v1  ;;  %v5352_v34 = vmax.f32 %v5350_v62, %v5351_v33  ;;  %v5320_v5 = vrot.slane %v5319_v21, 1  ;;  %7608 = vrot.lane.b32.xlu1 %v14141_v19, %s9476_s24  ;;  %v5365_v56 = vrot.slane %v5364_v14, 4 }
 0x6af   :  { %v5327_v58 = vrot.slane %v5326_v37, 1  ;;  %v5340_v16 = vmax.f32 %v5338_v39, %v5339_v26  ;;  %v5359_v29 = vmax.f32 %v5357_v47, %v5358_v55  ;;  %v5334_v60 = vrot.slane %v5333_v11, 1  ;;  %7510 = vrot.lane.b32.xlu0 %v14105_v61, %s9477_s26 }
 0x6b0   :  { %v5346_v42 = vrot.slane %v5345_v43, 2  ;;  %v5353_v27 = vrot.slane %v5352_v34, 2  ;;  %v5321_v46 = vmax.f32 %v5319_v21, %v5320_v5  ;;  %v6206_v4 = vsel %vm5959_vm12, %v5307_v25, -inf }
 0x6b1   :  { %v5328_v10 = vmax.f32 %v5326_v37, %v5327_v58  ;;  %v5341_v50 = vrot.slane %v5340_v16, 1  ;;  %v5360_v23 = vrot.slane %v5359_v29, 2  ;;  %v5366_v7 = vmax.f32 %v5364_v14, %v5365_v56 }
 0x6b2   :  { %v5347_v44 = vmax.f32 %v5345_v43, %v5346_v42  ;;  %v5354_v15 = vmax.f32 %v5352_v34, %v5353_v27  ;;  %v6209_v0 = vsel %vm5959_vm12, %v5314_v22, -inf  ;;  %v14153_v28 = vmax.f32 %v5333_v11, %v5334_v60  ;;  %v3697_v27 = vpop.f32.mrf.mxu3 }
 0x6b3   :  { %v14155_v54 = vmax.f32 %v5340_v16, %v5341_v50  ;;  %v5361_v52 = vmax.f32 %v5359_v29, %v5360_v23  ;;  %v14158_v57 = vsel %vm5959_vm12, %v5321_v46, -inf  ;;  %v5367_v2 = vrot.slane %v5366_v7, 2 }
 0x6b4   :  { %v5348_v24 = vrot.slane %v5347_v44, 1  ;;  %v5355_v53 = vrot.slane %v5354_v15, 1  ;;  %v14161_v6 = vsel %vm5959_vm12, %v5328_v10, -inf  ;;  %v3950_v3 = vrot.slane %v3694_v13, 2 }
 0x6b5   :  { %v5362_v25 = vrot.slane %v5361_v52, 1  ;;  %v3951_v45 = vrot.slane %v3694_v13, 4  ;;  %v5368_v36 = vmax.f32 %v5366_v7, %v5367_v2  ;;  %v3952_v8 = vrot.slane %v3694_v13, 6  ;;  %7221 = vrot.lane.b32.xlu2 %v14105_v61, %s9474_s1 }
 0x6b6   :  { %v5349_v48 = vmax.f32 %v5347_v44, %v5348_v24  ;;  %v5356_v9 = vmax.f32 %v5354_v15, %v5355_v53  ;;  %v5735_v49 = vsel %vm4166_vm11, %v3694_v13, -inf  ;;  %v5742_v40 = vsel %vm4166_vm11, %v3950_v3, -inf  ;;  %7124 = vrot.lane.b32.xlu1 %v14109_v59, %s9472_s21 }
 0x6b7   :  { %v5363_v20 = vmax.f32 %v5361_v52, %v5362_v25  ;;  %v5749_v32 = vsel %vm4166_vm11, %v3951_v45, -inf  ;;  %v5369_v41 = vrot.slane %v5368_v36, 1  ;;  %v5736_v35 = vrot.slane %v5735_v49, 4  ;;  %7802 = vrot.lane.b32.xlu0 %v7764_v12, %s9478_s27 }
 0x6b8   :  { %v6201_v62 = vsel %vm5959_vm12, %v5349_v48, -inf  ;;  %v6204_v22 = vsel %vm5959_vm12, %v5356_v9, -inf  ;;  %v5743_v1 = vrot.slane %v5742_v40, 4  ;;  %v5750_v21 = vrot.slane %v5749_v32, 4 }
 0x6b9   :  { %v6202_v18 = vmax.f32 %v14122_v31, %v6201_v62  ;;  %v6205_v39 = vmax.f32 %v14135_v17, %v6204_v22  ;;  %v6207_v51 = vsel %vm5959_vm12, %v5363_v20, -inf  ;;  %v5370_v59 = vmax.f32 %v5368_v36, %v5369_v41  ;;  %v3655_v20 = vpop.f32.mrf.mxu2  ;;  %v14206_v22 = vld [vmem:[#allocation3 + $0xb0] sm:$0xff] }
 0x6ba   :  { %v6208_v33 = vmax.f32 %v6206_v4, %v6207_v51  ;;  %v5737_v47 = vmax.f32 %v5735_v49, %v5736_v35  ;;  %v5744_v26 = vmax.f32 %v5742_v40, %v5743_v1  ;;  %v5756_v55 = vsel %vm4166_vm11, %v3952_v8, -inf  ;;  %7071 = vst.msk [vmem:[#allocation4 + $0x48] sm:$0xff] %vm5959_vm12, %v14206_v22 }
 0x6bb   :  { %v6428_v61 = vadd.f32 %v13976_v63, %v6202_v18  ;;  %v6429_v37 = vadd.f32 %v13976_v63, %v6205_v39  ;;  %v6210_v11 = vsel %vm5959_vm12, %v5370_v59, -inf  ;;  %v5751_v17 = vmax.f32 %v5749_v32, %v5750_v21 }
 0x6bc   :  { %v6430_v31 = vadd.f32 %v13976_v63, %v6208_v33  ;;  %v5738_v43 = vrot.slane %v5737_v47, 2  ;;  %v6211_v34 = vmax.f32 %v6209_v0, %v6210_v11  ;;  %v5745_v58 = vrot.slane %v5744_v26, 2 }
 0x6bd   :  { %v6556_v14 = vmax.f32 %v6428_v61, 0.0  ;;  %v6557_v5 = vmax.f32 %v6429_v37, 0.0  ;;  %v5752_v60 = vrot.slane %v5751_v17, 2  ;;  %v5757_v42 = vrot.slane %v5756_v55, 4  ;;  %7512 = vrot.lane.b32.xlu2 %v7764_v12, %s9477_s26 }
 0x6be   :  { %v6558_v16 = vmax.f32 %v6430_v31, 0.0  ;;  %v5739_v29 = vmax.f32 %v5737_v47, %v5738_v43  ;;  %v6431_v56 = vadd.f32 %v13976_v63, %v6211_v34  ;;  %v5746_v10 = vmax.f32 %v5744_v26, %v5745_v58  ;;  %7415 = vrot.lane.b32.xlu1 %v14143_v38, %s9473_s22 }
 0x6bf   :  { %v6929_v46 = vrot.slane %v6557_v5, 7  ;;  %v3953_v50 = vrot.slane %v3697_v27, 2  ;;  %v5753_v44 = vmax.f32 %v5751_v17, %v5752_v60  ;;  %v5758_v15 = vmax.f32 %v5756_v55, %v5757_v42  ;;  %7318 = vrot.lane.b32.xlu0 %v14141_v19, %s9469_s25 }
 0x6c0   :  { %v6931_v23 = vrot.slane %v6558_v16, 6  ;;  %v5740_v4 = vrot.slane %v5739_v29, 1  ;;  %v6559_v7 = vmax.f32 %v6431_v56, 0.0  ;;  %v5747_v52 = vrot.slane %v5746_v10, 1 }
 0x6c1   :  { %v6930_v0 = vsel %vm15107_vm10, %v6929_v46, %v6556_v14  ;;  %v3954_v24 = vrot.slane %v3697_v27, 4  ;;  %v14190_v53 = vsel %vm5959_vm12, %v14153_v28, -inf  ;;  %v5754_v38 = vrot.slane %v5753_v44, 1 }
 0x6c2   :  { %v5741_v2 = vmax.f32 %v5739_v29, %v5740_v4  ;;  %v5759_v13 = vrot.slane %v5758_v15, 2  ;;  %v14194_v25 = vsel %vm5959_vm12, %v14155_v54, -inf  ;;  %vm15110_vm5 = vcmask 1042434  }
 0x6c3   :  { %v6932_v3 = vsel %vm15110_vm5, %v6931_v23, %v6930_v0  ;;  %v3955_v45 = vrot.slane %v3697_v27, 6  ;;  %v5763_v19 = vsel %vm4166_vm11, %v3697_v27, -inf  ;;  %v6933_v48 = vrot.slane %v6559_v7, 5 }
 0x6c4   :  { %v5748_v9 = vmax.f32 %v5746_v10, %v5747_v52  ;;  %v5760_v36 = vmax.f32 %v5758_v15, %v5759_v13  ;;  %v5764_v8 = vrot.slane %v5763_v19, 4  ;;  %v5755_v49 = vmax.f32 %v5753_v44, %v5754_v38  ;;  %v3700_v52 = vpop.f32.mrf.mxu3 }
 0x6c5   :  { %v14199_v28 = vsel %vm5959_vm12, %v5741_v2, -inf  ;;  %v5770_v40 = vsel %vm4166_vm11, %v3953_v50, -inf  ;;  %v5777_v32 = vsel %vm4166_vm11, %v3954_v24, -inf  ;;  %vm15111_vm10 = vcmask 1043459  }
 0x6c6   :  { %v14204_v54 = vsel %vm15111_vm10, %v6933_v48, %v6932_v3  ;;  %v5761_v12 = vrot.slane %v5760_v36, 1  ;;  %v5765_v41 = vmax.f32 %v5763_v19, %v5764_v8  ;;  %v5771_v62 = vrot.slane %v5770_v40, 4 }
 0x6c7   :  { %v5778_v35 = vrot.slane %v5777_v32, 4  ;;  %v5784_v18 = vsel %vm4166_vm11, %v3955_v45, -inf  ;;  %v3911_v39 = vrot.slane %v3655_v20, 2  ;;  %v3912_v51 = vrot.slane %v3655_v20, 4 }
 0x6c8   :  { %v14212_v1 = vsel %vm5959_vm12, %v5748_v9, -inf  ;;  %v5766_v59 = vrot.slane %v5765_v41, 2  ;;  %v5772_v33 = vmax.f32 %v5770_v40, %v5771_v62  ;;  %v5785_v47 = vrot.slane %v5784_v18, 4 }
 0x6c9   :  { %v5779_v21 = vmax.f32 %v5777_v32, %v5778_v35  ;;  %v3913_v61 = vrot.slane %v3655_v20, 6  ;;  %v5371_v37 = vsel %vm4166_vm11, %v3655_v20, -inf  ;;  %v5378_v26 = vsel %vm4166_vm11, %v3911_v39, -inf }
 0x6ca   :  { %v5762_v55 = vmax.f32 %v5760_v36, %v5761_v12  ;;  %v5767_v11 = vmax.f32 %v5765_v41, %v5766_v59  ;;  %v5773_v31 = vrot.slane %v5772_v33, 2  ;;  %v5786_v43 = vmax.f32 %v5784_v18, %v5785_v47  ;;  %v14235_v47 = vpop.permute.xlu2 %7699 }
 0x6cb   :  { %v5780_v17 = vrot.slane %v5779_v21, 2  ;;  %v5372_v34 = vrot.slane %v5371_v37, 4  ;;  %v5379_v14 = vrot.slane %v5378_v26, 4  ;;  %v5385_v5 = vsel %vm4166_vm11, %v3912_v51, -inf }
 0x6cc   :  { %v5768_v58 = vrot.slane %v5767_v11, 1  ;;  %v5774_v16 = vmax.f32 %v5772_v33, %v5773_v31  ;;  %v5787_v29 = vrot.slane %v5786_v43, 2  ;;  %v5386_v60 = vrot.slane %v5385_v5, 4 }
 0x6cd   :  { %v5781_v42 = vmax.f32 %v5779_v21, %v5780_v17  ;;  %v5373_v27 = vmax.f32 %v5371_v37, %v5372_v34  ;;  %v5380_v56 = vmax.f32 %v5378_v26, %v5379_v14  ;;  %v5392_v46 = vsel %vm4166_vm11, %v3913_v61, -inf }
 0x6ce   :  { %v5769_v10 = vmax.f32 %v5767_v11, %v5768_v58  ;;  %v5775_v50 = vrot.slane %v5774_v16, 1  ;;  %v5788_v23 = vmax.f32 %v5786_v43, %v5787_v29  ;;  %v5387_v4 = vmax.f32 %v5385_v5, %v5386_v60  ;;  %v14244_v58 = vld [vmem:[#allocation3 + $0xf0] sm:$0xff] }
 0x6cf   :  { %v5782_v44 = vrot.slane %v5781_v42, 1  ;;  %v5374_v15 = vrot.slane %v5373_v27, 2  ;;  %v5381_v7 = vrot.slane %v5380_v56, 2  ;;  %v5393_v0 = vrot.slane %v5392_v46, 4  ;;  %7075 = vst.msk [vmem:[#allocation4 + $0x68] sm:$0xff] %vm5959_vm12, %v14244_v58 }
 0x6d0   :  { %v14219_v24 = vsel %vm5959_vm12, %v5755_v49, -inf  ;;  %v5776_v2 = vmax.f32 %v5774_v16, %v5775_v50  ;;  %v5789_v38 = vrot.slane %v5788_v23, 1  ;;  %v5388_v13 = vrot.slane %v5387_v4, 2 }
 0x6d1   :  { %v14222_v3 = vsel %vm5959_vm12, %v5762_v55, -inf  ;;  %v5375_v45 = vmax.f32 %v5373_v27, %v5374_v15  ;;  %v5382_v19 = vmax.f32 %v5380_v56, %v5381_v7  ;;  %v5394_v48 = vmax.f32 %v5392_v46, %v5393_v0 }
 0x6d2   :  { %v14224_v9 = vmax.f32 %v5781_v42, %v5782_v44  ;;  %v14227_v36 = vsel %vm5959_vm12, %v5769_v10, -inf  ;;  %v5389_v8 = vmax.f32 %v5387_v4, %v5388_v13  ;;  %v3956_v20 = vrot.slane %v3700_v52, 2  ;;  %v14256_v10 = vld [vmem:[%s15084_s2] ss:$0 sm:$0xff] }
 0x6d3   :  { %v14229_v40 = vmax.f32 %v5788_v23, %v5789_v38  ;;  %v5376_v49 = vrot.slane %v5375_v45, 1  ;;  %v5383_v32 = vrot.slane %v5382_v19, 1  ;;  %v5395_v12 = vrot.slane %v5394_v48, 2  ;;  %v3703_v38 = vpop.f32.mrf.mxu3 }
 0x6d4   :  { %v14232_v41 = vsel %vm5959_vm12, %v5776_v2, -inf  ;;  %v5390_v62 = vrot.slane %v5389_v8, 1  ;;  %v3957_v35 = vrot.slane %v3700_v52, 4  ;;  %v3958_v18 = vrot.slane %v3700_v52, 6 }
 0x6d5   :  { %v5377_v39 = vmax.f32 %v5375_v45, %v5376_v49  ;;  %v5384_v51 = vmax.f32 %v5382_v19, %v5383_v32  ;;  %v5396_v59 = vmax.f32 %v5394_v48, %v5395_v12  ;;  %v5791_v33 = vsel %vm4166_vm11, %v3700_v52, -inf  ;;  %v14261_v12 = vpop.permute.xlu2 %7215 }
 0x6d6   :  { %v5391_v21 = vmax.f32 %v5389_v8, %v5390_v62  ;;  %v5792_v61 = vrot.slane %v5791_v33, 4  ;;  %v5798_v37 = vsel %vm4166_vm11, %v3956_v20, -inf  ;;  %v5805_v26 = vsel %vm4166_vm11, %v3957_v35, -inf  ;;  %v7571_v62 = vld [vmem:[#allocation3 + $0x90] sm:$0xff] }
 0x6d7   :  { %v5397_v55 = vrot.slane %v5396_v59, 1  ;;  %v6213_v11 = vsel %vm5959_vm12, %v5377_v39, -inf  ;;  %v6216_v31 = vsel %vm5959_vm12, %v5384_v51, -inf  ;;  %v5799_v43 = vrot.slane %v5798_v37, 4  ;;  %v7765_v35 = vld [vmem:[#allocation3 + $0x92] sm:$0xff]  ;;  %7610 = vrot.lane.b32.xlu0 %v7571_v62, %s9476_s24 }
 0x6d8   :  { %v6214_v17 = vmax.f32 %v14158_v57, %v6213_v11  ;;  %v6217_v34 = vmax.f32 %v14161_v6, %v6216_v31  ;;  %v6219_v14 = vsel %vm5959_vm12, %v5391_v21, -inf  ;;  %v5793_v5 = vmax.f32 %v5791_v33, %v5792_v61  ;;  %v7797_v33 = vpop.permute.xlu0 %7796  ;;  %v7603_v21 = vpop.permute.xlu1 %7602  ;;  %7804 = vrot.lane.b32.xlu2 %v7765_v35, %s9478_s27 }
 0x6d9   :  { %v5398_v16 = vmax.f32 %v5396_v59, %v5397_v55  ;;  %v6220_v29 = vmax.f32 %v14190_v53, %v6219_v14  ;;  %v5800_v60 = vmax.f32 %v5798_v37, %v5799_v43  ;;  %v5806_v42 = vrot.slane %v5805_v26, 4  ;;  %7648 = vst.msk [vmem:[#allocation4 + $0x18] sm:$0xff] %vm7644_vm4, %v7603_v21 }
 0x6da   :  { %v6432_v27 = vadd.f32 %v13976_v63, %v6214_v17  ;;  %v6433_v56 = vadd.f32 %v13976_v63, %v6217_v34  ;;  %v5794_v57 = vrot.slane %v5793_v5, 2  ;;  %v5812_v6 = vsel %vm4166_vm11, %v3958_v18, -inf  ;;  %7745 = vst.msk [vmem:[#allocation4 + $0x18] sm:$0xff] %vm7741_vm15, %v14235_v47 }
 0x6db   :  { %v6222_v46 = vsel %vm5959_vm12, %v5398_v16, -inf  ;;  %v6434_v53 = vadd.f32 %v14256_v10, %v6220_v29  ;;  %v5801_v50 = vrot.slane %v5800_v60, 2  ;;  %v5807_v23 = vmax.f32 %v5805_v26, %v5806_v42  ;;  %7842 = vst.msk [vmem:[#allocation4 + $0x18] sm:$0xff] %vm7838_vm14, %v7797_v33 }
 0x6dc   :  { %v6223_v4 = vmax.f32 %v14194_v25, %v6222_v46  ;;  %v6560_v44 = vmax.f32 %v6432_v27, 0.0  ;;  %v6561_v15 = vmax.f32 %v6433_v56, 0.0  ;;  %v5795_v7 = vmax.f32 %v5793_v5, %v5794_v57  ;;  %v7668_v25 = vld [vmem:[#allocation3 + $0x91] sm:$0xff] }
 0x6dd   :  { %v6562_v63 = vmax.f32 %v6434_v53, 0.0  ;;  %v5802_v0 = vmax.f32 %v5800_v60, %v5801_v50  ;;  %v5808_v52 = vrot.slane %v5807_v23, 2  ;;  %v5813_v2 = vrot.slane %v5812_v6, 4  ;;  %7707 = vrot.lane.b32.xlu1 %v7668_v25, %s9475_s23 }
 0x6de   :  { %v6435_v13 = vadd.f32 %v14256_v10, %v6223_v4  ;;  %v6935_v45 = vrot.slane %v6560_v44, 4  ;;  %v6937_v19 = vrot.slane %v6561_v15, 3  ;;  %v5796_v48 = vrot.slane %v5795_v7, 1 }
 0x6df   :  { %v6939_v8 = vrot.slane %v6562_v63, 2  ;;  %v5803_v20 = vrot.slane %v5802_v0, 1  ;;  %v5809_v49 = vmax.f32 %v5807_v23, %v5808_v52  ;;  %v5814_v32 = vmax.f32 %v5812_v6, %v5813_v2  ;;  %v7086_v6 = vld [vmem:[#allocation3 + $0xa1] sm:$0xff] }
 0x6e0   :  { %v6563_v18 = vmax.f32 %v6435_v13, 0.0  ;;  %v6936_v39 = vsel %vm6792_vm0, %v6935_v45, %v14204_v54  ;;  %v5797_v51 = vmax.f32 %v5795_v7, %v5796_v48  ;;  %v3959_v59 = vrot.slane %v3703_v38, 2  ;;  %v14287_v7 = vpop.permute.xlu2 %7506  ;;  %7126 = vrot.lane.b32.xlu0 %v7086_v6, %s9472_s21  ;;  %7320 = vrot.lane.b32.xlu2 %v14206_v22, %s9469_s25 }
 0x6e1   :  { %v6938_v61 = vsel %vm6795_vm1, %v6937_v19, %v6936_v39  ;;  %v5804_v37 = vmax.f32 %v5802_v0, %v5803_v20  ;;  %v5810_v26 = vrot.slane %v5809_v49, 1  ;;  %v5815_v55 = vrot.slane %v5814_v32, 2 }
 0x6e2   :  { %v6940_v11 = vsel %vm6798_vm2, %v6939_v8, %v6938_v61  ;;  %v6941_v54 = vrot.slane %v6563_v18, 1  ;;  %v6297_v31 = vsel %vm5959_vm12, %v5797_v51, -inf  ;;  %v3960_v43 = vrot.slane %v3703_v38, 4  ;;  %v7858_v25 = vld [vmem:[#allocation4 + $0x18] sm:$0xff]  ;;  %v14310_v61 = vpop.f32.mrf.mxu3 }
 0x6e3   :  { %v5811_v17 = vmax.f32 %v5809_v49, %v5810_v26  ;;  %v5816_v34 = vmax.f32 %v5814_v32, %v5815_v55  ;;  %v6298_v14 = vmax.f32 %v14199_v28, %v6297_v31  ;;  %v6300_v5 = vsel %vm5959_vm12, %v5804_v37, -inf  ;;  %v7183_v28 = vld [vmem:[#allocation3 + $0xa2] sm:$0xff]  ;;  %v7313_v32 = vpop.permute.xlu0 %7312  ;;  %9380 = vmatmul.msk.f32.gmra.mxu1 %vm7880_vm13, %v7858_v25 }
 0x6e4   :  { %v6942_v16 = vsel %vm15100_vm3, %v6941_v54, %v6940_v11  ;;  %v6301_v29 = vmax.f32 %v14212_v1, %v6300_v5  ;;  %v3961_v60 = vrot.slane %v3703_v38, 6  ;;  %v5819_v42 = vsel %vm4166_vm11, %v3703_v38, -inf }
 0x6e5   :  { %7040 = vst.msk [vmem:[#allocation3 + $0xd1] sm:$0xff] %vm5959_vm12, %v6942_v16  ;;  %v5817_v27 = vrot.slane %v5816_v34, 1  ;;  %v6303_v47 = vsel %vm5959_vm12, %v5811_v17, -inf  ;;  %v6460_v56 = vadd.f32 %v14256_v10, %v6298_v14  ;;  %v5820_v57 = vrot.slane %v5819_v42, 4  ;;  %7223 = vrot.lane.b32.xlu1 %v7183_v28, %s9474_s1  ;;  %v14314_v17 = vld [vmem:[#allocation3 + $0xb2] sm:$0xff]  ;;  %v14321_v16 = vld [vmem:[#allocation3 + $0xc0] sm:$0xff] }
 0x6e6   :  { %v6304_v46 = vmax.f32 %v14219_v24, %v6303_v47  ;;  %v6461_v53 = vadd.f32 %v14256_v10, %v6301_v29  ;;  %v5826_v50 = vsel %vm4166_vm11, %v3959_v59, -inf  ;;  %v5833_v1 = vsel %vm4166_vm11, %v3960_v43, -inf  ;;  %v7119_v24 = vpop.permute.xlu1 %7118 }
 0x6e7   :  { %v5818_v23 = vmax.f32 %v5816_v34, %v5817_v27  ;;  %v6588_v4 = vmax.f32 %v6460_v56, 0.0  ;;  %v5821_v44 = vmax.f32 %v5819_v42, %v5820_v57  ;;  %v5827_v15 = vrot.slane %v5826_v50, 4  ;;  %v7377_v34 = vld [vmem:[#allocation3 + $0xb1] sm:$0xff] }
 0x6e8   :  { %v6462_v63 = vadd.f32 %v14256_v10, %v6304_v46  ;;  %v6589_v0 = vmax.f32 %v6461_v53, 0.0  ;;  %v5834_v52 = vrot.slane %v5833_v1, 4  ;;  %v5840_v2 = vsel %vm4166_vm11, %v3961_v60, -inf  ;;  %v14316_v14 = vpop.permute.xlu2 %7798  ;;  %7417 = vrot.lane.b32.xlu0 %v7377_v34, %s9473_s22  ;;  %7612 = vrot.lane.b32.xlu2 %v14321_v16, %s9476_s24 }
 0x6e9   :  { %v6306_v38 = vsel %vm5959_vm12, %v5818_v23, -inf  ;;  %v5822_v13 = vrot.slane %v5821_v44, 2  ;;  %v5828_v45 = vmax.f32 %v5826_v50, %v5827_v15  ;;  %v5841_v19 = vrot.slane %v5840_v2, 4 }
 0x6ea   :  { %vm15112_vm5 = vcmask 130112   ;;  %v6307_v48 = vmax.f32 %v14222_v3, %v6306_v38  ;;  %v6590_v8 = vmax.f32 %v6462_v63, 0.0  ;;  %v6985_v20 = vrot.slane %v6589_v0, 7 }
 0x6eb   :  { %7163 = vst.msk [vmem:[#allocation4 + $0x20] sm:$0xff] %vm15112_vm5, %v7119_v24  ;;  %v5835_v49 = vmax.f32 %v5833_v1, %v5834_v52  ;;  %v14302_v62 = vsel %vm5959_vm12, %v14224_v9, -inf  ;;  %v5823_v35 = vmax.f32 %v5821_v44, %v5822_v13  ;;  %v5829_v18 = vrot.slane %v5828_v45, 2 }
 0x6ec   :  { %7260 = vst.msk [vmem:[#allocation4 + $0x20] sm:$0xff] %vm7255_vm6, %v14261_v12  ;;  %v5842_v39 = vmax.f32 %v5840_v2, %v5841_v19  ;;  %v6463_v22 = vadd.f32 %v14256_v10, %v6307_v48  ;;  %vm15113_vm10 = vcmask 1041409   ;;  %v6987_v51 = vrot.slane %v6590_v8, 6  ;;  %v14347_v48 = vld [vmem:[#allocation3 + $0xc2] sm:$0xff] }
 0x6ed   :  { %7357 = vst.msk [vmem:[#allocation4 + $0x20] sm:$0xff] %vm15099_vm7, %v7313_v32  ;;  %v6986_v3 = vsel %vm15113_vm10, %v6985_v20, %v6588_v4  ;;  %v5836_v59 = vrot.slane %v5835_v49, 2  ;;  %v6317_v12 = vsel %vm5959_vm12, %v14229_v40, -inf  ;;  %v5824_v33 = vrot.slane %v5823_v35, 1  ;;  %7514 = vrot.lane.b32.xlu1 %v14314_v17, %s9477_s26  ;;  %v14349_v8 = vld [vmem:[#allocation3 + $0xc1] sm:$0xff] }
 0x6ee   :  { %v5830_v21 = vmax.f32 %v5828_v45, %v5829_v18  ;;  %v5843_v9 = vrot.slane %v5842_v39, 2  ;;  %v6591_v37 = vmax.f32 %v6463_v22, 0.0  ;;  %vm8106_vm5 = vcmask 123904   ;;  %v7410_v29 = vpop.permute.xlu1 %7409 }
 0x6ef   :  { %v5837_v26 = vmax.f32 %v5835_v49, %v5836_v59  ;;  %v3962_v55 = vrot.slane %v14310_v61, 2  ;;  %vm15114_vm7 = vcmask 1042434   ;;  %v5825_v54 = vmax.f32 %v5823_v35, %v5824_v33  ;;  %7454 = vst.msk [vmem:[#allocation4 + $0x20] sm:$0xff] %vm7449_vm8, %v7410_v29 }
 0x6f0   :  { %v6988_v11 = vsel %vm15114_vm7, %v6987_v51, %v6986_v3  ;;  %v5831_v31 = vrot.slane %v5830_v21, 1  ;;  %v5844_v43 = vmax.f32 %v5842_v39, %v5843_v9  ;;  %v6989_v40 = vrot.slane %v6591_v37, 5  ;;  %7551 = vst.msk [vmem:[#allocation4 + $0x20] sm:$0xff] %vm7546_vm9, %v14287_v7  ;;  %v14351_v20 = vpop.permute.xlu2 %7314  ;;  %7709 = vrot.lane.b32.xlu0 %v14349_v8, %s9475_s23  ;;  %7128 = vrot.lane.b32.xlu2 %v7377_v34, %s9472_s21 }
 0x6f1   :  { %v5838_v5 = vrot.slane %v5837_v26, 1  ;;  %v3963_v60 = vrot.slane %v14310_v61, 4  ;;  %v5847_v42 = vsel %vm4166_vm11, %v14310_v61, -inf  ;;  %v6309_v56 = vsel %vm5959_vm12, %v5825_v54, -inf  ;;  %v7946_v53 = vpop.f32.mrf.mxu1 }
 0x6f2   :  { %v5832_v27 = vmax.f32 %v5830_v21, %v5831_v31  ;;  %v5845_v47 = vrot.slane %v5844_v43, 1  ;;  %v5848_v57 = vrot.slane %v5847_v42, 4  ;;  %vm15115_vm7 = vcmask 1043459  }
 0x6f3   :  { %v6990_v28 = vsel %vm15115_vm7, %v6989_v40, %v6988_v11  ;;  %v5839_v6 = vmax.f32 %v5837_v26, %v5838_v5  ;;  %v6310_v46 = vmax.f32 %v14227_v36, %v6309_v56  ;;  %v14335_v50 = vsel %vm4166_vm11, %v3962_v55, -inf }
 0x6f4   :  { %v5846_v1 = vmax.f32 %v5844_v43, %v5845_v47  ;;  %v6312_v23 = vsel %vm5959_vm12, %v5832_v27, -inf  ;;  %v8010_v4 = vrot.slane %v7946_v53, 2  ;;  %v8011_v44 = vrot.slane %v7946_v53, 4 }
 0x6f5   :  { %v6313_v15 = vmax.f32 %v14232_v41, %v6312_v23  ;;  %v6315_v63 = vsel %vm5959_vm12, %v5839_v6, -inf  ;;  %v6464_v0 = vadd.f32 %v14256_v10, %v6310_v46  ;;  %v8012_v52 = vrot.slane %v7946_v53, 6  ;;  %7806 = vrot.lane.b32.xlu1 %v14347_v48, %s9478_s27 }
 0x6f6   :  { %v6316_v36 = vmax.f32 %v14302_v62, %v6315_v63  ;;  %v6318_v7 = vsel %vm5959_vm12, %v5846_v1, -inf  ;;  %v8107_v2 = vsel %vm8106_vm5, %v7946_v53, -inf  ;;  %v8114_v24 = vsel %vm8106_vm5, %v8010_v4, -inf  ;;  %v7052_v62 = vld [vmem:[#allocation3 + $0x60] sm:$0xff]  ;;  %v3709_v1 = vpop.f32.mrf.mxu3 }
 0x6f7   :  { %v6319_v38 = vmax.f32 %v6317_v12, %v6318_v7  ;;  %v6465_v13 = vadd.f32 %v14256_v10, %v6313_v15  ;;  %v6592_v45 = vmax.f32 %v6464_v0, 0.0  ;;  %v8108_v19 = vrot.slane %v8107_v2, 4  ;;  %7068 = vst.msk [vmem:[#allocation4 + $0x30] sm:$0xff] %vm5959_vm12, %v7052_v62  ;;  %v7051_v15 = vld [vmem:[#allocation3 + $0x50] sm:$0xff] }
 0x6f8   :  { %v6466_v41 = vadd.f32 %v14256_v10, %v6316_v36  ;;  %v8115_v49 = vrot.slane %v8114_v24, 4  ;;  %v8121_v32 = vsel %vm8106_vm5, %v8011_v44, -inf  ;;  %v8128_v25 = vsel %vm8106_vm5, %v8012_v52, -inf  ;;  %v7702_v33 = vpop.permute.xlu1 %7701  ;;  %7225 = vrot.lane.b32.xlu0 %v14314_v17, %s9474_s1  ;;  %7419 = vrot.lane.b32.xlu2 %v14349_v8, %s9473_s22  ;;  %7067 = vst.msk [vmem:[#allocation4 + $0x28] sm:$0xff] %vm5959_vm12, %v7051_v15 }
 0x6f9   :  { %v6467_v35 = vadd.f32 %v14256_v10, %v6319_v38  ;;  %v6593_v18 = vmax.f32 %v6465_v13, 0.0  ;;  %v6991_v39 = vrot.slane %v6592_v45, 4  ;;  %v8109_v22 = vmax.f32 %v8107_v2, %v8108_v19  ;;  %v7605_v55 = vpop.permute.xlu0 %7604 }
 0x6fa   :  { %v6594_v3 = vmax.f32 %v6466_v41, 0.0  ;;  %v8116_v51 = vmax.f32 %v8114_v24, %v8115_v49  ;;  %v8122_v59 = vrot.slane %v8121_v32, 4  ;;  %v8129_v12 = vrot.slane %v8128_v25, 4  ;;  %7649 = vst.msk [vmem:[#allocation4 + $0x20] sm:$0xff] %vm7644_vm4, %v7605_v55  ;;  %v14387_v49 = vld [vmem:[#allocation3 + $0xd0] sm:$0xff] }
 0x6fb   :  { %v6595_v21 = vmax.f32 %v6467_v35, 0.0  ;;  %v6992_v9 = vsel %vm6792_vm0, %v6991_v39, %v6990_v28  ;;  %v6993_v37 = vrot.slane %v6593_v18, 3  ;;  %v8110_v26 = vrot.slane %v8109_v22, 2  ;;  %7746 = vst.msk [vmem:[#allocation4 + $0x20] sm:$0xff] %vm7741_vm15, %v7702_v33 }
 0x6fc   :  { %v6995_v11 = vrot.slane %v6594_v3, 2  ;;  %v8117_v54 = vrot.slane %v8116_v51, 2  ;;  %v8123_v31 = vmax.f32 %v8121_v32, %v8122_v59  ;;  %v8130_v43 = vmax.f32 %v8128_v25, %v8129_v12  ;;  %7843 = vst.msk [vmem:[#allocation4 + $0x20] sm:$0xff] %vm7838_vm14, %v14316_v14 }
 0x6fd   :  { %v6994_v40 = vsel %vm6795_vm1, %v6993_v37, %v6992_v9  ;;  %v6997_v5 = vrot.slane %v6595_v21, 1  ;;  %v5849_v34 = vmax.f32 %v5847_v42, %v5848_v57  ;;  %v8111_v27 = vmax.f32 %v8109_v22, %v8110_v26  ;;  %v14376_v57 = vpop.permute.xlu2 %7606  ;;  %7322 = vrot.lane.b32.xlu1 %v14321_v16, %s9469_s25  ;;  %v14396_v22 = vld [vmem:[#allocation3 + $0xd1] sm:$0xff] }
 0x6fe   :  { %v6996_v29 = vsel %vm6798_vm2, %v6995_v11, %v6994_v40  ;;  %v8124_v47 = vrot.slane %v8123_v31, 2  ;;  %v3964_v56 = vrot.slane %v14310_v61, 6  ;;  %v8118_v6 = vmax.f32 %v8116_v51, %v8117_v54 }
 0x6ff   :  { %v6998_v28 = vsel %vm15100_vm3, %v6997_v5, %v6996_v29  ;;  %v8131_v46 = vrot.slane %v8130_v43, 2  ;;  %v5855_v53 = vrot.slane %v14335_v50, 4  ;;  %v5861_v42 = vsel %vm4166_vm11, %v3963_v60, -inf }
 0x700   :  { %7044 = vst.msk [vmem:[#allocation3 + $0x111] sm:$0xff] %vm5959_vm12, %v6998_v28  ;;  %v5850_v14 = vrot.slane %v5849_v34, 2  ;;  %v5862_v4 = vrot.slane %v5861_v42, 4  ;;  %v8112_v44 = vrot.slane %v8111_v27, 1  ;;  %v8125_v61 = vmax.f32 %v8123_v31, %v8124_v47  ;;  %7516 = vrot.lane.b32.xlu0 %v14347_v48, %s9477_s26  ;;  %7711 = vrot.lane.b32.xlu2 %v14396_v22, %s9475_s23  ;;  %v3712_v21 = vpop.f32.mrf.mxu3 }
 0x701   :  { %v5856_v23 = vmax.f32 %v14335_v50, %v5855_v53  ;;  %v5868_v60 = vsel %vm4166_vm11, %v3964_v56, -inf  ;;  %v8119_v63 = vrot.slane %v8118_v6, 1  ;;  %v8132_v0 = vmax.f32 %v8130_v43, %v8131_v46 }
 0x702   :  { %v5863_v52 = vmax.f32 %v5861_v42, %v5862_v4  ;;  %v5851_v36 = vmax.f32 %v5849_v34, %v5850_v14  ;;  %v5869_v17 = vrot.slane %v5868_v60, 4  ;;  %v3965_v7 = vrot.slane %v3709_v1, 2 }
 0x703   :  { %v5857_v16 = vrot.slane %v5856_v23, 2  ;;  %v8113_v2 = vmax.f32 %v8111_v27, %v8112_v44  ;;  %v8126_v50 = vrot.slane %v8125_v61, 1  ;;  %vm8555_vm10 = vcmask 130048  }
 0x704   :  { %v3966_v24 = vrot.slane %v3709_v1, 4  ;;  %v8120_v38 = vmax.f32 %v8118_v6, %v8119_v63  ;;  %v8133_v13 = vrot.slane %v8132_v0, 1  ;;  %v5864_v45 = vrot.slane %v5863_v52, 2 }
 0x705   :  { %v3967_v19 = vrot.slane %v3709_v1, 6  ;;  %v5858_v41 = vmax.f32 %v5856_v23, %v5857_v16  ;;  %v5875_v32 = vsel %vm4166_vm11, %v3709_v1, -inf  ;;  %v5882_v25 = vsel %vm4166_vm11, %v3965_v7, -inf  ;;  %v7123_v35 = vpop.permute.xlu2 %7122  ;;  %7614 = vrot.lane.b32.xlu1 %v14387_v49, %s9476_s24  ;;  %v14416_v23 = vld [vmem:[#allocation3 + $0xd2] sm:$0xff] }
 0x706   :  { %v5889_v62 = vsel %vm4166_vm11, %v3966_v24, -inf  ;;  %v5852_v18 = vrot.slane %v5851_v36, 1  ;;  %v5870_v39 = vmax.f32 %v5868_v60, %v5869_v17  ;;  %v5876_v3 = vrot.slane %v5875_v32, 4 }
 0x707   :  { %vm15116_vm7 = vcmask 130112   ;;  %v8127_v51 = vmax.f32 %v8125_v61, %v8126_v50  ;;  %v5883_v59 = vrot.slane %v5882_v25, 4  ;;  %v5890_v12 = vrot.slane %v5889_v62, 4 }
 0x708   :  { %7165 = vst.msk [vmem:[#allocation4 + $0x30] sm:$0xff] %vm15116_vm7, %v7123_v35  ;;  %v5896_v33 = vsel %vm4166_vm11, %v3967_v19, -inf  ;;  %v14403_v9 = vsel %vm8555_vm10, %v8113_v2, -inf  ;;  %v5865_v37 = vmax.f32 %v5863_v52, %v5864_v45  ;;  %v3968_v26 = vrot.slane %v3712_v21, 2  ;;  %7808 = vrot.lane.b32.xlu0 %v14416_v23, %s9478_s27  ;;  %7227 = vrot.lane.b32.xlu2 %v14347_v48, %s9474_s1  ;;  %v7949_v2 = vpop.f32.mrf.mxu1  ;;  %v7218_v45 = vpop.permute.xlu1 %7217 }
 0x709   :  { %v8134_v55 = vmax.f32 %v8132_v0, %v8133_v13  ;;  %v14406_v11 = vsel %vm8555_vm10, %v8120_v38, -inf  ;;  %v5859_v54 = vrot.slane %v5858_v41, 1  ;;  %v5877_v31 = vmax.f32 %v5875_v32, %v5876_v3  ;;  %v7121_v19 = vpop.permute.xlu0 %7120 }
 0x70a   :  { %v5853_v43 = vmax.f32 %v5851_v36, %v5852_v18  ;;  %v5871_v40 = vrot.slane %v5870_v39, 2  ;;  %v5897_v5 = vrot.slane %v5896_v33, 4  ;;  %v3969_v34 = vrot.slane %v3712_v21, 4  ;;  %7164 = vst.msk [vmem:[#allocation4 + $0x28] sm:$0xff] %vm15116_vm7, %v7121_v19  ;;  %v14458_v19 = vld [vmem:[#allocation3 + $0xe1] sm:$0xff] }
 0x70b   :  { %v14409_v29 = vsel %vm8555_vm10, %v8127_v51, -inf  ;;  %v5884_v27 = vmax.f32 %v5882_v25, %v5883_v59  ;;  %v5891_v47 = vmax.f32 %v5889_v62, %v5890_v12  ;;  %v5903_v56 = vsel %vm4166_vm11, %v3712_v21, -inf  ;;  %7261 = vst.msk [vmem:[#allocation4 + $0x28] sm:$0xff] %vm7255_vm6, %v7218_v45 }
 0x70c   :  { %v5866_v28 = vrot.slane %v5865_v37, 1  ;;  %v3970_v6 = vrot.slane %v3712_v21, 6  ;;  %v5904_v46 = vrot.slane %v5903_v56, 4  ;;  %v5910_v53 = vsel %vm4166_vm11, %v3968_v26, -inf }
 0x70d   :  { %v14414_v42 = vsel %vm8555_vm10, %v8134_v55, -inf  ;;  %v5860_v1 = vmax.f32 %v5858_v41, %v5859_v54  ;;  %v5878_v14 = vrot.slane %v5877_v31, 2  ;;  %v5911_v4 = vrot.slane %v5910_v53, 4  ;;  %7130 = vrot.lane.b32.xlu1 %v14349_v8, %s9472_s21  ;;  %v7859_v41 = vld [vmem:[#allocation4 + $0x20] sm:$0xff] }
 0x70e   :  { %v5872_v44 = vmax.f32 %v5870_v39, %v5871_v40  ;;  %v5898_v61 = vmax.f32 %v5896_v33, %v5897_v5  ;;  %v5905_v60 = vmax.f32 %v5903_v56, %v5904_v46  ;;  %v5917_v15 = vsel %vm4166_vm11, %v3969_v34, -inf  ;;  %9381 = vmatmul.msk.f32.gmra.mxu1 %vm7880_vm13, %v7859_v41  ;;  %v14449_v46 = vpop.permute.xlu2 %7413 }
 0x70f   :  { %v5885_v63 = vrot.slane %v5884_v27, 2  ;;  %v5892_v0 = vrot.slane %v5891_v47, 2  ;;  %v5912_v52 = vmax.f32 %v5910_v53, %v5911_v4  ;;  %v5918_v16 = vrot.slane %v5917_v15, 4 }
 0x710   :  { %v5867_v36 = vmax.f32 %v5865_v37, %v5866_v28  ;;  %v14426_v17 = vsel %vm5959_vm12, %v5853_v43, -inf  ;;  %v5906_v7 = vrot.slane %v5905_v60, 2  ;;  %v5924_v8 = vsel %vm4166_vm11, %v3970_v6, -inf  ;;  %7324 = vrot.lane.b32.xlu0 %v14387_v49, %s9469_s25  ;;  %7518 = vrot.lane.b32.xlu2 %v14416_v23, %s9477_s26 }
 0x711   :  { %v14430_v50 = vsel %vm5959_vm12, %v5860_v1, -inf  ;;  %v5879_v24 = vmax.f32 %v5877_v31, %v5878_v14  ;;  %v5913_v38 = vrot.slane %v5912_v52, 2  ;;  %v5919_v13 = vmax.f32 %v5917_v15, %v5918_v16 }
 0x712   :  { %v5873_v48 = vrot.slane %v5872_v44, 1  ;;  %v5899_v32 = vrot.slane %v5898_v61, 2  ;;  %v5907_v25 = vmax.f32 %v5905_v60, %v5906_v7  ;;  %v5925_v62 = vrot.slane %v5924_v8, 4 }
 0x713   :  { %v5886_v35 = vmax.f32 %v5884_v27, %v5885_v63  ;;  %v14434_v18 = vmax.f32 %v5891_v47, %v5892_v0  ;;  %v5914_v39 = vmax.f32 %v5912_v52, %v5913_v38  ;;  %v5920_v3 = vrot.slane %v5919_v13, 2 }
 0x714   :  { %v5908_v51 = vrot.slane %v5907_v25, 1  ;;  %v5926_v59 = vmax.f32 %v5924_v8, %v5925_v62  ;;  %v8013_v12 = vrot.slane %v7949_v2, 2  ;;  %v8014_v33 = vrot.slane %v7949_v2, 4 }
 0x715   :  { %vm15117_vm3 = vcmask 261312   ;;  %v5880_v21 = vrot.slane %v5879_v24, 1  ;;  %v5915_v37 = vrot.slane %v5914_v39, 1  ;;  %v5921_v26 = vmax.f32 %v5919_v13, %v5920_v3  ;;  %7421 = vrot.lane.b32.xlu1 %v14396_v22, %s9473_s22 }
 0x716   :  { %7358 = vst.msk [vmem:[#allocation4 + $0x28] sm:$0xff] %vm15117_vm3, %v14351_v20  ;;  %v8015_v55 = vrot.slane %v7949_v2, 6  ;;  %v5900_v54 = vmax.f32 %v5898_v61, %v5899_v32  ;;  %v5927_v31 = vrot.slane %v5926_v59, 2  ;;  %v8135_v43 = vsel %vm8106_vm5, %v7949_v2, -inf }
 0x717   :  { %v8142_v40 = vsel %vm8106_vm5, %v8013_v12, -inf  ;;  %v5916_v5 = vmax.f32 %v5914_v39, %v5915_v37  ;;  %v5922_v34 = vrot.slane %v5921_v26, 1  ;;  %v8136_v27 = vrot.slane %v8135_v43, 4 }
 0x718   :  { %v8143_v20 = vrot.slane %v8142_v40, 4  ;;  %v5909_v47 = vmax.f32 %v5907_v25, %v5908_v51  ;;  %v5928_v56 = vmax.f32 %v5926_v59, %v5927_v31  ;;  %v8149_v28 = vsel %vm8106_vm5, %v8014_v33, -inf  ;;  %7616 = vrot.lane.b32.xlu0 %v13988_v30, %s9476_s24  ;;  %v14470_v25 = vld [vmem:[#allocation3 + $0xe2] sm:$0xff]  ;;  %v3715_v59 = vpop.f32.mrf.mxu3  ;;  %v7509_v31 = vpop.permute.xlu1 %7508 }
 0x719   :  { %v8156_v6 = vsel %vm8106_vm5, %v8015_v55, -inf  ;;  %v5874_v53 = vmax.f32 %v5872_v44, %v5873_v48  ;;  %v6326_v1 = vsel %vm5959_vm12, %v5867_v36, -inf  ;;  %v5923_v14 = vmax.f32 %v5921_v26, %v5922_v34  ;;  %7810 = vrot.lane.b32.xlu2 %v14470_v25, %s9478_s27 }
 0x71a   :  { %v8137_v49 = vmax.f32 %v8135_v43, %v8136_v27  ;;  %v5887_v4 = vrot.slane %v5886_v35, 1  ;;  %v5894_v61 = vrot.slane %v14434_v18, 1  ;;  %v8144_v60 = vmax.f32 %v8142_v40, %v8143_v20 }
 0x71b   :  { %v8150_v15 = vrot.slane %v8149_v28, 4  ;;  %v14453_v63 = vmax.f32 %v5879_v24, %v5880_v21  ;;  %v6324_v0 = vsel %vm5959_vm12, %v5916_v5, -inf  ;;  %v8157_v16 = vrot.slane %v8156_v6, 4 }
 0x71c   :  { %v8138_v52 = vrot.slane %v8137_v49, 2  ;;  %v5901_v7 = vrot.slane %v5900_v54, 1  ;;  %v5929_v8 = vrot.slane %v5928_v56, 1  ;;  %v6321_v2 = vsel %vm5959_vm12, %v5909_v47, -inf }
 0x71d   :  { %v8145_v44 = vrot.slane %v8144_v60, 2  ;;  %v6327_v36 = vsel %vm5959_vm12, %v5923_v14, -inf  ;;  %v8151_v13 = vmax.f32 %v8149_v28, %v8150_v15  ;;  %v8158_v45 = vmax.f32 %v8156_v6, %v8157_v16  ;;  %7713 = vrot.lane.b32.xlu1 %v14458_v19, %s9475_s23  ;;  %v14504_v14 = vld [vmem:[#allocation3 + $0x100] sm:$0xff] }
 0x71e   :  { %v8139_v38 = vmax.f32 %v8137_v49, %v8138_v52  ;;  %v14461_v41 = vsel %vm5959_vm12, %v5874_v53, -inf  ;;  %v14463_v24 = vmax.f32 %v5886_v35, %v5887_v4  ;;  %v6325_v48 = vmax.f32 %v14430_v50, %v6324_v0  ;;  %7076 = vst.msk [vmem:[#allocation4 + $0x70] sm:$0xff] %vm5959_vm12, %v14504_v14 }
 0x71f   :  { %v8146_v32 = vmax.f32 %v8144_v60, %v8145_v44  ;;  %v6322_v62 = vmax.f32 %v14426_v17, %v6321_v2  ;;  %v8152_v3 = vrot.slane %v8151_v13, 2  ;;  %v8159_v51 = vrot.slane %v8158_v45, 2  ;;  %v7412_v17 = vpop.permute.xlu0 %7411 }
 0x720   :  { %v8140_v39 = vrot.slane %v8139_v38, 1  ;;  %v14476_v50 = vmax.f32 %v14434_v18, %v5894_v61  ;;  %v5930_v35 = vmax.f32 %v5928_v56, %v5929_v8  ;;  %v6328_v12 = vmax.f32 %v6326_v1, %v6327_v36  ;;  %7455 = vst.msk [vmem:[#allocation4 + $0x28] sm:$0xff] %vm7449_vm8, %v7412_v17  ;;  %v14484_v18 = vpop.permute.xlu2 %7705  ;;  %v14493_v56 = vld [vmem:[%s15086_s4] ss:$0 sm:$0xff]  ;;  %7132 = vrot.lane.b32.xlu0 %v14396_v22, %s9472_s21 }
 0x721   :  { %v8147_v33 = vrot.slane %v8146_v32, 1  ;;  %v14478_v21 = vmax.f32 %v5900_v54, %v5901_v7  ;;  %v8153_v26 = vmax.f32 %v8151_v13, %v8152_v3  ;;  %v8160_v55 = vmax.f32 %v8158_v45, %v8159_v51  ;;  %7552 = vst.msk [vmem:[#allocation4 + $0x28] sm:$0xff] %vm7546_vm9, %v7509_v31  ;;  %7326 = vrot.lane.b32.xlu2 %v13988_v30, %s9469_s25  ;;  %v7801_v45 = vpop.permute.xlu1 %7800 }
 0x722   :  { %v8141_v37 = vmax.f32 %v8139_v38, %v8140_v39  ;;  %v14481_v43 = vadd.f32 %v14256_v10, %v6325_v48  ;;  %v3971_v5 = vrot.slane %v3715_v59, 2  ;;  %v3972_v34 = vrot.slane %v3715_v59, 4  ;;  %7650 = vst.msk [vmem:[#allocation4 + $0x28] sm:$0xff] %vm7644_vm4, %v14376_v57 }
 0x723   :  { %v8148_v40 = vmax.f32 %v8146_v32, %v8147_v33  ;;  %v14487_v27 = vadd.f32 %v14256_v10, %v6322_v62  ;;  %v8154_v54 = vrot.slane %v8153_v26, 1  ;;  %v8161_v20 = vrot.slane %v8160_v55, 1 }
 0x724   :  { %v8557_v47 = vsel %vm8555_vm10, %v8141_v37, -inf  ;;  %v6330_v28 = vsel %vm5959_vm12, %v5930_v35, -inf  ;;  %v14498_v6 = vadd.f32 %v14256_v10, %v6328_v12  ;;  %v3973_v60 = vrot.slane %v3715_v59, 6 }
 0x725   :  { %v8558_v53 = vmax.f32 %v14403_v9, %v8557_v47  ;;  %v8560_v1 = vsel %vm8555_vm10, %v8148_v40, -inf  ;;  %v8155_v49 = vmax.f32 %v8153_v26, %v8154_v54  ;;  %v8162_v4 = vmax.f32 %v8160_v55, %v8161_v20  ;;  %7229 = vrot.lane.b32.xlu1 %v14416_v23, %s9474_s1 }
 0x726   :  { %v8561_v61 = vmax.f32 %v14406_v11, %v8560_v1  ;;  %v6597_v15 = vmax.f32 %v14481_v43, 0.0  ;;  %v5931_v0 = vsel %vm4166_vm11, %v3715_v59, -inf  ;;  %v5938_v9 = vsel %vm4166_vm11, %v3971_v5, -inf }
 0x727   :  { %v5945_v52 = vsel %vm4166_vm11, %v3972_v34, -inf  ;;  %v8563_v57 = vsel %vm8555_vm10, %v8155_v49, -inf  ;;  %v8566_v11 = vsel %vm8555_vm10, %v8162_v4, -inf  ;;  %v8656_v16 = vadd.f32 %v14493_v56, %v8558_v53  ;;  %v7704_v48 = vpop.permute.xlu0 %7703 }
 0x728   :  { %v8657_v7 = vadd.f32 %v14493_v56, %v8561_v61  ;;  %v6331_v8 = vmax.f32 %v14461_v41, %v6330_v28  ;;  %v8564_v2 = vmax.f32 %v14409_v29, %v8563_v57  ;;  %v8567_v23 = vmax.f32 %v14414_v42, %v8566_v11  ;;  %7747 = vst.msk [vmem:[#allocation4 + $0x28] sm:$0xff] %vm7741_vm15, %v7704_v48  ;;  %v14530_v41 = vpop.permute.xlu2 %7221 }
 0x729   :  { %v5932_v44 = vrot.slane %v5931_v0, 4  ;;  %v5939_v22 = vrot.slane %v5938_v9, 4  ;;  %v5946_v38 = vrot.slane %v5945_v52, 4  ;;  %v5952_v13 = vsel %vm4166_vm11, %v3973_v60, -inf  ;;  %7844 = vst.msk [vmem:[#allocation4 + $0x28] sm:$0xff] %vm7838_vm14, %v7801_v45  ;;  %7423 = vrot.lane.b32.xlu0 %v14458_v19, %s9473_s22  ;;  %7618 = vrot.lane.b32.xlu2 %v14244_v58, %s9476_s24  ;;  %v7672_v45 = vld [vmem:[#allocation3 + $0xf1] sm:$0xff] }
 0x72a   :  { %v8689_v36 = vmax.f32 %v8657_v7, 0.0  ;;  %v8658_v32 = vadd.f32 %v14493_v56, %v8564_v2  ;;  %v8659_v62 = vadd.f32 %v14493_v56, %v8567_v23  ;;  %v5953_v30 = vrot.slane %v5952_v13, 4 }
 0x72b   :  { %v5933_v39 = vmax.f32 %v5931_v0, %v5932_v44  ;;  %v8688_v29 = vmax.f32 %v8656_v16, 0.0  ;;  %v5940_v3 = vmax.f32 %v5938_v9, %v5939_v22  ;;  %v5947_v51 = vmax.f32 %v5945_v52, %v5946_v38 }
 0x72c   :  { %v8752_v42 = vrot.slane %v8689_v36, 7  ;;  %v8690_v59 = vmax.f32 %v8658_v32, 0.0  ;;  %v8691_v35 = vmax.f32 %v8659_v62, 0.0  ;;  %v5954_v33 = vmax.f32 %v5952_v13, %v5953_v30  ;;  %v14566_v13 = vld [vmem:[#allocation3 + $0xf2] sm:$0xff] }
 0x72d   :  { %v5934_v12 = vrot.slane %v5933_v39, 2  ;;  %v6596_v37 = vmax.f32 %v14487_v27, 0.0  ;;  %vm15118_vm11 = vcmask 1041409   ;;  %v5941_v55 = vrot.slane %v5940_v3, 2  ;;  %7520 = vrot.lane.b32.xlu1 %v14470_v25, %s9477_s26 }
 0x72e   :  { %v8753_v26 = vsel %vm15118_vm11, %v8752_v42, %v8688_v29  ;;  %v5948_v31 = vrot.slane %v5947_v51, 2  ;;  %v6471_v17 = vadd.f32 %v14256_v10, %v6331_v8  ;;  %v8754_v43 = vrot.slane %v8690_v59, 6 }
 0x72f   :  { %v5935_v40 = vmax.f32 %v5933_v39, %v5934_v12  ;;  %v5955_v5 = vrot.slane %v5954_v33, 2  ;;  %v6598_v34 = vmax.f32 %v14498_v6, 0.0  ;;  %v8756_v54 = vrot.slane %v8691_v35, 5  ;;  %v7317_v6 = vpop.permute.xlu1 %7316  ;;  %v7220_v0 = vpop.permute.xlu0 %7219 }
 0x730   :  { %v5942_v20 = vmax.f32 %v5940_v3, %v5941_v55  ;;  %v5949_v27 = vmax.f32 %v5947_v51, %v5948_v31  ;;  %v6999_v47 = vrot.slane %v6597_v15, 7  ;;  %vm15119_vm3 = vcmask 1042434   ;;  %7262 = vst.msk [vmem:[#allocation4 + $0x30] sm:$0xff] %vm7255_vm6, %v7220_v0  ;;  %v14552_v11 = vpop.permute.xlu2 %7512  ;;  %v7860_v16 = vld [vmem:[#allocation4 + $0x28] sm:$0xff]  ;;  %v7054_v55 = vld [vmem:[#allocation3 + $0xa0] sm:$0xff] }
 0x731   :  { %v8755_v28 = vsel %vm15119_vm3, %v8754_v43, %v8753_v26  ;;  %v5936_v53 = vrot.slane %v5935_v40, 1  ;;  %v5956_v1 = vmax.f32 %v5954_v33, %v5955_v5  ;;  %v6332_v49 = vsel %vm5959_vm12, %v14453_v63, -inf  ;;  %9382 = vmatmul.msk.f32.gmra.mxu1 %vm7880_vm13, %v7860_v16  ;;  %7715 = vrot.lane.b32.xlu0 %v7672_v45, %s9475_s23  ;;  %7070 = vst.msk [vmem:[#allocation4 + $0x40] sm:$0xff] %vm5959_vm12, %v7054_v55  ;;  %v7056_v5 = vld [vmem:[#allocation3 + $0xc0] sm:$0xff] }
 0x732   :  { %vm15120_vm7 = vcmask 1043459   ;;  %v5943_v61 = vrot.slane %v5942_v20, 1  ;;  %v5950_v60 = vrot.slane %v5949_v27, 1  ;;  %v6335_v9 = vsel %vm5959_vm12, %v14463_v24, -inf  ;;  %7134 = vrot.lane.b32.xlu2 %v14458_v19, %s9472_s21  ;;  %7072 = vst.msk [vmem:[#allocation4 + $0x50] sm:$0xff] %vm5959_vm12, %v7056_v5 }
 0x733   :  { %v14547_v4 = vsel %vm15120_vm7, %v8756_v54, %v8755_v28  ;;  %v6599_v52 = vmax.f32 %v6471_v17, 0.0  ;;  %v5937_v57 = vmax.f32 %v5935_v40, %v5936_v53  ;;  %v5957_v15 = vrot.slane %v5956_v1, 1  ;;  %v14591_v54 = vld [vmem:[#allocation3 + $0x110] sm:$0xff] }
 0x734   :  { %v6338_v63 = vsel %vm5959_vm12, %v14476_v50, -inf  ;;  %v7001_v7 = vrot.slane %v6598_v34, 6  ;;  %v5944_v8 = vmax.f32 %v5942_v20, %v5943_v61  ;;  %v5951_v2 = vmax.f32 %v5949_v27, %v5950_v60  ;;  %7077 = vst.msk [vmem:[#allocation4 + $0x78] sm:$0xff] %vm5959_vm12, %v14591_v54 }
 0x735   :  { %vm15121_vm11 = vcmask 261312   ;;  %v6341_v24 = vsel %vm5959_vm12, %v14478_v21, -inf  ;;  %vm15122_vm3 = vcmask 1041409   ;;  %v5958_v44 = vmax.f32 %v5956_v1, %v5957_v15  ;;  %7812 = vrot.lane.b32.xlu1 %v14566_v13, %s9478_s27 }
 0x736   :  { %7359 = vst.msk [vmem:[#allocation4 + $0x30] sm:$0xff] %vm15121_vm11, %v7317_v6  ;;  %v7000_v23 = vsel %vm15122_vm3, %v6999_v47, %v6596_v37  ;;  %v6333_v36 = vsel %vm5959_vm12, %v5937_v57, -inf  ;;  %v6336_v50 = vsel %vm5959_vm12, %v5944_v8, -inf  ;;  %v6339_v38 = vsel %vm5959_vm12, %v5951_v2, -inf  ;;  %v14608_v47 = vld [vmem:[#allocation3 + $0x101] sm:$0xff]  ;;  %v7952_v6 = vpop.f32.mrf.mxu1 }
 0x737   :  { %7456 = vst.msk [vmem:[#allocation4 + $0x30] sm:$0xff] %vm7449_vm8, %v14449_v46  ;;  %v6334_v22 = vmax.f32 %v6332_v49, %v6333_v36  ;;  %v7003_v48 = vrot.slane %v6599_v52, 5  ;;  %v6337_v32 = vmax.f32 %v6335_v9, %v6336_v50  ;;  %v6340_v62 = vmax.f32 %v6338_v63, %v6339_v38  ;;  %v7609_v59 = vpop.permute.xlu1 %7608  ;;  %v7511_v35 = vpop.permute.xlu0 %7510  ;;  %v7770_v49 = vld [vmem:[#allocation3 + $0x102] sm:$0xff]  ;;  %v14646_v38 = vld [vmem:[#allocation3 + $0x112] sm:$0xff] }
 0x738   :  { %v6342_v21 = vsel %vm5959_vm12, %v5958_v44, -inf  ;;  %vm15123_vm7 = vcmask 1042434   ;;  %vm15124_vm11 = vcmask 1043459   ;;  %7553 = vst.msk [vmem:[#allocation4 + $0x30] sm:$0xff] %vm7546_vm9, %v7511_v35  ;;  %v7805_v26 = vpop.permute.xlu2 %7804  ;;  %vm15125_vm3 = vcmask 1047559  }
 0x739   :  { %v7002_v46 = vsel %vm15123_vm7, %v7001_v7, %v7000_v23  ;;  %v6343_v39 = vmax.f32 %v6341_v24, %v6342_v21  ;;  %v6472_v30 = vadd.f32 %v14256_v10, %v6334_v22  ;;  %v6473_v29 = vadd.f32 %v14256_v10, %v6337_v32  ;;  %7651 = vst.msk [vmem:[#allocation4 + $0x30] sm:$0xff] %vm7644_vm4, %v7609_v59  ;;  %v14640_v22 = vld [vmem:[#allocation3 + $0x111] sm:$0xff] }
 0x73a   :  { %v6474_v42 = vadd.f32 %v14256_v10, %v6340_v62  ;;  %v7004_v12 = vsel %vm15124_vm11, %v7003_v48, %v7002_v46  ;;  %7748 = vst.msk [vmem:[#allocation4 + $0x30] sm:$0xff] %vm7741_vm15, %v14484_v18  ;;  %7231 = vrot.lane.b32.xlu0 %v14470_v25, %s9474_s1  ;;  %7425 = vrot.lane.b32.xlu2 %v7672_v45, %s9473_s22  ;;  %vm15126_vm7 = vcmask 130112   ;;  %vm15127_vm11 = vcmask 261312  }
 0x73b   :  { %v6475_v3 = vadd.f32 %v14256_v10, %v6343_v39  ;;  %v6600_v51 = vmax.f32 %v6472_v30, 0.0  ;;  %v6601_v33 = vmax.f32 %v6473_v29, 0.0  ;;  %v8016_v9 = vrot.slane %v7952_v6, 2 }
 0x73c   :  { %v6602_v37 = vmax.f32 %v6474_v42, 0.0  ;;  %v8017_v52 = vrot.slane %v7952_v6, 4  ;;  %v8018_v57 = vrot.slane %v7952_v6, 6  ;;  %v8163_v15 = vsel %vm8106_vm5, %v7952_v6, -inf }
 0x73d   :  { %v6603_v31 = vmax.f32 %v6475_v3, 0.0  ;;  %v7005_v17 = vrot.slane %v6600_v51, 4  ;;  %v7007_v19 = vrot.slane %v6601_v33, 3  ;;  %7328 = vrot.lane.b32.xlu1 %v14244_v58, %s9469_s25  ;;  %v8164_v8 = vrot.slane %v8163_v15, 4 }
 0x73e   :  { %v7009_v43 = vrot.slane %v6602_v37, 2  ;;  %v8177_v16 = vsel %vm8106_vm5, %v8017_v52, -inf  ;;  %v8184_v2 = vsel %vm8106_vm5, %v8018_v57, -inf }
 0x73f   :  { %v7006_v10 = vsel %vm6792_vm0, %v7005_v17, %v7004_v12  ;;  %v7011_v40 = vrot.slane %v6603_v31, 1  ;;  %v7125_v27 = vpop.permute.xlu1 %7124  ;;  %v7803_v58 = vpop.permute.xlu0 %7802  ;;  %v8178_v44 = vrot.slane %v8177_v16, 4  ;;  %v8185_v36 = vrot.slane %v8184_v2, 4 }
 0x740   :  { %v7008_v34 = vsel %vm6795_vm1, %v7007_v19, %v7006_v10  ;;  %7166 = vst.msk [vmem:[#allocation4 + $0x38] sm:$0xff] %vm15126_vm7, %v7125_v27  ;;  %v7321_v25 = vpop.permute.xlu2 %7320  ;;  %v8165_v50 = vmax.f32 %v8163_v15, %v8164_v8 }
 0x741   :  { %v7010_v18 = vsel %vm6798_vm2, %v7009_v43, %v7008_v34  ;;  %7263 = vst.msk [vmem:[#allocation4 + $0x38] sm:$0xff] %vm7255_vm6, %v14530_v41  ;;  %v8186_v48 = vmax.f32 %v8184_v2, %v8185_v36 }
 0x742   :  { %v7012_v20 = vsel %vm15125_vm3, %v7011_v40, %v7010_v18  ;;  %7845 = vst.msk [vmem:[#allocation4 + $0x30] sm:$0xff] %vm7838_vm14, %v7803_v58  ;;  %7522 = vrot.lane.b32.xlu0 %v14566_v13, %s9477_s26  ;;  %7717 = vrot.lane.b32.xlu2 %v14608_v47, %s9475_s23  ;;  %vm15128_vm3 = vmmov %vm15126_vm7  ;;  %v8166_v21 = vrot.slane %v8165_v50, 2 }
 0x743   :  { %7045 = vst.msk [vmem:[#allocation3 + $0x121] sm:$0xff] %vm5959_vm12, %v7012_v20  ;;  %vm15129_vm7 = vmmov %vm15128_vm3  ;;  %v8187_v29 = vrot.slane %v8186_v48, 2 }
 0x744   :  { %v8167_v42 = vmax.f32 %v8165_v50, %v8166_v21 }
 0x745   :  { %7620 = vrot.lane.b32.xlu1 %v14504_v14, %s9476_s24  ;;  %v8188_v55 = vmax.f32 %v8186_v48, %v8187_v29 }
 0x746   :  { %v8168_v20 = vrot.slane %v8167_v42, 1 }
 0x747   :  { %v7416_v28 = vpop.permute.xlu1 %7415  ;;  %v7319_v53 = vpop.permute.xlu0 %7318 }
 0x748   :  { %7360 = vst.msk [vmem:[#allocation4 + $0x38] sm:$0xff] %vm15127_vm11, %v7319_v53  ;;  %v7613_v1 = vpop.permute.xlu2 %7612 }
 0x749   :  { %7457 = vst.msk [vmem:[#allocation4 + $0x38] sm:$0xff] %vm7449_vm8, %v7416_v28  ;;  %v7861_v41 = vld [vmem:[#allocation4 + $0x30] sm:$0xff] }
 0x74a   :  { %7554 = vst.msk [vmem:[#allocation4 + $0x38] sm:$0xff] %vm7546_vm9, %v14552_v11  ;;  %9383 = vmatmul.msk.f32.gmra.mxu1 %vm7880_vm13, %v7861_v41  ;;  %7814 = vrot.lane.b32.xlu0 %v7770_v49, %s9478_s27  ;;  %v8170_v11 = vsel %vm8106_vm5, %v8016_v9, -inf  ;;  %v7578_v6 = vld [vmem:[#allocation3 + $0x120] sm:$0xff] }
 0x74b   :  { %7233 = vrot.lane.b32.xlu2 %v14566_v13, %s9474_s1  ;;  %v8171_v23 = vrot.slane %v8170_v11, 4  ;;  %v7772_v29 = vld [vmem:[#allocation3 + $0x122] sm:$0xff] }
 0x74d   :  { %7136 = vrot.lane.b32.xlu1 %v7672_v45, %s9472_s21  ;;  %v8172_v13 = vmax.f32 %v8170_v11, %v8171_v23  ;;  %v8179_v45 = vmax.f32 %v8177_v16, %v8178_v44 }
 0x74f   :  { %v7708_v61 = vpop.permute.xlu1 %7707  ;;  %v7611_v60 = vpop.permute.xlu0 %7610  ;;  %v8173_v39 = vrot.slane %v8172_v13, 2  ;;  %v8180_v30 = vrot.slane %v8179_v45, 2 }
 0x750   :  { %7652 = vst.msk [vmem:[#allocation4 + $0x38] sm:$0xff] %vm7644_vm4, %v7611_v60  ;;  %v7129_v0 = vpop.permute.xlu2 %7128 }
 0x751   :  { %7749 = vst.msk [vmem:[#allocation4 + $0x38] sm:$0xff] %vm7741_vm15, %v7708_v61  ;;  %v8174_v33 = vmax.f32 %v8172_v13, %v8173_v39  ;;  %v8181_v37 = vmax.f32 %v8179_v45, %v8180_v30 }
 0x752   :  { %7846 = vst.msk [vmem:[#allocation4 + $0x38] sm:$0xff] %vm7838_vm14, %v7805_v26  ;;  %7330 = vrot.lane.b32.xlu0 %v14504_v14, %s9469_s25 }
 0x753   :  { %7168 = vst.msk [vmem:[#allocation4 + $0x48] sm:$0xff] %vm15128_vm3, %v7129_v0  ;;  %7524 = vrot.lane.b32.xlu2 %v7770_v49, %s9477_s26  ;;  %v8175_v28 = vrot.slane %v8174_v33, 1  ;;  %v8182_v53 = vrot.slane %v8181_v37, 1  ;;  %v8169_v0 = vmax.f32 %v8167_v42, %v8168_v20  ;;  %vm15130_vm3 = vmmov %vm15127_vm11  ;;  %v7675_v42 = vld [vmem:[#allocation3 + $0x121] sm:$0xff] }
 0x755   :  { %7427 = vrot.lane.b32.xlu1 %v14608_v47, %s9473_s22  ;;  %v8176_v11 = vmax.f32 %v8174_v33, %v8175_v28  ;;  %v8183_v16 = vmax.f32 %v8181_v37, %v8182_v53  ;;  %v8568_v13 = vsel %vm8555_vm10, %v8169_v0, -inf }
 0x757   :  { %v7224_v63 = vpop.permute.xlu1 %7223  ;;  %v7127_v7 = vpop.permute.xlu0 %7126  ;;  %v14681_v21 = vsel %vm8555_vm10, %v8176_v11, -inf  ;;  %v14684_v39 = vsel %vm8555_vm10, %v8183_v16, -inf }
 0x758   :  { %7167 = vst.msk [vmem:[#allocation4 + $0x40] sm:$0xff] %vm15129_vm7, %v7127_v7  ;;  %v14635_v24 = vpop.permute.xlu2 %7419 }
 0x759   :  { %7264 = vst.msk [vmem:[#allocation4 + $0x40] sm:$0xff] %vm7255_vm6, %v7224_v63  ;;  %v7862_v14 = vld [vmem:[#allocation4 + $0x38] sm:$0xff] }
 0x75a   :  { %7361 = vst.msk [vmem:[#allocation4 + $0x40] sm:$0xff] %vm15127_vm11, %v7321_v25  ;;  %9384 = vmatmul.msk.f32.gmra.mxu1 %vm7880_vm13, %v7862_v14  ;;  %7622 = vrot.lane.b32.xlu0 %v14591_v54, %s9476_s24  ;;  %vm15132_vm11 = vmmov %vm15129_vm7 }
 0x75b   :  { %7816 = vrot.lane.b32.xlu2 %v14646_v38, %s9478_s27 }
 0x75d   :  { %7719 = vrot.lane.b32.xlu1 %v14640_v22, %s9475_s23 }
 0x75f   :  { %v7515_v32 = vpop.permute.xlu1 %7514  ;;  %v7418_v62 = vpop.permute.xlu0 %7417 }
 0x760   :  { %7458 = vst.msk [vmem:[#allocation4 + $0x40] sm:$0xff] %vm7449_vm8, %v7418_v62  ;;  %v14651_v46 = vpop.permute.xlu2 %7711  ;;  %v7955_v3 = vpop.f32.mrf.mxu1 }
 0x761   :  { %7555 = vst.msk [vmem:[#allocation4 + $0x40] sm:$0xff] %vm7546_vm9, %v7515_v32  ;;  %v8019_v51 = vrot.slane %v7955_v3, 2  ;;  %v8020_v59 = vrot.slane %v7955_v3, 4  ;;  %v8021_v35 = vrot.slane %v7955_v3, 6  ;;  %v8191_v12 = vsel %vm8106_vm5, %v7955_v3, -inf }
 0x762   :  { %7653 = vst.msk [vmem:[#allocation4 + $0x40] sm:$0xff] %vm7644_vm4, %v7613_v1  ;;  %7138 = vrot.lane.b32.xlu0 %v14608_v47, %s9472_s21  ;;  %v8192_v26 = vrot.slane %v8191_v12, 4  ;;  %v8189_v1 = vrot.slane %v8188_v55, 1 }
 0x763   :  { %7332 = vrot.lane.b32.xlu2 %v14591_v54, %s9469_s25  ;;  %v8198_v19 = vsel %vm8106_vm5, %v8019_v51, -inf  ;;  %v8205_v43 = vsel %vm8106_vm5, %v8020_v59, -inf  ;;  %v8212_v10 = vsel %vm8106_vm5, %v8021_v35, -inf }
 0x764   :  { %v8193_v5 = vmax.f32 %v8191_v12, %v8192_v26  ;;  %v8199_v34 = vrot.slane %v8198_v19, 4  ;;  %v8206_v54 = vrot.slane %v8205_v43, 4  ;;  %v8213_v18 = vrot.slane %v8212_v10, 4 }
 0x765   :  { %7235 = vrot.lane.b32.xlu1 %v7770_v49, %s9474_s1  ;;  %v8190_v63 = vmax.f32 %v8188_v55, %v8189_v1 }
 0x766   :  { %v8194_v27 = vrot.slane %v8193_v5, 2  ;;  %v8200_v58 = vmax.f32 %v8198_v19, %v8199_v34  ;;  %v8207_v25 = vmax.f32 %v8205_v43, %v8206_v54  ;;  %v8214_v47 = vmax.f32 %v8212_v10, %v8213_v18  ;;  %v7057_v43 = vld [vmem:[#allocation3 + $0xd0] sm:$0xff] }
 0x767   :  { %v7807_v31 = vpop.permute.xlu1 %7806  ;;  %v7710_v17 = vpop.permute.xlu0 %7709  ;;  %v14687_v3 = vsel %vm8555_vm10, %v8190_v63, -inf  ;;  %7073 = vst.msk [vmem:[#allocation4 + $0x58] sm:$0xff] %vm5959_vm12, %v7057_v43  ;;  %vm15131_vm12 = vmmov %vm15130_vm3 }
 0x768   :  { %7750 = vst.msk [vmem:[#allocation4 + $0x40] sm:$0xff] %vm7741_vm15, %v7710_v17  ;;  %v14665_v40 = vpop.permute.xlu2 %7227  ;;  %v8195_v41 = vmax.f32 %v8193_v5, %v8194_v27  ;;  %v8201_v49 = vrot.slane %v8200_v58, 2  ;;  %v8208_v61 = vrot.slane %v8207_v25, 2  ;;  %v8215_v60 = vrot.slane %v8214_v47, 2  ;;  %v7773_v27 = vld [vmem:[#allocation3 + $0x132] sm:$0xff] }
 0x769   :  { %7847 = vst.msk [vmem:[#allocation4 + $0x40] sm:$0xff] %vm7838_vm14, %v7807_v31 }
 0x76a   :  { %7429 = vrot.lane.b32.xlu0 %v14640_v22, %s9473_s22  ;;  %v8196_v9 = vrot.slane %v8195_v41, 1  ;;  %v8202_v52 = vmax.f32 %v8200_v58, %v8201_v49  ;;  %v8209_v57 = vmax.f32 %v8207_v25, %v8208_v61  ;;  %v8216_v15 = vmax.f32 %v8214_v47, %v8215_v60 }
 0x76b   :  { %7624 = vrot.lane.b32.xlu2 %v7578_v6, %s9476_s24 }
 0x76c   :  { %v8197_v2 = vmax.f32 %v8195_v41, %v8196_v9  ;;  %v8203_v14 = vrot.slane %v8202_v52, 1  ;;  %v8210_v23 = vrot.slane %v8209_v57, 1  ;;  %v8217_v44 = vrot.slane %v8216_v15, 1 }
 0x76d   :  { %7526 = vrot.lane.b32.xlu1 %v14646_v38, %s9477_s26 }
 0x76e   :  { %v8204_v45 = vmax.f32 %v8202_v52, %v8203_v14  ;;  %v8211_v48 = vmax.f32 %v8209_v57, %v8210_v23  ;;  %v8218_v32 = vmax.f32 %v8216_v15, %v8217_v44  ;;  %v8569_v62 = vsel %vm8555_vm10, %v8197_v2, -inf }
 0x76f   :  { %v7323_v7 = vpop.permute.xlu1 %7322  ;;  %v7226_v8 = vpop.permute.xlu0 %7225  ;;  %v8570_v30 = vmax.f32 %v8568_v13, %v8569_v62 }
 0x770   :  { %7265 = vst.msk [vmem:[#allocation4 + $0x48] sm:$0xff] %vm7255_vm6, %v7226_v8  ;;  %v7519_v36 = vpop.permute.xlu2 %7518  ;;  %v7863_v50 = vld [vmem:[#allocation4 + $0x40] sm:$0xff]  ;;  %v14690_v51 = vsel %vm8555_vm10, %v8204_v45, -inf  ;;  %v14693_v59 = vsel %vm8555_vm10, %v8211_v48, -inf }
 0x771   :  { %7362 = vst.msk [vmem:[#allocation4 + $0x48] sm:$0xff] %vm15130_vm3, %v7323_v7  ;;  %9385 = vmatmul.msk.f32.gmra.mxu1 %vm7880_vm13, %v7863_v50  ;;  %v8573_v35 = vmax.f32 %v14681_v21, %v14690_v51  ;;  %v8576_v12 = vmax.f32 %v14684_v39, %v14693_v59  ;;  %v8660_v37 = vadd.f32 %v14493_v56, %v8570_v30  ;;  %vm15133_vm3 = vmmov %vm15129_vm7 }
 0x772   :  { %7459 = vst.msk [vmem:[#allocation4 + $0x48] sm:$0xff] %vm7449_vm8, %v14635_v24  ;;  %v14696_v24 = vsel %vm8555_vm10, %v8218_v32, -inf  ;;  %7721 = vrot.lane.b32.xlu0 %v7675_v42, %s9475_s23 }
 0x773   :  { %v8579_v33 = vmax.f32 %v14687_v3, %v14696_v24  ;;  %7140 = vrot.lane.b32.xlu2 %v14640_v22, %s9472_s21  ;;  %v8692_v26 = vmax.f32 %v8660_v37, 0.0 }
 0x775   :  { %7818 = vrot.lane.b32.xlu1 %v7772_v29, %s9478_s27  ;;  %v8758_v19 = vrot.slane %v8692_v26, 4 }
 0x777   :  { %v7615_v55 = vpop.permute.xlu1 %7614  ;;  %v7517_v31 = vpop.permute.xlu0 %7516  ;;  %v14715_v10 = vsel %vm6792_vm0, %v8758_v19, %v14547_v4  ;;  %v7676_v4 = vld [vmem:[#allocation3 + $0x131] sm:$0xff] }
 0x778   :  { %7556 = vst.msk [vmem:[#allocation4 + $0x48] sm:$0xff] %vm7546_vm9, %v7517_v31  ;;  %v7811_v17 = vpop.permute.xlu2 %7810 }
 0x779   :  { %7654 = vst.msk [vmem:[#allocation4 + $0x48] sm:$0xff] %vm7644_vm4, %v7615_v55 }
 0x77a   :  { %7751 = vst.msk [vmem:[#allocation4 + $0x48] sm:$0xff] %vm7741_vm15, %v14651_v46  ;;  %7237 = vrot.lane.b32.xlu0 %v14646_v38, %s9474_s1  ;;  %v7579_v46 = vld [vmem:[#allocation3 + $0x130] sm:$0xff] }
 0x77b   :  { %7431 = vrot.lane.b32.xlu2 %v7675_v42, %s9473_s22 }
 0x77d   :  { %7334 = vrot.lane.b32.xlu1 %v7578_v6, %s9469_s25  ;;  %s9479_s25 = smov [#allocation5]  }
 0x77e   :  { %s8914_s21 = sshll.u32 %s9479_s25, 4  ;;  %s8915_s21 = int_to_ptr.vmem [resolvable:$true] %s8914_s21 }
 0x77f   :  { %v7131_v22 = vpop.permute.xlu1 %7130  ;;  %v7809_v5 = vpop.permute.xlu0 %7808 }
 0x780   :  { %7169 = vst.msk [vmem:[#allocation4 + $0x50] sm:$0xff] %vm15129_vm7, %v7131_v22  ;;  %v7327_v34 = vpop.permute.xlu2 %7326  ;;  %vm15134_vm7 = vmmov %vm15131_vm12 }
 0x781   :  { %7266 = vst.msk [vmem:[#allocation4 + $0x50] sm:$0xff] %vm7255_vm6, %v14665_v40 }
 0x782   :  { %7848 = vst.msk [vmem:[#allocation4 + $0x48] sm:$0xff] %vm7838_vm14, %v7809_v5  ;;  %7528 = vrot.lane.b32.xlu0 %v7772_v29, %s9477_s26 }
 0x783   :  { %7723 = vrot.lane.b32.xlu2 %v7676_v4, %s9475_s23 }
 0x785   :  { %7626 = vrot.lane.b32.xlu1 %v7579_v46, %s9476_s24 }
 0x787   :  { %v7422_v38 = vpop.permute.xlu1 %7421  ;;  %v7325_v54 = vpop.permute.xlu0 %7324 }
 0x788   :  { %7363 = vst.msk [vmem:[#allocation4 + $0x50] sm:$0xff] %vm15131_vm12, %v7325_v54  ;;  %v7619_v18 = vpop.permute.xlu2 %7618  ;;  %vm15135_vm12 = vmmov %vm15134_vm7 }
 0x789   :  { %7460 = vst.msk [vmem:[#allocation4 + $0x50] sm:$0xff] %vm7449_vm8, %v7422_v38  ;;  %v7864_v20 = vld [vmem:[#allocation4 + $0x48] sm:$0xff] }
 0x78a   :  { %7557 = vst.msk [vmem:[#allocation4 + $0x50] sm:$0xff] %vm7546_vm9, %v7519_v36  ;;  %9386 = vmatmul.msk.f32.gmra.mxu1 %vm7880_vm13, %v7864_v20  ;;  %7820 = vrot.lane.b32.xlu0 %v7773_v27, %s9478_s27 }
 0x78b   :  { %v7958_v41 = vpop.f32.mrf.mxu1 }
 0x78c   :  { %v8022_v49 = vrot.slane %v7958_v41, 2  ;;  %v8023_v61 = vrot.slane %v7958_v41, 4  ;;  %v8024_v60 = vrot.slane %v7958_v41, 6  ;;  %v8219_v6 = vsel %vm8106_vm5, %v7958_v41, -inf }
 0x78d   :  { %v8220_v11 = vrot.slane %v8219_v6, 4 }
 0x78e   :  { %v8226_v57 = vsel %vm8106_vm5, %v8022_v49, -inf  ;;  %v8233_v15 = vsel %vm8106_vm5, %v8023_v61, -inf  ;;  %v8240_v16 = vsel %vm8106_vm5, %v8024_v60, -inf }
 0x78f   :  { %v7714_v40 = vpop.permute.xlu1 %7713  ;;  %v7617_v58 = vpop.permute.xlu0 %7616  ;;  %v8227_v63 = vrot.slane %v8226_v57, 4  ;;  %v8234_v7 = vrot.slane %v8233_v15, 4  ;;  %v8241_v8 = vrot.slane %v8240_v16, 4  ;;  %v8221_v2 = vmax.f32 %v8219_v6, %v8220_v11 }
 0x790   :  { %7655 = vst.msk [vmem:[#allocation4 + $0x50] sm:$0xff] %vm7644_vm4, %v7617_v58  ;;  %v7135_v25 = vpop.permute.xlu2 %7134 }
 0x791   :  { %7752 = vst.msk [vmem:[#allocation4 + $0x50] sm:$0xff] %vm7741_vm15, %v7714_v40  ;;  %v8228_v44 = vmax.f32 %v8226_v57, %v8227_v63  ;;  %v8235_v36 = vmax.f32 %v8233_v15, %v8234_v7  ;;  %v8242_v13 = vmax.f32 %v8240_v16, %v8241_v8  ;;  %v8222_v45 = vrot.slane %v8221_v2, 2 }
 0x792   :  { %7849 = vst.msk [vmem:[#allocation4 + $0x50] sm:$0xff] %vm7838_vm14, %v7811_v17 }
 0x793   :  { %7171 = vst.msk [vmem:[#allocation4 + $0x60] sm:$0xff] %vm15132_vm11, %v7135_v25  ;;  %v8229_v48 = vrot.slane %v8228_v44, 2  ;;  %v8236_v32 = vrot.slane %v8235_v36, 2  ;;  %v8243_v62 = vrot.slane %v8242_v13, 2  ;;  %v8223_v30 = vmax.f32 %v8221_v2, %v8222_v45  ;;  %vm15136_vm11 = vmmov %vm15133_vm3 }
 0x795   :  { %v8230_v19 = vmax.f32 %v8228_v44, %v8229_v48  ;;  %v8237_v43 = vmax.f32 %v8235_v36, %v8236_v32  ;;  %v8244_v46 = vmax.f32 %v8242_v13, %v8243_v62  ;;  %v8224_v58 = vrot.slane %v8223_v30, 1 }
 0x797   :  { %v7230_v47 = vpop.permute.xlu1 %7229  ;;  %v7133_v28 = vpop.permute.xlu0 %7132  ;;  %v8231_v41 = vrot.slane %v8230_v19, 1  ;;  %v8238_v49 = vrot.slane %v8237_v43, 1  ;;  %v8245_v61 = vrot.slane %v8244_v46, 1  ;;  %v8225_v57 = vmax.f32 %v8223_v30, %v8224_v58 }
 0x798   :  { %7170 = vst.msk [vmem:[#allocation4 + $0x58] sm:$0xff] %vm15133_vm3, %v7133_v28  ;;  %v7426_v53 = vpop.permute.xlu2 %7425  ;;  %vm15137_vm3 = vcmask 1041409  }
 0x799   :  { %7267 = vst.msk [vmem:[#allocation4 + $0x58] sm:$0xff] %vm7255_vm6, %v7230_v47  ;;  %v7865_v1 = vld [vmem:[#allocation4 + $0x50] sm:$0xff]  ;;  %v8232_v2 = vmax.f32 %v8230_v19, %v8231_v41  ;;  %v8580_v48 = vsel %vm8555_vm10, %v8225_v57, -inf }
 0x79a   :  { %7364 = vst.msk [vmem:[#allocation4 + $0x58] sm:$0xff] %vm15134_vm7, %v7327_v34  ;;  %9387 = vmatmul.msk.f32.gmra.mxu1 %vm7880_vm13, %v7865_v1  ;;  %vm15138_vm7 = vcmask 1042434  }
 0x79f   :  { %v7521_v0 = vpop.permute.xlu1 %7520  ;;  %v7424_v9 = vpop.permute.xlu0 %7423 }
 0x7a0   :  { %7461 = vst.msk [vmem:[#allocation4 + $0x58] sm:$0xff] %vm7449_vm8, %v7424_v9  ;;  %v14744_v52 = vpop.permute.xlu2 %7717 }
 0x7a1   :  { %7558 = vst.msk [vmem:[#allocation4 + $0x58] sm:$0xff] %vm7546_vm9, %v7521_v0 }
 0x7a2   :  { %7656 = vst.msk [vmem:[#allocation4 + $0x58] sm:$0xff] %vm7644_vm4, %v7619_v18 }
 0x7a7   :  { %v7813_v14 = vpop.permute.xlu1 %7812  ;;  %v7716_v23 = vpop.permute.xlu0 %7715 }
 0x7a8   :  { %7753 = vst.msk [vmem:[#allocation4 + $0x58] sm:$0xff] %vm7741_vm15, %v7716_v23  ;;  %v14752_v50 = vpop.permute.xlu2 %7233  ;;  %v8246_v23 = vmax.f32 %v8244_v46, %v8245_v61 }
 0x7a9   :  { %7850 = vst.msk [vmem:[#allocation4 + $0x58] sm:$0xff] %vm7838_vm14, %v7813_v14  ;;  %v8239_v14 = vmax.f32 %v8237_v43, %v8238_v49 }
 0x7ae   :  { %v7961_v29 = vpop.f32.mrf.mxu1 }
 0x7af   :  { %v8025_v42 = vrot.slane %v7961_v29, 2  ;;  %v8026_v37 = vrot.slane %v7961_v29, 4  ;;  %v8027_v26 = vrot.slane %v7961_v29, 6  ;;  %v8247_v55 = vsel %vm8106_vm5, %v7961_v29, -inf  ;;  %v7329_v31 = vpop.permute.xlu1 %7328  ;;  %v7232_v17 = vpop.permute.xlu0 %7231 }
 0x7b0   :  { %v8248_v22 = vrot.slane %v8247_v55, 4  ;;  %7268 = vst.msk [vmem:[#allocation4 + $0x60] sm:$0xff] %vm7255_vm6, %v7232_v17  ;;  %v14757_v5 = vpop.permute.xlu2 %7524  ;;  %v7866_v34 = vld [vmem:[#allocation4 + $0x58] sm:$0xff] }
 0x7b1   :  { %v8254_v4 = vsel %vm8106_vm5, %v8025_v42, -inf  ;;  %v8261_v38 = vsel %vm8106_vm5, %v8026_v37, -inf  ;;  %v8268_v54 = vsel %vm8106_vm5, %v8027_v26, -inf  ;;  %7365 = vst.msk [vmem:[#allocation4 + $0x60] sm:$0xff] %vm15135_vm12, %v7329_v31  ;;  %9388 = vmatmul.msk.f32.gmra.mxu1 %vm7880_vm13, %v7866_v34  ;;  %v8583_v42 = vsel %vm8555_vm10, %v8232_v2, -inf }
 0x7b2   :  { %v8249_v18 = vmax.f32 %v8247_v55, %v8248_v22  ;;  %v8255_v20 = vrot.slane %v8254_v4, 4  ;;  %v8262_v27 = vrot.slane %v8261_v38, 4  ;;  %v8269_v40 = vrot.slane %v8268_v54, 4  ;;  %7462 = vst.msk [vmem:[#allocation4 + $0x60] sm:$0xff] %vm7449_vm8, %v7426_v53 }
 0x7b3   :  { %v8586_v37 = vsel %vm8555_vm10, %v8239_v14, -inf  ;;  %v8589_v55 = vsel %vm8555_vm10, %v8246_v23, -inf  ;;  %vm15139_vm12 = vcmask 1043459  }
 0x7b4   :  { %v8250_v25 = vrot.slane %v8249_v18, 2  ;;  %v8256_v47 = vmax.f32 %v8254_v4, %v8255_v20  ;;  %v8263_v28 = vmax.f32 %v8261_v38, %v8262_v27  ;;  %v8270_v1 = vmax.f32 %v8268_v54, %v8269_v40 }
 0x7b6   :  { %v8251_v60 = vmax.f32 %v8249_v18, %v8250_v25  ;;  %v8257_v6 = vrot.slane %v8256_v47, 2  ;;  %v8264_v0 = vrot.slane %v8263_v28, 2  ;;  %v8271_v9 = vrot.slane %v8270_v1, 2 }
 0x7b7   :  { %v7621_v15 = vpop.permute.xlu1 %7620  ;;  %v7523_v11 = vpop.permute.xlu0 %7522 }
 0x7b8   :  { %v8252_v16 = vrot.slane %v8251_v60, 1  ;;  %v8258_v63 = vmax.f32 %v8256_v47, %v8257_v6  ;;  %v8265_v7 = vmax.f32 %v8263_v28, %v8264_v0  ;;  %v8272_v8 = vmax.f32 %v8270_v1, %v8271_v9  ;;  %7559 = vst.msk [vmem:[#allocation4 + $0x60] sm:$0xff] %vm7546_vm9, %v7523_v11  ;;  %v14766_v53 = vpop.permute.xlu2 %7816 }
 0x7b9   :  { %7657 = vst.msk [vmem:[#allocation4 + $0x60] sm:$0xff] %vm7644_vm4, %v7621_v15 }
 0x7ba   :  { %v8253_v44 = vmax.f32 %v8251_v60, %v8252_v16  ;;  %v8259_v36 = vrot.slane %v8258_v63, 1  ;;  %v8266_v13 = vrot.slane %v8265_v7, 1  ;;  %v8273_v45 = vrot.slane %v8272_v8, 1  ;;  %7754 = vst.msk [vmem:[#allocation4 + $0x60] sm:$0xff] %vm7741_vm15, %v14744_v52 }
 0x7bc   :  { %v8260_v32 = vmax.f32 %v8258_v63, %v8259_v36  ;;  %v8267_v62 = vmax.f32 %v8265_v7, %v8266_v13  ;;  %v8274_v30 = vmax.f32 %v8272_v8, %v8273_v45  ;;  %v8581_v29 = vsel %vm8555_vm10, %v8253_v44, -inf }
 0x7bd   :  { %v8582_v26 = vmax.f32 %v8580_v48, %v8581_v29 }
 0x7be   :  { %v8584_v31 = vsel %vm8555_vm10, %v8260_v32, -inf  ;;  %v8587_v17 = vsel %vm8555_vm10, %v8267_v62, -inf  ;;  %v8590_v52 = vsel %vm8555_vm10, %v8274_v30, -inf }
 0x7bf   :  { %v8585_v19 = vmax.f32 %v8583_v42, %v8584_v31  ;;  %v8588_v43 = vmax.f32 %v8586_v37, %v8587_v17  ;;  %v8591_v22 = vmax.f32 %v8589_v55, %v8590_v52  ;;  %v7137_v34 = vpop.permute.xlu1 %7136  ;;  %v7815_v46 = vpop.permute.xlu0 %7814  ;;  %v8664_v38 = vadd.f32 %v14493_v56, %v8582_v26 }
 0x7c0   :  { %7172 = vst.msk [vmem:[#allocation4 + $0x68] sm:$0xff] %vm15136_vm11, %v7137_v34  ;;  %v14780_v4 = vpop.permute.xlu2 %7332  ;;  %vm15140_vm11 = vcmask 261312  }
 0x7c1   :  { %v8665_v54 = vadd.f32 %v14493_v56, %v8585_v19  ;;  %v8666_v18 = vadd.f32 %v14493_v56, %v8588_v43  ;;  %v8667_v20 = vadd.f32 %v14493_v56, %v8591_v22  ;;  %7269 = vst.msk [vmem:[#allocation4 + $0x68] sm:$0xff] %vm7255_vm6, %v14752_v50  ;;  %v8696_v25 = vmax.f32 %v8664_v38, 0.0 }
 0x7c2   :  { %7851 = vst.msk [vmem:[#allocation4 + $0x60] sm:$0xff] %vm7838_vm14, %v7815_v46 }
 0x7c3   :  { %v8697_v27 = vmax.f32 %v8665_v54, 0.0  ;;  %v8698_v40 = vmax.f32 %v8666_v18, 0.0  ;;  %v8699_v58 = vmax.f32 %v8667_v20, 0.0 }
 0x7c5   :  { %v8766_v47 = vrot.slane %v8697_v27, 7  ;;  %v8768_v28 = vrot.slane %v8698_v40, 6  ;;  %v8770_v41 = vrot.slane %v8699_v58, 5 }
 0x7c7   :  { %v8767_v1 = vsel %vm15137_vm3, %v8766_v47, %v8696_v25  ;;  %v7964_v49 = vpop.f32.mrf.mxu1  ;;  %v7428_v61 = vpop.permute.xlu1 %7427  ;;  %vm15141_vm3 = vcmask 130112  }
 0x7c8   :  { %v8769_v60 = vsel %vm15138_vm7, %v8768_v28, %v8767_v1  ;;  %v8028_v6 = vrot.slane %v7964_v49, 2  ;;  %v8029_v56 = vrot.slane %v7964_v49, 4  ;;  %v8030_v0 = vrot.slane %v7964_v49, 6  ;;  %v7331_v9 = vpop.permute.xlu0 %7330  ;;  %v14791_v50 = vpop.permute.xlu2 %7624  ;;  %vm15142_vm7 = vmmov %vm15141_vm3 }
 0x7c9   :  { %v14794_v57 = vsel %vm15139_vm12, %v8770_v41, %v8769_v60  ;;  %v8275_v15 = vsel %vm8106_vm5, %v7964_v49, -inf  ;;  %7366 = vst.msk [vmem:[#allocation4 + $0x68] sm:$0xff] %vm15140_vm11, %v7331_v9  ;;  %v7867_v11 = vld [vmem:[#allocation4 + $0x60] sm:$0xff]  ;;  %vm15143_vm12 = vmmov %vm15140_vm11 }
 0x7ca   :  { %v8282_v16 = vsel %vm8106_vm5, %v8028_v6, -inf  ;;  %v8289_v63 = vsel %vm8106_vm5, %v8029_v56, -inf  ;;  %7463 = vst.msk [vmem:[#allocation4 + $0x68] sm:$0xff] %vm7449_vm8, %v7428_v61  ;;  %9389 = vmatmul.msk.f32.gmra.mxu1 %vm7880_vm13, %v7867_v11  ;;  %v8276_v7 = vrot.slane %v8275_v15, 4  ;;  %v8296_v8 = vsel %vm8106_vm5, %v8030_v0, -inf }
 0x7cb   :  { %7560 = vst.msk [vmem:[#allocation4 + $0x68] sm:$0xff] %vm7546_vm9, %v14757_v5  ;;  %v8283_v2 = vrot.slane %v8282_v16, 4  ;;  %v8290_v14 = vrot.slane %v8289_v63, 4  ;;  %v8297_v23 = vrot.slane %v8296_v8, 4 }
 0x7cc   :  { %v8277_v44 = vmax.f32 %v8275_v15, %v8276_v7 }
 0x7cd   :  { %v8284_v45 = vmax.f32 %v8282_v16, %v8283_v2  ;;  %v8291_v48 = vmax.f32 %v8289_v63, %v8290_v14  ;;  %v8298_v62 = vmax.f32 %v8296_v8, %v8297_v23 }
 0x7ce   :  { %v8278_v30 = vrot.slane %v8277_v44, 2 }
 0x7cf   :  { %v7720_v36 = vpop.permute.xlu1 %7719  ;;  %v8285_v5 = vrot.slane %v8284_v45, 2  ;;  %v8292_v29 = vrot.slane %v8291_v48, 2  ;;  %v8299_v42 = vrot.slane %v8298_v62, 2 }
 0x7d0   :  { %v7623_v13 = vpop.permute.xlu0 %7622  ;;  %v7141_v32 = vpop.permute.xlu2 %7140  ;;  %v8279_v37 = vmax.f32 %v8277_v44, %v8278_v30 }
 0x7d1   :  { %7658 = vst.msk [vmem:[#allocation4 + $0x68] sm:$0xff] %vm7644_vm4, %v7623_v13  ;;  %v8286_v22 = vmax.f32 %v8284_v45, %v8285_v5  ;;  %v8293_v34 = vmax.f32 %v8291_v48, %v8292_v29 }
 0x7d2   :  { %7755 = vst.msk [vmem:[#allocation4 + $0x68] sm:$0xff] %vm7741_vm15, %v7720_v36  ;;  %v8280_v47 = vrot.slane %v8279_v37, 1 }
 0x7d3   :  { %7852 = vst.msk [vmem:[#allocation4 + $0x68] sm:$0xff] %vm7838_vm14, %v14766_v53  ;;  %v8300_v53 = vmax.f32 %v8298_v62, %v8299_v42  ;;  %v8287_v61 = vrot.slane %v8286_v22, 1  ;;  %v8294_v60 = vrot.slane %v8293_v34, 1 }
 0x7d4   :  { %7174 = vst.msk [vmem:[#allocation4 + $0x78] sm:$0xff] %vm15141_vm3, %v7141_v32 }
 0x7d5   :  { %v8301_v6 = vrot.slane %v8300_v53, 1  ;;  %v8288_v14 = vmax.f32 %v8286_v22, %v8287_v61  ;;  %v8295_v23 = vmax.f32 %v8293_v34, %v8294_v60  ;;  %v14852_v34 = vld [vmem:[%s15086_s4] ss:$0 sm:$0xff] }
 0x7d7   :  { %v7236_v26 = vpop.permute.xlu1 %7235  ;;  %v7967_v55 = vpop.f32.mrf.mxu1  ;;  %v8302_v44 = vmax.f32 %v8300_v53, %v8301_v6  ;;  %v14826_v42 = vsel %vm8555_vm10, %v8288_v14, -inf  ;;  %v8663_v6 = vadd.f32 %v14852_v34, %v8579_v33 }
 0x7d8   :  { %v7139_v31 = vpop.permute.xlu0 %7138  ;;  %v8031_v17 = vrot.slane %v7967_v55, 2  ;;  %v8032_v52 = vrot.slane %v7967_v55, 4  ;;  %v8033_v19 = vrot.slane %v7967_v55, 6  ;;  %v8303_v43 = vsel %vm8106_vm5, %v7967_v55, -inf }
 0x7d9   :  { %7173 = vst.msk [vmem:[#allocation4 + $0x70] sm:$0xff] %vm15142_vm7, %v7139_v31  ;;  %v8304_v46 = vrot.slane %v8303_v43, 4  ;;  %v14832_v55 = vsel %vm8555_vm10, %v8302_v44, -inf }
 0x7da   :  { %7270 = vst.msk [vmem:[#allocation4 + $0x70] sm:$0xff] %vm7255_vm6, %v7236_v26  ;;  %v8310_v38 = vsel %vm8106_vm5, %v8031_v17, -inf  ;;  %v8317_v54 = vsel %vm8106_vm5, %v8032_v52, -inf  ;;  %v8324_v18 = vsel %vm8106_vm5, %v8033_v19, -inf  ;;  %v7868_v20 = vld [vmem:[#allocation4 + $0x68] sm:$0xff] }
 0x7db   :  { %7367 = vst.msk [vmem:[#allocation4 + $0x70] sm:$0xff] %vm15143_vm12, %v14780_v4  ;;  %v8305_v27 = vmax.f32 %v8303_v43, %v8304_v46  ;;  %v8311_v40 = vrot.slane %v8310_v38, 4  ;;  %v8318_v58 = vrot.slane %v8317_v54, 4  ;;  %v8325_v25 = vrot.slane %v8324_v18, 4  ;;  %9390 = vmatmul.msk.f32.gmra.mxu1 %vm7880_vm13, %v7868_v20 }
 0x7dc   :  { %v8281_v4 = vmax.f32 %v8279_v37, %v8280_v47  ;;  %v14829_v37 = vsel %vm8555_vm10, %v8295_v23, -inf }
 0x7dd   :  { %v8306_v28 = vrot.slane %v8305_v27, 2  ;;  %v8312_v1 = vmax.f32 %v8310_v38, %v8311_v40  ;;  %v8319_v41 = vmax.f32 %v8317_v54, %v8318_v58  ;;  %v8326_v49 = vmax.f32 %v8324_v18, %v8325_v25 }
 0x7de   :  { %v8592_v32 = vsel %vm8555_vm10, %v8281_v4, -inf }
 0x7df   :  { %v8307_v56 = vmax.f32 %v8305_v27, %v8306_v28  ;;  %v8313_v0 = vrot.slane %v8312_v1, 2  ;;  %v8320_v9 = vrot.slane %v8319_v41, 2  ;;  %v8327_v15 = vrot.slane %v8326_v49, 2  ;;  %v7527_v11 = vpop.permute.xlu1 %7526  ;;  %v7432_v27 = vpop.permute.xlu2 %7431 }
 0x7e0   :  { %v7430_v16 = vpop.permute.xlu0 %7429 }
 0x7e1   :  { %v8308_v63 = vrot.slane %v8307_v56, 1  ;;  %v8314_v7 = vmax.f32 %v8312_v1, %v8313_v0  ;;  %v8321_v8 = vmax.f32 %v8319_v41, %v8320_v9  ;;  %v8328_v2 = vmax.f32 %v8326_v49, %v8327_v15  ;;  %7464 = vst.msk [vmem:[#allocation4 + $0x70] sm:$0xff] %vm7449_vm8, %v7430_v16  ;;  %v8833_v1 = vld [vmem:[%s15087_s5 + $0x8] sm:$0xff] }
 0x7e2   :  { %7561 = vst.msk [vmem:[#allocation4 + $0x70] sm:$0xff] %vm7546_vm9, %v7527_v11  ;;  %8858 = vmatpush.msrb.mxu2 %v8833_v1  ;;  %v8661_v41 = vadd.f32 %v14852_v34, %v8573_v35  ;;  %v8662_v49 = vadd.f32 %v14852_v34, %v8576_v12  ;;  %v8695_v9 = vmax.f32 %v8663_v6, 0.0 }
 0x7e3   :  { %v8309_v36 = vmax.f32 %v8307_v56, %v8308_v63  ;;  %v8315_v13 = vrot.slane %v8314_v7, 1  ;;  %v8322_v45 = vrot.slane %v8321_v8, 1  ;;  %v8329_v48 = vrot.slane %v8328_v2, 1  ;;  %7659 = vst.msk [vmem:[#allocation4 + $0x70] sm:$0xff] %vm7644_vm4, %v14791_v50 }
 0x7e4   :  { %v8693_v60 = vmax.f32 %v8661_v41, 0.0  ;;  %v8694_v56 = vmax.f32 %v8662_v49, 0.0  ;;  %v8764_v35 = vrot.slane %v8695_v9, 1 }
 0x7e5   :  { %v8316_v62 = vmax.f32 %v8314_v7, %v8315_v13  ;;  %v8323_v30 = vmax.f32 %v8321_v8, %v8322_v45  ;;  %v8330_v5 = vmax.f32 %v8328_v2, %v8329_v48  ;;  %v8593_v29 = vsel %vm8555_vm10, %v8309_v36, -inf }
 0x7e6   :  { %v8594_v26 = vmax.f32 %v8592_v32, %v8593_v29  ;;  %v8760_v0 = vrot.slane %v8693_v60, 3  ;;  %v8762_v21 = vrot.slane %v8694_v56, 2 }
 0x7e7   :  { %v14835_v31 = vsel %vm8555_vm10, %v8316_v62, -inf  ;;  %v14838_v50 = vsel %vm8555_vm10, %v8323_v30, -inf  ;;  %v14841_v17 = vsel %vm8555_vm10, %v8330_v5, -inf  ;;  %v7819_v52 = vpop.permute.xlu1 %7818  ;;  %v7724_v28 = vpop.permute.xlu2 %7723 }
 0x7e8   :  { %v8597_v19 = vmax.f32 %v14826_v42, %v14835_v31  ;;  %v8600_v43 = vmax.f32 %v14829_v37, %v14838_v50  ;;  %v8603_v22 = vmax.f32 %v14832_v55, %v14841_v17  ;;  %v8668_v46 = vadd.f32 %v14852_v34, %v8594_v26  ;;  %v7722_v53 = vpop.permute.xlu0 %7721 }
 0x7e9   :  { %7756 = vst.msk [vmem:[#allocation4 + $0x70] sm:$0xff] %vm7741_vm15, %v7722_v53  ;;  %v8761_v51 = vsel %vm6795_vm1, %v8760_v0, %v14715_v10 }
 0x7ea   :  { %v8700_v38 = vmax.f32 %v8668_v46, 0.0  ;;  %7853 = vst.msk [vmem:[#allocation4 + $0x70] sm:$0xff] %vm7838_vm14, %v7819_v52  ;;  %v8763_v39 = vsel %vm6798_vm2, %v8762_v21, %v8761_v51 }
 0x7ec   :  { %v8772_v54 = vrot.slane %v8700_v38, 4 }
 0x7ee   :  { %v14859_v18 = vsel %vm6792_vm0, %v8772_v54, %v14794_v57  ;;  %v7970_v12 = vpop.f32.mrf.mxu1 }
 0x7ef   :  { %v7335_v20 = vpop.permute.xlu1 %7334  ;;  %v8034_v4 = vrot.slane %v7970_v12, 2  ;;  %v8035_v3 = vrot.slane %v7970_v12, 4  ;;  %v8036_v33 = vrot.slane %v7970_v12, 6  ;;  %v8331_v23 = vsel %vm8106_vm5, %v7970_v12, -inf }
 0x7f0   :  { %v7238_v40 = vpop.permute.xlu0 %7237  ;;  %v8332_v30 = vrot.slane %v8331_v23, 4 }
 0x7f1   :  { %7271 = vst.msk [vmem:[#allocation4 + $0x78] sm:$0xff] %vm7255_vm6, %v7238_v40  ;;  %v7869_v58 = vld [vmem:[#allocation4 + $0x70] sm:$0xff]  ;;  %v8338_v7 = vsel %vm8106_vm5, %v8034_v4, -inf  ;;  %v8345_v10 = vsel %vm8106_vm5, %v8035_v3, -inf  ;;  %v8352_v2 = vsel %vm8106_vm5, %v8036_v33, -inf  ;;  %vm15147_vm6 = vcmask 1043459  }
 0x7f2   :  { %7368 = vst.msk [vmem:[#allocation4 + $0x78] sm:$0xff] %vm15140_vm11, %v7335_v20  ;;  %9391 = vmatmul.msk.f32.gmra.mxu1 %vm7880_vm13, %v7869_v58  ;;  %v8339_v36 = vrot.slane %v8338_v7, 4  ;;  %v8346_v13 = vrot.slane %v8345_v10, 4  ;;  %v8353_v32 = vrot.slane %v8352_v2, 4  ;;  %v8333_v54 = vmax.f32 %v8331_v23, %v8332_v30  ;;  %v8832_v30 = vld [vmem:[%s15087_s5] sm:$0xff]  ;;  %vm15151_vm3 = vmmov %vm15147_vm6 }
 0x7f3   :  { %7465 = vst.msk [vmem:[#allocation4 + $0x78] sm:$0xff] %vm7449_vm8, %v7432_v27  ;;  %8859 = vmatpush.msrb.mxu2 %v8832_v30  ;;  %vm8880_vm8 = vcmask 1041408  }
 0x7f4   :  { %v8340_v26 = vmax.f32 %v8338_v7, %v8339_v36  ;;  %v8347_v52 = vmax.f32 %v8345_v10, %v8346_v13  ;;  %v8354_v53 = vmax.f32 %v8352_v2, %v8353_v32  ;;  %v8334_v1 = vrot.slane %v8333_v54, 2 }
 0x7f6   :  { %v8341_v40 = vrot.slane %v8340_v26, 2  ;;  %v8348_v58 = vrot.slane %v8347_v52, 2  ;;  %v8335_v9 = vmax.f32 %v8333_v54, %v8334_v1 }
 0x7f7   :  { %v7627_v25 = vpop.permute.xlu1 %7626 }
 0x7f8   :  { %v7529_v47 = vpop.permute.xlu0 %7528  ;;  %v8349_v60 = vmax.f32 %v8347_v52, %v8348_v58  ;;  %v8336_v3 = vrot.slane %v8335_v9, 1 }
 0x7f9   :  { %7562 = vst.msk [vmem:[#allocation4 + $0x78] sm:$0xff] %vm7546_vm9, %v7529_v47 }
 0x7fa   :  { %7660 = vst.msk [vmem:[#allocation4 + $0x78] sm:$0xff] %vm7644_vm4, %v7627_v25  ;;  %v8337_v13 = vmax.f32 %v8335_v9, %v8336_v3 }
 0x7fb   :  { %7757 = vst.msk [vmem:[#allocation4 + $0x78] sm:$0xff] %vm7741_vm15, %v7724_v28  ;;  %v8355_v28 = vrot.slane %v8354_v53, 2  ;;  %vm15146_vm15 = vcmask 1042434  }
 0x7fd   :  { %v8356_v56 = vmax.f32 %v8354_v53, %v8355_v28 }
 0x800   :  { %v7821_v57 = vpop.permute.xlu0 %7820 }
 0x801   :  { %7854 = vst.msk [vmem:[#allocation4 + $0x78] sm:$0xff] %vm7838_vm14, %v7821_v57  ;;  %vm15144_vm14 = vcmask 1047559  }
 0x802   :  { %v14889_v59 = vsel %vm15144_vm14, %v8764_v35, %v8763_v39  ;;  %v8350_v39 = vrot.slane %v8349_v60, 1  ;;  %vm15148_vm9 = vmmov %vm15144_vm14 }
 0x803   :  { %v14947_v30 = vsel %vm8555_vm10, %v14889_v59, 0.0  ;;  %vm15152_vm7 = vmmov %vm15148_vm9 }
 0x804   :  { %v8351_v10 = vmax.f32 %v8349_v60, %v8350_v39  ;;  %vm15153_vm12 = vmmov %vm15152_vm7 }
 0x807   :  { %v7973_v15 = vpop.f32.mrf.mxu1 }
 0x808   :  { %v7870_v61 = vld [vmem:[#allocation4 + $0x78] sm:$0xff]  ;;  %v8037_v11 = vrot.slane %v7973_v15, 2  ;;  %v8038_v24 = vrot.slane %v7973_v15, 4  ;;  %v8039_v16 = vrot.slane %v7973_v15, 6  ;;  %v8359_v45 = vsel %vm8106_vm5, %v7973_v15, -inf }
 0x809   :  { %9392 = vmatmul.msk.f32.gmra.mxu1 %vm7880_vm13, %v7870_v61  ;;  %v8360_v5 = vrot.slane %v8359_v45, 4  ;;  %v8342_v61 = vmax.f32 %v8340_v26, %v8341_v40  ;;  %vm15145_vm13 = vcmask 1041409  }
 0x80a   :  { %v8366_v63 = vsel %vm8106_vm5, %v8037_v11, -inf  ;;  %v8373_v8 = vsel %vm8106_vm5, %v8038_v24, -inf  ;;  %v8380_v14 = vsel %vm8106_vm5, %v8039_v16, -inf  ;;  %v8357_v11 = vrot.slane %v8356_v56, 1  ;;  %vm15149_vm4 = vmmov %vm15145_vm13 }
 0x80b   :  { %v8367_v44 = vrot.slane %v8366_v63, 4  ;;  %v8374_v48 = vrot.slane %v8373_v8, 4  ;;  %v8381_v62 = vrot.slane %v8380_v14, 4  ;;  %v8361_v20 = vmax.f32 %v8359_v45, %v8360_v5 }
 0x80c   :  { %v8343_v35 = vrot.slane %v8342_v61, 1  ;;  %v14903_v24 = vadd.f32 %v14852_v34, %v8597_v19 }
 0x80d   :  { %v8368_v29 = vmax.f32 %v8366_v63, %v8367_v44  ;;  %v8375_v46 = vmax.f32 %v8373_v8, %v8374_v48  ;;  %v8382_v38 = vmax.f32 %v8380_v14, %v8381_v62  ;;  %v8362_v41 = vrot.slane %v8361_v20, 2 }
 0x80e   :  { %v8344_v7 = vmax.f32 %v8342_v61, %v8343_v35  ;;  %v8358_v14 = vmax.f32 %v8356_v56, %v8357_v11  ;;  %v8671_v56 = vadd.f32 %v14852_v34, %v8603_v22 }
 0x80f   :  { %v8369_v27 = vrot.slane %v8368_v29, 2  ;;  %v8376_v25 = vrot.slane %v8375_v46, 2  ;;  %v8383_v57 = vrot.slane %v8382_v38, 2  ;;  %v8363_v21 = vmax.f32 %v8361_v20, %v8362_v41 }
 0x810   :  { %v8607_v5 = vsel %vm8555_vm10, %v8344_v7, -inf }
 0x811   :  { %v8370_v49 = vmax.f32 %v8368_v29, %v8369_v27  ;;  %v8377_v6 = vmax.f32 %v8375_v46, %v8376_v25  ;;  %v8384_v0 = vmax.f32 %v8382_v38, %v8383_v57  ;;  %v8364_v33 = vrot.slane %v8363_v21, 1 }
 0x812   :  { %v8610_v29 = vsel %vm8555_vm10, %v8351_v10, -inf  ;;  %v8613_v46 = vsel %vm8555_vm10, %v8358_v14, -inf }
 0x813   :  { %v8371_v51 = vrot.slane %v8370_v49, 1  ;;  %v8378_v12 = vrot.slane %v8377_v6, 1  ;;  %v8385_v4 = vrot.slane %v8384_v0, 1  ;;  %v8365_v31 = vmax.f32 %v8363_v21, %v8364_v33 }
 0x814   :  { %v8604_v21 = vsel %vm8555_vm10, %v8337_v13, -inf }
 0x815   :  { %v8372_v16 = vmax.f32 %v8370_v49, %v8371_v51  ;;  %v8379_v8 = vmax.f32 %v8377_v6, %v8378_v12  ;;  %v8386_v23 = vmax.f32 %v8384_v0, %v8385_v4  ;;  %v8605_v25 = vsel %vm8555_vm10, %v8365_v31, -inf }
 0x816   :  { %v8670_v6 = vadd.f32 %v14852_v34, %v8600_v43  ;;  %v8701_v12 = vmax.f32 %v14903_v24, 0.0  ;;  %v8703_v4 = vmax.f32 %v8671_v56, 0.0 }
 0x817   :  { %v7976_v47 = vpop.f32.mrf.mxu1  ;;  %v8608_v19 = vsel %vm8555_vm10, %v8372_v16, -inf  ;;  %v8611_v26 = vsel %vm8555_vm10, %v8379_v8, -inf  ;;  %v8614_v53 = vsel %vm8555_vm10, %v8386_v23, -inf }
 0x818   :  { %v8387_v2 = vsel %vm8106_vm5, %v7976_v47, -inf  ;;  %v8040_v44 = vrot.slane %v7976_v47, 2  ;;  %v8041_v36 = vrot.slane %v7976_v47, 4  ;;  %v8042_v45 = vrot.slane %v7976_v47, 6 }
 0x819   :  { %v8388_v32 = vrot.slane %v8387_v2, 4  ;;  %v8609_v20 = vmax.f32 %v8607_v5, %v8608_v19  ;;  %v8612_v47 = vmax.f32 %v8610_v29, %v8611_v26  ;;  %v8615_v1 = vmax.f32 %v8613_v46, %v8614_v53 }
 0x81a   :  { %v8394_v38 = vsel %vm8106_vm5, %v8040_v44, -inf  ;;  %v8401_v54 = vsel %vm8106_vm5, %v8041_v36, -inf  ;;  %v8408_v27 = vsel %vm8106_vm5, %v8042_v45, -inf  ;;  %v8702_v22 = vmax.f32 %v8670_v6, 0.0 }
 0x81b   :  { %v8389_v28 = vmax.f32 %v8387_v2, %v8388_v32  ;;  %v8395_v41 = vrot.slane %v8394_v38, 4  ;;  %v8402_v49 = vrot.slane %v8401_v54, 4  ;;  %v8409_v0 = vrot.slane %v8408_v27, 4 }
 0x81c   :  { %v8673_v51 = vadd.f32 %v14852_v34, %v8609_v20  ;;  %v8674_v50 = vadd.f32 %v14852_v34, %v8612_v47  ;;  %v8675_v43 = vadd.f32 %v14852_v34, %v8615_v1  ;;  %v14938_v10 = vrot.slane %v8701_v12, 3 }
 0x81d   :  { %v8390_v11 = vrot.slane %v8389_v28, 2  ;;  %v8396_v55 = vmax.f32 %v8394_v38, %v8395_v41  ;;  %v8403_v17 = vmax.f32 %v8401_v54, %v8402_v49  ;;  %v8410_v3 = vmax.f32 %v8408_v27, %v8409_v0 }
 0x81e   :  { %v8705_v16 = vmax.f32 %v8673_v51, 0.0  ;;  %v8706_v14 = vmax.f32 %v8674_v50, 0.0  ;;  %v8707_v23 = vmax.f32 %v8675_v43, 0.0  ;;  %v14941_v45 = vrot.slane %v8702_v22, 2 }
 0x81f   :  { %v8391_v8 = vmax.f32 %v8389_v28, %v8390_v11  ;;  %v8397_v44 = vrot.slane %v8396_v55, 2  ;;  %v8404_v36 = vrot.slane %v8403_v17, 2 }
 0x820   :  { %v8780_v19 = vrot.slane %v8705_v16, 7  ;;  %v8782_v46 = vrot.slane %v8706_v14, 6  ;;  %v8784_v53 = vrot.slane %v8707_v23, 5 }
 0x821   :  { %v8392_v29 = vrot.slane %v8391_v8, 1  ;;  %v8398_v38 = vmax.f32 %v8396_v55, %v8397_v44  ;;  %v8405_v54 = vmax.f32 %v8403_v17, %v8404_v36 }
 0x823   :  { %v8406_v6 = vrot.slane %v8405_v54, 1 }
 0x825   :  { %v8407_v14 = vmax.f32 %v8405_v54, %v8406_v6 }
 0x827   :  { %v8622_v54 = vsel %vm8555_vm10, %v8407_v14, -inf }
 0x82e   :  { %v7979_v15 = vpop.f32.mrf.mxu1 }
 0x82f   :  { %v8415_v63 = vsel %vm8106_vm5, %v7979_v15, -inf  ;;  %v8043_v48 = vrot.slane %v7979_v15, 2  ;;  %v8044_v62 = vrot.slane %v7979_v15, 4  ;;  %v8045_v52 = vrot.slane %v7979_v15, 6 }
 0x830   :  { %v8416_v42 = vrot.slane %v8415_v63, 4  ;;  %v8606_v15 = vmax.f32 %v8604_v21, %v8605_v25 }
 0x831   :  { %v8422_v58 = vsel %vm8106_vm5, %v8043_v48, -inf  ;;  %v8429_v57 = vsel %vm8106_vm5, %v8044_v62, -inf  ;;  %v8436_v61 = vsel %vm8106_vm5, %v8045_v52, -inf  ;;  %v14943_v48 = vrot.slane %v8703_v4, 1 }
 0x832   :  { %v8417_v40 = vmax.f32 %v8415_v63, %v8416_v42  ;;  %v8423_v9 = vrot.slane %v8422_v58, 4  ;;  %v8430_v39 = vrot.slane %v8429_v57, 4  ;;  %v8437_v37 = vrot.slane %v8436_v61, 4 }
 0x833   :  { %v8672_v24 = vadd.f32 %v14852_v34, %v8606_v15  ;;  %v8411_v42 = vrot.slane %v8410_v3, 2 }
 0x834   :  { %v8418_v35 = vrot.slane %v8417_v40, 2  ;;  %v8424_v33 = vmax.f32 %v8422_v58, %v8423_v9  ;;  %v8431_v7 = vmax.f32 %v8429_v57, %v8430_v39  ;;  %v8438_v2 = vmax.f32 %v8436_v61, %v8437_v37 }
 0x835   :  { %v8704_v5 = vmax.f32 %v8672_v24, 0.0  ;;  %v8412_v20 = vmax.f32 %v8410_v3, %v8411_v42  ;;  %v8393_v57 = vmax.f32 %v8391_v8, %v8392_v29  ;;  %v8399_v61 = vrot.slane %v8398_v38, 1 }
 0x836   :  { %v8419_v63 = vmax.f32 %v8417_v40, %v8418_v35  ;;  %v8425_v31 = vrot.slane %v8424_v33, 2  ;;  %v8432_v62 = vrot.slane %v8431_v7, 2  ;;  %v8439_v26 = vrot.slane %v8438_v2, 2 }
 0x837   :  { %v8781_v25 = vsel %vm15145_vm13, %v8780_v19, %v8704_v5  ;;  %v8413_v9 = vrot.slane %v8412_v20, 1  ;;  %v8616_v37 = vsel %vm8555_vm10, %v8393_v57, -inf }
 0x838   :  { %v8420_v32 = vrot.slane %v8419_v63, 1  ;;  %v8426_v27 = vmax.f32 %v8424_v33, %v8425_v31  ;;  %v8433_v28 = vmax.f32 %v8431_v7, %v8432_v62  ;;  %v8440_v1 = vmax.f32 %v8438_v2, %v8439_v26 }
 0x839   :  { %v8783_v3 = vsel %vm15146_vm15, %v8782_v46, %v8781_v25  ;;  %v8400_v33 = vmax.f32 %v8398_v38, %v8399_v61  ;;  %v8414_v23 = vmax.f32 %v8412_v20, %v8413_v9 }
 0x83a   :  { %v8421_v47 = vmax.f32 %v8419_v63, %v8420_v32  ;;  %v8427_v21 = vrot.slane %v8426_v27, 1  ;;  %v8434_v39 = vrot.slane %v8433_v28, 1  ;;  %v8441_v50 = vrot.slane %v8440_v1, 1 }
 0x83b   :  { %v8785_v32 = vsel %vm15147_vm6, %v8784_v53, %v8783_v3  ;;  %v8619_v62 = vsel %vm8555_vm10, %v8400_v33, -inf  ;;  %v8625_v20 = vsel %vm8555_vm10, %v8414_v23, -inf }
 0x83c   :  { %v8617_v12 = vsel %vm8555_vm10, %v8421_v47, -inf  ;;  %v8428_v7 = vmax.f32 %v8426_v27, %v8427_v21  ;;  %v8435_v24 = vmax.f32 %v8433_v28, %v8434_v39  ;;  %v8442_v42 = vmax.f32 %v8440_v1, %v8441_v50 }
 0x83d   :  { %v8618_v16 = vmax.f32 %v8616_v37, %v8617_v12 }
 0x83e   :  { %v8620_v26 = vsel %vm8555_vm10, %v8428_v7, -inf  ;;  %v8626_v53 = vsel %vm8555_vm10, %v8442_v42, -inf }
 0x83f   :  { %v8676_v5 = vadd.f32 %v14852_v34, %v8618_v16 }
 0x841   :  { %v8708_v1 = vmax.f32 %v8676_v5, 0.0 }
 0x843   :  { %v8786_v50 = vrot.slane %v8708_v1, 4 }
 0x847   :  { %v14923_v60 = vpop.f32.mrf.mxu1 }
 0x848   :  { %v8046_v40 = vrot.slane %v14923_v60, 2  ;;  %v8047_v59 = vrot.slane %v14923_v60, 4  ;;  %v8048_v41 = vrot.slane %v14923_v60, 6  ;;  %v8443_v56 = vsel %vm8106_vm5, %v14923_v60, -inf }
 0x849   :  { %v8444_v43 = vrot.slane %v8443_v56, 4 }
 0x84a   :  { %v8450_v51 = vsel %vm8106_vm5, %v8046_v40, -inf  ;;  %v8457_v15 = vsel %vm8106_vm5, %v8047_v59, -inf  ;;  %v8464_v55 = vsel %vm8106_vm5, %v8048_v41, -inf  ;;  %v8621_v59 = vmax.f32 %v8619_v62, %v8620_v26 }
 0x84b   :  { %v8451_v60 = vrot.slane %v8450_v51, 4  ;;  %v8458_v63 = vrot.slane %v8457_v15, 4  ;;  %v8465_v8 = vrot.slane %v8464_v55, 4  ;;  %v8445_v31 = vmax.f32 %v8443_v56, %v8444_v43 }
 0x84d   :  { %v8452_v19 = vmax.f32 %v8450_v51, %v8451_v60  ;;  %v8459_v29 = vmax.f32 %v8457_v15, %v8458_v63  ;;  %v8466_v46 = vmax.f32 %v8464_v55, %v8465_v8  ;;  %v8446_v25 = vrot.slane %v8445_v31, 2 }
 0x84f   :  { %v8453_v47 = vrot.slane %v8452_v19, 2  ;;  %v8460_v41 = vrot.slane %v8459_v29, 2 }
 0x851   :  { %v8454_v39 = vmax.f32 %v8452_v19, %v8453_v47  ;;  %v8461_v43 = vmax.f32 %v8459_v29, %v8460_v41 }
 0x853   :  { %v8462_v14 = vrot.slane %v8461_v43, 1 }
 0x858   :  { %v7985_v13 = vpop.f32.mrf.mxu1 }
 0x859   :  { %v8049_v52 = vrot.slane %v7985_v13, 2  ;;  %v8050_v58 = vrot.slane %v7985_v13, 4  ;;  %v8051_v0 = vrot.slane %v7985_v13, 6  ;;  %v8471_v17 = vsel %vm8106_vm5, %v7985_v13, -inf }
 0x85a   :  { %v8472_v44 = vrot.slane %v8471_v17, 4 }
 0x85b   :  { %v8478_v49 = vsel %vm8106_vm5, %v8049_v52, -inf  ;;  %v8485_v35 = vsel %vm8106_vm5, %v8050_v58, -inf  ;;  %v8492_v4 = vsel %vm8106_vm5, %v8051_v0, -inf  ;;  %v8623_v52 = vsel %vm8555_vm10, %v8435_v24, -inf }
 0x85c   :  { %v8479_v11 = vrot.slane %v8478_v49, 4  ;;  %v8486_v22 = vrot.slane %v8485_v35, 4  ;;  %v8493_v36 = vrot.slane %v8492_v4, 4  ;;  %v8473_v27 = vmax.f32 %v8471_v17, %v8472_v44 }
 0x85d   :  { %v8624_v57 = vmax.f32 %v8622_v54, %v8623_v52  ;;  %v8627_v0 = vmax.f32 %v8625_v20, %v8626_v53  ;;  %v8455_v24 = vrot.slane %v8454_v39, 1  ;;  %v8463_v54 = vmax.f32 %v8461_v43, %v8462_v14 }
 0x85e   :  { %v8480_v2 = vmax.f32 %v8478_v49, %v8479_v11  ;;  %v8487_v13 = vmax.f32 %v8485_v35, %v8486_v22  ;;  %v8494_v40 = vmax.f32 %v8492_v4, %v8493_v36  ;;  %v8467_v49 = vrot.slane %v8466_v46, 2 }
 0x85f   :  { %v8474_v9 = vrot.slane %v8473_v27, 2  ;;  %v8447_v35 = vmax.f32 %v8445_v31, %v8446_v25  ;;  %v8677_v11 = vadd.f32 %v14852_v34, %v8621_v59  ;;  %v14976_v37 = vadd.f32 %v14852_v34, %v8624_v57 }
 0x860   :  { %v8481_v38 = vrot.slane %v8480_v2, 2  ;;  %v8488_v28 = vrot.slane %v8487_v13, 2  ;;  %v8495_v21 = vrot.slane %v8494_v40, 2  ;;  %v8468_v55 = vmax.f32 %v8466_v46, %v8467_v49 }
 0x861   :  { %v8475_v4 = vmax.f32 %v8473_v27, %v8474_v9  ;;  %v14982_v63 = vadd.f32 %v14852_v34, %v8627_v0  ;;  %v8448_v7 = vrot.slane %v8447_v35, 1  ;;  %v8710_v36 = vmax.f32 %v14976_v37, 0.0 }
 0x862   :  { %v8482_v61 = vmax.f32 %v8480_v2, %v8481_v38  ;;  %v8489_v12 = vmax.f32 %v8487_v13, %v8488_v28  ;;  %v8496_v3 = vmax.f32 %v8494_v40, %v8495_v21  ;;  %v8709_v2 = vmax.f32 %v8677_v11, 0.0  ;;  %v8871_v38 = vld [vmem:[%s15089_s7 + $0x30] sm:$0x3] }
 0x863   :  { %v8469_v42 = vrot.slane %v8468_v55, 1  ;;  %v14986_v13 = vsel %vm6792_vm0, %v8786_v50, %v8785_v32  ;;  %v8476_v62 = vrot.slane %v8475_v4, 1  ;;  %v8449_v26 = vmax.f32 %v8447_v35, %v8448_v7  ;;  %9394 = vmatpush.msk.msrb.mxu3 %vm8880_vm8, %v8871_v38  ;;  %v8870_v32 = vld [vmem:[%s15089_s7 + $0x28] sm:$0xff] }
 0x864   :  { %v8483_v60 = vrot.slane %v8482_v61, 1  ;;  %v8490_v8 = vrot.slane %v8489_v12, 1  ;;  %v8497_v5 = vrot.slane %v8496_v3, 1  ;;  %v8456_v52 = vmax.f32 %v8454_v39, %v8455_v24 }
 0x865   :  { %v8775_v40 = vsel %vm6795_vm1, %v14938_v10, %v14859_v18  ;;  %v8477_v28 = vmax.f32 %v8475_v4, %v8476_v62  ;;  %8894 = vmatpush.msrb.mxu3 %v8870_v32  ;;  %v15002_v41 = vrot.slane %v8709_v2, 3  ;;  %v8628_v0 = vsel %vm8555_vm10, %v8449_v26, -inf }
 0x866   :  { %v8484_v31 = vmax.f32 %v8482_v61, %v8483_v60  ;;  %v8491_v46 = vmax.f32 %v8489_v12, %v8490_v8  ;;  %v8777_v47 = vsel %vm6798_vm2, %v14941_v45, %v8775_v40  ;;  %v8498_v59 = vmax.f32 %v8496_v3, %v8497_v5 }
 0x867   :  { %v8779_v1 = vsel %vm15148_vm9, %v14943_v48, %v8777_v47  ;;  %v8631_v49 = vsel %vm8555_vm10, %v8456_v52, -inf  ;;  %v8634_v9 = vsel %vm8555_vm10, %v8463_v54, -inf }
 0x868   :  { %v8632_v53 = vsel %vm8555_vm10, %v8484_v31, -inf  ;;  %v8635_v18 = vsel %vm8555_vm10, %v8491_v46, -inf  ;;  %v8813_v10 = vsel %vm8555_vm10, %v8779_v1, 0.0  ;;  %v8638_v39 = vsel %vm8555_vm10, %v8498_v59, -inf }
 0x869   :  { %v8633_v61 = vmax.f32 %v8631_v49, %v8632_v53  ;;  %v15008_v45 = vadd.f32 %v8813_v10, %v14947_v30  ;;  %v8636_v35 = vmax.f32 %v8634_v9, %v8635_v18 }
 0x86f   :  { %v7988_v58 = vpop.f32.mrf.mxu1 }
 0x870   :  { %v8052_v6 = vrot.slane %v7988_v58, 2  ;;  %v8053_v56 = vrot.slane %v7988_v58, 4  ;;  %v8054_v51 = vrot.slane %v7988_v58, 6  ;;  %v8499_v15 = vsel %vm8106_vm5, %v7988_v58, -inf }
 0x871   :  { %v8500_v33 = vrot.slane %v8499_v15, 4  ;;  %v8470_v58 = vmax.f32 %v8468_v55, %v8469_v42  ;;  %v8681_v55 = vadd.f32 %v14852_v34, %v8633_v61 }
 0x872   :  { %v8506_v17 = vsel %vm8106_vm5, %v8052_v6, -inf  ;;  %v8513_v22 = vsel %vm8106_vm5, %v8053_v56, -inf  ;;  %v8520_v16 = vsel %vm8106_vm5, %v8054_v51, -inf  ;;  %v8629_v51 = vsel %vm8555_vm10, %v8477_v28, -inf }
 0x873   :  { %v8507_v23 = vrot.slane %v8506_v17, 4  ;;  %v8514_v44 = vrot.slane %v8513_v22, 4  ;;  %v8521_v19 = vrot.slane %v8520_v16, 4  ;;  %v8501_v29 = vmax.f32 %v8499_v15, %v8500_v33 }
 0x874   :  { %v8637_v48 = vsel %vm8555_vm10, %v8470_v58, -inf  ;;  %v8630_v14 = vmax.f32 %v8628_v0, %v8629_v51 }
 0x875   :  { %v8508_v20 = vmax.f32 %v8506_v17, %v8507_v23  ;;  %v8515_v27 = vmax.f32 %v8513_v22, %v8514_v44  ;;  %v8522_v25 = vmax.f32 %v8520_v16, %v8521_v19  ;;  %v8502_v57 = vrot.slane %v8501_v29, 2 }
 0x876   :  { %v8639_v23 = vmax.f32 %v8637_v48, %v8638_v39  ;;  %v8682_v44 = vadd.f32 %v14852_v34, %v8636_v35  ;;  %v8680_v32 = vadd.f32 %v14852_v34, %v8630_v14  ;;  %v8789_v14 = vsel %vm6795_vm1, %v15002_v41, %v14986_v13 }
 0x877   :  { %v8509_v6 = vrot.slane %v8508_v20, 2  ;;  %v8516_v56 = vrot.slane %v8515_v27, 2  ;;  %v8523_v21 = vrot.slane %v8522_v25, 2  ;;  %v8503_v12 = vmax.f32 %v8501_v29, %v8502_v57 }
 0x878   :  { %v8713_v29 = vmax.f32 %v8681_v55, 0.0  ;;  %v8683_v40 = vadd.f32 %v14852_v34, %v8639_v23  ;;  %v8714_v58 = vmax.f32 %v8682_v44, 0.0  ;;  %v8712_v0 = vmax.f32 %v8680_v32, 0.0  ;;  %v8867_v23 = vld [vmem:[%s15089_s7 + $0x10] sm:$0xff] }
 0x879   :  { %v8510_v60 = vmax.f32 %v8508_v20, %v8509_v6  ;;  %v8517_v17 = vmax.f32 %v8515_v27, %v8516_v56  ;;  %v8524_v4 = vmax.f32 %v8522_v25, %v8523_v21  ;;  %v8504_v42 = vrot.slane %v8503_v12, 1 }
 0x87a   :  { %v8794_v57 = vrot.slane %v8713_v29, 7  ;;  %v8715_v9 = vmax.f32 %v8683_v40, 0.0  ;;  %v8796_v48 = vrot.slane %v8714_v58, 6 }
 0x87b   :  { %v8511_v26 = vrot.slane %v8510_v60, 1  ;;  %v8518_v52 = vrot.slane %v8517_v17, 1  ;;  %v8525_v46 = vrot.slane %v8524_v4, 1  ;;  %v8505_v53 = vmax.f32 %v8503_v12, %v8504_v42 }
 0x87c   :  { %v8798_v37 = vrot.slane %v8715_v9, 5 }
 0x87d   :  { %v8512_v1 = vmax.f32 %v8510_v60, %v8511_v26  ;;  %v8519_v49 = vmax.f32 %v8517_v17, %v8518_v52  ;;  %v8526_v18 = vmax.f32 %v8524_v4, %v8525_v46  ;;  %v8640_v21 = vsel %vm8555_vm10, %v8505_v53, -inf  ;;  %v8868_v4 = vld [vmem:[%s15089_s7 + $0x18] sm:$0xff] }
 0x87f   :  { %v8649_v60 = vsel %vm8555_vm10, %v8526_v18, -inf }
 0x886   :  { %v7991_v15 = vpop.f32.mrf.mxu1 }
 0x887   :  { %v8055_v11 = vrot.slane %v7991_v15, 2  ;;  %v8056_v50 = vrot.slane %v7991_v15, 4  ;;  %v8057_v43 = vrot.slane %v7991_v15, 6  ;;  %v8527_v30 = vsel %vm8106_vm5, %v7991_v15, -inf }
 0x888   :  { %v8528_v22 = vrot.slane %v8527_v30, 4  ;;  %v8795_v15 = vsel %vm15149_vm4, %v8794_v57, %v8712_v0 }
 0x889   :  { %v8534_v3 = vsel %vm8106_vm5, %v8055_v11, -inf  ;;  %v8541_v33 = vsel %vm8106_vm5, %v8056_v50, -inf  ;;  %v8548_v16 = vsel %vm8106_vm5, %v8057_v43, -inf  ;;  %v8643_v50 = vsel %vm8555_vm10, %v8512_v1, -inf  ;;  %vm15150_vm5 = vmmov %vm15146_vm15 }
 0x88a   :  { %v8529_v7 = vmax.f32 %v8527_v30, %v8528_v22  ;;  %v8535_v24 = vrot.slane %v8534_v3, 4  ;;  %v8542_v8 = vrot.slane %v8541_v33, 4  ;;  %v8549_v2 = vrot.slane %v8548_v16, 4  ;;  %v8869_v22 = vld [vmem:[%s15089_s7 + $0x20] sm:$0xff] }
 0x88b   :  { %v8646_v43 = vsel %vm8555_vm10, %v8519_v49, -inf  ;;  %8895 = vmatpush.msrb.mxu3 %v8869_v22 }
 0x88c   :  { %v8530_v31 = vrot.slane %v8529_v7, 2  ;;  %v8536_v19 = vmax.f32 %v8534_v3, %v8535_v24  ;;  %v8543_v62 = vmax.f32 %v8541_v33, %v8542_v8  ;;  %v8550_v5 = vmax.f32 %v8548_v16, %v8549_v2 }
 0x88d   :  { %v8711_v24 = vmax.f32 %v14982_v63, 0.0  ;;  %v8790_v8 = vrot.slane %v8710_v36, 2  ;;  %v8797_v2 = vsel %vm15150_vm5, %v8796_v48, %v8795_v15  ;;  %8896 = vmatpush.msrb.mxu3 %v8868_v4  ;;  %v8815_v36 = vrot.slane %v15008_v45, 4  ;;  %v9429_v15 = vld [vmem:[%s15090_s8] ss:$0 sm:$0xff] }
 0x88e   :  { %v8531_v38 = vmax.f32 %v8529_v7, %v8530_v31  ;;  %v8537_v54 = vrot.slane %v8536_v19, 2  ;;  %v8544_v20 = vrot.slane %v8543_v62, 2  ;;  %v8551_v27 = vrot.slane %v8550_v5, 2 }
 0x88f   :  { %8897 = vmatpush.msrb.mxu3 %v8867_v23  ;;  %v8799_v29 = vsel %vm15151_vm3, %v8798_v37, %v8797_v2  ;;  %v8791_v26 = vsel %vm6798_vm2, %v8790_v8, %v8789_v14  ;;  %v8792_v52 = vrot.slane %v8711_v24, 1  ;;  %v8816_v40 = vadd.f32 %v8815_v36, %v15008_v45 }
 0x890   :  { %v8532_v25 = vrot.slane %v8531_v38, 1  ;;  %v8538_v47 = vmax.f32 %v8536_v19, %v8537_v54  ;;  %v8545_v28 = vmax.f32 %v8543_v62, %v8544_v20  ;;  %v8552_v59 = vmax.f32 %v8550_v5, %v8551_v27  ;;  %v8866_v19 = vld [vmem:[%s15089_s7 + $0x8] sm:$0xff] }
 0x891   :  { %8898 = vmatpush.msrb.mxu3 %v8866_v19  ;;  %v8793_v32 = vsel %vm15152_vm7, %v8792_v52, %v8791_v26 }
 0x892   :  { %v8533_v10 = vmax.f32 %v8531_v38, %v8532_v25  ;;  %v8539_v61 = vrot.slane %v8538_v47, 1  ;;  %v8546_v6 = vrot.slane %v8545_v28, 1  ;;  %v8553_v56 = vrot.slane %v8552_v59, 1 }
 0x893   :  { %v8821_v25 = vsel %vm8555_vm10, %v8793_v32, 0.0 }
 0x894   :  { %v8540_v51 = vmax.f32 %v8538_v47, %v8539_v61  ;;  %v8547_v35 = vmax.f32 %v8545_v28, %v8546_v6  ;;  %v8554_v39 = vmax.f32 %v8552_v59, %v8553_v56  ;;  %v8641_v12 = vsel %vm8555_vm10, %v8533_v10, -inf }
 0x895   :  { %v8642_v11 = vmax.f32 %v8640_v21, %v8641_v12  ;;  %v8817_v28 = vrot.slane %v8816_v40, 2 }
 0x896   :  { %v8644_v30 = vsel %vm8555_vm10, %v8540_v51, -inf  ;;  %v8647_v55 = vsel %vm8555_vm10, %v8547_v35, -inf  ;;  %v8650_v17 = vsel %vm8555_vm10, %v8554_v39, -inf  ;;  %v9428_v51 = vld [vmem:[%s15088_s6] ss:$0 sm:$0xff]  ;;  %s9480_s6 = smov 1  }
 0x897   :  { %v8645_v3 = vmax.f32 %v8643_v50, %v8644_v30  ;;  %v8648_v33 = vmax.f32 %v8646_v43, %v8647_v55  ;;  %v8651_v16 = vmax.f32 %v8649_v60, %v8650_v17  ;;  %v8684_v7 = vadd.f32 %v14852_v34, %v8642_v11 }
 0x898   :  { %v8818_v1 = vadd.f32 %v8817_v28, %v8816_v40 }
 0x899   :  { %v8685_v44 = vadd.f32 %v14852_v34, %v8645_v3  ;;  %v8686_v42 = vadd.f32 %v14852_v34, %v8648_v33  ;;  %v8687_v31 = vadd.f32 %v14852_v34, %v8651_v16  ;;  %v8716_v63 = vmax.f32 %v8684_v7, 0.0  ;;  %v8865_v34 = vld [vmem:[%s15089_s7] sm:$0xff] }
 0x89a   :  { %8899 = vmatpush.msrb.mxu3 %v8865_v34  ;;  %v8819_v10 = vrot.slane %v8818_v1, 1 }
 0x89b   :  { %v8717_v13 = vmax.f32 %v8685_v44, 0.0  ;;  %v8718_v41 = vmax.f32 %v8686_v42, 0.0  ;;  %v8719_v62 = vmax.f32 %v8687_v31, 0.0  ;;  %v8800_v5 = vrot.slane %v8716_v63, 4 }
 0x89c   :  { %v8820_v56 = vadd.f32 %v8819_v10, %v8818_v1 }
 0x89d   :  { %v8801_v46 = vsel %vm6792_vm0, %v8800_v5, %v8799_v29  ;;  %v8802_v38 = vrot.slane %v8717_v13, 3  ;;  %v8804_v54 = vrot.slane %v8718_v41, 2  ;;  %v8806_v27 = vrot.slane %v8719_v62, 1  ;;  %vm15154_vm0 = vmmov %vm15149_vm4 }
 0x89e   :  { %v8830_v9 = vmul.f32 0.0625, %v8820_v56 }
 0x89f   :  { %v8803_v20 = vsel %vm6795_vm1, %v8802_v38, %v8801_v46  ;;  %vm8876_vm1 = vcmask 408576  }
 0x8a0   :  { %v8805_v58 = vsel %vm6798_vm2, %v8804_v54, %v8803_v20  ;;  %vm8907_vm2 = vcmask 73728  }
 0x8a1   :  { %v8807_v53 = vsel %vm15153_vm12, %v8806_v27, %v8805_v58 }
 0x8a2   :  { %v8822_v47 = vsel %vm8555_vm10, %v8807_v53, 0.0 }
 0x8a3   :  { %v8823_v59 = vadd.f32 %v8822_v47, %v8821_v25 }
 0x8a5   :  { %v8824_v57 = vrot.slane %v8823_v59, 4 }
 0x8a7   :  { %v8825_v49 = vadd.f32 %v8824_v57, %v8823_v59 }
 0x8a9   :  { %v8826_v18 = vrot.slane %v8825_v49, 2 }
 0x8ab   :  { %v8827_v61 = vadd.f32 %v8826_v18, %v8825_v49 }
 0x8ad   :  { %v8828_v6 = vrot.slane %v8827_v61, 1 }
 0x8af   :  { %v8829_v45 = vadd.f32 %v8828_v6, %v8827_v61 }
 0x8b1   :  { %v8831_v0 = vmul.f32 0.0625, %v8829_v45 }
 0x8b3   :  { %v8840_v48 = vrot.slane %v8831_v0, 7 }
 0x8b5   :  { %v8841_v21 = vsel %vm15154_vm0, %v8840_v48, %v8830_v9 }
 0x8b6   :  { %9393 = vmatmul.msk.f32.vlgmr.msrb.gmra.mxu2 %vm8555_vm10, %v8841_v21 }
 0x939   :  { %v8861_v35 = vpop.f32.mrf.mxu2 }
 0x93a   :  { %v8862_v39 = vadd.f32 %v9428_v51, %v8861_v35 }
 0x93c   :  { %v8864_v12 = vmax.f32 %v8862_v39, 0.0 }
 0x93e   :  { %9395 = vmatmul.msk.f32.vlgmr.msrb.gmra.mxu3 %vm8876_vm1, %v8864_v12 }
 0x9c1   :  { %v8901_v11 = vpop.f32.mrf.mxu3 }
 0x9c2   :  { %v8902_v50 = vadd.f32 %v9429_v15, %v8901_v11 }
 0x9c4   :  { %v8905_v43 = vrot.slane %v8902_v50, 1  ;;  %8908 = vst.msk [vmem:[#allocation5] sm:$0x1] %vm8907_vm2, %v8902_v50 }
 0x9c6   :  { %8909 = vst.msk [vmem:[#allocation5 + $0x1] sm:$0x1] %vm8907_vm2, %v8905_v43 }
 0x9c7   :  { %8922 = dma.vmem_to_hbm [thread:$0]  %s8915_s21, 32, %s8917_s18, [#allocation6], %s9474_s1, %s9474_s1, %s9480_s6  }
 0x9c8   :  { %9461 = dma.done.wait [#allocation6], 32  }
 0x9c9   :  { %9462 = vsyncadd [#allocation6], 4294967264 }
 0x9ca   :  { %8927 = vsyncpa [#allocation6], 1 }

</bundles_post_ra>
